<compile_context>
chip_gen: v7x
topology: tpu7x:2x2x1
jax: 0.10.0
libtpu: 0.0.40
codegen_flags: <defaults>
</compile_context>

<pallas_src>
import functools

import jax
import jax.numpy as jnp
import numpy as np
from jax import lax
from jax.experimental import pallas as pl
from jax.experimental.pallas import tpu as pltpu


def _silu(x):
    return x * jax.nn.sigmoid(x)


def mlstm_seq_kernel(head_size, hidden, proj_in, chunk, batch,
                     # ---- inputs ----
                     conv_p,                       # SMEM (5,): taps[0:4], bias
                     x_ref,                        # (chunk*B, D) time-chunk of rows
                     c0_ref, n0_ref, m0_ref,       # (B, H) initial state
                     ln_w, ln_b,
                     w_up, b_up,                   # fused [up_left | up_right]
                     w_cpath, b_cpath,             # fused [skip | q | k | i | f]
                     w_lpath, b_lpath,             # fused [v | o]
                     gn_w, gn_b, g_full,           # GroupNorm affine + (H,H) block-avg
                     w_down, b_down,
                     # ---- outputs ----
                     out_ref, h_out, c_out, n_out, m_out,
                     # ---- scratch ----
                     yc_scr, yl_scr, h_buf, c_scr, n_scr, m_scr):
    f32 = jnp.float32
    bf16 = jnp.bfloat16
    H = hidden
    P = proj_in
    B = batch
    CT = chunk
    k_scale = 1.0 / (head_size ** 0.5)

    # Initialize the recurrent carry from the caller's state on the first chunk.
    @pl.when(pl.program_id(0) == 0)
    def _():
        c_scr[...] = c0_ref[...]
        n_scr[...] = n0_ref[...]
        m_scr[...] = m0_ref[...]

    x = x_ref[...]                                            # (M, D), M = CT*B

    # LayerNorm(input_size), eps=1e-5, biased variance (batched over the chunk).
    mu = jnp.mean(x, axis=-1, keepdims=True)
    var = jnp.mean((x - mu) ** 2, axis=-1, keepdims=True)
    x_norm = (x - mu) * lax.rsqrt(var + 1e-5) * ln_w[...] + ln_b[...]

    # Fused up projection (one wide bf16 MXU matmul, f32 accumulation).
    up = jnp.dot(x_norm.astype(bf16), w_up[...], preferred_element_type=f32) + b_up[...]
    x_left = up[:, :P]
    x_right = up[:, P:]

    # CausalConv1d(1,1,4) along the feature axis: XLU lane rolls + scalar taps.
    # output[t] = bias + taps[3]*x[t] + taps[2]*x[t-1] + taps[1]*x[t-2] + taps[0]*x[t-3]
    lane = lax.broadcasted_iota(jnp.int32, x_left.shape, 1)
    conv = conv_p[4] + conv_p[3] * x_left
    for d in (1, 2, 3):
        shifted = pltpu.roll(x_left, shift=d, axis=1)         # y[t] = x[t-d] (wrapped)
        shifted = jnp.where(lane >= d, shifted, 0.0)          # causal zero-fill
        conv = conv + conv_p[3 - d] * shifted
    x_conv = _silu(conv)

    # Fused projections driven by x_conv: [skip | q | k | i | f] -> VMEM scratch
    # (the recurrence loop slices 8-row windows out of it).
    yc_scr[...] = (jnp.dot(x_conv.astype(bf16), w_cpath[...],
                           preferred_element_type=f32) + b_cpath[...])

    # Fused projections driven by x_left: [v | o]; sigmoid applied to the o half.
    yl = jnp.dot(x_left.astype(bf16), w_lpath[...], preferred_element_type=f32) + b_lpath[...]
    yl_scr[:, 0:H] = yl[:, 0:H]
    yl_scr[:, H:2 * H] = jax.nn.sigmoid(yl[:, H:2 * H])

    # Sequential mLSTM recurrence (pure VPU elementwise + one row-reduce).
    def step(s, carry):
        r = pl.ds(pl.multiple_of(s * B, B), B)                # 8-row, sublane-aligned
        q_s = yc_scr[r, 1 * H:2 * H]
        k_s = yc_scr[r, 2 * H:3 * H] * k_scale
        i_t = yc_scr[r, 3 * H:4 * H]
        f_t = yc_scr[r, 4 * H:5 * H]
        v_s = yl_scr[r, 0:H]
        o_s = yl_scr[r, H:2 * H]

        m_prev = m_scr[...]
        m_t = jnp.maximum(f_t + m_prev, i_t)
        i_g = jnp.exp(i_t - m_t)
        f_g = jnp.exp(f_t + m_prev - m_t)
        c_t = f_g * c_scr[...] + i_g * (v_s * k_s)
        n_t = f_g * n_scr[...] + i_g * k_s

        nq = n_t * q_s
        nrm = jnp.sqrt(jnp.sum(nq * nq, axis=-1, keepdims=True)) + 1e-6
        inv = pl.reciprocal(nrm, approx=True)                 # EUP slot (nearly free)
        inv = inv * (2.0 - nrm * inv)                         # Newton step -> ~f32 accuracy
        h_t = o_s * (c_t * q_s) * inv

        h_buf[r, :] = h_t
        c_scr[...] = c_t
        n_scr[...] = n_t
        m_scr[...] = m_t
        return carry

    lax.fori_loop(0, CT, step, 0, unroll=True)

    # Batched output path for the whole chunk.
    # GroupNorm(num_heads, hidden): block-averaging matmul (entries 1/head_size).
    h_all = h_buf[...]
    mean_b = jnp.dot(h_all, g_full[...], preferred_element_type=f32)
    cen = h_all - mean_b
    var_b = jnp.dot(cen * cen, g_full[...], preferred_element_type=f32)
    gn = cen * lax.rsqrt(var_b + 1e-5) * gn_w[...] + gn_b[...]

    x_skip = yc_scr[:, 0:H]
    pre = (gn + x_skip) * _silu(x_right)
    out = jnp.dot(pre.astype(bf16), w_down[...], preferred_element_type=f32) + b_down[...]
    out_ref[...] = out + x                                    # residual, lane-dense store

    # Final state of this chunk; the constant-index output blocks stay VMEM
    # resident across the grid and the last write is what lands in HBM.
    h_out[...] = h_buf[(CT - 1) * B:CT * B, :]
    c_out[...] = c_scr[...]
    n_out[...] = n_scr[...]
    m_out[...] = m_scr[...]


def mlstm_block_seq(params, x_seq, state, *, chunk=16):
    """Apply mLSTMBlock.forward sequentially over x_seq of shape (T, B, D).

    Weights are DMA'd to VMEM once and stay resident; projections are batched
    over `chunk` timesteps (M = chunk*B MXU rows); only the gating recurrence
    is sequential.  Returns (out_seq (T,B,D), (h_T, c_T, n_T, m_T)).
    """
    T, B, D = x_seq.shape
    H = params["hidden_size"]
    P = params["proj_in"]
    head_size = params["head_size"]
    assert T % chunk == 0
    M = chunk * B
    num_chunks = T // chunk

    _h0, c0, n0, m0 = state            # h_prev is never read by the forward pass
    x_flat = x_seq.reshape(T * B, D)   # row index = t*B + b

    def const2(shape):
        return pl.BlockSpec(shape, lambda t: (0, 0))

    in_specs = [
        pl.BlockSpec(memory_space=pltpu.MemorySpace.SMEM),        # conv taps/bias
        pl.BlockSpec((M, D), lambda t: (t, 0)),                   # x time-chunk
        const2((B, H)), const2((B, H)), const2((B, H)),           # c0, n0, m0
        const2((1, D)), const2((1, D)),                           # ln_w, ln_b
        const2((D, P + H)), const2((1, P + H)),                   # w_up, b_up
        const2((P, 5 * H)), const2((1, 5 * H)),                   # w_cpath, b_cpath
        const2((P, 2 * H)), const2((1, 2 * H)),                   # w_lpath, b_lpath
        const2((1, H)), const2((1, H)), const2((H, H)),           # gn_w, gn_b, g_full
        const2((H, D)), const2((1, D)),                           # w_down, b_down
    ]
    out_shapes = (jax.ShapeDtypeStruct((T * B, D), jnp.float32),
                  jax.ShapeDtypeStruct((B, H), jnp.float32),
                  jax.ShapeDtypeStruct((B, H), jnp.float32),
                  jax.ShapeDtypeStruct((B, H), jnp.float32),
                  jax.ShapeDtypeStruct((B, H), jnp.float32))
    out_specs = (pl.BlockSpec((M, D), lambda t: (t, 0)),
                 const2((B, H)), const2((B, H)), const2((B, H)), const2((B, H)))

    scratch_shapes = [
        pltpu.VMEM((M, 5 * H), jnp.float32),   # yc: [skip | q | k | i | f]
        pltpu.VMEM((M, 2 * H), jnp.float32),   # yl: [v | sigmoid(o)]
        pltpu.VMEM((M, H), jnp.float32),       # per-chunk h_t buffer
        pltpu.VMEM((B, H), jnp.float32),       # c carry (persists across chunks)
        pltpu.VMEM((B, H), jnp.float32),       # n carry
        pltpu.VMEM((B, H), jnp.float32),       # m carry
    ]

    fn = pl.pallas_call(
        functools.partial(mlstm_seq_kernel, head_size, H, P, chunk, B),
        grid=(num_chunks,),
        in_specs=in_specs,
        out_specs=out_specs,
        out_shape=out_shapes,
        scratch_shapes=scratch_shapes,
        compiler_params=pltpu.CompilerParams(
            dimension_semantics=("arbitrary",),          # sequential carry over time
            vmem_limit_bytes=32 * 1024 * 1024),
    )
    out_flat, h_t, c_t, n_t, m_t = fn(
        params["conv_p"], x_flat, c0, n0, m0,
        params["ln_w"], params["ln_b"],
        params["w_up"], params["b_up"],
        params["w_cpath"], params["b_cpath"],
        params["w_lpath"], params["b_lpath"],
        params["gn_w"], params["gn_b"], params["g_full"],
        params["w_down"], params["b_down"])
    return out_flat.reshape(T, B, D), (h_t, c_t, n_t, m_t)


def init_params(key, input_size, hidden_size, num_heads, proj_factor=2):
    head_size = hidden_size // num_heads
    proj_in = int(input_size * proj_factor)
    keys = iter(jax.random.split(key, 64))
    bf16 = jnp.bfloat16

    def linear(fan_in, fan_out):
        k1, k2 = jax.random.split(next(keys))
        bound = 1.0 / np.sqrt(fan_in)
        w = jax.random.uniform(k1, (fan_in, fan_out), jnp.float32, -bound, bound)
        b = jax.random.uniform(k2, (1, fan_out), jnp.float32, -bound, bound)
        return w, b

    def block_diag(fan_in, fan_out, nb):
        bi, bo = fan_in // nb, fan_out // nb
        w = jnp.zeros((fan_in, fan_out), jnp.float32)
        biases = []
        for g in range(nb):
            wg, bg = linear(bi, bo)
            w = w.at[g * bi:(g + 1) * bi, g * bo:(g + 1) * bo].set(wg)
            biases.append(bg)
        return w, jnp.concatenate(biases, axis=-1)

    p = {"head_size": head_size, "hidden_size": hidden_size,
         "proj_in": proj_in, "num_heads": num_heads}
    p["ln_w"] = jnp.ones((1, input_size), jnp.float32)
    p["ln_b"] = jnp.zeros((1, input_size), jnp.float32)

    w_upl, b_upl = linear(input_size, proj_in)
    w_upr, b_upr = linear(input_size, hidden_size)
    w_skip, b_skip = linear(proj_in, hidden_size)
    w_down, b_down = linear(hidden_size, input_size)

    # CausalConv1d(1, 1, 4): 4 taps + bias, packed into one SMEM vector.
    cb = 1.0 / np.sqrt(1 * 4)
    taps = jax.random.uniform(next(keys), (4,), jnp.float32, -cb, cb)
    conv_bias = jax.random.uniform(next(keys), (1,), jnp.float32, -cb, cb)
    p["conv_p"] = jnp.concatenate([taps, conv_bias])          # (5,) f32 in SMEM

    wq, bq = block_diag(proj_in, hidden_size, num_heads)
    wk, bk = block_diag(proj_in, hidden_size, num_heads)
    wv, bv = block_diag(proj_in, hidden_size, num_heads)
    wi, bi = linear(proj_in, hidden_size)
    wf, bf = linear(proj_in, hidden_size)
    wo, bo = linear(proj_in, hidden_size)

    # Fused weights (bf16 for the MXU) + fused f32 biases.
    p["w_up"] = jnp.concatenate([w_upl, w_upr], axis=1).astype(bf16)
    p["b_up"] = jnp.concatenate([b_upl, b_upr], axis=1)
    p["w_cpath"] = jnp.concatenate([w_skip, wq, wk, wi, wf], axis=1).astype(bf16)
    p["b_cpath"] = jnp.concatenate([b_skip, bq, bk, bi, bf], axis=1)
    p["w_lpath"] = jnp.concatenate([wv, wo], axis=1).astype(bf16)
    p["b_lpath"] = jnp.concatenate([bv, bo], axis=1)
    p["w_down"] = w_down.astype(bf16)
    p["b_down"] = b_down

    p["gn_w"] = jnp.ones((1, hidden_size), jnp.float32)
    p["gn_b"] = jnp.zeros((1, hidden_size), jnp.float32)

    # Fused GroupNorm block-averaging matrix (H, H): 1/head_size within a head.
    grp = jnp.arange(hidden_size) // head_size
    p["g_full"] = (grp[:, None] == grp[None, :]).astype(jnp.float32) / head_size
    return p


def mlstm_step_ref(p, x, state):
    """Pure-JAX single-step reference mirroring the PyTorch forward (bf16
    matmul operands / f32 accumulation, like the kernel)."""
    h_prev, c_prev, n_prev, m_prev = state
    hs = p["head_size"]; H = p["hidden_size"]; P = p["proj_in"]; G = p["num_heads"]

    def mm(a, w):
        return jnp.dot(a.astype(jnp.bfloat16), w, preferred_element_type=jnp.float32)

    mu = jnp.mean(x, -1, keepdims=True)
    var = jnp.mean((x - mu) ** 2, -1, keepdims=True)
    x_norm = (x - mu) / jnp.sqrt(var + 1e-5) * p["ln_w"] + p["ln_b"]

    up = mm(x_norm, p["w_up"]) + p["b_up"]
    x_left, x_right = up[:, :P], up[:, P:]

    taps, cbias = p["conv_p"][:4], p["conv_p"][4]
    L = x_left.shape[-1]
    xp = jnp.pad(x_left, ((0, 0), (3, 0)))
    conv = cbias + sum(taps[j] * xp[:, j:j + L] for j in range(4))
    x_conv = conv * jax.nn.sigmoid(conv)

    yc = mm(x_conv, p["w_cpath"]) + p["b_cpath"]
    x_skip = yc[:, 0 * H:1 * H]
    q = yc[:, 1 * H:2 * H]
    k = yc[:, 2 * H:3 * H] / hs ** 0.5
    i_tilde = yc[:, 3 * H:4 * H]
    f_tilde = yc[:, 4 * H:5 * H]

    yl = mm(x_left, p["w_lpath"]) + p["b_lpath"]
    v, o = yl[:, :H], jax.nn.sigmoid(yl[:, H:])

    m_t = jnp.maximum(f_tilde + m_prev, i_tilde)
    i_g = jnp.exp(i_tilde - m_t)
    f_g = jnp.exp(f_tilde + m_prev - m_t)
    c_t = f_g * c_prev + i_g * (v * k)
    n_t = f_g * n_prev + i_g * k
    nrm = jnp.linalg.norm(n_t * q, axis=-1, keepdims=True)
    h_t = o * (c_t * q) / (nrm + 1e-6)

    B = h_t.shape[0]
    hg = h_t.reshape(B, G, hs)
    gm = jnp.mean(hg, -1, keepdims=True)
    gv = jnp.mean((hg - gm) ** 2, -1, keepdims=True)
    hn = ((hg - gm) / jnp.sqrt(gv + 1e-5)).reshape(B, H)
    gn = hn * p["gn_w"] + p["gn_b"]

    out = (gn + x_skip) * (x_right * jax.nn.sigmoid(x_right))
    out = mm(out, p["w_down"]) + p["b_down"]
    return out + x, (h_t, c_t, n_t, m_t)


def mlstm_seq_ref(params, x_seq, state):
    outs = []
    for t in range(x_seq.shape[0]):
        o, state = mlstm_step_ref(params, x_seq[t], state)
        outs.append(o)
    return jnp.stack(outs, 0), state


if __name__ == "__main__":
    # Lane/sublane friendly shapes: 8 batch rows (full sublane tile),
    # input = hidden = 128 (lane-dense residual/output), proj_in = 256,
    # T = 32 timesteps processed as 2 chunks of 16 (M = 128 MXU rows).
    input_size, hidden_size, num_heads = 128, 128, 4
    B, T, chunk = 8, 32, 16

    key = jax.random.PRNGKey(0)
    kp, kx, kh, kc, kn = jax.random.split(key, 5)
    params = init_params(kp, input_size, hidden_size, num_heads)

    x_seq = jax.random.normal(kx, (T, B, input_size), jnp.float32)
    h0 = 0.1 * jax.random.normal(kh, (B, hidden_size), jnp.float32)
    c0 = 0.1 * jax.random.normal(kc, (B, hidden_size), jnp.float32)
    n0 = 0.1 * jax.random.normal(kn, (B, hidden_size), jnp.float32)
    m0 = jnp.zeros((B, hidden_size), jnp.float32)
    state = (h0, c0, n0, m0)

    out, new_state = mlstm_block_seq(params, x_seq, state, chunk=chunk)
    jax.block_until_ready((out, new_state))

    ref_out, ref_state = mlstm_seq_ref(params, x_seq, state)

    np.testing.assert_allclose(np.asarray(out), np.asarray(ref_out),
                               rtol=3e-3, atol=3e-3)
    for a, b in zip(new_state, ref_state):
        np.testing.assert_allclose(np.asarray(a), np.asarray(b),
                                   rtol=3e-3, atol=3e-3)

    print("KERNEL_OK")
</pallas_src>

<mosaic_0001>
module attributes {stable_mosaic.version = 11 : i64} {
  func.func @mlstm_seq_kernel(%arg0: i32, %arg1: memref<5xf32, #tpu.memory_space<smem>>, %arg2: memref<128x128xf32, #tpu.memory_space<vmem>>, %arg3: memref<8x128xf32, #tpu.memory_space<vmem>>, %arg4: memref<8x128xf32, #tpu.memory_space<vmem>>, %arg5: memref<8x128xf32, #tpu.memory_space<vmem>>, %arg6: memref<1x128xf32, #tpu.memory_space<vmem>>, %arg7: memref<1x128xf32, #tpu.memory_space<vmem>>, %arg8: memref<128x384xbf16, #tpu.memory_space<vmem>>, %arg9: memref<1x384xf32, #tpu.memory_space<vmem>>, %arg10: memref<256x640xbf16, #tpu.memory_space<vmem>>, %arg11: memref<1x640xf32, #tpu.memory_space<vmem>>, %arg12: memref<256x256xbf16, #tpu.memory_space<vmem>>, %arg13: memref<1x256xf32, #tpu.memory_space<vmem>>, %arg14: memref<1x128xf32, #tpu.memory_space<vmem>>, %arg15: memref<1x128xf32, #tpu.memory_space<vmem>>, %arg16: memref<128x128xf32, #tpu.memory_space<vmem>>, %arg17: memref<128x128xbf16, #tpu.memory_space<vmem>>, %arg18: memref<1x128xf32, #tpu.memory_space<vmem>>, %arg19: memref<128x128xf32, #tpu.memory_space<vmem>>, %arg20: memref<8x128xf32, #tpu.memory_space<vmem>>, %arg21: memref<8x128xf32, #tpu.memory_space<vmem>>, %arg22: memref<8x128xf32, #tpu.memory_space<vmem>>, %arg23: memref<8x128xf32, #tpu.memory_space<vmem>>, %arg24: memref<128x640xf32, #tpu.memory_space<vmem>>, %arg25: memref<128x256xf32, #tpu.memory_space<vmem>>, %arg26: memref<128x128xf32, #tpu.memory_space<vmem>>, %arg27: memref<8x128xf32, #tpu.memory_space<vmem>>, %arg28: memref<8x128xf32, #tpu.memory_space<vmem>>, %arg29: memref<8x128xf32, #tpu.memory_space<vmem>>) attributes {dimension_semantics = [#tpu.dimension_semantics<arbitrary>], iteration_bounds = array<i64: 2>, scalar_prefetch = 0 : i64, scratch_operands = 6 : i64, tpu.core_type = #tpu.core_type<tc>, window_params = [{transform_indices = @transform_0, window_bounds = array<i64: 5>}, {transform_indices = @transform_1, window_bounds = array<i64: 128, 128>}, {pipeline_mode = #tpu.pipeline_mode<synchronous>, transform_indices = @transform_2, window_bounds = array<i64: 8, 128>}, {pipeline_mode = #tpu.pipeline_mode<synchronous>, transform_indices = @transform_3, window_bounds = array<i64: 8, 128>}, {pipeline_mode = #tpu.pipeline_mode<synchronous>, transform_indices = @transform_4, window_bounds = array<i64: 8, 128>}, {pipeline_mode = #tpu.pipeline_mode<synchronous>, transform_indices = @transform_5, window_bounds = array<i64: 1, 128>}, {pipeline_mode = #tpu.pipeline_mode<synchronous>, transform_indices = @transform_6, window_bounds = array<i64: 1, 128>}, {pipeline_mode = #tpu.pipeline_mode<synchronous>, transform_indices = @transform_7, window_bounds = array<i64: 128, 384>}, {pipeline_mode = #tpu.pipeline_mode<synchronous>, transform_indices = @transform_8, window_bounds = array<i64: 1, 384>}, {pipeline_mode = #tpu.pipeline_mode<synchronous>, transform_indices = @transform_9, window_bounds = array<i64: 256, 640>}, {pipeline_mode = #tpu.pipeline_mode<synchronous>, transform_indices = @transform_10, window_bounds = array<i64: 1, 640>}, {pipeline_mode = #tpu.pipeline_mode<synchronous>, transform_indices = @transform_11, window_bounds = array<i64: 256, 256>}, {pipeline_mode = #tpu.pipeline_mode<synchronous>, transform_indices = @transform_12, window_bounds = array<i64: 1, 256>}, {pipeline_mode = #tpu.pipeline_mode<synchronous>, transform_indices = @transform_13, window_bounds = array<i64: 1, 128>}, {pipeline_mode = #tpu.pipeline_mode<synchronous>, transform_indices = @transform_14, window_bounds = array<i64: 1, 128>}, {pipeline_mode = #tpu.pipeline_mode<synchronous>, transform_indices = @transform_15, window_bounds = array<i64: 128, 128>}, {pipeline_mode = #tpu.pipeline_mode<synchronous>, transform_indices = @transform_16, window_bounds = array<i64: 128, 128>}, {pipeline_mode = #tpu.pipeline_mode<synchronous>, transform_indices = @transform_17, window_bounds = array<i64: 1, 128>}, {transform_indices = @transform_18, window_bounds = array<i64: 128, 128>}, {pipeline_mode = #tpu.pipeline_mode<synchronous>, transform_indices = @transform_19, window_bounds = array<i64: 8, 128>}, {pipeline_mode = #tpu.pipeline_mode<synchronous>, transform_indices = @transform_20, window_bounds = array<i64: 8, 128>}, {pipeline_mode = #tpu.pipeline_mode<synchronous>, transform_indices = @transform_21, window_bounds = array<i64: 8, 128>}, {pipeline_mode = #tpu.pipeline_mode<synchronous>, transform_indices = @transform_22, window_bounds = array<i64: 8, 128>}]} {
    %c0_i32 = arith.constant 0 : i32
    %0 = arith.cmpi eq, %arg0, %c0_i32 : i32
    %1 = arith.extui %0 : i1 to i32
    %c0_i32_0 = arith.constant 0 : i32
    %2 = arith.cmpi ne, %1, %c0_i32_0 : i32
    scf.if %2 {
      %c0_462 = arith.constant 0 : index
      %c0_463 = arith.constant 0 : index
      %1004 = vector.load %arg3[%c0_462, %c0_463] : memref<8x128xf32, #tpu.memory_space<vmem>>, vector<8x128xf32>
      %c0_464 = arith.constant 0 : index
      %c0_465 = arith.constant 0 : index
      %1005 = vector.load %arg27[%c0_464, %c0_465] : memref<8x128xf32, #tpu.memory_space<vmem>>, vector<8x128xf32>
      tpu.vector_store %arg27[%c0_464, %c0_465], %1004 {strides = array<i32>} : memref<8x128xf32, #tpu.memory_space<vmem>>, vector<8x128xf32>,
      %c0_466 = arith.constant 0 : index
      %c0_467 = arith.constant 0 : index
      %1006 = vector.load %arg4[%c0_466, %c0_467] : memref<8x128xf32, #tpu.memory_space<vmem>>, vector<8x128xf32>
      %c0_468 = arith.constant 0 : index
      %c0_469 = arith.constant 0 : index
      %1007 = vector.load %arg28[%c0_468, %c0_469] : memref<8x128xf32, #tpu.memory_space<vmem>>, vector<8x128xf32>
      tpu.vector_store %arg28[%c0_468, %c0_469], %1006 {strides = array<i32>} : memref<8x128xf32, #tpu.memory_space<vmem>>, vector<8x128xf32>,
      %c0_470 = arith.constant 0 : index
      %c0_471 = arith.constant 0 : index
      %1008 = vector.load %arg5[%c0_470, %c0_471] : memref<8x128xf32, #tpu.memory_space<vmem>>, vector<8x128xf32>
      %c0_472 = arith.constant 0 : index
      %c0_473 = arith.constant 0 : index
      %1009 = vector.load %arg29[%c0_472, %c0_473] : memref<8x128xf32, #tpu.memory_space<vmem>>, vector<8x128xf32>
      tpu.vector_store %arg29[%c0_472, %c0_473], %1008 {strides = array<i32>} : memref<8x128xf32, #tpu.memory_space<vmem>>, vector<8x128xf32>,
    } else {
    }
    %c0 = arith.constant 0 : index
    %c0_1 = arith.constant 0 : index
    %3 = vector.load %arg2[%c0, %c0_1] : memref<128x128xf32, #tpu.memory_space<vmem>>, vector<128x128xf32>
    %cst = arith.constant dense<0.000000e+00> : vector<128xf32>
    %4 = vector.multi_reduction <add>, %3, %cst [1] : vector<128x128xf32> to vector<128xf32>
    %5 = vector.shape_cast %4 : vector<128xf32> to vector<128x1xf32>
    %cst_2 = arith.constant 1.280000e+02 : f32
    %6 = vector.broadcast %cst_2 : f32 to vector<128x1xf32>
    %7 = arith.divf %5, %6 : vector<128x1xf32>
    %8 = vector.broadcast %7 : vector<128x1xf32> to vector<128x128xf32>
    %9 = arith.subf %3, %8 : vector<128x128xf32>
    %10 = arith.mulf %9, %9 : vector<128x128xf32>
    %cst_3 = arith.constant dense<0.000000e+00> : vector<128xf32>
    %11 = vector.multi_reduction <add>, %10, %cst_3 [1] : vector<128x128xf32> to vector<128xf32>
    %12 = vector.shape_cast %11 : vector<128xf32> to vector<128x1xf32>
    %cst_4 = arith.constant 1.280000e+02 : f32
    %13 = vector.broadcast %cst_4 : f32 to vector<128x1xf32>
    %14 = arith.divf %12, %13 : vector<128x1xf32>
    %15 = vector.broadcast %7 : vector<128x1xf32> to vector<128x128xf32>
    %16 = arith.subf %3, %15 : vector<128x128xf32>
    %cst_5 = arith.constant 9.99999974E-6 : f32
    %17 = vector.broadcast %cst_5 : f32 to vector<128x1xf32>
    %18 = arith.addf %14, %17 : vector<128x1xf32>
    %19 = math.rsqrt %18 : vector<128x1xf32>
    %20 = vector.broadcast %19 : vector<128x1xf32> to vector<128x128xf32>
    %21 = arith.mulf %16, %20 : vector<128x128xf32>
    %c0_6 = arith.constant 0 : index
    %c0_7 = arith.constant 0 : index
    %22 = vector.load %arg6[%c0_6, %c0_7] : memref<1x128xf32, #tpu.memory_space<vmem>>, vector<1x128xf32>
    %23 = vector.broadcast %22 : vector<1x128xf32> to vector<128x128xf32>
    %24 = arith.mulf %21, %23 : vector<128x128xf32>
    %c0_8 = arith.constant 0 : index
    %c0_9 = arith.constant 0 : index
    %25 = vector.load %arg7[%c0_8, %c0_9] : memref<1x128xf32, #tpu.memory_space<vmem>>, vector<1x128xf32>
    %26 = vector.broadcast %25 : vector<1x128xf32> to vector<128x128xf32>
    %27 = arith.addf %24, %26 : vector<128x128xf32>
    %28 = arith.truncf %27 : vector<128x128xf32> to vector<128x128xbf16>
    %c0_10 = arith.constant 0 : index
    %c0_11 = arith.constant 0 : index
    %29 = vector.load %arg8[%c0_10, %c0_11] : memref<128x384xbf16, #tpu.memory_space<vmem>>, vector<128x384xbf16>
    %cst_12 = arith.constant dense<0.000000e+00> : vector<128x384xf32>
    %30 = tpu.matmul %28, %29, %cst_12 {dimension_numbers = #tpu.dot_dimension_numbers<[1], [0], [0], [1], [0, 0, 1, 1], [], []>} : vector<128x128xbf16>, vector<128x384xbf16>, vector<128x384xf32> -> vector<128x384xf32>
    %c0_13 = arith.constant 0 : index
    %c0_14 = arith.constant 0 : index
    %31 = vector.load %arg9[%c0_13, %c0_14] : memref<1x384xf32, #tpu.memory_space<vmem>>, vector<1x384xf32>
    %32 = vector.broadcast %31 : vector<1x384xf32> to vector<128x384xf32>
    %33 = arith.addf %30, %32 : vector<128x384xf32>
    %34 = vector.extract_strided_slice %33 {offsets = [0, 0], sizes = [128, 256], strides = [1, 1]} : vector<128x384xf32> to vector<128x256xf32>
    %35 = vector.extract_strided_slice %33 {offsets = [0, 256], sizes = [128, 128], strides = [1, 1]} : vector<128x384xf32> to vector<128x128xf32>
    %36 = tpu.iota {dimensions = array<i32: 1>} : vector<128x256xi32>
    %c4 = arith.constant 4 : index
    %37 = memref.load %arg1[%c4] : memref<5xf32, #tpu.memory_space<smem>>
    %c3 = arith.constant 3 : index
    %38 = memref.load %arg1[%c3] : memref<5xf32, #tpu.memory_space<smem>>
    %39 = vector.broadcast %38 : f32 to vector<128x256xf32>
    %40 = arith.mulf %39, %34 : vector<128x256xf32>
    %41 = vector.broadcast %37 : f32 to vector<128x256xf32>
    %42 = arith.addf %41, %40 : vector<128x256xf32>
    %c1_i32 = arith.constant 1 : i32
    %43 = tpu.dynamic_rotate %34 by %c1_i32 dim 1 : vector<128x256xf32>, i32 -> vector<128x256xf32>
    %c1_i32_15 = arith.constant 1 : i32
    %44 = vector.broadcast %c1_i32_15 : i32 to vector<128x256xi32>
    %45 = arith.cmpi sge, %36, %44 : vector<128x256xi32>
    %cst_16 = arith.constant 0.000000e+00 : f32
    %46 = vector.broadcast %cst_16 : f32 to vector<128x256xf32>
    %47 = arith.select %45, %43, %46 : vector<128x256xi1>, vector<128x256xf32>
    %c2 = arith.constant 2 : index
    %48 = memref.load %arg1[%c2] : memref<5xf32, #tpu.memory_space<smem>>
    %49 = vector.broadcast %48 : f32 to vector<128x256xf32>
    %50 = arith.mulf %49, %47 : vector<128x256xf32>
    %51 = arith.addf %42, %50 : vector<128x256xf32>
    %c2_i32 = arith.constant 2 : i32
    %52 = tpu.dynamic_rotate %34 by %c2_i32 dim 1 : vector<128x256xf32>, i32 -> vector<128x256xf32>
    %c2_i32_17 = arith.constant 2 : i32
    %53 = vector.broadcast %c2_i32_17 : i32 to vector<128x256xi32>
    %54 = arith.cmpi sge, %36, %53 : vector<128x256xi32>
    %cst_18 = arith.constant 0.000000e+00 : f32
    %55 = vector.broadcast %cst_18 : f32 to vector<128x256xf32>
    %56 = arith.select %54, %52, %55 : vector<128x256xi1>, vector<128x256xf32>
    %c1 = arith.constant 1 : index
    %57 = memref.load %arg1[%c1] : memref<5xf32, #tpu.memory_space<smem>>
    %58 = vector.broadcast %57 : f32 to vector<128x256xf32>
    %59 = arith.mulf %58, %56 : vector<128x256xf32>
    %60 = arith.addf %51, %59 : vector<128x256xf32>
    %c3_i32 = arith.constant 3 : i32
    %61 = tpu.dynamic_rotate %34 by %c3_i32 dim 1 : vector<128x256xf32>, i32 -> vector<128x256xf32>
    %c3_i32_19 = arith.constant 3 : i32
    %62 = vector.broadcast %c3_i32_19 : i32 to vector<128x256xi32>
    %63 = arith.cmpi sge, %36, %62 : vector<128x256xi32>
    %cst_20 = arith.constant 0.000000e+00 : f32
    %64 = vector.broadcast %cst_20 : f32 to vector<128x256xf32>
    %65 = arith.select %63, %61, %64 : vector<128x256xi1>, vector<128x256xf32>
    %c0_21 = arith.constant 0 : index
    %66 = memref.load %arg1[%c0_21] : memref<5xf32, #tpu.memory_space<smem>>
    %67 = vector.broadcast %66 : f32 to vector<128x256xf32>
    %68 = arith.mulf %67, %65 : vector<128x256xf32>
    %69 = arith.addf %60, %68 : vector<128x256xf32>
    %70 = arith.negf %69 : vector<128x256xf32>
    %71 = math.exp %70 : vector<128x256xf32>
    %cst_22 = arith.constant 1.000000e+00 : f32
    %72 = vector.broadcast %cst_22 : f32 to vector<128x256xf32>
    %73 = arith.addf %72, %71 : vector<128x256xf32>
    %74 = arith.divf %72, %73 : vector<128x256xf32>
    %75 = arith.mulf %69, %74 : vector<128x256xf32>
    %76 = arith.truncf %75 : vector<128x256xf32> to vector<128x256xbf16>
    %c0_23 = arith.constant 0 : index
    %c0_24 = arith.constant 0 : index
    %77 = vector.load %arg10[%c0_23, %c0_24] : memref<256x640xbf16, #tpu.memory_space<vmem>>, vector<256x640xbf16>
    %cst_25 = arith.constant dense<0.000000e+00> : vector<128x640xf32>
    %78 = tpu.matmul %76, %77, %cst_25 {dimension_numbers = #tpu.dot_dimension_numbers<[1], [0], [0], [1], [0, 0, 1, 1], [], []>} : vector<128x256xbf16>, vector<256x640xbf16>, vector<128x640xf32> -> vector<128x640xf32>
    %c0_26 = arith.constant 0 : index
    %c0_27 = arith.constant 0 : index
    %79 = vector.load %arg11[%c0_26, %c0_27] : memref<1x640xf32, #tpu.memory_space<vmem>>, vector<1x640xf32>
    %80 = vector.broadcast %79 : vector<1x640xf32> to vector<128x640xf32>
    %81 = arith.addf %78, %80 : vector<128x640xf32>
    %c0_28 = arith.constant 0 : index
    %c0_29 = arith.constant 0 : index
    %82 = vector.load %arg24[%c0_28, %c0_29] : memref<128x640xf32, #tpu.memory_space<vmem>>, vector<128x640xf32>
    tpu.vector_store %arg24[%c0_28, %c0_29], %81 {strides = array<i32>} : memref<128x640xf32, #tpu.memory_space<vmem>>, vector<128x640xf32>,
    %83 = arith.truncf %34 : vector<128x256xf32> to vector<128x256xbf16>
    %c0_30 = arith.constant 0 : index
    %c0_31 = arith.constant 0 : index
    %84 = vector.load %arg12[%c0_30, %c0_31] : memref<256x256xbf16, #tpu.memory_space<vmem>>, vector<256x256xbf16>
    %cst_32 = arith.constant dense<0.000000e+00> : vector<128x256xf32>
    %85 = tpu.matmul %83, %84, %cst_32 {dimension_numbers = #tpu.dot_dimension_numbers<[1], [0], [0], [1], [0, 0, 1, 1], [], []>} : vector<128x256xbf16>, vector<256x256xbf16>, vector<128x256xf32> -> vector<128x256xf32>
    %c0_33 = arith.constant 0 : index
    %c0_34 = arith.constant 0 : index
    %86 = vector.load %arg13[%c0_33, %c0_34] : memref<1x256xf32, #tpu.memory_space<vmem>>, vector<1x256xf32>
    %87 = vector.broadcast %86 : vector<1x256xf32> to vector<128x256xf32>
    %88 = arith.addf %85, %87 : vector<128x256xf32>
    %89 = vector.extract_strided_slice %88 {offsets = [0, 0], sizes = [128, 128], strides = [1, 1]} : vector<128x256xf32> to vector<128x128xf32>
    %c0_35 = arith.constant 0 : index
    %c0_36 = arith.constant 0 : index
    %90 = vector.load %arg25[%c0_35, %c0_36] : memref<128x256xf32, #tpu.memory_space<vmem>>, vector<128x128xf32>
    tpu.vector_store %arg25[%c0_35, %c0_36], %89 {strides = array<i32>} : memref<128x256xf32, #tpu.memory_space<vmem>>, vector<128x128xf32>,
    %91 = vector.extract_strided_slice %88 {offsets = [0, 128], sizes = [128, 128], strides = [1, 1]} : vector<128x256xf32> to vector<128x128xf32>
    %92 = arith.negf %91 : vector<128x128xf32>
    %93 = math.exp %92 : vector<128x128xf32>
    %cst_37 = arith.constant 1.000000e+00 : f32
    %94 = vector.broadcast %cst_37 : f32 to vector<128x128xf32>
    %95 = arith.addf %94, %93 : vector<128x128xf32>
    %96 = arith.divf %94, %95 : vector<128x128xf32>
    %c0_38 = arith.constant 0 : index
    %c128 = arith.constant 128 : index
    %97 = vector.load %arg25[%c0_38, %c128] : memref<128x256xf32, #tpu.memory_space<vmem>>, vector<128x128xf32>
    tpu.vector_store %arg25[%c0_38, %c128], %96 {strides = array<i32>} : memref<128x256xf32, #tpu.memory_space<vmem>>, vector<128x128xf32>,
    %c0_i32_39 = arith.constant 0 : i32
    %c8_i32 = arith.constant 8 : i32
    %98 = arith.muli %c0_i32_39, %c8_i32 : i32
    %99 = tpu.assume_multiple %98, 8 : i32
    %100 = arith.index_cast %99 : i32 to index
    %c128_40 = arith.constant 128 : index
    %101 = vector.load %arg24[%100, %c128_40] : memref<128x640xf32, #tpu.memory_space<vmem>>, vector<8x128xf32>
    %102 = arith.index_cast %99 : i32 to index
    %c256 = arith.constant 256 : index
    %103 = vector.load %arg24[%102, %c256] : memref<128x640xf32, #tpu.memory_space<vmem>>, vector<8x128xf32>
    %cst_41 = arith.constant 0.176776692 : f32
    %104 = vector.broadcast %cst_41 : f32 to vector<8x128xf32>
    %105 = arith.mulf %103, %104 : vector<8x128xf32>
    %106 = arith.index_cast %99 : i32 to index
    %c384 = arith.constant 384 : index
    %107 = vector.load %arg24[%106, %c384] : memref<128x640xf32, #tpu.memory_space<vmem>>, vector<8x128xf32>
    %108 = arith.index_cast %99 : i32 to index
    %c512 = arith.constant 512 : index
    %109 = vector.load %arg24[%108, %c512] : memref<128x640xf32, #tpu.memory_space<vmem>>, vector<8x128xf32>
    %110 = arith.index_cast %99 : i32 to index
    %c0_42 = arith.constant 0 : index
    %111 = vector.load %arg25[%110, %c0_42] : memref<128x256xf32, #tpu.memory_space<vmem>>, vector<8x128xf32>
    %112 = arith.index_cast %99 : i32 to index
    %c128_43 = arith.constant 128 : index
    %113 = vector.load %arg25[%112, %c128_43] : memref<128x256xf32, #tpu.memory_space<vmem>>, vector<8x128xf32>
    %c0_44 = arith.constant 0 : index
    %c0_45 = arith.constant 0 : index
    %114 = vector.load %arg29[%c0_44, %c0_45] : memref<8x128xf32, #tpu.memory_space<vmem>>, vector<8x128xf32>
    %115 = arith.addf %109, %114 : vector<8x128xf32>
    %116 = arith.maximumf %115, %107 : vector<8x128xf32>
    %117 = arith.subf %107, %116 : vector<8x128xf32>
    %118 = math.exp %117 : vector<8x128xf32>
    %119 = arith.addf %109, %114 : vector<8x128xf32>
    %120 = arith.subf %119, %116 : vector<8x128xf32>
    %121 = math.exp %120 : vector<8x128xf32>
    %c0_46 = arith.constant 0 : index
    %c0_47 = arith.constant 0 : index
    %122 = vector.load %arg27[%c0_46, %c0_47] : memref<8x128xf32, #tpu.memory_space<vmem>>, vector<8x128xf32>
    %123 = arith.mulf %121, %122 : vector<8x128xf32>
    %124 = arith.mulf %111, %105 : vector<8x128xf32>
    %125 = arith.mulf %118, %124 : vector<8x128xf32>
    %126 = arith.addf %123, %125 : vector<8x128xf32>
    %c0_48 = arith.constant 0 : index
    %c0_49 = arith.constant 0 : index
    %127 = vector.load %arg28[%c0_48, %c0_49] : memref<8x128xf32, #tpu.memory_space<vmem>>, vector<8x128xf32>
    %128 = arith.mulf %121, %127 : vector<8x128xf32>
    %129 = arith.mulf %118, %105 : vector<8x128xf32>
    %130 = arith.addf %128, %129 : vector<8x128xf32>
    %131 = arith.mulf %130, %101 : vector<8x128xf32>
    %132 = arith.mulf %131, %131 : vector<8x128xf32>
    %cst_50 = arith.constant dense<0.000000e+00> : vector<8xf32>
    %133 = vector.multi_reduction <add>, %132, %cst_50 [1] : vector<8x128xf32> to vector<8xf32>
    %134 = vector.shape_cast %133 : vector<8xf32> to vector<8x1xf32>
    %135 = math.sqrt %134 : vector<8x1xf32>
    %cst_51 = arith.constant 9.99999997E-7 : f32
    %136 = vector.broadcast %cst_51 : f32 to vector<8x1xf32>
    %137 = arith.addf %135, %136 : vector<8x1xf32>
    %138 = tpu.reciprocal %137 {approx = true} : vector<8x1xf32> -> vector<8x1xf32>
    %139 = arith.mulf %137, %138 : vector<8x1xf32>
    %cst_52 = arith.constant 2.000000e+00 : f32
    %140 = vector.broadcast %cst_52 : f32 to vector<8x1xf32>
    %141 = arith.subf %140, %139 : vector<8x1xf32>
    %142 = arith.mulf %138, %141 : vector<8x1xf32>
    %143 = arith.mulf %126, %101 : vector<8x128xf32>
    %144 = arith.mulf %113, %143 : vector<8x128xf32>
    %145 = vector.broadcast %142 : vector<8x1xf32> to vector<8x128xf32>
    %146 = arith.mulf %144, %145 : vector<8x128xf32>
    %147 = arith.index_cast %99 : i32 to index
    %c0_53 = arith.constant 0 : index
    %148 = vector.load %arg26[%147, %c0_53] : memref<128x128xf32, #tpu.memory_space<vmem>>, vector<8x128xf32>
    tpu.vector_store %arg26[%147, %c0_53], %146 {strides = array<i32>} : memref<128x128xf32, #tpu.memory_space<vmem>>, vector<8x128xf32>,
    %c0_54 = arith.constant 0 : index
    %c0_55 = arith.constant 0 : index
    %149 = vector.load %arg27[%c0_54, %c0_55] : memref<8x128xf32, #tpu.memory_space<vmem>>, vector<8x128xf32>
    tpu.vector_store %arg27[%c0_54, %c0_55], %126 {strides = array<i32>} : memref<8x128xf32, #tpu.memory_space<vmem>>, vector<8x128xf32>,
    %c0_56 = arith.constant 0 : index
    %c0_57 = arith.constant 0 : index
    %150 = vector.load %arg28[%c0_56, %c0_57] : memref<8x128xf32, #tpu.memory_space<vmem>>, vector<8x128xf32>
    tpu.vector_store %arg28[%c0_56, %c0_57], %130 {strides = array<i32>} : memref<8x128xf32, #tpu.memory_space<vmem>>, vector<8x128xf32>,
    %c0_58 = arith.constant 0 : index
    %c0_59 = arith.constant 0 : index
    %151 = vector.load %arg29[%c0_58, %c0_59] : memref<8x128xf32, #tpu.memory_space<vmem>>, vector<8x128xf32>
    tpu.vector_store %arg29[%c0_58, %c0_59], %116 {strides = array<i32>} : memref<8x128xf32, #tpu.memory_space<vmem>>, vector<8x128xf32>,
    %c1_i32_60 = arith.constant 1 : i32
    %c8_i32_61 = arith.constant 8 : i32
    %152 = arith.muli %c1_i32_60, %c8_i32_61 : i32
    %153 = tpu.assume_multiple %152, 8 : i32
    %154 = arith.index_cast %153 : i32 to index
    %c128_62 = arith.constant 128 : index
    %155 = vector.load %arg24[%154, %c128_62] : memref<128x640xf32, #tpu.memory_space<vmem>>, vector<8x128xf32>
    %156 = arith.index_cast %153 : i32 to index
    %c256_63 = arith.constant 256 : index
    %157 = vector.load %arg24[%156, %c256_63] : memref<128x640xf32, #tpu.memory_space<vmem>>, vector<8x128xf32>
    %cst_64 = arith.constant 0.176776692 : f32
    %158 = vector.broadcast %cst_64 : f32 to vector<8x128xf32>
    %159 = arith.mulf %157, %158 : vector<8x128xf32>
    %160 = arith.index_cast %153 : i32 to index
    %c384_65 = arith.constant 384 : index
    %161 = vector.load %arg24[%160, %c384_65] : memref<128x640xf32, #tpu.memory_space<vmem>>, vector<8x128xf32>
    %162 = arith.index_cast %153 : i32 to index
    %c512_66 = arith.constant 512 : index
    %163 = vector.load %arg24[%162, %c512_66] : memref<128x640xf32, #tpu.memory_space<vmem>>, vector<8x128xf32>
    %164 = arith.index_cast %153 : i32 to index
    %c0_67 = arith.constant 0 : index
    %165 = vector.load %arg25[%164, %c0_67] : memref<128x256xf32, #tpu.memory_space<vmem>>, vector<8x128xf32>
    %166 = arith.index_cast %153 : i32 to index
    %c128_68 = arith.constant 128 : index
    %167 = vector.load %arg25[%166, %c128_68] : memref<128x256xf32, #tpu.memory_space<vmem>>, vector<8x128xf32>
    %c0_69 = arith.constant 0 : index
    %c0_70 = arith.constant 0 : index
    %168 = vector.load %arg29[%c0_69, %c0_70] : memref<8x128xf32, #tpu.memory_space<vmem>>, vector<8x128xf32>
    %169 = arith.addf %163, %168 : vector<8x128xf32>
    %170 = arith.maximumf %169, %161 : vector<8x128xf32>
    %171 = arith.subf %161, %170 : vector<8x128xf32>
    %172 = math.exp %171 : vector<8x128xf32>
    %173 = arith.addf %163, %168 : vector<8x128xf32>
    %174 = arith.subf %173, %170 : vector<8x128xf32>
    %175 = math.exp %174 : vector<8x128xf32>
    %c0_71 = arith.constant 0 : index
    %c0_72 = arith.constant 0 : index
    %176 = vector.load %arg27[%c0_71, %c0_72] : memref<8x128xf32, #tpu.memory_space<vmem>>, vector<8x128xf32>
    %177 = arith.mulf %175, %176 : vector<8x128xf32>
    %178 = arith.mulf %165, %159 : vector<8x128xf32>
    %179 = arith.mulf %172, %178 : vector<8x128xf32>
    %180 = arith.addf %177, %179 : vector<8x128xf32>
    %c0_73 = arith.constant 0 : index
    %c0_74 = arith.constant 0 : index
    %181 = vector.load %arg28[%c0_73, %c0_74] : memref<8x128xf32, #tpu.memory_space<vmem>>, vector<8x128xf32>
    %182 = arith.mulf %175, %181 : vector<8x128xf32>
    %183 = arith.mulf %172, %159 : vector<8x128xf32>
    %184 = arith.addf %182, %183 : vector<8x128xf32>
    %185 = arith.mulf %184, %155 : vector<8x128xf32>
    %186 = arith.mulf %185, %185 : vector<8x128xf32>
    %cst_75 = arith.constant dense<0.000000e+00> : vector<8xf32>
    %187 = vector.multi_reduction <add>, %186, %cst_75 [1] : vector<8x128xf32> to vector<8xf32>
    %188 = vector.shape_cast %187 : vector<8xf32> to vector<8x1xf32>
    %189 = math.sqrt %188 : vector<8x1xf32>
    %cst_76 = arith.constant 9.99999997E-7 : f32
    %190 = vector.broadcast %cst_76 : f32 to vector<8x1xf32>
    %191 = arith.addf %189, %190 : vector<8x1xf32>
    %192 = tpu.reciprocal %191 {approx = true} : vector<8x1xf32> -> vector<8x1xf32>
    %193 = arith.mulf %191, %192 : vector<8x1xf32>
    %cst_77 = arith.constant 2.000000e+00 : f32
    %194 = vector.broadcast %cst_77 : f32 to vector<8x1xf32>
    %195 = arith.subf %194, %193 : vector<8x1xf32>
    %196 = arith.mulf %192, %195 : vector<8x1xf32>
    %197 = arith.mulf %180, %155 : vector<8x128xf32>
    %198 = arith.mulf %167, %197 : vector<8x128xf32>
    %199 = vector.broadcast %196 : vector<8x1xf32> to vector<8x128xf32>
    %200 = arith.mulf %198, %199 : vector<8x128xf32>
    %201 = arith.index_cast %153 : i32 to index
    %c0_78 = arith.constant 0 : index
    %202 = vector.load %arg26[%201, %c0_78] : memref<128x128xf32, #tpu.memory_space<vmem>>, vector<8x128xf32>
    tpu.vector_store %arg26[%201, %c0_78], %200 {strides = array<i32>} : memref<128x128xf32, #tpu.memory_space<vmem>>, vector<8x128xf32>,
    %c0_79 = arith.constant 0 : index
    %c0_80 = arith.constant 0 : index
    %203 = vector.load %arg27[%c0_79, %c0_80] : memref<8x128xf32, #tpu.memory_space<vmem>>, vector<8x128xf32>
    tpu.vector_store %arg27[%c0_79, %c0_80], %180 {strides = array<i32>} : memref<8x128xf32, #tpu.memory_space<vmem>>, vector<8x128xf32>,
    %c0_81 = arith.constant 0 : index
    %c0_82 = arith.constant 0 : index
    %204 = vector.load %arg28[%c0_81, %c0_82] : memref<8x128xf32, #tpu.memory_space<vmem>>, vector<8x128xf32>
    tpu.vector_store %arg28[%c0_81, %c0_82], %184 {strides = array<i32>} : memref<8x128xf32, #tpu.memory_space<vmem>>, vector<8x128xf32>,
    %c0_83 = arith.constant 0 : index
    %c0_84 = arith.constant 0 : index
    %205 = vector.load %arg29[%c0_83, %c0_84] : memref<8x128xf32, #tpu.memory_space<vmem>>, vector<8x128xf32>
    tpu.vector_store %arg29[%c0_83, %c0_84], %170 {strides = array<i32>} : memref<8x128xf32, #tpu.memory_space<vmem>>, vector<8x128xf32>,
    %c2_i32_85 = arith.constant 2 : i32
    %c8_i32_86 = arith.constant 8 : i32
    %206 = arith.muli %c2_i32_85, %c8_i32_86 : i32
    %207 = tpu.assume_multiple %206, 8 : i32
    %208 = arith.index_cast %207 : i32 to index
    %c128_87 = arith.constant 128 : index
    %209 = vector.load %arg24[%208, %c128_87] : memref<128x640xf32, #tpu.memory_space<vmem>>, vector<8x128xf32>
    %210 = arith.index_cast %207 : i32 to index
    %c256_88 = arith.constant 256 : index
    %211 = vector.load %arg24[%210, %c256_88] : memref<128x640xf32, #tpu.memory_space<vmem>>, vector<8x128xf32>
    %cst_89 = arith.constant 0.176776692 : f32
    %212 = vector.broadcast %cst_89 : f32 to vector<8x128xf32>
    %213 = arith.mulf %211, %212 : vector<8x128xf32>
    %214 = arith.index_cast %207 : i32 to index
    %c384_90 = arith.constant 384 : index
    %215 = vector.load %arg24[%214, %c384_90] : memref<128x640xf32, #tpu.memory_space<vmem>>, vector<8x128xf32>
    %216 = arith.index_cast %207 : i32 to index
    %c512_91 = arith.constant 512 : index
    %217 = vector.load %arg24[%216, %c512_91] : memref<128x640xf32, #tpu.memory_space<vmem>>, vector<8x128xf32>
    %218 = arith.index_cast %207 : i32 to index
    %c0_92 = arith.constant 0 : index
    %219 = vector.load %arg25[%218, %c0_92] : memref<128x256xf32, #tpu.memory_space<vmem>>, vector<8x128xf32>
    %220 = arith.index_cast %207 : i32 to index
    %c128_93 = arith.constant 128 : index
    %221 = vector.load %arg25[%220, %c128_93] : memref<128x256xf32, #tpu.memory_space<vmem>>, vector<8x128xf32>
    %c0_94 = arith.constant 0 : index
    %c0_95 = arith.constant 0 : index
    %222 = vector.load %arg29[%c0_94, %c0_95] : memref<8x128xf32, #tpu.memory_space<vmem>>, vector<8x128xf32>
    %223 = arith.addf %217, %222 : vector<8x128xf32>
    %224 = arith.maximumf %223, %215 : vector<8x128xf32>
    %225 = arith.subf %215, %224 : vector<8x128xf32>
    %226 = math.exp %225 : vector<8x128xf32>
    %227 = arith.addf %217, %222 : vector<8x128xf32>
    %228 = arith.subf %227, %224 : vector<8x128xf32>
    %229 = math.exp %228 : vector<8x128xf32>
    %c0_96 = arith.constant 0 : index
    %c0_97 = arith.constant 0 : index
    %230 = vector.load %arg27[%c0_96, %c0_97] : memref<8x128xf32, #tpu.memory_space<vmem>>, vector<8x128xf32>
    %231 = arith.mulf %229, %230 : vector<8x128xf32>
    %232 = arith.mulf %219, %213 : vector<8x128xf32>
    %233 = arith.mulf %226, %232 : vector<8x128xf32>
    %234 = arith.addf %231, %233 : vector<8x128xf32>
    %c0_98 = arith.constant 0 : index
    %c0_99 = arith.constant 0 : index
    %235 = vector.load %arg28[%c0_98, %c0_99] : memref<8x128xf32, #tpu.memory_space<vmem>>, vector<8x128xf32>
    %236 = arith.mulf %229, %235 : vector<8x128xf32>
    %237 = arith.mulf %226, %213 : vector<8x128xf32>
    %238 = arith.addf %236, %237 : vector<8x128xf32>
    %239 = arith.mulf %238, %209 : vector<8x128xf32>
    %240 = arith.mulf %239, %239 : vector<8x128xf32>
    %cst_100 = arith.constant dense<0.000000e+00> : vector<8xf32>
    %241 = vector.multi_reduction <add>, %240, %cst_100 [1] : vector<8x128xf32> to vector<8xf32>
    %242 = vector.shape_cast %241 : vector<8xf32> to vector<8x1xf32>
    %243 = math.sqrt %242 : vector<8x1xf32>
    %cst_101 = arith.constant 9.99999997E-7 : f32
    %244 = vector.broadcast %cst_101 : f32 to vector<8x1xf32>
    %245 = arith.addf %243, %244 : vector<8x1xf32>
    %246 = tpu.reciprocal %245 {approx = true} : vector<8x1xf32> -> vector<8x1xf32>
    %247 = arith.mulf %245, %246 : vector<8x1xf32>
    %cst_102 = arith.constant 2.000000e+00 : f32
    %248 = vector.broadcast %cst_102 : f32 to vector<8x1xf32>
    %249 = arith.subf %248, %247 : vector<8x1xf32>
    %250 = arith.mulf %246, %249 : vector<8x1xf32>
    %251 = arith.mulf %234, %209 : vector<8x128xf32>
    %252 = arith.mulf %221, %251 : vector<8x128xf32>
    %253 = vector.broadcast %250 : vector<8x1xf32> to vector<8x128xf32>
    %254 = arith.mulf %252, %253 : vector<8x128xf32>
    %255 = arith.index_cast %207 : i32 to index
    %c0_103 = arith.constant 0 : index
    %256 = vector.load %arg26[%255, %c0_103] : memref<128x128xf32, #tpu.memory_space<vmem>>, vector<8x128xf32>
    tpu.vector_store %arg26[%255, %c0_103], %254 {strides = array<i32>} : memref<128x128xf32, #tpu.memory_space<vmem>>, vector<8x128xf32>,
    %c0_104 = arith.constant 0 : index
    %c0_105 = arith.constant 0 : index
    %257 = vector.load %arg27[%c0_104, %c0_105] : memref<8x128xf32, #tpu.memory_space<vmem>>, vector<8x128xf32>
    tpu.vector_store %arg27[%c0_104, %c0_105], %234 {strides = array<i32>} : memref<8x128xf32, #tpu.memory_space<vmem>>, vector<8x128xf32>,
    %c0_106 = arith.constant 0 : index
    %c0_107 = arith.constant 0 : index
    %258 = vector.load %arg28[%c0_106, %c0_107] : memref<8x128xf32, #tpu.memory_space<vmem>>, vector<8x128xf32>
    tpu.vector_store %arg28[%c0_106, %c0_107], %238 {strides = array<i32>} : memref<8x128xf32, #tpu.memory_space<vmem>>, vector<8x128xf32>,
    %c0_108 = arith.constant 0 : index
    %c0_109 = arith.constant 0 : index
    %259 = vector.load %arg29[%c0_108, %c0_109] : memref<8x128xf32, #tpu.memory_space<vmem>>, vector<8x128xf32>
    tpu.vector_store %arg29[%c0_108, %c0_109], %224 {strides = array<i32>} : memref<8x128xf32, #tpu.memory_space<vmem>>, vector<8x128xf32>,
    %c3_i32_110 = arith.constant 3 : i32
    %c8_i32_111 = arith.constant 8 : i32
    %260 = arith.muli %c3_i32_110, %c8_i32_111 : i32
    %261 = tpu.assume_multiple %260, 8 : i32
    %262 = arith.index_cast %261 : i32 to index
    %c128_112 = arith.constant 128 : index
    %263 = vector.load %arg24[%262, %c128_112] : memref<128x640xf32, #tpu.memory_space<vmem>>, vector<8x128xf32>
    %264 = arith.index_cast %261 : i32 to index
    %c256_113 = arith.constant 256 : index
    %265 = vector.load %arg24[%264, %c256_113] : memref<128x640xf32, #tpu.memory_space<vmem>>, vector<8x128xf32>
    %cst_114 = arith.constant 0.176776692 : f32
    %266 = vector.broadcast %cst_114 : f32 to vector<8x128xf32>
    %267 = arith.mulf %265, %266 : vector<8x128xf32>
    %268 = arith.index_cast %261 : i32 to index
    %c384_115 = arith.constant 384 : index
    %269 = vector.load %arg24[%268, %c384_115] : memref<128x640xf32, #tpu.memory_space<vmem>>, vector<8x128xf32>
    %270 = arith.index_cast %261 : i32 to index
    %c512_116 = arith.constant 512 : index
    %271 = vector.load %arg24[%270, %c512_116] : memref<128x640xf32, #tpu.memory_space<vmem>>, vector<8x128xf32>
    %272 = arith.index_cast %261 : i32 to index
    %c0_117 = arith.constant 0 : index
    %273 = vector.load %arg25[%272, %c0_117] : memref<128x256xf32, #tpu.memory_space<vmem>>, vector<8x128xf32>
    %274 = arith.index_cast %261 : i32 to index
    %c128_118 = arith.constant 128 : index
    %275 = vector.load %arg25[%274, %c128_118] : memref<128x256xf32, #tpu.memory_space<vmem>>, vector<8x128xf32>
    %c0_119 = arith.constant 0 : index
    %c0_120 = arith.constant 0 : index
    %276 = vector.load %arg29[%c0_119, %c0_120] : memref<8x128xf32, #tpu.memory_space<vmem>>, vector<8x128xf32>
    %277 = arith.addf %271, %276 : vector<8x128xf32>
    %278 = arith.maximumf %277, %269 : vector<8x128xf32>
    %279 = arith.subf %269, %278 : vector<8x128xf32>
    %280 = math.exp %279 : vector<8x128xf32>
    %281 = arith.addf %271, %276 : vector<8x128xf32>
    %282 = arith.subf %281, %278 : vector<8x128xf32>
    %283 = math.exp %282 : vector<8x128xf32>
    %c0_121 = arith.constant 0 : index
    %c0_122 = arith.constant 0 : index
    %284 = vector.load %arg27[%c0_121, %c0_122] : memref<8x128xf32, #tpu.memory_space<vmem>>, vector<8x128xf32>
    %285 = arith.mulf %283, %284 : vector<8x128xf32>
    %286 = arith.mulf %273, %267 : vector<8x128xf32>
    %287 = arith.mulf %280, %286 : vector<8x128xf32>
    %288 = arith.addf %285, %287 : vector<8x128xf32>
    %c0_123 = arith.constant 0 : index
    %c0_124 = arith.constant 0 : index
    %289 = vector.load %arg28[%c0_123, %c0_124] : memref<8x128xf32, #tpu.memory_space<vmem>>, vector<8x128xf32>
    %290 = arith.mulf %283, %289 : vector<8x128xf32>
    %291 = arith.mulf %280, %267 : vector<8x128xf32>
    %292 = arith.addf %290, %291 : vector<8x128xf32>
    %293 = arith.mulf %292, %263 : vector<8x128xf32>
    %294 = arith.mulf %293, %293 : vector<8x128xf32>
    %cst_125 = arith.constant dense<0.000000e+00> : vector<8xf32>
    %295 = vector.multi_reduction <add>, %294, %cst_125 [1] : vector<8x128xf32> to vector<8xf32>
    %296 = vector.shape_cast %295 : vector<8xf32> to vector<8x1xf32>
    %297 = math.sqrt %296 : vector<8x1xf32>
    %cst_126 = arith.constant 9.99999997E-7 : f32
    %298 = vector.broadcast %cst_126 : f32 to vector<8x1xf32>
    %299 = arith.addf %297, %298 : vector<8x1xf32>
    %300 = tpu.reciprocal %299 {approx = true} : vector<8x1xf32> -> vector<8x1xf32>
    %301 = arith.mulf %299, %300 : vector<8x1xf32>
    %cst_127 = arith.constant 2.000000e+00 : f32
    %302 = vector.broadcast %cst_127 : f32 to vector<8x1xf32>
    %303 = arith.subf %302, %301 : vector<8x1xf32>
    %304 = arith.mulf %300, %303 : vector<8x1xf32>
    %305 = arith.mulf %288, %263 : vector<8x128xf32>
    %306 = arith.mulf %275, %305 : vector<8x128xf32>
    %307 = vector.broadcast %304 : vector<8x1xf32> to vector<8x128xf32>
    %308 = arith.mulf %306, %307 : vector<8x128xf32>
    %309 = arith.index_cast %261 : i32 to index
    %c0_128 = arith.constant 0 : index
    %310 = vector.load %arg26[%309, %c0_128] : memref<128x128xf32, #tpu.memory_space<vmem>>, vector<8x128xf32>
    tpu.vector_store %arg26[%309, %c0_128], %308 {strides = array<i32>} : memref<128x128xf32, #tpu.memory_space<vmem>>, vector<8x128xf32>,
    %c0_129 = arith.constant 0 : index
    %c0_130 = arith.constant 0 : index
    %311 = vector.load %arg27[%c0_129, %c0_130] : memref<8x128xf32, #tpu.memory_space<vmem>>, vector<8x128xf32>
    tpu.vector_store %arg27[%c0_129, %c0_130], %288 {strides = array<i32>} : memref<8x128xf32, #tpu.memory_space<vmem>>, vector<8x128xf32>,
    %c0_131 = arith.constant 0 : index
    %c0_132 = arith.constant 0 : index
    %312 = vector.load %arg28[%c0_131, %c0_132] : memref<8x128xf32, #tpu.memory_space<vmem>>, vector<8x128xf32>
    tpu.vector_store %arg28[%c0_131, %c0_132], %292 {strides = array<i32>} : memref<8x128xf32, #tpu.memory_space<vmem>>, vector<8x128xf32>,
    %c0_133 = arith.constant 0 : index
    %c0_134 = arith.constant 0 : index
    %313 = vector.load %arg29[%c0_133, %c0_134] : memref<8x128xf32, #tpu.memory_space<vmem>>, vector<8x128xf32>
    tpu.vector_store %arg29[%c0_133, %c0_134], %278 {strides = array<i32>} : memref<8x128xf32, #tpu.memory_space<vmem>>, vector<8x128xf32>,
    %c4_i32 = arith.constant 4 : i32
    %c8_i32_135 = arith.constant 8 : i32
    %314 = arith.muli %c4_i32, %c8_i32_135 : i32
    %315 = tpu.assume_multiple %314, 8 : i32
    %316 = arith.index_cast %315 : i32 to index
    %c128_136 = arith.constant 128 : index
    %317 = vector.load %arg24[%316, %c128_136] : memref<128x640xf32, #tpu.memory_space<vmem>>, vector<8x128xf32>
    %318 = arith.index_cast %315 : i32 to index
    %c256_137 = arith.constant 256 : index
    %319 = vector.load %arg24[%318, %c256_137] : memref<128x640xf32, #tpu.memory_space<vmem>>, vector<8x128xf32>
    %cst_138 = arith.constant 0.176776692 : f32
    %320 = vector.broadcast %cst_138 : f32 to vector<8x128xf32>
    %321 = arith.mulf %319, %320 : vector<8x128xf32>
    %322 = arith.index_cast %315 : i32 to index
    %c384_139 = arith.constant 384 : index
    %323 = vector.load %arg24[%322, %c384_139] : memref<128x640xf32, #tpu.memory_space<vmem>>, vector<8x128xf32>
    %324 = arith.index_cast %315 : i32 to index
    %c512_140 = arith.constant 512 : index
    %325 = vector.load %arg24[%324, %c512_140] : memref<128x640xf32, #tpu.memory_space<vmem>>, vector<8x128xf32>
    %326 = arith.index_cast %315 : i32 to index
    %c0_141 = arith.constant 0 : index
    %327 = vector.load %arg25[%326, %c0_141] : memref<128x256xf32, #tpu.memory_space<vmem>>, vector<8x128xf32>
    %328 = arith.index_cast %315 : i32 to index
    %c128_142 = arith.constant 128 : index
    %329 = vector.load %arg25[%328, %c128_142] : memref<128x256xf32, #tpu.memory_space<vmem>>, vector<8x128xf32>
    %c0_143 = arith.constant 0 : index
    %c0_144 = arith.constant 0 : index
    %330 = vector.load %arg29[%c0_143, %c0_144] : memref<8x128xf32, #tpu.memory_space<vmem>>, vector<8x128xf32>
    %331 = arith.addf %325, %330 : vector<8x128xf32>
    %332 = arith.maximumf %331, %323 : vector<8x128xf32>
    %333 = arith.subf %323, %332 : vector<8x128xf32>
    %334 = math.exp %333 : vector<8x128xf32>
    %335 = arith.addf %325, %330 : vector<8x128xf32>
    %336 = arith.subf %335, %332 : vector<8x128xf32>
    %337 = math.exp %336 : vector<8x128xf32>
    %c0_145 = arith.constant 0 : index
    %c0_146 = arith.constant 0 : index
    %338 = vector.load %arg27[%c0_145, %c0_146] : memref<8x128xf32, #tpu.memory_space<vmem>>, vector<8x128xf32>
    %339 = arith.mulf %337, %338 : vector<8x128xf32>
    %340 = arith.mulf %327, %321 : vector<8x128xf32>
    %341 = arith.mulf %334, %340 : vector<8x128xf32>
    %342 = arith.addf %339, %341 : vector<8x128xf32>
    %c0_147 = arith.constant 0 : index
    %c0_148 = arith.constant 0 : index
    %343 = vector.load %arg28[%c0_147, %c0_148] : memref<8x128xf32, #tpu.memory_space<vmem>>, vector<8x128xf32>
    %344 = arith.mulf %337, %343 : vector<8x128xf32>
    %345 = arith.mulf %334, %321 : vector<8x128xf32>
    %346 = arith.addf %344, %345 : vector<8x128xf32>
    %347 = arith.mulf %346, %317 : vector<8x128xf32>
    %348 = arith.mulf %347, %347 : vector<8x128xf32>
    %cst_149 = arith.constant dense<0.000000e+00> : vector<8xf32>
    %349 = vector.multi_reduction <add>, %348, %cst_149 [1] : vector<8x128xf32> to vector<8xf32>
    %350 = vector.shape_cast %349 : vector<8xf32> to vector<8x1xf32>
    %351 = math.sqrt %350 : vector<8x1xf32>
    %cst_150 = arith.constant 9.99999997E-7 : f32
    %352 = vector.broadcast %cst_150 : f32 to vector<8x1xf32>
    %353 = arith.addf %351, %352 : vector<8x1xf32>
    %354 = tpu.reciprocal %353 {approx = true} : vector<8x1xf32> -> vector<8x1xf32>
    %355 = arith.mulf %353, %354 : vector<8x1xf32>
    %cst_151 = arith.constant 2.000000e+00 : f32
    %356 = vector.broadcast %cst_151 : f32 to vector<8x1xf32>
    %357 = arith.subf %356, %355 : vector<8x1xf32>
    %358 = arith.mulf %354, %357 : vector<8x1xf32>
    %359 = arith.mulf %342, %317 : vector<8x128xf32>
    %360 = arith.mulf %329, %359 : vector<8x128xf32>
    %361 = vector.broadcast %358 : vector<8x1xf32> to vector<8x128xf32>
    %362 = arith.mulf %360, %361 : vector<8x128xf32>
    %363 = arith.index_cast %315 : i32 to index
    %c0_152 = arith.constant 0 : index
    %364 = vector.load %arg26[%363, %c0_152] : memref<128x128xf32, #tpu.memory_space<vmem>>, vector<8x128xf32>
    tpu.vector_store %arg26[%363, %c0_152], %362 {strides = array<i32>} : memref<128x128xf32, #tpu.memory_space<vmem>>, vector<8x128xf32>,
    %c0_153 = arith.constant 0 : index
    %c0_154 = arith.constant 0 : index
    %365 = vector.load %arg27[%c0_153, %c0_154] : memref<8x128xf32, #tpu.memory_space<vmem>>, vector<8x128xf32>
    tpu.vector_store %arg27[%c0_153, %c0_154], %342 {strides = array<i32>} : memref<8x128xf32, #tpu.memory_space<vmem>>, vector<8x128xf32>,
    %c0_155 = arith.constant 0 : index
    %c0_156 = arith.constant 0 : index
    %366 = vector.load %arg28[%c0_155, %c0_156] : memref<8x128xf32, #tpu.memory_space<vmem>>, vector<8x128xf32>
    tpu.vector_store %arg28[%c0_155, %c0_156], %346 {strides = array<i32>} : memref<8x128xf32, #tpu.memory_space<vmem>>, vector<8x128xf32>,
    %c0_157 = arith.constant 0 : index
    %c0_158 = arith.constant 0 : index
    %367 = vector.load %arg29[%c0_157, %c0_158] : memref<8x128xf32, #tpu.memory_space<vmem>>, vector<8x128xf32>
    tpu.vector_store %arg29[%c0_157, %c0_158], %332 {strides = array<i32>} : memref<8x128xf32, #tpu.memory_space<vmem>>, vector<8x128xf32>,
    %c5_i32 = arith.constant 5 : i32
    %c8_i32_159 = arith.constant 8 : i32
    %368 = arith.muli %c5_i32, %c8_i32_159 : i32
    %369 = tpu.assume_multiple %368, 8 : i32
    %370 = arith.index_cast %369 : i32 to index
    %c128_160 = arith.constant 128 : index
    %371 = vector.load %arg24[%370, %c128_160] : memref<128x640xf32, #tpu.memory_space<vmem>>, vector<8x128xf32>
    %372 = arith.index_cast %369 : i32 to index
    %c256_161 = arith.constant 256 : index
    %373 = vector.load %arg24[%372, %c256_161] : memref<128x640xf32, #tpu.memory_space<vmem>>, vector<8x128xf32>
    %cst_162 = arith.constant 0.176776692 : f32
    %374 = vector.broadcast %cst_162 : f32 to vector<8x128xf32>
    %375 = arith.mulf %373, %374 : vector<8x128xf32>
    %376 = arith.index_cast %369 : i32 to index
    %c384_163 = arith.constant 384 : index
    %377 = vector.load %arg24[%376, %c384_163] : memref<128x640xf32, #tpu.memory_space<vmem>>, vector<8x128xf32>
    %378 = arith.index_cast %369 : i32 to index
    %c512_164 = arith.constant 512 : index
    %379 = vector.load %arg24[%378, %c512_164] : memref<128x640xf32, #tpu.memory_space<vmem>>, vector<8x128xf32>
    %380 = arith.index_cast %369 : i32 to index
    %c0_165 = arith.constant 0 : index
    %381 = vector.load %arg25[%380, %c0_165] : memref<128x256xf32, #tpu.memory_space<vmem>>, vector<8x128xf32>
    %382 = arith.index_cast %369 : i32 to index
    %c128_166 = arith.constant 128 : index
    %383 = vector.load %arg25[%382, %c128_166] : memref<128x256xf32, #tpu.memory_space<vmem>>, vector<8x128xf32>
    %c0_167 = arith.constant 0 : index
    %c0_168 = arith.constant 0 : index
    %384 = vector.load %arg29[%c0_167, %c0_168] : memref<8x128xf32, #tpu.memory_space<vmem>>, vector<8x128xf32>
    %385 = arith.addf %379, %384 : vector<8x128xf32>
    %386 = arith.maximumf %385, %377 : vector<8x128xf32>
    %387 = arith.subf %377, %386 : vector<8x128xf32>
    %388 = math.exp %387 : vector<8x128xf32>
    %389 = arith.addf %379, %384 : vector<8x128xf32>
    %390 = arith.subf %389, %386 : vector<8x128xf32>
    %391 = math.exp %390 : vector<8x128xf32>
    %c0_169 = arith.constant 0 : index
    %c0_170 = arith.constant 0 : index
    %392 = vector.load %arg27[%c0_169, %c0_170] : memref<8x128xf32, #tpu.memory_space<vmem>>, vector<8x128xf32>
    %393 = arith.mulf %391, %392 : vector<8x128xf32>
    %394 = arith.mulf %381, %375 : vector<8x128xf32>
    %395 = arith.mulf %388, %394 : vector<8x128xf32>
    %396 = arith.addf %393, %395 : vector<8x128xf32>
    %c0_171 = arith.constant 0 : index
    %c0_172 = arith.constant 0 : index
    %397 = vector.load %arg28[%c0_171, %c0_172] : memref<8x128xf32, #tpu.memory_space<vmem>>, vector<8x128xf32>
    %398 = arith.mulf %391, %397 : vector<8x128xf32>
    %399 = arith.mulf %388, %375 : vector<8x128xf32>
    %400 = arith.addf %398, %399 : vector<8x128xf32>
    %401 = arith.mulf %400, %371 : vector<8x128xf32>
    %402 = arith.mulf %401, %401 : vector<8x128xf32>
    %cst_173 = arith.constant dense<0.000000e+00> : vector<8xf32>
    %403 = vector.multi_reduction <add>, %402, %cst_173 [1] : vector<8x128xf32> to vector<8xf32>
    %404 = vector.shape_cast %403 : vector<8xf32> to vector<8x1xf32>
    %405 = math.sqrt %404 : vector<8x1xf32>
    %cst_174 = arith.constant 9.99999997E-7 : f32
    %406 = vector.broadcast %cst_174 : f32 to vector<8x1xf32>
    %407 = arith.addf %405, %406 : vector<8x1xf32>
    %408 = tpu.reciprocal %407 {approx = true} : vector<8x1xf32> -> vector<8x1xf32>
    %409 = arith.mulf %407, %408 : vector<8x1xf32>
    %cst_175 = arith.constant 2.000000e+00 : f32
    %410 = vector.broadcast %cst_175 : f32 to vector<8x1xf32>
    %411 = arith.subf %410, %409 : vector<8x1xf32>
    %412 = arith.mulf %408, %411 : vector<8x1xf32>
    %413 = arith.mulf %396, %371 : vector<8x128xf32>
    %414 = arith.mulf %383, %413 : vector<8x128xf32>
    %415 = vector.broadcast %412 : vector<8x1xf32> to vector<8x128xf32>
    %416 = arith.mulf %414, %415 : vector<8x128xf32>
    %417 = arith.index_cast %369 : i32 to index
    %c0_176 = arith.constant 0 : index
    %418 = vector.load %arg26[%417, %c0_176] : memref<128x128xf32, #tpu.memory_space<vmem>>, vector<8x128xf32>
    tpu.vector_store %arg26[%417, %c0_176], %416 {strides = array<i32>} : memref<128x128xf32, #tpu.memory_space<vmem>>, vector<8x128xf32>,
    %c0_177 = arith.constant 0 : index
    %c0_178 = arith.constant 0 : index
    %419 = vector.load %arg27[%c0_177, %c0_178] : memref<8x128xf32, #tpu.memory_space<vmem>>, vector<8x128xf32>
    tpu.vector_store %arg27[%c0_177, %c0_178], %396 {strides = array<i32>} : memref<8x128xf32, #tpu.memory_space<vmem>>, vector<8x128xf32>,
    %c0_179 = arith.constant 0 : index
    %c0_180 = arith.constant 0 : index
    %420 = vector.load %arg28[%c0_179, %c0_180] : memref<8x128xf32, #tpu.memory_space<vmem>>, vector<8x128xf32>
    tpu.vector_store %arg28[%c0_179, %c0_180], %400 {strides = array<i32>} : memref<8x128xf32, #tpu.memory_space<vmem>>, vector<8x128xf32>,
    %c0_181 = arith.constant 0 : index
    %c0_182 = arith.constant 0 : index
    %421 = vector.load %arg29[%c0_181, %c0_182] : memref<8x128xf32, #tpu.memory_space<vmem>>, vector<8x128xf32>
    tpu.vector_store %arg29[%c0_181, %c0_182], %386 {strides = array<i32>} : memref<8x128xf32, #tpu.memory_space<vmem>>, vector<8x128xf32>,
    %c6_i32 = arith.constant 6 : i32
    %c8_i32_183 = arith.constant 8 : i32
    %422 = arith.muli %c6_i32, %c8_i32_183 : i32
    %423 = tpu.assume_multiple %422, 8 : i32
    %424 = arith.index_cast %423 : i32 to index
    %c128_184 = arith.constant 128 : index
    %425 = vector.load %arg24[%424, %c128_184] : memref<128x640xf32, #tpu.memory_space<vmem>>, vector<8x128xf32>
    %426 = arith.index_cast %423 : i32 to index
    %c256_185 = arith.constant 256 : index
    %427 = vector.load %arg24[%426, %c256_185] : memref<128x640xf32, #tpu.memory_space<vmem>>, vector<8x128xf32>
    %cst_186 = arith.constant 0.176776692 : f32
    %428 = vector.broadcast %cst_186 : f32 to vector<8x128xf32>
    %429 = arith.mulf %427, %428 : vector<8x128xf32>
    %430 = arith.index_cast %423 : i32 to index
    %c384_187 = arith.constant 384 : index
    %431 = vector.load %arg24[%430, %c384_187] : memref<128x640xf32, #tpu.memory_space<vmem>>, vector<8x128xf32>
    %432 = arith.index_cast %423 : i32 to index
    %c512_188 = arith.constant 512 : index
    %433 = vector.load %arg24[%432, %c512_188] : memref<128x640xf32, #tpu.memory_space<vmem>>, vector<8x128xf32>
    %434 = arith.index_cast %423 : i32 to index
    %c0_189 = arith.constant 0 : index
    %435 = vector.load %arg25[%434, %c0_189] : memref<128x256xf32, #tpu.memory_space<vmem>>, vector<8x128xf32>
    %436 = arith.index_cast %423 : i32 to index
    %c128_190 = arith.constant 128 : index
    %437 = vector.load %arg25[%436, %c128_190] : memref<128x256xf32, #tpu.memory_space<vmem>>, vector<8x128xf32>
    %c0_191 = arith.constant 0 : index
    %c0_192 = arith.constant 0 : index
    %438 = vector.load %arg29[%c0_191, %c0_192] : memref<8x128xf32, #tpu.memory_space<vmem>>, vector<8x128xf32>
    %439 = arith.addf %433, %438 : vector<8x128xf32>
    %440 = arith.maximumf %439, %431 : vector<8x128xf32>
    %441 = arith.subf %431, %440 : vector<8x128xf32>
    %442 = math.exp %441 : vector<8x128xf32>
    %443 = arith.addf %433, %438 : vector<8x128xf32>
    %444 = arith.subf %443, %440 : vector<8x128xf32>
    %445 = math.exp %444 : vector<8x128xf32>
    %c0_193 = arith.constant 0 : index
    %c0_194 = arith.constant 0 : index
    %446 = vector.load %arg27[%c0_193, %c0_194] : memref<8x128xf32, #tpu.memory_space<vmem>>, vector<8x128xf32>
    %447 = arith.mulf %445, %446 : vector<8x128xf32>
    %448 = arith.mulf %435, %429 : vector<8x128xf32>
    %449 = arith.mulf %442, %448 : vector<8x128xf32>
    %450 = arith.addf %447, %449 : vector<8x128xf32>
    %c0_195 = arith.constant 0 : index
    %c0_196 = arith.constant 0 : index
    %451 = vector.load %arg28[%c0_195, %c0_196] : memref<8x128xf32, #tpu.memory_space<vmem>>, vector<8x128xf32>
    %452 = arith.mulf %445, %451 : vector<8x128xf32>
    %453 = arith.mulf %442, %429 : vector<8x128xf32>
    %454 = arith.addf %452, %453 : vector<8x128xf32>
    %455 = arith.mulf %454, %425 : vector<8x128xf32>
    %456 = arith.mulf %455, %455 : vector<8x128xf32>
    %cst_197 = arith.constant dense<0.000000e+00> : vector<8xf32>
    %457 = vector.multi_reduction <add>, %456, %cst_197 [1] : vector<8x128xf32> to vector<8xf32>
    %458 = vector.shape_cast %457 : vector<8xf32> to vector<8x1xf32>
    %459 = math.sqrt %458 : vector<8x1xf32>
    %cst_198 = arith.constant 9.99999997E-7 : f32
    %460 = vector.broadcast %cst_198 : f32 to vector<8x1xf32>
    %461 = arith.addf %459, %460 : vector<8x1xf32>
    %462 = tpu.reciprocal %461 {approx = true} : vector<8x1xf32> -> vector<8x1xf32>
    %463 = arith.mulf %461, %462 : vector<8x1xf32>
    %cst_199 = arith.constant 2.000000e+00 : f32
    %464 = vector.broadcast %cst_199 : f32 to vector<8x1xf32>
    %465 = arith.subf %464, %463 : vector<8x1xf32>
    %466 = arith.mulf %462, %465 : vector<8x1xf32>
    %467 = arith.mulf %450, %425 : vector<8x128xf32>
    %468 = arith.mulf %437, %467 : vector<8x128xf32>
    %469 = vector.broadcast %466 : vector<8x1xf32> to vector<8x128xf32>
    %470 = arith.mulf %468, %469 : vector<8x128xf32>
    %471 = arith.index_cast %423 : i32 to index
    %c0_200 = arith.constant 0 : index
    %472 = vector.load %arg26[%471, %c0_200] : memref<128x128xf32, #tpu.memory_space<vmem>>, vector<8x128xf32>
    tpu.vector_store %arg26[%471, %c0_200], %470 {strides = array<i32>} : memref<128x128xf32, #tpu.memory_space<vmem>>, vector<8x128xf32>,
    %c0_201 = arith.constant 0 : index
    %c0_202 = arith.constant 0 : index
    %473 = vector.load %arg27[%c0_201, %c0_202] : memref<8x128xf32, #tpu.memory_space<vmem>>, vector<8x128xf32>
    tpu.vector_store %arg27[%c0_201, %c0_202], %450 {strides = array<i32>} : memref<8x128xf32, #tpu.memory_space<vmem>>, vector<8x128xf32>,
    %c0_203 = arith.constant 0 : index
    %c0_204 = arith.constant 0 : index
    %474 = vector.load %arg28[%c0_203, %c0_204] : memref<8x128xf32, #tpu.memory_space<vmem>>, vector<8x128xf32>
    tpu.vector_store %arg28[%c0_203, %c0_204], %454 {strides = array<i32>} : memref<8x128xf32, #tpu.memory_space<vmem>>, vector<8x128xf32>,
    %c0_205 = arith.constant 0 : index
    %c0_206 = arith.constant 0 : index
    %475 = vector.load %arg29[%c0_205, %c0_206] : memref<8x128xf32, #tpu.memory_space<vmem>>, vector<8x128xf32>
    tpu.vector_store %arg29[%c0_205, %c0_206], %440 {strides = array<i32>} : memref<8x128xf32, #tpu.memory_space<vmem>>, vector<8x128xf32>,
    %c7_i32 = arith.constant 7 : i32
    %c8_i32_207 = arith.constant 8 : i32
    %476 = arith.muli %c7_i32, %c8_i32_207 : i32
    %477 = tpu.assume_multiple %476, 8 : i32
    %478 = arith.index_cast %477 : i32 to index
    %c128_208 = arith.constant 128 : index
    %479 = vector.load %arg24[%478, %c128_208] : memref<128x640xf32, #tpu.memory_space<vmem>>, vector<8x128xf32>
    %480 = arith.index_cast %477 : i32 to index
    %c256_209 = arith.constant 256 : index
    %481 = vector.load %arg24[%480, %c256_209] : memref<128x640xf32, #tpu.memory_space<vmem>>, vector<8x128xf32>
    %cst_210 = arith.constant 0.176776692 : f32
    %482 = vector.broadcast %cst_210 : f32 to vector<8x128xf32>
    %483 = arith.mulf %481, %482 : vector<8x128xf32>
    %484 = arith.index_cast %477 : i32 to index
    %c384_211 = arith.constant 384 : index
    %485 = vector.load %arg24[%484, %c384_211] : memref<128x640xf32, #tpu.memory_space<vmem>>, vector<8x128xf32>
    %486 = arith.index_cast %477 : i32 to index
    %c512_212 = arith.constant 512 : index
    %487 = vector.load %arg24[%486, %c512_212] : memref<128x640xf32, #tpu.memory_space<vmem>>, vector<8x128xf32>
    %488 = arith.index_cast %477 : i32 to index
    %c0_213 = arith.constant 0 : index
    %489 = vector.load %arg25[%488, %c0_213] : memref<128x256xf32, #tpu.memory_space<vmem>>, vector<8x128xf32>
    %490 = arith.index_cast %477 : i32 to index
    %c128_214 = arith.constant 128 : index
    %491 = vector.load %arg25[%490, %c128_214] : memref<128x256xf32, #tpu.memory_space<vmem>>, vector<8x128xf32>
    %c0_215 = arith.constant 0 : index
    %c0_216 = arith.constant 0 : index
    %492 = vector.load %arg29[%c0_215, %c0_216] : memref<8x128xf32, #tpu.memory_space<vmem>>, vector<8x128xf32>
    %493 = arith.addf %487, %492 : vector<8x128xf32>
    %494 = arith.maximumf %493, %485 : vector<8x128xf32>
    %495 = arith.subf %485, %494 : vector<8x128xf32>
    %496 = math.exp %495 : vector<8x128xf32>
    %497 = arith.addf %487, %492 : vector<8x128xf32>
    %498 = arith.subf %497, %494 : vector<8x128xf32>
    %499 = math.exp %498 : vector<8x128xf32>
    %c0_217 = arith.constant 0 : index
    %c0_218 = arith.constant 0 : index
    %500 = vector.load %arg27[%c0_217, %c0_218] : memref<8x128xf32, #tpu.memory_space<vmem>>, vector<8x128xf32>
    %501 = arith.mulf %499, %500 : vector<8x128xf32>
    %502 = arith.mulf %489, %483 : vector<8x128xf32>
    %503 = arith.mulf %496, %502 : vector<8x128xf32>
    %504 = arith.addf %501, %503 : vector<8x128xf32>
    %c0_219 = arith.constant 0 : index
    %c0_220 = arith.constant 0 : index
    %505 = vector.load %arg28[%c0_219, %c0_220] : memref<8x128xf32, #tpu.memory_space<vmem>>, vector<8x128xf32>
    %506 = arith.mulf %499, %505 : vector<8x128xf32>
    %507 = arith.mulf %496, %483 : vector<8x128xf32>
    %508 = arith.addf %506, %507 : vector<8x128xf32>
    %509 = arith.mulf %508, %479 : vector<8x128xf32>
    %510 = arith.mulf %509, %509 : vector<8x128xf32>
    %cst_221 = arith.constant dense<0.000000e+00> : vector<8xf32>
    %511 = vector.multi_reduction <add>, %510, %cst_221 [1] : vector<8x128xf32> to vector<8xf32>
    %512 = vector.shape_cast %511 : vector<8xf32> to vector<8x1xf32>
    %513 = math.sqrt %512 : vector<8x1xf32>
    %cst_222 = arith.constant 9.99999997E-7 : f32
    %514 = vector.broadcast %cst_222 : f32 to vector<8x1xf32>
    %515 = arith.addf %513, %514 : vector<8x1xf32>
    %516 = tpu.reciprocal %515 {approx = true} : vector<8x1xf32> -> vector<8x1xf32>
    %517 = arith.mulf %515, %516 : vector<8x1xf32>
    %cst_223 = arith.constant 2.000000e+00 : f32
    %518 = vector.broadcast %cst_223 : f32 to vector<8x1xf32>
    %519 = arith.subf %518, %517 : vector<8x1xf32>
    %520 = arith.mulf %516, %519 : vector<8x1xf32>
    %521 = arith.mulf %504, %479 : vector<8x128xf32>
    %522 = arith.mulf %491, %521 : vector<8x128xf32>
    %523 = vector.broadcast %520 : vector<8x1xf32> to vector<8x128xf32>
    %524 = arith.mulf %522, %523 : vector<8x128xf32>
    %525 = arith.index_cast %477 : i32 to index
    %c0_224 = arith.constant 0 : index
    %526 = vector.load %arg26[%525, %c0_224] : memref<128x128xf32, #tpu.memory_space<vmem>>, vector<8x128xf32>
    tpu.vector_store %arg26[%525, %c0_224], %524 {strides = array<i32>} : memref<128x128xf32, #tpu.memory_space<vmem>>, vector<8x128xf32>,
    %c0_225 = arith.constant 0 : index
    %c0_226 = arith.constant 0 : index
    %527 = vector.load %arg27[%c0_225, %c0_226] : memref<8x128xf32, #tpu.memory_space<vmem>>, vector<8x128xf32>
    tpu.vector_store %arg27[%c0_225, %c0_226], %504 {strides = array<i32>} : memref<8x128xf32, #tpu.memory_space<vmem>>, vector<8x128xf32>,
    %c0_227 = arith.constant 0 : index
    %c0_228 = arith.constant 0 : index
    %528 = vector.load %arg28[%c0_227, %c0_228] : memref<8x128xf32, #tpu.memory_space<vmem>>, vector<8x128xf32>
    tpu.vector_store %arg28[%c0_227, %c0_228], %508 {strides = array<i32>} : memref<8x128xf32, #tpu.memory_space<vmem>>, vector<8x128xf32>,
    %c0_229 = arith.constant 0 : index
    %c0_230 = arith.constant 0 : index
    %529 = vector.load %arg29[%c0_229, %c0_230] : memref<8x128xf32, #tpu.memory_space<vmem>>, vector<8x128xf32>
    tpu.vector_store %arg29[%c0_229, %c0_230], %494 {strides = array<i32>} : memref<8x128xf32, #tpu.memory_space<vmem>>, vector<8x128xf32>,
    %c8_i32_231 = arith.constant 8 : i32
    %c8_i32_232 = arith.constant 8 : i32
    %530 = arith.muli %c8_i32_231, %c8_i32_232 : i32
    %531 = tpu.assume_multiple %530, 8 : i32
    %532 = arith.index_cast %531 : i32 to index
    %c128_233 = arith.constant 128 : index
    %533 = vector.load %arg24[%532, %c128_233] : memref<128x640xf32, #tpu.memory_space<vmem>>, vector<8x128xf32>
    %534 = arith.index_cast %531 : i32 to index
    %c256_234 = arith.constant 256 : index
    %535 = vector.load %arg24[%534, %c256_234] : memref<128x640xf32, #tpu.memory_space<vmem>>, vector<8x128xf32>
    %cst_235 = arith.constant 0.176776692 : f32
    %536 = vector.broadcast %cst_235 : f32 to vector<8x128xf32>
    %537 = arith.mulf %535, %536 : vector<8x128xf32>
    %538 = arith.index_cast %531 : i32 to index
    %c384_236 = arith.constant 384 : index
    %539 = vector.load %arg24[%538, %c384_236] : memref<128x640xf32, #tpu.memory_space<vmem>>, vector<8x128xf32>
    %540 = arith.index_cast %531 : i32 to index
    %c512_237 = arith.constant 512 : index
    %541 = vector.load %arg24[%540, %c512_237] : memref<128x640xf32, #tpu.memory_space<vmem>>, vector<8x128xf32>
    %542 = arith.index_cast %531 : i32 to index
    %c0_238 = arith.constant 0 : index
    %543 = vector.load %arg25[%542, %c0_238] : memref<128x256xf32, #tpu.memory_space<vmem>>, vector<8x128xf32>
    %544 = arith.index_cast %531 : i32 to index
    %c128_239 = arith.constant 128 : index
    %545 = vector.load %arg25[%544, %c128_239] : memref<128x256xf32, #tpu.memory_space<vmem>>, vector<8x128xf32>
    %c0_240 = arith.constant 0 : index
    %c0_241 = arith.constant 0 : index
    %546 = vector.load %arg29[%c0_240, %c0_241] : memref<8x128xf32, #tpu.memory_space<vmem>>, vector<8x128xf32>
    %547 = arith.addf %541, %546 : vector<8x128xf32>
    %548 = arith.maximumf %547, %539 : vector<8x128xf32>
    %549 = arith.subf %539, %548 : vector<8x128xf32>
    %550 = math.exp %549 : vector<8x128xf32>
    %551 = arith.addf %541, %546 : vector<8x128xf32>
    %552 = arith.subf %551, %548 : vector<8x128xf32>
    %553 = math.exp %552 : vector<8x128xf32>
    %c0_242 = arith.constant 0 : index
    %c0_243 = arith.constant 0 : index
    %554 = vector.load %arg27[%c0_242, %c0_243] : memref<8x128xf32, #tpu.memory_space<vmem>>, vector<8x128xf32>
    %555 = arith.mulf %553, %554 : vector<8x128xf32>
    %556 = arith.mulf %543, %537 : vector<8x128xf32>
    %557 = arith.mulf %550, %556 : vector<8x128xf32>
    %558 = arith.addf %555, %557 : vector<8x128xf32>
    %c0_244 = arith.constant 0 : index
    %c0_245 = arith.constant 0 : index
    %559 = vector.load %arg28[%c0_244, %c0_245] : memref<8x128xf32, #tpu.memory_space<vmem>>, vector<8x128xf32>
    %560 = arith.mulf %553, %559 : vector<8x128xf32>
    %561 = arith.mulf %550, %537 : vector<8x128xf32>
    %562 = arith.addf %560, %561 : vector<8x128xf32>
    %563 = arith.mulf %562, %533 : vector<8x128xf32>
    %564 = arith.mulf %563, %563 : vector<8x128xf32>
    %cst_246 = arith.constant dense<0.000000e+00> : vector<8xf32>
    %565 = vector.multi_reduction <add>, %564, %cst_246 [1] : vector<8x128xf32> to vector<8xf32>
    %566 = vector.shape_cast %565 : vector<8xf32> to vector<8x1xf32>
    %567 = math.sqrt %566 : vector<8x1xf32>
    %cst_247 = arith.constant 9.99999997E-7 : f32
    %568 = vector.broadcast %cst_247 : f32 to vector<8x1xf32>
    %569 = arith.addf %567, %568 : vector<8x1xf32>
    %570 = tpu.reciprocal %569 {approx = true} : vector<8x1xf32> -> vector<8x1xf32>
    %571 = arith.mulf %569, %570 : vector<8x1xf32>
    %cst_248 = arith.constant 2.000000e+00 : f32
    %572 = vector.broadcast %cst_248 : f32 to vector<8x1xf32>
    %573 = arith.subf %572, %571 : vector<8x1xf32>
    %574 = arith.mulf %570, %573 : vector<8x1xf32>
    %575 = arith.mulf %558, %533 : vector<8x128xf32>
    %576 = arith.mulf %545, %575 : vector<8x128xf32>
    %577 = vector.broadcast %574 : vector<8x1xf32> to vector<8x128xf32>
    %578 = arith.mulf %576, %577 : vector<8x128xf32>
    %579 = arith.index_cast %531 : i32 to index
    %c0_249 = arith.constant 0 : index
    %580 = vector.load %arg26[%579, %c0_249] : memref<128x128xf32, #tpu.memory_space<vmem>>, vector<8x128xf32>
    tpu.vector_store %arg26[%579, %c0_249], %578 {strides = array<i32>} : memref<128x128xf32, #tpu.memory_space<vmem>>, vector<8x128xf32>,
    %c0_250 = arith.constant 0 : index
    %c0_251 = arith.constant 0 : index
    %581 = vector.load %arg27[%c0_250, %c0_251] : memref<8x128xf32, #tpu.memory_space<vmem>>, vector<8x128xf32>
    tpu.vector_store %arg27[%c0_250, %c0_251], %558 {strides = array<i32>} : memref<8x128xf32, #tpu.memory_space<vmem>>, vector<8x128xf32>,
    %c0_252 = arith.constant 0 : index
    %c0_253 = arith.constant 0 : index
    %582 = vector.load %arg28[%c0_252, %c0_253] : memref<8x128xf32, #tpu.memory_space<vmem>>, vector<8x128xf32>
    tpu.vector_store %arg28[%c0_252, %c0_253], %562 {strides = array<i32>} : memref<8x128xf32, #tpu.memory_space<vmem>>, vector<8x128xf32>,
    %c0_254 = arith.constant 0 : index
    %c0_255 = arith.constant 0 : index
    %583 = vector.load %arg29[%c0_254, %c0_255] : memref<8x128xf32, #tpu.memory_space<vmem>>, vector<8x128xf32>
    tpu.vector_store %arg29[%c0_254, %c0_255], %548 {strides = array<i32>} : memref<8x128xf32, #tpu.memory_space<vmem>>, vector<8x128xf32>,
    %c9_i32 = arith.constant 9 : i32
    %c8_i32_256 = arith.constant 8 : i32
    %584 = arith.muli %c9_i32, %c8_i32_256 : i32
    %585 = tpu.assume_multiple %584, 8 : i32
    %586 = arith.index_cast %585 : i32 to index
    %c128_257 = arith.constant 128 : index
    %587 = vector.load %arg24[%586, %c128_257] : memref<128x640xf32, #tpu.memory_space<vmem>>, vector<8x128xf32>
    %588 = arith.index_cast %585 : i32 to index
    %c256_258 = arith.constant 256 : index
    %589 = vector.load %arg24[%588, %c256_258] : memref<128x640xf32, #tpu.memory_space<vmem>>, vector<8x128xf32>
    %cst_259 = arith.constant 0.176776692 : f32
    %590 = vector.broadcast %cst_259 : f32 to vector<8x128xf32>
    %591 = arith.mulf %589, %590 : vector<8x128xf32>
    %592 = arith.index_cast %585 : i32 to index
    %c384_260 = arith.constant 384 : index
    %593 = vector.load %arg24[%592, %c384_260] : memref<128x640xf32, #tpu.memory_space<vmem>>, vector<8x128xf32>
    %594 = arith.index_cast %585 : i32 to index
    %c512_261 = arith.constant 512 : index
    %595 = vector.load %arg24[%594, %c512_261] : memref<128x640xf32, #tpu.memory_space<vmem>>, vector<8x128xf32>
    %596 = arith.index_cast %585 : i32 to index
    %c0_262 = arith.constant 0 : index
    %597 = vector.load %arg25[%596, %c0_262] : memref<128x256xf32, #tpu.memory_space<vmem>>, vector<8x128xf32>
    %598 = arith.index_cast %585 : i32 to index
    %c128_263 = arith.constant 128 : index
    %599 = vector.load %arg25[%598, %c128_263] : memref<128x256xf32, #tpu.memory_space<vmem>>, vector<8x128xf32>
    %c0_264 = arith.constant 0 : index
    %c0_265 = arith.constant 0 : index
    %600 = vector.load %arg29[%c0_264, %c0_265] : memref<8x128xf32, #tpu.memory_space<vmem>>, vector<8x128xf32>
    %601 = arith.addf %595, %600 : vector<8x128xf32>
    %602 = arith.maximumf %601, %593 : vector<8x128xf32>
    %603 = arith.subf %593, %602 : vector<8x128xf32>
    %604 = math.exp %603 : vector<8x128xf32>
    %605 = arith.addf %595, %600 : vector<8x128xf32>
    %606 = arith.subf %605, %602 : vector<8x128xf32>
    %607 = math.exp %606 : vector<8x128xf32>
    %c0_266 = arith.constant 0 : index
    %c0_267 = arith.constant 0 : index
    %608 = vector.load %arg27[%c0_266, %c0_267] : memref<8x128xf32, #tpu.memory_space<vmem>>, vector<8x128xf32>
    %609 = arith.mulf %607, %608 : vector<8x128xf32>
    %610 = arith.mulf %597, %591 : vector<8x128xf32>
    %611 = arith.mulf %604, %610 : vector<8x128xf32>
    %612 = arith.addf %609, %611 : vector<8x128xf32>
    %c0_268 = arith.constant 0 : index
    %c0_269 = arith.constant 0 : index
    %613 = vector.load %arg28[%c0_268, %c0_269] : memref<8x128xf32, #tpu.memory_space<vmem>>, vector<8x128xf32>
    %614 = arith.mulf %607, %613 : vector<8x128xf32>
    %615 = arith.mulf %604, %591 : vector<8x128xf32>
    %616 = arith.addf %614, %615 : vector<8x128xf32>
    %617 = arith.mulf %616, %587 : vector<8x128xf32>
    %618 = arith.mulf %617, %617 : vector<8x128xf32>
    %cst_270 = arith.constant dense<0.000000e+00> : vector<8xf32>
    %619 = vector.multi_reduction <add>, %618, %cst_270 [1] : vector<8x128xf32> to vector<8xf32>
    %620 = vector.shape_cast %619 : vector<8xf32> to vector<8x1xf32>
    %621 = math.sqrt %620 : vector<8x1xf32>
    %cst_271 = arith.constant 9.99999997E-7 : f32
    %622 = vector.broadcast %cst_271 : f32 to vector<8x1xf32>
    %623 = arith.addf %621, %622 : vector<8x1xf32>
    %624 = tpu.reciprocal %623 {approx = true} : vector<8x1xf32> -> vector<8x1xf32>
    %625 = arith.mulf %623, %624 : vector<8x1xf32>
    %cst_272 = arith.constant 2.000000e+00 : f32
    %626 = vector.broadcast %cst_272 : f32 to vector<8x1xf32>
    %627 = arith.subf %626, %625 : vector<8x1xf32>
    %628 = arith.mulf %624, %627 : vector<8x1xf32>
    %629 = arith.mulf %612, %587 : vector<8x128xf32>
    %630 = arith.mulf %599, %629 : vector<8x128xf32>
    %631 = vector.broadcast %628 : vector<8x1xf32> to vector<8x128xf32>
    %632 = arith.mulf %630, %631 : vector<8x128xf32>
    %633 = arith.index_cast %585 : i32 to index
    %c0_273 = arith.constant 0 : index
    %634 = vector.load %arg26[%633, %c0_273] : memref<128x128xf32, #tpu.memory_space<vmem>>, vector<8x128xf32>
    tpu.vector_store %arg26[%633, %c0_273], %632 {strides = array<i32>} : memref<128x128xf32, #tpu.memory_space<vmem>>, vector<8x128xf32>,
    %c0_274 = arith.constant 0 : index
    %c0_275 = arith.constant 0 : index
    %635 = vector.load %arg27[%c0_274, %c0_275] : memref<8x128xf32, #tpu.memory_space<vmem>>, vector<8x128xf32>
    tpu.vector_store %arg27[%c0_274, %c0_275], %612 {strides = array<i32>} : memref<8x128xf32, #tpu.memory_space<vmem>>, vector<8x128xf32>,
    %c0_276 = arith.constant 0 : index
    %c0_277 = arith.constant 0 : index
    %636 = vector.load %arg28[%c0_276, %c0_277] : memref<8x128xf32, #tpu.memory_space<vmem>>, vector<8x128xf32>
    tpu.vector_store %arg28[%c0_276, %c0_277], %616 {strides = array<i32>} : memref<8x128xf32, #tpu.memory_space<vmem>>, vector<8x128xf32>,
    %c0_278 = arith.constant 0 : index
    %c0_279 = arith.constant 0 : index
    %637 = vector.load %arg29[%c0_278, %c0_279] : memref<8x128xf32, #tpu.memory_space<vmem>>, vector<8x128xf32>
    tpu.vector_store %arg29[%c0_278, %c0_279], %602 {strides = array<i32>} : memref<8x128xf32, #tpu.memory_space<vmem>>, vector<8x128xf32>,
    %c10_i32 = arith.constant 10 : i32
    %c8_i32_280 = arith.constant 8 : i32
    %638 = arith.muli %c10_i32, %c8_i32_280 : i32
    %639 = tpu.assume_multiple %638, 8 : i32
    %640 = arith.index_cast %639 : i32 to index
    %c128_281 = arith.constant 128 : index
    %641 = vector.load %arg24[%640, %c128_281] : memref<128x640xf32, #tpu.memory_space<vmem>>, vector<8x128xf32>
    %642 = arith.index_cast %639 : i32 to index
    %c256_282 = arith.constant 256 : index
    %643 = vector.load %arg24[%642, %c256_282] : memref<128x640xf32, #tpu.memory_space<vmem>>, vector<8x128xf32>
    %cst_283 = arith.constant 0.176776692 : f32
    %644 = vector.broadcast %cst_283 : f32 to vector<8x128xf32>
    %645 = arith.mulf %643, %644 : vector<8x128xf32>
    %646 = arith.index_cast %639 : i32 to index
    %c384_284 = arith.constant 384 : index
    %647 = vector.load %arg24[%646, %c384_284] : memref<128x640xf32, #tpu.memory_space<vmem>>, vector<8x128xf32>
    %648 = arith.index_cast %639 : i32 to index
    %c512_285 = arith.constant 512 : index
    %649 = vector.load %arg24[%648, %c512_285] : memref<128x640xf32, #tpu.memory_space<vmem>>, vector<8x128xf32>
    %650 = arith.index_cast %639 : i32 to index
    %c0_286 = arith.constant 0 : index
    %651 = vector.load %arg25[%650, %c0_286] : memref<128x256xf32, #tpu.memory_space<vmem>>, vector<8x128xf32>
    %652 = arith.index_cast %639 : i32 to index
    %c128_287 = arith.constant 128 : index
    %653 = vector.load %arg25[%652, %c128_287] : memref<128x256xf32, #tpu.memory_space<vmem>>, vector<8x128xf32>
    %c0_288 = arith.constant 0 : index
    %c0_289 = arith.constant 0 : index
    %654 = vector.load %arg29[%c0_288, %c0_289] : memref<8x128xf32, #tpu.memory_space<vmem>>, vector<8x128xf32>
    %655 = arith.addf %649, %654 : vector<8x128xf32>
    %656 = arith.maximumf %655, %647 : vector<8x128xf32>
    %657 = arith.subf %647, %656 : vector<8x128xf32>
    %658 = math.exp %657 : vector<8x128xf32>
    %659 = arith.addf %649, %654 : vector<8x128xf32>
    %660 = arith.subf %659, %656 : vector<8x128xf32>
    %661 = math.exp %660 : vector<8x128xf32>
    %c0_290 = arith.constant 0 : index
    %c0_291 = arith.constant 0 : index
    %662 = vector.load %arg27[%c0_290, %c0_291] : memref<8x128xf32, #tpu.memory_space<vmem>>, vector<8x128xf32>
    %663 = arith.mulf %661, %662 : vector<8x128xf32>
    %664 = arith.mulf %651, %645 : vector<8x128xf32>
    %665 = arith.mulf %658, %664 : vector<8x128xf32>
    %666 = arith.addf %663, %665 : vector<8x128xf32>
    %c0_292 = arith.constant 0 : index
    %c0_293 = arith.constant 0 : index
    %667 = vector.load %arg28[%c0_292, %c0_293] : memref<8x128xf32, #tpu.memory_space<vmem>>, vector<8x128xf32>
    %668 = arith.mulf %661, %667 : vector<8x128xf32>
    %669 = arith.mulf %658, %645 : vector<8x128xf32>
    %670 = arith.addf %668, %669 : vector<8x128xf32>
    %671 = arith.mulf %670, %641 : vector<8x128xf32>
    %672 = arith.mulf %671, %671 : vector<8x128xf32>
    %cst_294 = arith.constant dense<0.000000e+00> : vector<8xf32>
    %673 = vector.multi_reduction <add>, %672, %cst_294 [1] : vector<8x128xf32> to vector<8xf32>
    %674 = vector.shape_cast %673 : vector<8xf32> to vector<8x1xf32>
    %675 = math.sqrt %674 : vector<8x1xf32>
    %cst_295 = arith.constant 9.99999997E-7 : f32
    %676 = vector.broadcast %cst_295 : f32 to vector<8x1xf32>
    %677 = arith.addf %675, %676 : vector<8x1xf32>
    %678 = tpu.reciprocal %677 {approx = true} : vector<8x1xf32> -> vector<8x1xf32>
    %679 = arith.mulf %677, %678 : vector<8x1xf32>
    %cst_296 = arith.constant 2.000000e+00 : f32
    %680 = vector.broadcast %cst_296 : f32 to vector<8x1xf32>
    %681 = arith.subf %680, %679 : vector<8x1xf32>
    %682 = arith.mulf %678, %681 : vector<8x1xf32>
    %683 = arith.mulf %666, %641 : vector<8x128xf32>
    %684 = arith.mulf %653, %683 : vector<8x128xf32>
    %685 = vector.broadcast %682 : vector<8x1xf32> to vector<8x128xf32>
    %686 = arith.mulf %684, %685 : vector<8x128xf32>
    %687 = arith.index_cast %639 : i32 to index
    %c0_297 = arith.constant 0 : index
    %688 = vector.load %arg26[%687, %c0_297] : memref<128x128xf32, #tpu.memory_space<vmem>>, vector<8x128xf32>
    tpu.vector_store %arg26[%687, %c0_297], %686 {strides = array<i32>} : memref<128x128xf32, #tpu.memory_space<vmem>>, vector<8x128xf32>,
    %c0_298 = arith.constant 0 : index
    %c0_299 = arith.constant 0 : index
    %689 = vector.load %arg27[%c0_298, %c0_299] : memref<8x128xf32, #tpu.memory_space<vmem>>, vector<8x128xf32>
    tpu.vector_store %arg27[%c0_298, %c0_299], %666 {strides = array<i32>} : memref<8x128xf32, #tpu.memory_space<vmem>>, vector<8x128xf32>,
    %c0_300 = arith.constant 0 : index
    %c0_301 = arith.constant 0 : index
    %690 = vector.load %arg28[%c0_300, %c0_301] : memref<8x128xf32, #tpu.memory_space<vmem>>, vector<8x128xf32>
    tpu.vector_store %arg28[%c0_300, %c0_301], %670 {strides = array<i32>} : memref<8x128xf32, #tpu.memory_space<vmem>>, vector<8x128xf32>,
    %c0_302 = arith.constant 0 : index
    %c0_303 = arith.constant 0 : index
    %691 = vector.load %arg29[%c0_302, %c0_303] : memref<8x128xf32, #tpu.memory_space<vmem>>, vector<8x128xf32>
    tpu.vector_store %arg29[%c0_302, %c0_303], %656 {strides = array<i32>} : memref<8x128xf32, #tpu.memory_space<vmem>>, vector<8x128xf32>,
    %c11_i32 = arith.constant 11 : i32
    %c8_i32_304 = arith.constant 8 : i32
    %692 = arith.muli %c11_i32, %c8_i32_304 : i32
    %693 = tpu.assume_multiple %692, 8 : i32
    %694 = arith.index_cast %693 : i32 to index
    %c128_305 = arith.constant 128 : index
    %695 = vector.load %arg24[%694, %c128_305] : memref<128x640xf32, #tpu.memory_space<vmem>>, vector<8x128xf32>
    %696 = arith.index_cast %693 : i32 to index
    %c256_306 = arith.constant 256 : index
    %697 = vector.load %arg24[%696, %c256_306] : memref<128x640xf32, #tpu.memory_space<vmem>>, vector<8x128xf32>
    %cst_307 = arith.constant 0.176776692 : f32
    %698 = vector.broadcast %cst_307 : f32 to vector<8x128xf32>
    %699 = arith.mulf %697, %698 : vector<8x128xf32>
    %700 = arith.index_cast %693 : i32 to index
    %c384_308 = arith.constant 384 : index
    %701 = vector.load %arg24[%700, %c384_308] : memref<128x640xf32, #tpu.memory_space<vmem>>, vector<8x128xf32>
    %702 = arith.index_cast %693 : i32 to index
    %c512_309 = arith.constant 512 : index
    %703 = vector.load %arg24[%702, %c512_309] : memref<128x640xf32, #tpu.memory_space<vmem>>, vector<8x128xf32>
    %704 = arith.index_cast %693 : i32 to index
    %c0_310 = arith.constant 0 : index
    %705 = vector.load %arg25[%704, %c0_310] : memref<128x256xf32, #tpu.memory_space<vmem>>, vector<8x128xf32>
    %706 = arith.index_cast %693 : i32 to index
    %c128_311 = arith.constant 128 : index
    %707 = vector.load %arg25[%706, %c128_311] : memref<128x256xf32, #tpu.memory_space<vmem>>, vector<8x128xf32>
    %c0_312 = arith.constant 0 : index
    %c0_313 = arith.constant 0 : index
    %708 = vector.load %arg29[%c0_312, %c0_313] : memref<8x128xf32, #tpu.memory_space<vmem>>, vector<8x128xf32>
    %709 = arith.addf %703, %708 : vector<8x128xf32>
    %710 = arith.maximumf %709, %701 : vector<8x128xf32>
    %711 = arith.subf %701, %710 : vector<8x128xf32>
    %712 = math.exp %711 : vector<8x128xf32>
    %713 = arith.addf %703, %708 : vector<8x128xf32>
    %714 = arith.subf %713, %710 : vector<8x128xf32>
    %715 = math.exp %714 : vector<8x128xf32>
    %c0_314 = arith.constant 0 : index
    %c0_315 = arith.constant 0 : index
    %716 = vector.load %arg27[%c0_314, %c0_315] : memref<8x128xf32, #tpu.memory_space<vmem>>, vector<8x128xf32>
    %717 = arith.mulf %715, %716 : vector<8x128xf32>
    %718 = arith.mulf %705, %699 : vector<8x128xf32>
    %719 = arith.mulf %712, %718 : vector<8x128xf32>
    %720 = arith.addf %717, %719 : vector<8x128xf32>
    %c0_316 = arith.constant 0 : index
    %c0_317 = arith.constant 0 : index
    %721 = vector.load %arg28[%c0_316, %c0_317] : memref<8x128xf32, #tpu.memory_space<vmem>>, vector<8x128xf32>
    %722 = arith.mulf %715, %721 : vector<8x128xf32>
    %723 = arith.mulf %712, %699 : vector<8x128xf32>
    %724 = arith.addf %722, %723 : vector<8x128xf32>
    %725 = arith.mulf %724, %695 : vector<8x128xf32>
    %726 = arith.mulf %725, %725 : vector<8x128xf32>
    %cst_318 = arith.constant dense<0.000000e+00> : vector<8xf32>
    %727 = vector.multi_reduction <add>, %726, %cst_318 [1] : vector<8x128xf32> to vector<8xf32>
    %728 = vector.shape_cast %727 : vector<8xf32> to vector<8x1xf32>
    %729 = math.sqrt %728 : vector<8x1xf32>
    %cst_319 = arith.constant 9.99999997E-7 : f32
    %730 = vector.broadcast %cst_319 : f32 to vector<8x1xf32>
    %731 = arith.addf %729, %730 : vector<8x1xf32>
    %732 = tpu.reciprocal %731 {approx = true} : vector<8x1xf32> -> vector<8x1xf32>
    %733 = arith.mulf %731, %732 : vector<8x1xf32>
    %cst_320 = arith.constant 2.000000e+00 : f32
    %734 = vector.broadcast %cst_320 : f32 to vector<8x1xf32>
    %735 = arith.subf %734, %733 : vector<8x1xf32>
    %736 = arith.mulf %732, %735 : vector<8x1xf32>
    %737 = arith.mulf %720, %695 : vector<8x128xf32>
    %738 = arith.mulf %707, %737 : vector<8x128xf32>
    %739 = vector.broadcast %736 : vector<8x1xf32> to vector<8x128xf32>
    %740 = arith.mulf %738, %739 : vector<8x128xf32>
    %741 = arith.index_cast %693 : i32 to index
    %c0_321 = arith.constant 0 : index
    %742 = vector.load %arg26[%741, %c0_321] : memref<128x128xf32, #tpu.memory_space<vmem>>, vector<8x128xf32>
    tpu.vector_store %arg26[%741, %c0_321], %740 {strides = array<i32>} : memref<128x128xf32, #tpu.memory_space<vmem>>, vector<8x128xf32>,
    %c0_322 = arith.constant 0 : index
    %c0_323 = arith.constant 0 : index
    %743 = vector.load %arg27[%c0_322, %c0_323] : memref<8x128xf32, #tpu.memory_space<vmem>>, vector<8x128xf32>
    tpu.vector_store %arg27[%c0_322, %c0_323], %720 {strides = array<i32>} : memref<8x128xf32, #tpu.memory_space<vmem>>, vector<8x128xf32>,
    %c0_324 = arith.constant 0 : index
    %c0_325 = arith.constant 0 : index
    %744 = vector.load %arg28[%c0_324, %c0_325] : memref<8x128xf32, #tpu.memory_space<vmem>>, vector<8x128xf32>
    tpu.vector_store %arg28[%c0_324, %c0_325], %724 {strides = array<i32>} : memref<8x128xf32, #tpu.memory_space<vmem>>, vector<8x128xf32>,
    %c0_326 = arith.constant 0 : index
    %c0_327 = arith.constant 0 : index
    %745 = vector.load %arg29[%c0_326, %c0_327] : memref<8x128xf32, #tpu.memory_space<vmem>>, vector<8x128xf32>
    tpu.vector_store %arg29[%c0_326, %c0_327], %710 {strides = array<i32>} : memref<8x128xf32, #tpu.memory_space<vmem>>, vector<8x128xf32>,
    %c12_i32 = arith.constant 12 : i32
    %c8_i32_328 = arith.constant 8 : i32
    %746 = arith.muli %c12_i32, %c8_i32_328 : i32
    %747 = tpu.assume_multiple %746, 8 : i32
    %748 = arith.index_cast %747 : i32 to index
    %c128_329 = arith.constant 128 : index
    %749 = vector.load %arg24[%748, %c128_329] : memref<128x640xf32, #tpu.memory_space<vmem>>, vector<8x128xf32>
    %750 = arith.index_cast %747 : i32 to index
    %c256_330 = arith.constant 256 : index
    %751 = vector.load %arg24[%750, %c256_330] : memref<128x640xf32, #tpu.memory_space<vmem>>, vector<8x128xf32>
    %cst_331 = arith.constant 0.176776692 : f32
    %752 = vector.broadcast %cst_331 : f32 to vector<8x128xf32>
    %753 = arith.mulf %751, %752 : vector<8x128xf32>
    %754 = arith.index_cast %747 : i32 to index
    %c384_332 = arith.constant 384 : index
    %755 = vector.load %arg24[%754, %c384_332] : memref<128x640xf32, #tpu.memory_space<vmem>>, vector<8x128xf32>
    %756 = arith.index_cast %747 : i32 to index
    %c512_333 = arith.constant 512 : index
    %757 = vector.load %arg24[%756, %c512_333] : memref<128x640xf32, #tpu.memory_space<vmem>>, vector<8x128xf32>
    %758 = arith.index_cast %747 : i32 to index
    %c0_334 = arith.constant 0 : index
    %759 = vector.load %arg25[%758, %c0_334] : memref<128x256xf32, #tpu.memory_space<vmem>>, vector<8x128xf32>
    %760 = arith.index_cast %747 : i32 to index
    %c128_335 = arith.constant 128 : index
    %761 = vector.load %arg25[%760, %c128_335] : memref<128x256xf32, #tpu.memory_space<vmem>>, vector<8x128xf32>
    %c0_336 = arith.constant 0 : index
    %c0_337 = arith.constant 0 : index
    %762 = vector.load %arg29[%c0_336, %c0_337] : memref<8x128xf32, #tpu.memory_space<vmem>>, vector<8x128xf32>
    %763 = arith.addf %757, %762 : vector<8x128xf32>
    %764 = arith.maximumf %763, %755 : vector<8x128xf32>
    %765 = arith.subf %755, %764 : vector<8x128xf32>
    %766 = math.exp %765 : vector<8x128xf32>
    %767 = arith.addf %757, %762 : vector<8x128xf32>
    %768 = arith.subf %767, %764 : vector<8x128xf32>
    %769 = math.exp %768 : vector<8x128xf32>
    %c0_338 = arith.constant 0 : index
    %c0_339 = arith.constant 0 : index
    %770 = vector.load %arg27[%c0_338, %c0_339] : memref<8x128xf32, #tpu.memory_space<vmem>>, vector<8x128xf32>
    %771 = arith.mulf %769, %770 : vector<8x128xf32>
    %772 = arith.mulf %759, %753 : vector<8x128xf32>
    %773 = arith.mulf %766, %772 : vector<8x128xf32>
    %774 = arith.addf %771, %773 : vector<8x128xf32>
    %c0_340 = arith.constant 0 : index
    %c0_341 = arith.constant 0 : index
    %775 = vector.load %arg28[%c0_340, %c0_341] : memref<8x128xf32, #tpu.memory_space<vmem>>, vector<8x128xf32>
    %776 = arith.mulf %769, %775 : vector<8x128xf32>
    %777 = arith.mulf %766, %753 : vector<8x128xf32>
    %778 = arith.addf %776, %777 : vector<8x128xf32>
    %779 = arith.mulf %778, %749 : vector<8x128xf32>
    %780 = arith.mulf %779, %779 : vector<8x128xf32>
    %cst_342 = arith.constant dense<0.000000e+00> : vector<8xf32>
    %781 = vector.multi_reduction <add>, %780, %cst_342 [1] : vector<8x128xf32> to vector<8xf32>
    %782 = vector.shape_cast %781 : vector<8xf32> to vector<8x1xf32>
    %783 = math.sqrt %782 : vector<8x1xf32>
    %cst_343 = arith.constant 9.99999997E-7 : f32
    %784 = vector.broadcast %cst_343 : f32 to vector<8x1xf32>
    %785 = arith.addf %783, %784 : vector<8x1xf32>
    %786 = tpu.reciprocal %785 {approx = true} : vector<8x1xf32> -> vector<8x1xf32>
    %787 = arith.mulf %785, %786 : vector<8x1xf32>
    %cst_344 = arith.constant 2.000000e+00 : f32
    %788 = vector.broadcast %cst_344 : f32 to vector<8x1xf32>
    %789 = arith.subf %788, %787 : vector<8x1xf32>
    %790 = arith.mulf %786, %789 : vector<8x1xf32>
    %791 = arith.mulf %774, %749 : vector<8x128xf32>
    %792 = arith.mulf %761, %791 : vector<8x128xf32>
    %793 = vector.broadcast %790 : vector<8x1xf32> to vector<8x128xf32>
    %794 = arith.mulf %792, %793 : vector<8x128xf32>
    %795 = arith.index_cast %747 : i32 to index
    %c0_345 = arith.constant 0 : index
    %796 = vector.load %arg26[%795, %c0_345] : memref<128x128xf32, #tpu.memory_space<vmem>>, vector<8x128xf32>
    tpu.vector_store %arg26[%795, %c0_345], %794 {strides = array<i32>} : memref<128x128xf32, #tpu.memory_space<vmem>>, vector<8x128xf32>,
    %c0_346 = arith.constant 0 : index
    %c0_347 = arith.constant 0 : index
    %797 = vector.load %arg27[%c0_346, %c0_347] : memref<8x128xf32, #tpu.memory_space<vmem>>, vector<8x128xf32>
    tpu.vector_store %arg27[%c0_346, %c0_347], %774 {strides = array<i32>} : memref<8x128xf32, #tpu.memory_space<vmem>>, vector<8x128xf32>,
    %c0_348 = arith.constant 0 : index
    %c0_349 = arith.constant 0 : index
    %798 = vector.load %arg28[%c0_348, %c0_349] : memref<8x128xf32, #tpu.memory_space<vmem>>, vector<8x128xf32>
    tpu.vector_store %arg28[%c0_348, %c0_349], %778 {strides = array<i32>} : memref<8x128xf32, #tpu.memory_space<vmem>>, vector<8x128xf32>,
    %c0_350 = arith.constant 0 : index
    %c0_351 = arith.constant 0 : index
    %799 = vector.load %arg29[%c0_350, %c0_351] : memref<8x128xf32, #tpu.memory_space<vmem>>, vector<8x128xf32>
    tpu.vector_store %arg29[%c0_350, %c0_351], %764 {strides = array<i32>} : memref<8x128xf32, #tpu.memory_space<vmem>>, vector<8x128xf32>,
    %c13_i32 = arith.constant 13 : i32
    %c8_i32_352 = arith.constant 8 : i32
    %800 = arith.muli %c13_i32, %c8_i32_352 : i32
    %801 = tpu.assume_multiple %800, 8 : i32
    %802 = arith.index_cast %801 : i32 to index
    %c128_353 = arith.constant 128 : index
    %803 = vector.load %arg24[%802, %c128_353] : memref<128x640xf32, #tpu.memory_space<vmem>>, vector<8x128xf32>
    %804 = arith.index_cast %801 : i32 to index
    %c256_354 = arith.constant 256 : index
    %805 = vector.load %arg24[%804, %c256_354] : memref<128x640xf32, #tpu.memory_space<vmem>>, vector<8x128xf32>
    %cst_355 = arith.constant 0.176776692 : f32
    %806 = vector.broadcast %cst_355 : f32 to vector<8x128xf32>
    %807 = arith.mulf %805, %806 : vector<8x128xf32>
    %808 = arith.index_cast %801 : i32 to index
    %c384_356 = arith.constant 384 : index
    %809 = vector.load %arg24[%808, %c384_356] : memref<128x640xf32, #tpu.memory_space<vmem>>, vector<8x128xf32>
    %810 = arith.index_cast %801 : i32 to index
    %c512_357 = arith.constant 512 : index
    %811 = vector.load %arg24[%810, %c512_357] : memref<128x640xf32, #tpu.memory_space<vmem>>, vector<8x128xf32>
    %812 = arith.index_cast %801 : i32 to index
    %c0_358 = arith.constant 0 : index
    %813 = vector.load %arg25[%812, %c0_358] : memref<128x256xf32, #tpu.memory_space<vmem>>, vector<8x128xf32>
    %814 = arith.index_cast %801 : i32 to index
    %c128_359 = arith.constant 128 : index
    %815 = vector.load %arg25[%814, %c128_359] : memref<128x256xf32, #tpu.memory_space<vmem>>, vector<8x128xf32>
    %c0_360 = arith.constant 0 : index
    %c0_361 = arith.constant 0 : index
    %816 = vector.load %arg29[%c0_360, %c0_361] : memref<8x128xf32, #tpu.memory_space<vmem>>, vector<8x128xf32>
    %817 = arith.addf %811, %816 : vector<8x128xf32>
    %818 = arith.maximumf %817, %809 : vector<8x128xf32>
    %819 = arith.subf %809, %818 : vector<8x128xf32>
    %820 = math.exp %819 : vector<8x128xf32>
    %821 = arith.addf %811, %816 : vector<8x128xf32>
    %822 = arith.subf %821, %818 : vector<8x128xf32>
    %823 = math.exp %822 : vector<8x128xf32>
    %c0_362 = arith.constant 0 : index
    %c0_363 = arith.constant 0 : index
    %824 = vector.load %arg27[%c0_362, %c0_363] : memref<8x128xf32, #tpu.memory_space<vmem>>, vector<8x128xf32>
    %825 = arith.mulf %823, %824 : vector<8x128xf32>
    %826 = arith.mulf %813, %807 : vector<8x128xf32>
    %827 = arith.mulf %820, %826 : vector<8x128xf32>
    %828 = arith.addf %825, %827 : vector<8x128xf32>
    %c0_364 = arith.constant 0 : index
    %c0_365 = arith.constant 0 : index
    %829 = vector.load %arg28[%c0_364, %c0_365] : memref<8x128xf32, #tpu.memory_space<vmem>>, vector<8x128xf32>
    %830 = arith.mulf %823, %829 : vector<8x128xf32>
    %831 = arith.mulf %820, %807 : vector<8x128xf32>
    %832 = arith.addf %830, %831 : vector<8x128xf32>
    %833 = arith.mulf %832, %803 : vector<8x128xf32>
    %834 = arith.mulf %833, %833 : vector<8x128xf32>
    %cst_366 = arith.constant dense<0.000000e+00> : vector<8xf32>
    %835 = vector.multi_reduction <add>, %834, %cst_366 [1] : vector<8x128xf32> to vector<8xf32>
    %836 = vector.shape_cast %835 : vector<8xf32> to vector<8x1xf32>
    %837 = math.sqrt %836 : vector<8x1xf32>
    %cst_367 = arith.constant 9.99999997E-7 : f32
    %838 = vector.broadcast %cst_367 : f32 to vector<8x1xf32>
    %839 = arith.addf %837, %838 : vector<8x1xf32>
    %840 = tpu.reciprocal %839 {approx = true} : vector<8x1xf32> -> vector<8x1xf32>
    %841 = arith.mulf %839, %840 : vector<8x1xf32>
    %cst_368 = arith.constant 2.000000e+00 : f32
    %842 = vector.broadcast %cst_368 : f32 to vector<8x1xf32>
    %843 = arith.subf %842, %841 : vector<8x1xf32>
    %844 = arith.mulf %840, %843 : vector<8x1xf32>
    %845 = arith.mulf %828, %803 : vector<8x128xf32>
    %846 = arith.mulf %815, %845 : vector<8x128xf32>
    %847 = vector.broadcast %844 : vector<8x1xf32> to vector<8x128xf32>
    %848 = arith.mulf %846, %847 : vector<8x128xf32>
    %849 = arith.index_cast %801 : i32 to index
    %c0_369 = arith.constant 0 : index
    %850 = vector.load %arg26[%849, %c0_369] : memref<128x128xf32, #tpu.memory_space<vmem>>, vector<8x128xf32>
    tpu.vector_store %arg26[%849, %c0_369], %848 {strides = array<i32>} : memref<128x128xf32, #tpu.memory_space<vmem>>, vector<8x128xf32>,
    %c0_370 = arith.constant 0 : index
    %c0_371 = arith.constant 0 : index
    %851 = vector.load %arg27[%c0_370, %c0_371] : memref<8x128xf32, #tpu.memory_space<vmem>>, vector<8x128xf32>
    tpu.vector_store %arg27[%c0_370, %c0_371], %828 {strides = array<i32>} : memref<8x128xf32, #tpu.memory_space<vmem>>, vector<8x128xf32>,
    %c0_372 = arith.constant 0 : index
    %c0_373 = arith.constant 0 : index
    %852 = vector.load %arg28[%c0_372, %c0_373] : memref<8x128xf32, #tpu.memory_space<vmem>>, vector<8x128xf32>
    tpu.vector_store %arg28[%c0_372, %c0_373], %832 {strides = array<i32>} : memref<8x128xf32, #tpu.memory_space<vmem>>, vector<8x128xf32>,
    %c0_374 = arith.constant 0 : index
    %c0_375 = arith.constant 0 : index
    %853 = vector.load %arg29[%c0_374, %c0_375] : memref<8x128xf32, #tpu.memory_space<vmem>>, vector<8x128xf32>
    tpu.vector_store %arg29[%c0_374, %c0_375], %818 {strides = array<i32>} : memref<8x128xf32, #tpu.memory_space<vmem>>, vector<8x128xf32>,
    %c14_i32 = arith.constant 14 : i32
    %c8_i32_376 = arith.constant 8 : i32
    %854 = arith.muli %c14_i32, %c8_i32_376 : i32
    %855 = tpu.assume_multiple %854, 8 : i32
    %856 = arith.index_cast %855 : i32 to index
    %c128_377 = arith.constant 128 : index
    %857 = vector.load %arg24[%856, %c128_377] : memref<128x640xf32, #tpu.memory_space<vmem>>, vector<8x128xf32>
    %858 = arith.index_cast %855 : i32 to index
    %c256_378 = arith.constant 256 : index
    %859 = vector.load %arg24[%858, %c256_378] : memref<128x640xf32, #tpu.memory_space<vmem>>, vector<8x128xf32>
    %cst_379 = arith.constant 0.176776692 : f32
    %860 = vector.broadcast %cst_379 : f32 to vector<8x128xf32>
    %861 = arith.mulf %859, %860 : vector<8x128xf32>
    %862 = arith.index_cast %855 : i32 to index
    %c384_380 = arith.constant 384 : index
    %863 = vector.load %arg24[%862, %c384_380] : memref<128x640xf32, #tpu.memory_space<vmem>>, vector<8x128xf32>
    %864 = arith.index_cast %855 : i32 to index
    %c512_381 = arith.constant 512 : index
    %865 = vector.load %arg24[%864, %c512_381] : memref<128x640xf32, #tpu.memory_space<vmem>>, vector<8x128xf32>
    %866 = arith.index_cast %855 : i32 to index
    %c0_382 = arith.constant 0 : index
    %867 = vector.load %arg25[%866, %c0_382] : memref<128x256xf32, #tpu.memory_space<vmem>>, vector<8x128xf32>
    %868 = arith.index_cast %855 : i32 to index
    %c128_383 = arith.constant 128 : index
    %869 = vector.load %arg25[%868, %c128_383] : memref<128x256xf32, #tpu.memory_space<vmem>>, vector<8x128xf32>
    %c0_384 = arith.constant 0 : index
    %c0_385 = arith.constant 0 : index
    %870 = vector.load %arg29[%c0_384, %c0_385] : memref<8x128xf32, #tpu.memory_space<vmem>>, vector<8x128xf32>
    %871 = arith.addf %865, %870 : vector<8x128xf32>
    %872 = arith.maximumf %871, %863 : vector<8x128xf32>
    %873 = arith.subf %863, %872 : vector<8x128xf32>
    %874 = math.exp %873 : vector<8x128xf32>
    %875 = arith.addf %865, %870 : vector<8x128xf32>
    %876 = arith.subf %875, %872 : vector<8x128xf32>
    %877 = math.exp %876 : vector<8x128xf32>
    %c0_386 = arith.constant 0 : index
    %c0_387 = arith.constant 0 : index
    %878 = vector.load %arg27[%c0_386, %c0_387] : memref<8x128xf32, #tpu.memory_space<vmem>>, vector<8x128xf32>
    %879 = arith.mulf %877, %878 : vector<8x128xf32>
    %880 = arith.mulf %867, %861 : vector<8x128xf32>
    %881 = arith.mulf %874, %880 : vector<8x128xf32>
    %882 = arith.addf %879, %881 : vector<8x128xf32>
    %c0_388 = arith.constant 0 : index
    %c0_389 = arith.constant 0 : index
    %883 = vector.load %arg28[%c0_388, %c0_389] : memref<8x128xf32, #tpu.memory_space<vmem>>, vector<8x128xf32>
    %884 = arith.mulf %877, %883 : vector<8x128xf32>
    %885 = arith.mulf %874, %861 : vector<8x128xf32>
    %886 = arith.addf %884, %885 : vector<8x128xf32>
    %887 = arith.mulf %886, %857 : vector<8x128xf32>
    %888 = arith.mulf %887, %887 : vector<8x128xf32>
    %cst_390 = arith.constant dense<0.000000e+00> : vector<8xf32>
    %889 = vector.multi_reduction <add>, %888, %cst_390 [1] : vector<8x128xf32> to vector<8xf32>
    %890 = vector.shape_cast %889 : vector<8xf32> to vector<8x1xf32>
    %891 = math.sqrt %890 : vector<8x1xf32>
    %cst_391 = arith.constant 9.99999997E-7 : f32
    %892 = vector.broadcast %cst_391 : f32 to vector<8x1xf32>
    %893 = arith.addf %891, %892 : vector<8x1xf32>
    %894 = tpu.reciprocal %893 {approx = true} : vector<8x1xf32> -> vector<8x1xf32>
    %895 = arith.mulf %893, %894 : vector<8x1xf32>
    %cst_392 = arith.constant 2.000000e+00 : f32
    %896 = vector.broadcast %cst_392 : f32 to vector<8x1xf32>
    %897 = arith.subf %896, %895 : vector<8x1xf32>
    %898 = arith.mulf %894, %897 : vector<8x1xf32>
    %899 = arith.mulf %882, %857 : vector<8x128xf32>
    %900 = arith.mulf %869, %899 : vector<8x128xf32>
    %901 = vector.broadcast %898 : vector<8x1xf32> to vector<8x128xf32>
    %902 = arith.mulf %900, %901 : vector<8x128xf32>
    %903 = arith.index_cast %855 : i32 to index
    %c0_393 = arith.constant 0 : index
    %904 = vector.load %arg26[%903, %c0_393] : memref<128x128xf32, #tpu.memory_space<vmem>>, vector<8x128xf32>
    tpu.vector_store %arg26[%903, %c0_393], %902 {strides = array<i32>} : memref<128x128xf32, #tpu.memory_space<vmem>>, vector<8x128xf32>,
    %c0_394 = arith.constant 0 : index
    %c0_395 = arith.constant 0 : index
    %905 = vector.load %arg27[%c0_394, %c0_395] : memref<8x128xf32, #tpu.memory_space<vmem>>, vector<8x128xf32>
    tpu.vector_store %arg27[%c0_394, %c0_395], %882 {strides = array<i32>} : memref<8x128xf32, #tpu.memory_space<vmem>>, vector<8x128xf32>,
    %c0_396 = arith.constant 0 : index
    %c0_397 = arith.constant 0 : index
    %906 = vector.load %arg28[%c0_396, %c0_397] : memref<8x128xf32, #tpu.memory_space<vmem>>, vector<8x128xf32>
    tpu.vector_store %arg28[%c0_396, %c0_397], %886 {strides = array<i32>} : memref<8x128xf32, #tpu.memory_space<vmem>>, vector<8x128xf32>,
    %c0_398 = arith.constant 0 : index
    %c0_399 = arith.constant 0 : index
    %907 = vector.load %arg29[%c0_398, %c0_399] : memref<8x128xf32, #tpu.memory_space<vmem>>, vector<8x128xf32>
    tpu.vector_store %arg29[%c0_398, %c0_399], %872 {strides = array<i32>} : memref<8x128xf32, #tpu.memory_space<vmem>>, vector<8x128xf32>,
    %c15_i32 = arith.constant 15 : i32
    %c8_i32_400 = arith.constant 8 : i32
    %908 = arith.muli %c15_i32, %c8_i32_400 : i32
    %909 = tpu.assume_multiple %908, 8 : i32
    %910 = arith.index_cast %909 : i32 to index
    %c128_401 = arith.constant 128 : index
    %911 = vector.load %arg24[%910, %c128_401] : memref<128x640xf32, #tpu.memory_space<vmem>>, vector<8x128xf32>
    %912 = arith.index_cast %909 : i32 to index
    %c256_402 = arith.constant 256 : index
    %913 = vector.load %arg24[%912, %c256_402] : memref<128x640xf32, #tpu.memory_space<vmem>>, vector<8x128xf32>
    %cst_403 = arith.constant 0.176776692 : f32
    %914 = vector.broadcast %cst_403 : f32 to vector<8x128xf32>
    %915 = arith.mulf %913, %914 : vector<8x128xf32>
    %916 = arith.index_cast %909 : i32 to index
    %c384_404 = arith.constant 384 : index
    %917 = vector.load %arg24[%916, %c384_404] : memref<128x640xf32, #tpu.memory_space<vmem>>, vector<8x128xf32>
    %918 = arith.index_cast %909 : i32 to index
    %c512_405 = arith.constant 512 : index
    %919 = vector.load %arg24[%918, %c512_405] : memref<128x640xf32, #tpu.memory_space<vmem>>, vector<8x128xf32>
    %920 = arith.index_cast %909 : i32 to index
    %c0_406 = arith.constant 0 : index
    %921 = vector.load %arg25[%920, %c0_406] : memref<128x256xf32, #tpu.memory_space<vmem>>, vector<8x128xf32>
    %922 = arith.index_cast %909 : i32 to index
    %c128_407 = arith.constant 128 : index
    %923 = vector.load %arg25[%922, %c128_407] : memref<128x256xf32, #tpu.memory_space<vmem>>, vector<8x128xf32>
    %c0_408 = arith.constant 0 : index
    %c0_409 = arith.constant 0 : index
    %924 = vector.load %arg29[%c0_408, %c0_409] : memref<8x128xf32, #tpu.memory_space<vmem>>, vector<8x128xf32>
    %925 = arith.addf %919, %924 : vector<8x128xf32>
    %926 = arith.maximumf %925, %917 : vector<8x128xf32>
    %927 = arith.subf %917, %926 : vector<8x128xf32>
    %928 = math.exp %927 : vector<8x128xf32>
    %929 = arith.addf %919, %924 : vector<8x128xf32>
    %930 = arith.subf %929, %926 : vector<8x128xf32>
    %931 = math.exp %930 : vector<8x128xf32>
    %c0_410 = arith.constant 0 : index
    %c0_411 = arith.constant 0 : index
    %932 = vector.load %arg27[%c0_410, %c0_411] : memref<8x128xf32, #tpu.memory_space<vmem>>, vector<8x128xf32>
    %933 = arith.mulf %931, %932 : vector<8x128xf32>
    %934 = arith.mulf %921, %915 : vector<8x128xf32>
    %935 = arith.mulf %928, %934 : vector<8x128xf32>
    %936 = arith.addf %933, %935 : vector<8x128xf32>
    %c0_412 = arith.constant 0 : index
    %c0_413 = arith.constant 0 : index
    %937 = vector.load %arg28[%c0_412, %c0_413] : memref<8x128xf32, #tpu.memory_space<vmem>>, vector<8x128xf32>
    %938 = arith.mulf %931, %937 : vector<8x128xf32>
    %939 = arith.mulf %928, %915 : vector<8x128xf32>
    %940 = arith.addf %938, %939 : vector<8x128xf32>
    %941 = arith.mulf %940, %911 : vector<8x128xf32>
    %942 = arith.mulf %941, %941 : vector<8x128xf32>
    %cst_414 = arith.constant dense<0.000000e+00> : vector<8xf32>
    %943 = vector.multi_reduction <add>, %942, %cst_414 [1] : vector<8x128xf32> to vector<8xf32>
    %944 = vector.shape_cast %943 : vector<8xf32> to vector<8x1xf32>
    %945 = math.sqrt %944 : vector<8x1xf32>
    %cst_415 = arith.constant 9.99999997E-7 : f32
    %946 = vector.broadcast %cst_415 : f32 to vector<8x1xf32>
    %947 = arith.addf %945, %946 : vector<8x1xf32>
    %948 = tpu.reciprocal %947 {approx = true} : vector<8x1xf32> -> vector<8x1xf32>
    %949 = arith.mulf %947, %948 : vector<8x1xf32>
    %cst_416 = arith.constant 2.000000e+00 : f32
    %950 = vector.broadcast %cst_416 : f32 to vector<8x1xf32>
    %951 = arith.subf %950, %949 : vector<8x1xf32>
    %952 = arith.mulf %948, %951 : vector<8x1xf32>
    %953 = arith.mulf %936, %911 : vector<8x128xf32>
    %954 = arith.mulf %923, %953 : vector<8x128xf32>
    %955 = vector.broadcast %952 : vector<8x1xf32> to vector<8x128xf32>
    %956 = arith.mulf %954, %955 : vector<8x128xf32>
    %957 = arith.index_cast %909 : i32 to index
    %c0_417 = arith.constant 0 : index
    %958 = vector.load %arg26[%957, %c0_417] : memref<128x128xf32, #tpu.memory_space<vmem>>, vector<8x128xf32>
    tpu.vector_store %arg26[%957, %c0_417], %956 {strides = array<i32>} : memref<128x128xf32, #tpu.memory_space<vmem>>, vector<8x128xf32>,
    %c0_418 = arith.constant 0 : index
    %c0_419 = arith.constant 0 : index
    %959 = vector.load %arg27[%c0_418, %c0_419] : memref<8x128xf32, #tpu.memory_space<vmem>>, vector<8x128xf32>
    tpu.vector_store %arg27[%c0_418, %c0_419], %936 {strides = array<i32>} : memref<8x128xf32, #tpu.memory_space<vmem>>, vector<8x128xf32>,
    %c0_420 = arith.constant 0 : index
    %c0_421 = arith.constant 0 : index
    %960 = vector.load %arg28[%c0_420, %c0_421] : memref<8x128xf32, #tpu.memory_space<vmem>>, vector<8x128xf32>
    tpu.vector_store %arg28[%c0_420, %c0_421], %940 {strides = array<i32>} : memref<8x128xf32, #tpu.memory_space<vmem>>, vector<8x128xf32>,
    %c0_422 = arith.constant 0 : index
    %c0_423 = arith.constant 0 : index
    %961 = vector.load %arg29[%c0_422, %c0_423] : memref<8x128xf32, #tpu.memory_space<vmem>>, vector<8x128xf32>
    tpu.vector_store %arg29[%c0_422, %c0_423], %926 {strides = array<i32>} : memref<8x128xf32, #tpu.memory_space<vmem>>, vector<8x128xf32>,
    %c16_i32 = arith.constant 16 : i32
    %c0_424 = arith.constant 0 : index
    %c0_425 = arith.constant 0 : index
    %962 = vector.load %arg26[%c0_424, %c0_425] : memref<128x128xf32, #tpu.memory_space<vmem>>, vector<128x128xf32>
    %c0_426 = arith.constant 0 : index
    %c0_427 = arith.constant 0 : index
    %963 = vector.load %arg16[%c0_426, %c0_427] : memref<128x128xf32, #tpu.memory_space<vmem>>, vector<128x128xf32>
    %cst_428 = arith.constant dense<0.000000e+00> : vector<128x128xf32>
    %964 = tpu.matmul %962, %963, %cst_428 {dimension_numbers = #tpu.dot_dimension_numbers<[1], [0], [0], [1], [0, 0, 1, 1], [], []>} : vector<128x128xf32>, vector<128x128xf32>, vector<128x128xf32> -> vector<128x128xf32>
    %965 = arith.subf %962, %964 : vector<128x128xf32>
    %966 = arith.mulf %965, %965 : vector<128x128xf32>
    %c0_429 = arith.constant 0 : index
    %c0_430 = arith.constant 0 : index
    %967 = vector.load %arg16[%c0_429, %c0_430] : memref<128x128xf32, #tpu.memory_space<vmem>>, vector<128x128xf32>
    %cst_431 = arith.constant dense<0.000000e+00> : vector<128x128xf32>
    %968 = tpu.matmul %966, %967, %cst_431 {dimension_numbers = #tpu.dot_dimension_numbers<[1], [0], [0], [1], [0, 0, 1, 1], [], []>} : vector<128x128xf32>, vector<128x128xf32>, vector<128x128xf32> -> vector<128x128xf32>
    %cst_432 = arith.constant 9.99999974E-6 : f32
    %969 = vector.broadcast %cst_432 : f32 to vector<128x128xf32>
    %970 = arith.addf %968, %969 : vector<128x128xf32>
    %971 = math.rsqrt %970 : vector<128x128xf32>
    %972 = arith.mulf %965, %971 : vector<128x128xf32>
    %c0_433 = arith.constant 0 : index
    %c0_434 = arith.constant 0 : index
    %973 = vector.load %arg14[%c0_433, %c0_434] : memref<1x128xf32, #tpu.memory_space<vmem>>, vector<1x128xf32>
    %974 = vector.broadcast %973 : vector<1x128xf32> to vector<128x128xf32>
    %975 = arith.mulf %972, %974 : vector<128x128xf32>
    %c0_435 = arith.constant 0 : index
    %c0_436 = arith.constant 0 : index
    %976 = vector.load %arg15[%c0_435, %c0_436] : memref<1x128xf32, #tpu.memory_space<vmem>>, vector<1x128xf32>
    %977 = vector.broadcast %976 : vector<1x128xf32> to vector<128x128xf32>
    %978 = arith.addf %975, %977 : vector<128x128xf32>
    %c0_437 = arith.constant 0 : index
    %c0_438 = arith.constant 0 : index
    %979 = vector.load %arg24[%c0_437, %c0_438] : memref<128x640xf32, #tpu.memory_space<vmem>>, vector<128x128xf32>
    %980 = arith.addf %978, %979 : vector<128x128xf32>
    %981 = arith.negf %35 : vector<128x128xf32>
    %982 = math.exp %981 : vector<128x128xf32>
    %cst_439 = arith.constant 1.000000e+00 : f32
    %983 = vector.broadcast %cst_439 : f32 to vector<128x128xf32>
    %984 = arith.addf %983, %982 : vector<128x128xf32>
    %985 = arith.divf %983, %984 : vector<128x128xf32>
    %986 = arith.mulf %35, %985 : vector<128x128xf32>
    %987 = arith.mulf %980, %986 : vector<128x128xf32>
    %988 = arith.truncf %987 : vector<128x128xf32> to vector<128x128xbf16>
    %c0_440 = arith.constant 0 : index
    %c0_441 = arith.constant 0 : index
    %989 = vector.load %arg17[%c0_440, %c0_441] : memref<128x128xbf16, #tpu.memory_space<vmem>>, vector<128x128xbf16>
    %cst_442 = arith.constant dense<0.000000e+00> : vector<128x128xf32>
    %990 = tpu.matmul %988, %989, %cst_442 {dimension_numbers = #tpu.dot_dimension_numbers<[1], [0], [0], [1], [0, 0, 1, 1], [], []>} : vector<128x128xbf16>, vector<128x128xbf16>, vector<128x128xf32> -> vector<128x128xf32>
    %c0_443 = arith.constant 0 : index
    %c0_444 = arith.constant 0 : index
    %991 = vector.load %arg18[%c0_443, %c0_444] : memref<1x128xf32, #tpu.memory_space<vmem>>, vector<1x128xf32>
    %992 = vector.broadcast %991 : vector<1x128xf32> to vector<128x128xf32>
    %993 = arith.addf %990, %992 : vector<128x128xf32>
    %994 = arith.addf %993, %3 : vector<128x128xf32>
    %c0_445 = arith.constant 0 : index
    %c0_446 = arith.constant 0 : index
    %995 = vector.load %arg19[%c0_445, %c0_446] : memref<128x128xf32, #tpu.memory_space<vmem>>, vector<128x128xf32>
    tpu.vector_store %arg19[%c0_445, %c0_446], %994 {strides = array<i32>} : memref<128x128xf32, #tpu.memory_space<vmem>>, vector<128x128xf32>,
    %c120 = arith.constant 120 : index
    %c0_447 = arith.constant 0 : index
    %996 = vector.load %arg26[%c120, %c0_447] : memref<128x128xf32, #tpu.memory_space<vmem>>, vector<8x128xf32>
    %c0_448 = arith.constant 0 : index
    %c0_449 = arith.constant 0 : index
    %997 = vector.load %arg20[%c0_448, %c0_449] : memref<8x128xf32, #tpu.memory_space<vmem>>, vector<8x128xf32>
    tpu.vector_store %arg20[%c0_448, %c0_449], %996 {strides = array<i32>} : memref<8x128xf32, #tpu.memory_space<vmem>>, vector<8x128xf32>,
    %c0_450 = arith.constant 0 : index
    %c0_451 = arith.constant 0 : index
    %998 = vector.load %arg27[%c0_450, %c0_451] : memref<8x128xf32, #tpu.memory_space<vmem>>, vector<8x128xf32>
    %c0_452 = arith.constant 0 : index
    %c0_453 = arith.constant 0 : index
    %999 = vector.load %arg21[%c0_452, %c0_453] : memref<8x128xf32, #tpu.memory_space<vmem>>, vector<8x128xf32>
    tpu.vector_store %arg21[%c0_452, %c0_453], %998 {strides = array<i32>} : memref<8x128xf32, #tpu.memory_space<vmem>>, vector<8x128xf32>,
    %c0_454 = arith.constant 0 : index
    %c0_455 = arith.constant 0 : index
    %1000 = vector.load %arg28[%c0_454, %c0_455] : memref<8x128xf32, #tpu.memory_space<vmem>>, vector<8x128xf32>
    %c0_456 = arith.constant 0 : index
    %c0_457 = arith.constant 0 : index
    %1001 = vector.load %arg22[%c0_456, %c0_457] : memref<8x128xf32, #tpu.memory_space<vmem>>, vector<8x128xf32>
    tpu.vector_store %arg22[%c0_456, %c0_457], %1000 {strides = array<i32>} : memref<8x128xf32, #tpu.memory_space<vmem>>, vector<8x128xf32>,
    %c0_458 = arith.constant 0 : index
    %c0_459 = arith.constant 0 : index
    %1002 = vector.load %arg29[%c0_458, %c0_459] : memref<8x128xf32, #tpu.memory_space<vmem>>, vector<8x128xf32>
    %c0_460 = arith.constant 0 : index
    %c0_461 = arith.constant 0 : index
    %1003 = vector.load %arg23[%c0_460, %c0_461] : memref<8x128xf32, #tpu.memory_space<vmem>>, vector<8x128xf32>
    tpu.vector_store %arg23[%c0_460, %c0_461], %1002 {strides = array<i32>} : memref<8x128xf32, #tpu.memory_space<vmem>>, vector<8x128xf32>,
    return
  }
  func.func @transform_0(%arg0: i32) -> i32 {
    %c0_i32 = arith.constant 0 : i32
    %c0_i32_0 = arith.constant 0 : i32
    return %c0_i32 : i32
  }
  func.func @transform_1(%arg0: i32) -> (i32, i32) {
    %c0_i32 = arith.constant 0 : i32
    %c0_i32_0 = arith.constant 0 : i32
    return %arg0, %c0_i32 : i32, i32
  }
  func.func @transform_2(%arg0: i32) -> (i32, i32) {
    %c0_i32 = arith.constant 0 : i32
    %c0_i32_0 = arith.constant 0 : i32
    %c0_i32_1 = arith.constant 0 : i32
    return %c0_i32, %c0_i32_0 : i32, i32
  }
  func.func @transform_3(%arg0: i32) -> (i32, i32) {
    %c0_i32 = arith.constant 0 : i32
    %c0_i32_0 = arith.constant 0 : i32
    %c0_i32_1 = arith.constant 0 : i32
    return %c0_i32, %c0_i32_0 : i32, i32
  }
  func.func @transform_4(%arg0: i32) -> (i32, i32) {
    %c0_i32 = arith.constant 0 : i32
    %c0_i32_0 = arith.constant 0 : i32
    %c0_i32_1 = arith.constant 0 : i32
    return %c0_i32, %c0_i32_0 : i32, i32
  }
  func.func @transform_5(%arg0: i32) -> (i32, i32) {
    %c0_i32 = arith.constant 0 : i32
    %c0_i32_0 = arith.constant 0 : i32
    %c0_i32_1 = arith.constant 0 : i32
    return %c0_i32, %c0_i32_0 : i32, i32
  }
  func.func @transform_6(%arg0: i32) -> (i32, i32) {
    %c0_i32 = arith.constant 0 : i32
    %c0_i32_0 = arith.constant 0 : i32
    %c0_i32_1 = arith.constant 0 : i32
    return %c0_i32, %c0_i32_0 : i32, i32
  }
  func.func @transform_7(%arg0: i32) -> (i32, i32) {
    %c0_i32 = arith.constant 0 : i32
    %c0_i32_0 = arith.constant 0 : i32
    %c0_i32_1 = arith.constant 0 : i32
    return %c0_i32, %c0_i32_0 : i32, i32
  }
  func.func @transform_8(%arg0: i32) -> (i32, i32) {
    %c0_i32 = arith.constant 0 : i32
    %c0_i32_0 = arith.constant 0 : i32
    %c0_i32_1 = arith.constant 0 : i32
    return %c0_i32, %c0_i32_0 : i32, i32
  }
  func.func @transform_9(%arg0: i32) -> (i32, i32) {
    %c0_i32 = arith.constant 0 : i32
    %c0_i32_0 = arith.constant 0 : i32
    %c0_i32_1 = arith.constant 0 : i32
    return %c0_i32, %c0_i32_0 : i32, i32
  }
  func.func @transform_10(%arg0: i32) -> (i32, i32) {
    %c0_i32 = arith.constant 0 : i32
    %c0_i32_0 = arith.constant 0 : i32
    %c0_i32_1 = arith.constant 0 : i32
    return %c0_i32, %c0_i32_0 : i32, i32
  }
  func.func @transform_11(%arg0: i32) -> (i32, i32) {
    %c0_i32 = arith.constant 0 : i32
    %c0_i32_0 = arith.constant 0 : i32
    %c0_i32_1 = arith.constant 0 : i32
    return %c0_i32, %c0_i32_0 : i32, i32
  }
  func.func @transform_12(%arg0: i32) -> (i32, i32) {
    %c0_i32 = arith.constant 0 : i32
    %c0_i32_0 = arith.constant 0 : i32
    %c0_i32_1 = arith.constant 0 : i32
    return %c0_i32, %c0_i32_0 : i32, i32
  }
  func.func @transform_13(%arg0: i32) -> (i32, i32) {
    %c0_i32 = arith.constant 0 : i32
    %c0_i32_0 = arith.constant 0 : i32
    %c0_i32_1 = arith.constant 0 : i32
    return %c0_i32, %c0_i32_0 : i32, i32
  }
  func.func @transform_14(%arg0: i32) -> (i32, i32) {
    %c0_i32 = arith.constant 0 : i32
    %c0_i32_0 = arith.constant 0 : i32
    %c0_i32_1 = arith.constant 0 : i32
    return %c0_i32, %c0_i32_0 : i32, i32
  }
  func.func @transform_15(%arg0: i32) -> (i32, i32) {
    %c0_i32 = arith.constant 0 : i32
    %c0_i32_0 = arith.constant 0 : i32
    %c0_i32_1 = arith.constant 0 : i32
    return %c0_i32, %c0_i32_0 : i32, i32
  }
  func.func @transform_16(%arg0: i32) -> (i32, i32) {
    %c0_i32 = arith.constant 0 : i32
    %c0_i32_0 = arith.constant 0 : i32
    %c0_i32_1 = arith.constant 0 : i32
    return %c0_i32, %c0_i32_0 : i32, i32
  }
  func.func @transform_17(%arg0: i32) -> (i32, i32) {
    %c0_i32 = arith.constant 0 : i32
    %c0_i32_0 = arith.constant 0 : i32
    %c0_i32_1 = arith.constant 0 : i32
    return %c0_i32, %c0_i32_0 : i32, i32
  }
  func.func @transform_18(%arg0: i32) -> (i32, i32) {
    %c0_i32 = arith.constant 0 : i32
    %c0_i32_0 = arith.constant 0 : i32
    return %arg0, %c0_i32 : i32, i32
  }
  func.func @transform_19(%arg0: i32) -> (i32, i32) {
    %c0_i32 = arith.constant 0 : i32
    %c0_i32_0 = arith.constant 0 : i32
    %c0_i32_1 = arith.constant 0 : i32
    return %c0_i32, %c0_i32_0 : i32, i32
  }
  func.func @transform_20(%arg0: i32) -> (i32, i32) {
    %c0_i32 = arith.constant 0 : i32
    %c0_i32_0 = arith.constant 0 : i32
    %c0_i32_1 = arith.constant 0 : i32
    return %c0_i32, %c0_i32_0 : i32, i32
  }
  func.func @transform_21(%arg0: i32) -> (i32, i32) {
    %c0_i32 = arith.constant 0 : i32
    %c0_i32_0 = arith.constant 0 : i32
    %c0_i32_1 = arith.constant 0 : i32
    return %c0_i32, %c0_i32_0 : i32, i32
  }
  func.func @transform_22(%arg0: i32) -> (i32, i32) {
    %c0_i32 = arith.constant 0 : i32
    %c0_i32_0 = arith.constant 0 : i32
    %c0_i32_1 = arith.constant 0 : i32
    return %c0_i32, %c0_i32_0 : i32, i32
  }
}

</mosaic_0001>

<bundles_post_ra>
// kernel: tpu_custom_call.1
= control target key start
LH: loop header
LB: loop body
LE: loop exit
PB: predicated region body
PF: predicated region fallthrough
CT: control target
= control target key end

     0   :  { %s11190_s0 = inlined_call_operand.hbm [shape: f32[5], index: 0, kind: input, shape index: {}]   ;;  %s11191_s1 = inlined_call_operand.hbm [shape: f32[256,128], index: 1, kind: input, shape index: {}]   ;;  %s11192_s2 = inlined_call_operand.hbm [shape: f32[8,128], index: 2, kind: input, shape index: {}]   ;;  %s11193_s3 = inlined_call_operand.vmem [shape: f32[8,128], index: 3, kind: input, shape index: {}]   ;;  %s11194_s4 = inlined_call_operand.hbm [shape: f32[8,128], index: 4, kind: input, shape index: {}]   ;;  %s11195_s5 = inlined_call_operand.hbm [shape: f32[1,128], index: 5, kind: input, shape index: {}]   ;;  %s11196_s6 = inlined_call_operand.vmem [shape: f32[1,128], index: 6, kind: input, shape index: {}]   ;;  %s11197_s7 = inlined_call_operand.hbm [shape: bf16[128,384], index: 7, kind: input, shape index: {}]   ;;  %s11198_s8 = inlined_call_operand.vmem [shape: f32[1,384], index: 8, kind: input, shape index: {}]   ;;  %s11199_s9 = inlined_call_operand.hbm [shape: bf16[256,640], index: 9, kind: input, shape index: {}]   ;;  %s11200_s10 = inlined_call_operand.vmem [shape: f32[1,640], index: 10, kind: input, shape index: {}]   ;;  %s11201_s11 = inlined_call_operand.hbm [shape: bf16[256,256], index: 11, kind: input, shape index: {}]   ;;  %s11202_s12 = inlined_call_operand.vmem [shape: f32[1,256], index: 12, kind: input, shape index: {}]   ;;  %s11203_s13 = inlined_call_operand.vmem [shape: f32[1,128], index: 13, kind: input, shape index: {}]   ;;  %s11204_s14 = inlined_call_operand.vmem [shape: f32[1,128], index: 14, kind: input, shape index: {}]   ;;  %s11205_s15 = inlined_call_operand.hbm [shape: f32[128,128], index: 15, kind: input, shape index: {}]   ;;  %s11206_s16 = inlined_call_operand.hbm [shape: bf16[128,128], index: 16, kind: input, shape index: {}]   ;;  %s11207_s17 = inlined_call_operand.vmem [shape: f32[1,128], index: 17, kind: input, shape index: {}]   ;;  %s11208_s18 = inlined_call_operand.hbm [shape: f32[256,128], index: 18, kind: output, shape index: {0}]   ;;  %s11209_s19 = inlined_call_operand.hbm [shape: f32[8,128], index: 19, kind: output, shape index: {1}]   ;;  %s11210_s20 = inlined_call_operand.hbm [shape: f32[8,128], index: 20, kind: output, shape index: {2}]   ;;  %s11211_s21 = inlined_call_operand.hbm [shape: f32[8,128], index: 21, kind: output, shape index: {3}]   ;;  %s11212_s22 = inlined_call_operand.hbm [shape: f32[8,128], index: 22, kind: output, shape index: {4}]  }
   0x1   :  { %11298 = sst [smem:[#allocation122_spill]] %s11190_s0 }
   0x2   :  { %11299 = sst [smem:[#allocation123_spill]] %s11191_s1 }
   0x3   :  { %11300 = sst [smem:[#allocation124_spill]] %s11192_s2 }
   0x4   :  { %11301 = sst [smem:[#allocation125_spill]] %s11193_s3 }
   0x5   :  { %11302 = sst [smem:[#allocation126_spill]] %s11194_s4 }
   0x6   :  { %11303 = sst [smem:[#allocation127_spill]] %s11195_s5 }
   0x7   :  { %11304 = sst [smem:[#allocation128_spill]] %s11196_s6 }
   0x8   :  { %11305 = sst [smem:[#allocation129_spill]] %s11197_s7 }
   0x9   :  { %11306 = sst [smem:[#allocation130_spill]] %s11198_s8 }
   0xa   :  { %11307 = sst [smem:[#allocation131_spill]] %s11199_s9 }
   0xb   :  { %11308 = sst [smem:[#allocation132_spill]] %s11204_s14 }
   0xc   :  { %11309 = sst [smem:[#allocation133_spill]] %s11205_s15 }
   0xd   :  { %11310 = sst [smem:[#allocation134_spill]] %s11207_s17 }
   0xe   :  { %11311 = sst [smem:[#allocation135_spill]] %s11208_s18 }
   0xf   :  { %11312 = sst [smem:[#allocation136_spill]] %s11209_s19 }
  0x10   :  { %11313 = sst [smem:[#allocation137_spill]] %s11210_s20 }
  0x11   :  { %11314 = sst [smem:[#allocation138_spill]] %s11211_s21 }
  0x12   :  { %11315 = sst [smem:[#allocation139_spill]] %s11212_s22 }
  0x13   :  { %28 = vsyncpa [#allocation11], 0 }
  0x14   :  { %29 = vsyncpa [#allocation9], 0 }
  0x15   :  { %31 = vsyncpa [#allocation9 + $0x1], 0 }
  0x16   :  { %32 = vsyncpa [#allocation14], 0 }
  0x17   :  { %33 = vsyncpa [#allocation17], 0 }
  0x18   :  { %34 = vsyncpa [#allocation20], 0 }
  0x19   :  { %35 = vsyncpa [#allocation23], 0 }
  0x1a   :  { %36 = vsyncpa [#allocation10], 0 }
  0x1b   :  { %38 = vsyncpa [#allocation10 + $0x1], 0 }
  0x1c   :  { %39 = vsyncpa [#allocation27], 0 }
  0x1d   :  { %40 = vsyncpa [#allocation30], 0  ;;  %s7876_s3 = smov 0   ;;  %s7878_s28 = smov 0  }
  0x1e   :  { %s7880_s29 = smov 0   ;;  %s7882_s30 = smov 0  }
  0x1f LB: > { %s7732_s4 = smov [#allocation13]   ;;  %s7897_s23 = sadd.s32 4294967295, %s7730_s30   ;;  %s7730_s30 = sphi %s7882_s30, %s11654_s30   ;;  %s7726_s29 = sphi %s7880_s29, %s11653_s29   ;;  %s7722_s28 = sphi %s7878_s28, %s11652_s28   ;;  %s7718_s3 = sphi %s7876_s3, %s11651_s3  }
  0x20   : > { %s566_s0 = sshll.u32 %s7732_s4, 4  ;;  %p5746_p0 = scmp.ge.s32.totalorder %s7730_s30, 1  ;;  %s567_s0 = int_to_ptr.vmem [resolvable:$true] %s566_s0 }
  0x21   : > { %p11221_p1 = scmp.eq.s32.totalorder %s7897_s23, 0  ;;  %p544_p2 = scmp.lt.s32.totalorder %s7730_s30, 3 }
  0x22   : > { %s7733_s5 = smov [#allocation16]   ;;  %s7734_s6 = smov [#allocation19]  }
  0x23   : > { %p7903_p4 = pnand %p5746_p0, %p544_p2  ;;  %s591_s24 = sshll.u32 %s7733_s5, 4  ;;  %s7910_s24 = int_to_ptr.vmem [resolvable:$true] %s591_s24 }
  0x24   : > { %s620_s25 = sshll.u32 %s7734_s6, 4  ;;  %s11318_s4 = sld [smem:[#allocation124_spill]]  ;;  %s7918_s25 = int_to_ptr.vmem [resolvable:$true] %s620_s25 }
  0x25   : > { %s11316_s1 = scalar_select %p7903_p4, 1, 0 }
  0x26   : > { %p6477_p6 = pneg %p7903_p4 }
  0x28   : > { %p7914_p7 = pnand %p6477_p6, %p11221_p1 }
  0x2a   : > { %s7265_s18 = scalar_lea.hbm %s11318_s4, 128  ;;  %p7928_p9 = pneg %p7914_p7 }
  0x2b   : > { %p7266_p8 = scmp.ne.s32.totalorder %s11318_s4, %s7265_s18  ;;  %p7272_p12 = scmp.lt.u32.totalorder %s7265_s18, %s11318_s4 }
  0x2d   : > { %p7268_p10 = pnand %p7928_p9, %p7266_p8 }
  0x2f   : > { %p7269_p11 = pneg %p7268_p10 }
  0x31   : > { %p7274_p13 = pnand %p7272_p12, %p7269_p11 }
  0x33   : > { %7277 = shalt.err (!%p7274_p13)
}
  0x34   : > { %s7278_s2 = scalar_lea.vmem %s567_s0, 128  ;;  %p7286_p5 = scmp.lt.s32.totalorder %s567_s0, %s567_s0 }
  0x35   : > { %p7279_p0 = scmp.ne.s32.totalorder %s567_s0, %s7278_s2  ;;  %p7287_p3 = scmp.lt.s32.totalorder %s7278_s2, %s7278_s2 }
  0x37   : > { %p7281_p2 = pnand %p7279_p0, %p7928_p9  ;;  %p7288_p1 = por %p7287_p3, %p7286_p5 }
  0x39   : > { %p7282_p6 = pneg %p7281_p2 }
  0x3b   : > { %p7289_p4 = pnand %p7288_p1, %p7282_p6 }
  0x3d   : > { %7292 = shalt.err (!%p7289_p4)
}
  0x3e   : > { %6483 = dma.hbm_to_vmem [thread:$0]  (!%p7914_p7), %s11318_s4, 128, %s567_s0, [#allocation14]  }
  0x3f   : > { %s11320_s27 = sld [smem:[#allocation127_spill]] }
  0x45   : > { %s7293_s6 = scalar_lea.hbm %s11320_s27, 16 }
  0x46   : > { %p7294_p8 = scmp.ne.s32.totalorder %s11320_s27, %s7293_s6  ;;  %p7300_p1 = scmp.lt.u32.totalorder %s7293_s6, %s11320_s27 }
  0x48   : > { %p7296_p10 = pnand %p7294_p8, %p7928_p9 }
  0x4a   : > { %p7297_p3 = pneg %p7296_p10 }
  0x4c   : > { %p7302_p4 = pnand %p7300_p1, %p7297_p3 }
  0x4e   : > { %7305 = shalt.err (!%p7302_p4)
}
  0x4f   : > { %s7306_s0 = scalar_lea.vmem %s7910_s24, 16  ;;  %s7313_s19 = scalar_lea.vmem %s7910_s24, 32 }
  0x50   : > { %p7307_p5 = scmp.ne.s32.totalorder %s7910_s24, %s7306_s0  ;;  %p7314_p13 = scmp.lt.s32.totalorder %s7910_s24, %s7910_s24 }
  0x51   : > { %p7315_p0 = scmp.lt.s32.totalorder %s7313_s19, %s7306_s0 }
  0x52   : > { %p7309_p11 = pnand %p7307_p5, %p7928_p9 }
  0x53   : > { %p7316_p2 = por %p7315_p0, %p7314_p13 }
  0x54   : > { %p7310_p12 = pneg %p7309_p11 }
  0x56   : > { %p7317_p6 = pnand %p7316_p2, %p7310_p12 }
  0x58   : > { %7320 = shalt.err (!%p7317_p6)
}
  0x59   : > { %6489 = dma.hbm_to_vmem [thread:$0]  (!%p7914_p7), %s11320_s27, 16, %s7910_s24, [#allocation17]  }
  0x5a   : > { %s11321_s9 = sld [smem:[#allocation131_spill]] }
  0x60   : > { %s7321_s18 = scalar_lea.hbm %s11321_s9, 10240 }
  0x61   : > { %p7322_p8 = scmp.ne.s32.totalorder %s11321_s9, %s7321_s18  ;;  %p7328_p1 = scmp.lt.u32.totalorder %s7321_s18, %s11321_s9 }
  0x63   : > { %p7324_p10 = pnand %p7322_p8, %p7928_p9 }
  0x65   : > { %p7325_p3 = pneg %p7324_p10 }
  0x67   : > { %p7330_p4 = pnand %p7328_p1, %p7325_p3 }
  0x69   : > { %7333 = shalt.err (!%p7330_p4)
}
  0x6a   : > { %s7334_s24 = scalar_lea.vmem %s7918_s25, 10240  ;;  %p7342_p13 = scmp.lt.s32.totalorder %s7918_s25, %s7918_s25 }
  0x6b   : > { %p7335_p5 = scmp.ne.s32.totalorder %s7918_s25, %s7334_s24  ;;  %p7343_p0 = scmp.lt.s32.totalorder %s7334_s24, %s7334_s24 }
  0x6d   : > { %p7337_p11 = pnand %p7335_p5, %p7928_p9  ;;  %p7344_p2 = por %p7343_p0, %p7342_p13 }
  0x6f   : > { %p7338_p12 = pneg %p7337_p11 }
  0x71   : > { %p7345_p6 = pnand %p7344_p2, %p7338_p12 }
  0x73   : > { %7348 = shalt.err (!%p7345_p6)
}
  0x74   : > { %s7735_s19 = smov 320   ;;  %s7736_s14 = smov 20  }
  0x75   : > { %6495 = dma.hbm_to_vmem [thread:$0]  (!%p7914_p7), %s11321_s9, 10240, %s7918_s25, [#allocation20], %s7735_s19, %s7735_s19, %s7736_s14  }
  0x76   : > { %s7737_s22 = smov [#allocation22]   ;;  %s11322_s15 = sld [smem:[#allocation133_spill]] }
  0x77   : > { %s658_s18 = sshll.u32 %s7737_s22, 4  ;;  %s659_s18 = int_to_ptr.vmem [resolvable:$true] %s658_s18 }
  0x7c   : > { %s7349_s2 = scalar_lea.hbm %s11322_s15, 2048 }
  0x7d   : > { %p7350_p8 = scmp.ne.s32.totalorder %s11322_s15, %s7349_s2  ;;  %p7356_p1 = scmp.lt.u32.totalorder %s7349_s2, %s11322_s15 }
  0x7f   : > { %p7352_p10 = pnand %p7350_p8, %p7928_p9 }
  0x81   : > { %p7353_p3 = pneg %p7352_p10 }
  0x83   : > { %p7358_p4 = pnand %p7356_p1, %p7353_p3 }
  0x85   : > { %7361 = shalt.err (!%p7358_p4)
}
  0x86   : > { %s7362_s25 = scalar_lea.vmem %s659_s18, 2048  ;;  %p7370_p13 = scmp.lt.s32.totalorder %s659_s18, %s659_s18 }
  0x87   : > { %p7363_p5 = scmp.ne.s32.totalorder %s659_s18, %s7362_s25  ;;  %p7371_p0 = scmp.lt.s32.totalorder %s7362_s25, %s7362_s25 }
  0x89   : > { %p7365_p11 = pnand %p7363_p5, %p7928_p9  ;;  %p7372_p2 = por %p7371_p0, %p7370_p13 }
  0x8b   : > { %p7366_p12 = pneg %p7365_p11 }
  0x8d   : > { %p7373_p6 = pnand %p7372_p2, %p7366_p12 }
  0x8f   : > { %7376 = shalt.err (!%p7373_p6)
}
  0x90   : > { %s11227_s19 = smov 128   ;;  %s11229_s14 = smov 8  }
  0x91   : > { %6501 = dma.hbm_to_vmem [thread:$0]  (!%p7914_p7), %s11322_s15, 2048, %s659_s18, [#allocation23], %s11227_s19, %s11227_s19, %s11229_s14  }
  0x92   : > { %s11323_s22 = sld [smem:[#allocation122_spill]] }
  0x98   : > { %s7377_s20 = scalar_lea.hbm %s11323_s22, 16 }
  0x99   : > { %p7378_p8 = scmp.ne.s32.totalorder %s11323_s22, %s7377_s20  ;;  %p7384_p1 = scmp.lt.u32.totalorder %s7377_s20, %s11323_s22 }
  0x9b   : > { %p7380_p10 = pnand %p7378_p8, %p7928_p9 }
  0x9d   : > { %p7381_p3 = pneg %p7380_p10 }
  0x9f   : > { %p7386_p4 = pnand %p7384_p1, %p7381_p3 }
  0xa1   : > { %7389 = shalt.err (!%p7386_p4)
}
  0xa2   : > { %s7740_s25 = smov [#allocation8]   ;;  %s7741_s27 = smov [#allocation15]  }
  0xa3   : > { %6480 = dma.hbm_to_smem (!%p7914_p7), %s11323_s22, 16, %s7740_s25, [#allocation11]  }
  0xa4   : > { %s580_s21 = sshll.u32 %s7741_s27, 4  ;;  %s7742_s17 = smov [#allocation18]   ;;  %s581_s21 = int_to_ptr.vmem [resolvable:$true] %s580_s21 }
  0xa5   : > { %s604_s6 = sshll.u32 %s7742_s17, 4  ;;  %s11324_s14 = sld [smem:[#allocation126_spill]]  ;;  %s605_s6 = int_to_ptr.vmem [resolvable:$true] %s604_s6 }
  0xab   : > { %s7390_s0 = scalar_lea.hbm %s11324_s14, 128 }
  0xac   : > { %p7391_p5 = scmp.ne.s32.totalorder %s11324_s14, %s7390_s0  ;;  %p7397_p13 = scmp.lt.u32.totalorder %s7390_s0, %s11324_s14 }
  0xae   : > { %p7393_p11 = pnand %p7391_p5, %p7928_p9 }
  0xb0   : > { %p7394_p12 = pneg %p7393_p11 }
  0xb2   : > { %p7399_p0 = pnand %p7397_p13, %p7394_p12 }
  0xb4   : > { %7402 = shalt.err (!%p7399_p0)
}
  0xb5   : > { %s7403_s25 = scalar_lea.vmem %s581_s21, 128  ;;  %p7411_p10 = scmp.lt.s32.totalorder %s581_s21, %s581_s21 }
  0xb6   : > { %p7404_p2 = scmp.ne.s32.totalorder %s581_s21, %s7403_s25  ;;  %p7412_p3 = scmp.lt.s32.totalorder %s7403_s25, %s7403_s25 }
  0xb8   : > { %p7406_p6 = pnand %p7404_p2, %p7928_p9  ;;  %p7413_p1 = por %p7412_p3, %p7411_p10 }
  0xba   : > { %p7407_p8 = pneg %p7406_p6 }
  0xbc   : > { %p7414_p4 = pnand %p7413_p1, %p7407_p8 }
  0xbe   : > { %7417 = shalt.err (!%p7414_p4)
}
  0xbf   : > { %6486 = dma.hbm_to_vmem [thread:$0]  (!%p7914_p7), %s11324_s14, 128, %s581_s21, [#allocation14]  }
  0xc0   : > { %s11325_s7 = sld [smem:[#allocation129_spill]] }
  0xc6   : > { %s7418_s17 = scalar_lea.hbm %s11325_s7, 3072 }
  0xc7   : > { %p7419_p5 = scmp.ne.s32.totalorder %s11325_s7, %s7418_s17  ;;  %p7425_p13 = scmp.lt.u32.totalorder %s7418_s17, %s11325_s7 }
  0xc9   : > { %p7421_p11 = pnand %p7419_p5, %p7928_p9 }
  0xcb   : > { %p7422_p12 = pneg %p7421_p11 }
  0xcd   : > { %p7427_p0 = pnand %p7425_p13, %p7422_p12 }
  0xcf   : > { %7430 = shalt.err (!%p7427_p0)
}
  0xd0   : > { %s7431_s18 = scalar_lea.vmem %s605_s6, 3072  ;;  %p7439_p10 = scmp.lt.s32.totalorder %s605_s6, %s605_s6 }
  0xd1   : > { %p7432_p2 = scmp.ne.s32.totalorder %s605_s6, %s7431_s18  ;;  %p7440_p3 = scmp.lt.s32.totalorder %s7431_s18, %s7431_s18 }
  0xd3   : > { %p7434_p6 = pnand %p7432_p2, %p7928_p9  ;;  %p7441_p1 = por %p7440_p3, %p7439_p10 }
  0xd5   : > { %p7435_p8 = pneg %p7434_p6 }
  0xd7   : > { %p7442_p4 = pnand %p7441_p1, %p7435_p8 }
  0xd9   : > { %7445 = shalt.err (!%p7442_p4)
}
  0xda   : > { %s7743_s21 = smov 192   ;;  %s7744_s25 = smov 12  }
  0xdb   : > { %6492 = dma.hbm_to_vmem [thread:$0]  (!%p7914_p7), %s11325_s7, 3072, %s605_s6, [#allocation17], %s7743_s21, %s7743_s21, %s7744_s25  }
  0xdc   : > { %s7745_s9 = smov [#allocation21]   ;;  %s7746_s17 = smov [#allocation24]  }
  0xdd   : > { %s636_s27 = sshll.u32 %s7745_s9, 4  ;;  %s671_s2 = sshll.u32 %s7746_s17, 4  ;;  %s637_s27 = int_to_ptr.vmem [resolvable:$true] %s636_s27  ;;  %s672_s2 = int_to_ptr.vmem [resolvable:$true] %s671_s2 }
  0xde   : > { %s7446_s24 = scalar_lea.hbm %s11201_s11, 4096 }
  0xdf   : > { %p7447_p5 = scmp.ne.s32.totalorder %s11201_s11, %s7446_s24  ;;  %p7453_p13 = scmp.lt.u32.totalorder %s7446_s24, %s11201_s11 }
  0xe1   : > { %p7449_p11 = pnand %p7447_p5, %p7928_p9 }
  0xe3   : > { %p7450_p12 = pneg %p7449_p11 }
  0xe5   : > { %p7455_p0 = pnand %p7453_p13, %p7450_p12 }
  0xe7   : > { %7458 = shalt.err (!%p7455_p0)
}
  0xe8   : > { %s7459_s6 = scalar_lea.vmem %s637_s27, 4096  ;;  %p7467_p10 = scmp.lt.s32.totalorder %s637_s27, %s637_s27 }
  0xe9   : > { %p7460_p2 = scmp.ne.s32.totalorder %s637_s27, %s7459_s6  ;;  %p7468_p3 = scmp.lt.s32.totalorder %s7459_s6, %s7459_s6 }
  0xeb   : > { %p7462_p6 = pnand %p7460_p2, %p7928_p9  ;;  %p7469_p1 = por %p7468_p3, %p7467_p10 }
  0xed   : > { %p7463_p8 = pneg %p7462_p6 }
  0xef   : > { %p7470_p4 = pnand %p7469_p1, %p7463_p8 }
  0xf1   : > { %7473 = shalt.err (!%p7470_p4)
}
  0xf2   : > { %s11326_s14 = smov 8   ;;  %s11327_s21 = smov 128  }
  0xf3   : > { %6498 = dma.hbm_to_vmem [thread:$0]  (!%p7914_p7), %s11201_s11, 4096, %s637_s27, [#allocation20], %s11327_s21, %s11327_s21, %s11326_s14  }
  0xf4   : > { %s7474_s4 = scalar_lea.hbm %s11206_s16, 1024 }
  0xf5   : > { %p7475_p5 = scmp.ne.s32.totalorder %s11206_s16, %s7474_s4  ;;  %p7481_p13 = scmp.lt.u32.totalorder %s7474_s4, %s11206_s16 }
  0xf7   : > { %p7477_p11 = pnand %p7475_p5, %p7928_p9 }
  0xf9   : > { %p7478_p12 = pneg %p7477_p11 }
  0xfb   : > { %p7483_p0 = pnand %p7481_p13, %p7478_p12 }
  0xfd   : > { %7486 = shalt.err (!%p7483_p0)
}
  0xfe   : > { %s7487_s24 = scalar_lea.vmem %s672_s2, 1024  ;;  %p7495_p10 = scmp.lt.s32.totalorder %s672_s2, %s672_s2 }
  0xff   : > { %p7488_p2 = scmp.ne.s32.totalorder %s672_s2, %s7487_s24  ;;  %p7496_p3 = scmp.lt.s32.totalorder %s7487_s24, %s7487_s24 }
 0x101   : > { %p7490_p6 = pnand %p7488_p2, %p7928_p9  ;;  %p7497_p1 = por %p7496_p3, %p7495_p10 }
 0x103   : > { %p7491_p8 = pneg %p7490_p6 }
 0x105   : > { %p7498_p4 = pnand %p7497_p1, %p7491_p8 }
 0x107   : > { %7501 = shalt.err (!%p7498_p4)
}
 0x108   : > { %s7747_s27 = smov 64   ;;  %s7748_s5 = smov 4  }
 0x109   : > { %6504 = dma.hbm_to_vmem [thread:$0]  (!%p7914_p7), %s11206_s16, 1024, %s672_s2, [#allocation23], %s7747_s27, %s7747_s27, %s7748_s5  }
 0x10a   : > { %s5745_s15 = sadd.s32 4294967294, %s7730_s30   ;;  %s8105_s22 = sadd.s32 1, %s7730_s30  }
 0x10b   : > { %s74_s25 = sadd.s32 1, %s7726_s29  ;;  %s71_s19 = ssub.s32 %s7730_s30, %s8105_s22 }
 0x10c   : > { %p81_p9 = scmp.ne.s32.totalorder %s7726_s29, %s7722_s28  ;;  %p72_p5 = scmp.eq.s32.totalorder %s71_s19, 0 }
 0x10d   : > { %p82_p11 = scmp.eq.s32.totalorder %s7730_s30, 0  ;;  %p87_p12 = scmp.ne.s32.totalorder %s7722_s28, %s7718_s3 }
 0x10e   : > { %p11233_p13 = scmp.eq.s32.totalorder %s7897_s23, 1  ;;  %p11328_p2 = scmp.eq.s32.totalorder %s7897_s23, 0 }
 0x10f   : > { %s8117_s4 = scalar_select %p72_p5, %s7726_s29, %s74_s25  }
 0x110   : > { %p83_p0 = por %p82_p11, %p81_p9  ;;  %p8121_p6 = por %p11328_p2, %p87_p12 }
 0x111   : > { %p8127_p7 = por %p11233_p13, %p81_p9  ;;  %p453_p8 = scmp.eq.s32.totalorder %s5745_s15, 1 }
 0x112   : > { %p6522_p10 = scmp.lt.s32.totalorder %s7730_s30, 2  ;;  %s688_s9 = sand.u32 1, %s7726_s29  }
 0x113   : > { %s11330_s2 = scalar_select %p8127_p7, 1, 0 }
 0x114   : > { %p8133_p3 = por %p453_p8, %p87_p12  ;;  %s5757_s0 = sshll.u32 %s688_s9, 7 }
 0x115   : > { %s6003_s20 = sshll.u32 %s7730_s30, 11  ;;  %s11332_s5 = sld [smem:[#allocation123_spill]] }
 0x116   : > { %s11331_s17 = scalar_select %p8133_p3, 1, 0 }
 0x117   : > { %s692_s6 = scalar_lea.vmem [#allocation12], %s5757_s0  ;;  %p8143_p1 = pnand %p6522_p10, %p83_p0 }
 0x118   : > { %s699_s25 = sshll.u32 %s692_s6, 4  ;;  %s8149_s19 = scalar_lea.sflag [#allocation9], %s688_s9  ;;  %s8147_s25 = int_to_ptr.vmem [resolvable:$true] %s699_s25 }
 0x119   : > { %p7504_p9 = pneg %p8143_p1 }
 0x11b   : > { %s8141_s18 = scalar_lea.hbm %s11332_s5, %s6003_s20  ;;  %s7507_s24 = scalar_lea.hbm %s11332_s5, 4096 }
 0x11c   : > { %s7502_s7 = scalar_lea.hbm %s8141_s18, 2048  ;;  %p7508_p12 = scmp.lt.u32.totalorder %s8141_s18, %s11332_s5 }
 0x11d   : > { %p7503_p4 = scmp.ne.s32.totalorder %s8141_s18, %s7502_s7  ;;  %p7509_p0 = scmp.lt.u32.totalorder %s7507_s24, %s7502_s7 }
 0x11e   : > { %p7511_p8 = scmp.lt.u32.totalorder %s7502_s7, %s8141_s18 }
 0x11f   : > { %p7505_p5 = pnand %p7504_p9, %p7503_p4  ;;  %p7510_p2 = por %p7509_p0, %p7508_p12 }
 0x121   : > { %p7506_p11 = pneg %p7505_p5  ;;  %p7512_p10 = por %p7511_p8, %p7510_p2 }
 0x123   : > { %p7513_p13 = pnand %p7512_p10, %p7506_p11 }
 0x125   : > { %7516 = shalt.err (!%p7513_p13)
}
 0x126   : > { %s7517_s9 = scalar_lea.vmem %s8147_s25, 2048  ;;  %s7749_s0 = smov [#allocation12]  }
 0x127   : > { %p7518_p4 = scmp.ne.s32.totalorder %s8147_s25, %s7517_s9  ;;  %s7522_s20 = sshll.u32 %s7749_s0, 4  ;;  %s7523_s20 = int_to_ptr.vmem [resolvable:$false] %s7522_s20 }
 0x128   : > { %s7524_s27 = scalar_lea.vmem %s7523_s20, 4096  ;;  %p7525_p7 = scmp.lt.s32.totalorder %s8147_s25, %s7523_s20 }
 0x129   : > { %p7520_p5 = pnand %p7518_p4, %p7504_p9  ;;  %p7526_p12 = scmp.lt.s32.totalorder %s7524_s27, %s7517_s9 }
 0x12b   : > { %p7521_p3 = pneg %p7520_p5  ;;  %p7527_p0 = por %p7526_p12, %p7525_p7 }
 0x12d   : > { %p7528_p2 = pnand %p7527_p0, %p7521_p3 }
 0x12f   : > { %7531 = shalt.err (!%p7528_p2)
}
 0x130   : > { %6508 = dma.hbm_to_vmem [thread:$0]  (!%p8143_p1), %s8141_s18, 2048, %s8147_s25, %s8149_s19, %s11327_s21, %s11327_s21, %s11326_s14  }
 0x131   : > { %p11334_p13 = scmp.ne.s32.totalorder %s11316_s1, 0 }
 0x133   : > { %711 = sbr.rel (%p11334_p13) target bundleno = 2446 (0x98e), region = 92 }
 0x13a   : > { %p11335_p9 = scmp.eq.s32.totalorder %s7897_s23, 0 }
 0x13c   : > { %7681 = dma.done.wait (%p11335_p9), [#allocation11], 16   ;;  %p11336_p11 = pmov %p11335_p9 }
 0x13d   : > { %s8187_s7 = sand.u32 1, %s7722_s28  }
 0x13e   : > { %7683 = vsyncadd (%p11336_p11), [#allocation11], 4294967280  ;;  %s5762_s15 = sshll.u32 %s8187_s7, 7  ;;  %s718_s24 = scalar_lea.sflag [#allocation9], %s8187_s7 }
 0x13f   : > { %s8191_s6 = scalar_lea.vmem [#allocation12], %s5762_s15 }
 0x140   : > { %7685 = dma.done.wait (%p8121_p6), %s718_s24, 2048  }
 0x141   : > { %7687 = vsyncadd (%p8121_p6), %s718_s24, 4294965248  ;;  %p11337_p7 = pmov %p11335_p9 }
 0x143   : > { %7689 = dma.done.wait (%p11337_p7), [#allocation14], 256   ;;  %p11338_p3 = pmov %p11337_p7 }
 0x145   : > { %7691 = vsyncadd (%p11338_p3), [#allocation14], 4294967040  ;;  %p11339_p1 = pmov %p11338_p3 }
 0x147   : > { %7693 = dma.done.wait (%p11339_p1), [#allocation17], 3088   ;;  %p11340_p8 = pmov %p11339_p1 }
 0x148   : > { %p11341_p10 = pmov %p11339_p1 }
 0x149   : > { %7695 = vsyncadd (%p11340_p8), [#allocation17], 4294964208 }
 0x14a   : > { %7697 = dma.done.wait (%p11341_p10), [#allocation20], 14336   ;;  %p11342_p4 = pmov %p11339_p1 }
 0x14b   : > { %p11343_p6 = pmov %p11339_p1 }
 0x14c   : > { %7699 = vsyncadd (%p11342_p4), [#allocation20], 4294952960 }
 0x14d   : > { %7701 = dma.done.wait (%p11343_p6), [#allocation23], 3072   ;;  %p11344_p5 = pmov %p11339_p1 }
 0x14f   : > { %7703 = vsyncadd (%p11344_p5), [#allocation23], 4294964224 }
 0x150   : > { %758 = sfence }
 0x151   : > { %s8213_s1 = scalar_lea.vmem [#allocation25], %s5762_s15  ;;  %p11345_p12 = scmp.ne.s32.totalorder %s7897_s23, 0 }
 0x152   : > { %v822_v0 = vld [vmem:[#allocation13] sm:$0xff] (!%p11345_p12)  ;;  %s11346_s26 = sld [smem:[#allocation125_spill]] (!%p11345_p12)  ;;  %v826_v2 = vld [vmem:[#allocation15] sm:$0xff] (!%p11345_p12) }
 0x153   : > { %821 = sbr.rel (%p11345_p12) target bundleno = 346 (0x15a), region = 136  ;;  %823 = vst [vmem:[#allocation5] sm:$0xff] (!%p11345_p12), %v822_v0  ;;  %827 = vst [vmem:[#allocation7] sm:$0xff] (!%p11345_p12), %v826_v2 }
 0x158   : > { %v824_v1 = vld [vmem:[%s11346_s26] sm:$0xff] (!%p11345_p12) }
 0x159   : > { %825 = vst [vmem:[#allocation6] sm:$0xff] (!%p11345_p12), %v824_v1 }
 0x15a PF: > { %v828_v3 = vld [vmem:[%s8191_s6] sm:$0xff]  ;;  %v830_v4 = vld [vmem:[%s8191_s6 + $0x10] sm:$0xff]  ;;  %v829_v5 = vld [vmem:[%s8191_s6 + $0x8] sm:$0xff]  ;;  %s11347_s19 = sld [smem:[#allocation128_spill]]  ;;  %s11350_s8 = sld [smem:[#allocation130_spill]] }
 0x15b   : > { %844 = vadd.xlane.f32.xlu0 %v828_v3  ;;  %848 = vadd.xlane.f32.xlu1 %v830_v4  ;;  %v831_v6 = vld [vmem:[%s8191_s6 + $0x18] sm:$0xff]  ;;  %v832_v7 = vld [vmem:[%s8191_s6 + $0x20] sm:$0xff]  ;;  %v833_v8 = vld [vmem:[%s8191_s6 + $0x28] sm:$0xff]  ;;  %s7751_s20 = smov 1   ;;  %s7752_s27 = smov 2  }
 0x15c   : > { %v8227_v9 = vld [vmem:[%s8191_s6 + $0x30] sm:$0xff]  ;;  %v8230_v10 = vld [vmem:[%s8191_s6 + $0x38] sm:$0xff]  ;;  %v8233_v11 = vld [vmem:[%s8191_s6 + $0x40] sm:$0xff]  ;;  %s7753_s15 = smov 3   ;;  %s8493_s24 = sld [smem:[#allocation8 + $0x3]] }
 0x15d   : > { %v8236_v12 = vld [vmem:[%s8191_s6 + $0x48] sm:$0xff]  ;;  %v8241_v13 = vld [vmem:[%s8191_s6 + $0x50] sm:$0xff]  ;;  %v8244_v14 = vld [vmem:[%s8191_s6 + $0x58] sm:$0xff]  ;;  %s8504_s14 = sld [smem:[#allocation8 + $0x4]]  ;;  %s5801_s21 = sld [smem:[#allocation8 + $0x2]] }
 0x15e   : > { %v8249_v15 = vld [vmem:[%s8191_s6 + $0x60] sm:$0xff]  ;;  %v8252_v16 = vld [vmem:[%s8191_s6 + $0x68] sm:$0xff]  ;;  %v8257_v17 = vld [vmem:[%s8191_s6 + $0x70] sm:$0xff]  ;;  %s5802_s26 = sld [smem:[#allocation8 + $0x1]]  ;;  %s2058_s18 = sld [smem:[#allocation8]] }
 0x15f   : > { %846 = vadd.xlane.f32.xlu0 %v829_v5  ;;  %850 = vadd.xlane.f32.xlu1 %v831_v6  ;;  %v8260_v18 = vld [vmem:[%s8191_s6 + $0x78] sm:$0xff]  ;;  %p11626_p2 = scmp.eq.s32.totalorder %s7897_s23, 1 }
 0x160   : > { %v6600_v19 = vld [vmem:[#allocation18 + $0x4] ss:$12 sps:$4 sm:$0xff]   ;;  %v6602_v20 = vld [vmem:[#allocation18] ss:$12 sps:$4 sm:$0xff]   ;;  %v6603_v21 = vld [vmem:[#allocation18 + $0x1c] ss:$12 sps:$4 sm:$0xff]  }
 0x161   : > { %v6605_v22 = vld [vmem:[#allocation18 + $0x8] ss:$12 sps:$4 sm:$0xff]   ;;  %1252 = vmatprep.subr.bf16.mxu0 %v6600_v19  ;;  %v6606_v61 = vld [vmem:[#allocation18 + $0x18] ss:$12 sps:$4 sm:$0xff]  }
 0x162   : > { %1253 = vmatpush1.bf16.msra.mxu0 %v6602_v20  ;;  %6165 = vmatprep.subr.bf16.mxu1 %v6605_v22 }
 0x163   : > { %852 = vadd.xlane.f32.xlu0 %v832_v7  ;;  %854 = vadd.xlane.f32.xlu1 %v833_v8 }
 0x164   : > { %1254 = vmatprep.subr.bf16.mxu0 %v6603_v21  ;;  %6166 = vmatpush3.bf16.msra.mxu1 %v6605_v22  ;;  %v6611_v21 = vld [vmem:[#allocation18 + $0x4c] ss:$12 sps:$4 sm:$0xff]  }
 0x165   : > { %v6613_v22 = vld [vmem:[#allocation18 + $0x38] ss:$12 sps:$4 sm:$0xff]  }
 0x166   : > { %1255 = vmatpush1.bf16.msra.mxu0 %v6606_v61 }
 0x167   : > { %856 = vadd.xlane.f32.xlu0 %v8227_v9  ;;  %858 = vadd.xlane.f32.xlu1 %v8230_v10 }
 0x16b   : > { %860 = vadd.xlane.f32.xlu0 %v8233_v11  ;;  %862 = vadd.xlane.f32.xlu1 %v8236_v12 }
 0x16f   : > { %864 = vadd.xlane.f32.xlu0 %v8241_v13  ;;  %866 = vadd.xlane.f32.xlu1 %v8244_v14 }
 0x173   : > { %868 = vadd.xlane.f32.xlu0 %v8249_v15  ;;  %870 = vadd.xlane.f32.xlu1 %v8252_v16 }
 0x177   : > { %872 = vadd.xlane.f32.xlu0 %v8257_v17  ;;  %874 = vadd.xlane.f32.xlu1 %v8260_v18 }
 0x1e8   : > { %v845_v23 = vpop.xlane.xlu0 %844  ;;  %v849_v24 = vpop.xlane.xlu1 %848 }
 0x1e9   : > { %v877_v25 = vmul.f32 0.0078125, %v845_v23  ;;  %v879_v26 = vmul.f32 0.0078125, %v849_v24 }
 0x1eb   : > { %v8266_v27 = vsub.f32 %v828_v3, %v877_v25  ;;  %v8268_v28 = vsub.f32 %v830_v4, %v879_v26  ;;  %v6607_v3 = vld [vmem:[#allocation18 + $0x34] ss:$12 sps:$4 sm:$0xff]  }
 0x1ec   : > { %v847_v29 = vpop.xlane.xlu0 %846  ;;  %v851_v30 = vpop.xlane.xlu1 %850  ;;  %v6609_v4 = vld [vmem:[#allocation18 + $0x20] ss:$12 sps:$4 sm:$0xff]   ;;  %1256 = vmatprep.subr.bf16.mxu0 %v6607_v3  ;;  %v6614_v25 = vld [vmem:[#allocation18 + $0x48] ss:$12 sps:$4 sm:$0xff]  }
 0x1ed   : > { %v878_v31 = vmul.f32 0.0078125, %v847_v29  ;;  %v909_v32 = vmul.f32 %v8266_v27, %v8266_v27  ;;  %v880_v33 = vmul.f32 0.0078125, %v851_v30  ;;  %v911_v34 = vmul.f32 %v8268_v28, %v8268_v28  ;;  %6167 = vmatprep.subr.bf16.mxu1 %v6609_v4 }
 0x1ee   : > { %6168 = vmatpush3.bf16.msra.mxu1 %v6609_v4 }
 0x1ef   : > { %925 = vadd.xlane.f32.xlu0 %v909_v32  ;;  %v8274_v35 = vsub.f32 %v829_v5, %v878_v31  ;;  %v8276_v36 = vsub.f32 %v831_v6, %v880_v33  ;;  %6169 = vmatprep.subr.bf16.mxu1 %v6613_v22  ;;  %v6615_v32 = vld [vmem:[#allocation18 + $0x64] ss:$12 sps:$4 sm:$0xff]  }
 0x1f0   : > { %v853_v37 = vpop.xlane.xlu0 %852  ;;  %v855_v38 = vpop.xlane.xlu1 %854  ;;  %v6617_v33 = vld [vmem:[#allocation18 + $0x50] ss:$12 sps:$4 sm:$0xff]  }
 0x1f1   : > { %v881_v39 = vmul.f32 0.0078125, %v853_v37  ;;  %v910_v40 = vmul.f32 %v8274_v35, %v8274_v35  ;;  %v882_v41 = vmul.f32 0.0078125, %v855_v38  ;;  %v912_v42 = vmul.f32 %v8276_v36, %v8276_v36 }
 0x1f2   : > { %6170 = vmatpush3.bf16.msra.mxu1 %v6613_v22 }
 0x1f3   : > { %929 = vadd.xlane.f32.xlu0 %v911_v34  ;;  %927 = vadd.xlane.f32.xlu1 %v910_v40  ;;  %v8282_v43 = vsub.f32 %v832_v7, %v881_v39  ;;  %v8284_v44 = vsub.f32 %v833_v8, %v882_v41  ;;  %v6618_v34 = vld [vmem:[#allocation18 + $0x60] ss:$12 sps:$4 sm:$0xff]   ;;  %v6621_v39 = vld [vmem:[#allocation18 + $0x68] ss:$12 sps:$4 sm:$0xff]   ;;  %v6622_v40 = vld [vmem:[#allocation18 + $0x78] ss:$12 sps:$4 sm:$0xff]  }
 0x1f4   : > { %v857_v45 = vpop.xlane.xlu0 %856  ;;  %v859_v46 = vpop.xlane.xlu1 %858  ;;  %6171 = vmatprep.subr.bf16.mxu1 %v6617_v33  ;;  %v6625_v41 = vld [vmem:[#allocation18 + $0x80] ss:$12 sps:$4 sm:$0xff]  }
 0x1f5   : > { %v883_v47 = vmul.f32 0.0078125, %v857_v45  ;;  %v913_v48 = vmul.f32 %v8282_v43, %v8282_v43  ;;  %v884_v49 = vmul.f32 0.0078125, %v859_v46  ;;  %v914_v50 = vmul.f32 %v8284_v44, %v8284_v44  ;;  %v6627_v45 = vld [vmem:[#allocation18 + $0xac] ss:$12 sps:$4 sm:$0xff]  }
 0x1f6   : > { %6172 = vmatpush3.bf16.msra.mxu1 %v6617_v33  ;;  %v6629_v46 = vld [vmem:[#allocation18 + $0x98] ss:$12 sps:$4 sm:$0xff]  }
 0x1f7   : > { %931 = vadd.xlane.f32.xlu1 %v912_v42  ;;  %933 = vadd.xlane.f32.xlu0 %v913_v48  ;;  %v8291_v51 = vsub.f32 %v8227_v9, %v883_v47  ;;  %v8294_v52 = vsub.f32 %v8230_v10, %v884_v49  ;;  %v6610_v10 = vld [vmem:[#allocation18 + $0x30] ss:$12 sps:$4 sm:$0xff]   ;;  %v6630_v47 = vld [vmem:[#allocation18 + $0xa8] ss:$12 sps:$4 sm:$0xff]   ;;  %v7750_v49 = vmov 0  }
 0x1f8   : > { %v861_v53 = vpop.xlane.xlu0 %860  ;;  %v863_v54 = vpop.xlane.xlu1 %862  ;;  %1257 = vmatpush1.bf16.msra.mxu0 %v6610_v10  ;;  %6173 = vmatprep.subr.bf16.mxu1 %v6621_v39  ;;  %v6626_v42 = vld [vmem:[#allocation18 + $0x90] ss:$12 sps:$4 sm:$0xff]  }
 0x1f9   : > { %v885_v55 = vmul.f32 0.0078125, %v861_v53  ;;  %v915_v56 = vmul.f32 %v8291_v51, %v8291_v51  ;;  %v886_v57 = vmul.f32 0.0078125, %v863_v54  ;;  %v916_v58 = vmul.f32 %v8294_v52, %v8294_v52  ;;  %1258 = vmatprep.subr.bf16.mxu0 %v6611_v21  ;;  %v6631_v48 = vld [vmem:[#allocation18 + $0xb0] ss:$12 sps:$4 sm:$0xff]   ;;  %1284 = vmatprep.mubr.bf16.mxu0 %v7750_v49 }
 0x1fa   : > { %6174 = vmatpush3.bf16.msra.mxu1 %v6621_v39 }
 0x1fb   : > { %935 = vadd.xlane.f32.xlu1 %v914_v50  ;;  %937 = vadd.xlane.f32.xlu0 %v915_v56  ;;  %v8301_v59 = vsub.f32 %v8233_v11, %v885_v55  ;;  %v8304_v60 = vsub.f32 %v8236_v12, %v886_v57 }
 0x1fc   : > { %v865_v62 = vpop.xlane.xlu0 %864  ;;  %v867_v63 = vpop.xlane.xlu1 %866  ;;  %1259 = vmatpush1.bf16.msra.mxu0 %v6614_v25  ;;  %6175 = vmatprep.subr.bf16.mxu1 %v6625_v41  ;;  %v8342_v25 = vld [vmem:[#allocation16] ss:$0 sm:$0xff] }
 0x1fd   : > { %v887_v0 = vmul.f32 0.0078125, %v865_v62  ;;  %v917_v1 = vmul.f32 %v8301_v59, %v8301_v59  ;;  %v888_v2 = vmul.f32 0.0078125, %v867_v63  ;;  %v918_v5 = vmul.f32 %v8304_v60, %v8304_v60  ;;  %1260 = vmatprep.subr.bf16.mxu0 %v6615_v32 }
 0x1fe   : > { %6176 = vmatpush3.bf16.msra.mxu1 %v6625_v41 }
 0x1ff   : > { %939 = vadd.xlane.f32.xlu1 %v916_v58  ;;  %941 = vadd.xlane.f32.xlu0 %v917_v1  ;;  %v8311_v6 = vsub.f32 %v8241_v13, %v887_v0  ;;  %v8314_v7 = vsub.f32 %v8244_v14, %v888_v2 }
 0x200   : > { %v869_v8 = vpop.xlane.xlu0 %868  ;;  %v871_v9 = vpop.xlane.xlu1 %870  ;;  %1261 = vmatpush1.bf16.msra.mxu0 %v6618_v34  ;;  %6177 = vmatprep.subr.bf16.mxu1 %v6629_v46 }
 0x201   : > { %v889_v11 = vmul.f32 0.0078125, %v869_v8  ;;  %v919_v12 = vmul.f32 %v8311_v6, %v8311_v6  ;;  %v890_v19 = vmul.f32 0.0078125, %v871_v9  ;;  %v920_v13 = vmul.f32 %v8314_v7, %v8314_v7 }
 0x202   : > { %6178 = vmatpush3.bf16.msra.mxu1 %v6629_v46 }
 0x203   : > { %943 = vadd.xlane.f32.xlu1 %v918_v5  ;;  %945 = vadd.xlane.f32.xlu0 %v919_v12  ;;  %v8321_v14 = vsub.f32 %v8249_v15, %v889_v11  ;;  %v8324_v20 = vsub.f32 %v8252_v16, %v890_v19 }
 0x204   : > { %v873_v23 = vpop.xlane.xlu0 %872  ;;  %v875_v24 = vpop.xlane.xlu1 %874  ;;  %6179 = vmatprep.subr.bf16.mxu1 %v6631_v48 }
 0x205   : > { %v891_v26 = vmul.f32 0.0078125, %v873_v23  ;;  %v921_v29 = vmul.f32 %v8321_v14, %v8321_v14  ;;  %v892_v30 = vmul.f32 0.0078125, %v875_v24  ;;  %v922_v15 = vmul.f32 %v8324_v20, %v8324_v20 }
 0x206   : > { %6180 = vmatpush3.bf16.msra.mxu1 %v6631_v48 }
 0x207   : > { %947 = vadd.xlane.f32.xlu1 %v920_v13  ;;  %949 = vadd.xlane.f32.xlu0 %v921_v29  ;;  %v8331_v16 = vsub.f32 %v8257_v17, %v891_v26  ;;  %v8334_v31 = vsub.f32 %v8260_v18, %v892_v30  ;;  %v6619_v17 = vld [vmem:[#allocation18 + $0x7c] ss:$12 sps:$4 sm:$0xff]   ;;  %v6623_v18 = vld [vmem:[#allocation18 + $0x94] ss:$12 sps:$4 sm:$0xff]  }
 0x208   : > { %1262 = vmatprep.subr.bf16.mxu0 %v6619_v17 }
 0x209   : > { %v923_v37 = vmul.f32 %v8331_v16, %v8331_v16  ;;  %v924_v38 = vmul.f32 %v8334_v31, %v8334_v31  ;;  %1263 = vmatpush1.bf16.msra.mxu0 %v6622_v40 }
 0x20a   : > { %1264 = vmatprep.subr.bf16.mxu0 %v6623_v18 }
 0x20b   : > { %951 = vadd.xlane.f32.xlu1 %v922_v15  ;;  %953 = vadd.xlane.f32.xlu0 %v923_v37 }
 0x20d   : > { %1265 = vmatpush1.bf16.msra.mxu0 %v6626_v42 }
 0x20e   : > { %1266 = vmatprep.subr.bf16.mxu0 %v6627_v45 }
 0x20f   : > { %955 = vadd.xlane.f32.xlu1 %v924_v38 }
 0x211   : > { %1267 = vmatpush1.bf16.msra.mxu0 %v6630_v47 }
 0x27c   : > { %v926_v50 = vpop.xlane.xlu0 %925 }
 0x27d   : > { %v957_v53 = vmul.f32 0.0078125, %v926_v50 }
 0x27f   : > { %v973_v54 = vadd.f32 1e-05, %v957_v53 }
 0x280   : > { %v928_v55 = vpop.xlane.xlu1 %927  ;;  %v930_v56 = vpop.xlane.xlu0 %929 }
 0x281   : > { %6800 = vrsqrt.f32 %v973_v54  ;;  %v958_v57 = vmul.f32 0.0078125, %v928_v55  ;;  %v959_v58 = vmul.f32 0.0078125, %v930_v56 }
 0x283   : > { %v974_v61 = vadd.f32 1e-05, %v958_v57  ;;  %v975_v62 = vadd.f32 1e-05, %v959_v58 }
 0x284   : > { %v932_v63 = vpop.xlane.xlu1 %931  ;;  %v934_v0 = vpop.xlane.xlu0 %933 }
 0x285   : > { %6802 = vrsqrt.f32 %v974_v61  ;;  %v960_v1 = vmul.f32 0.0078125, %v932_v63  ;;  %v961_v2 = vmul.f32 0.0078125, %v934_v0 }
 0x286   : > { %6804 = vrsqrt.f32 %v975_v62 }
 0x287   : > { %v976_v3 = vadd.f32 1e-05, %v960_v1  ;;  %v977_v4 = vadd.f32 1e-05, %v961_v2 }
 0x288   : > { %v936_v5 = vpop.xlane.xlu1 %935  ;;  %v938_v8 = vpop.xlane.xlu0 %937 }
 0x289   : > { %6806 = vrsqrt.f32 %v976_v3  ;;  %v962_v9 = vmul.f32 0.0078125, %v936_v5  ;;  %v963_v10 = vmul.f32 0.0078125, %v938_v8 }
 0x28a   : > { %6808 = vrsqrt.f32 %v977_v4 }
 0x28b   : > { %v6801_v11 = vpop.eup %6800  ;;  %v978_v12 = vadd.f32 1e-05, %v962_v9  ;;  %v979_v19 = vadd.f32 1e-05, %v963_v10 }
 0x28c   : > { %v940_v13 = vpop.xlane.xlu1 %939  ;;  %v942_v21 = vpop.xlane.xlu0 %941  ;;  %v1005_v22 = vmul.f32 %v6801_v11, %v8266_v27  ;;  %v8349_v27 = vld [vmem:[%s11347_s19] ss:$0 sm:$0xff]  ;;  %s7755_s19 = smov [#allocation29]  }
 0x28d   : > { %6810 = vrsqrt.f32 %v978_v12  ;;  %v964_v23 = vmul.f32 0.0078125, %v940_v13  ;;  %v965_v24 = vmul.f32 0.0078125, %v942_v21  ;;  %s5504_s9 = sshll.u32 %s7755_s19, 4  ;;  %s10999_s9 = int_to_ptr.vmem [resolvable:$true] %s5504_s9 }
 0x28e   : > { %6812 = vrsqrt.f32 %v979_v19  ;;  %v1028_v37 = vmul.f32 %v8342_v25, %v1005_v22 }
 0x28f   : > { %v6803_v26 = vpop.eup %6802  ;;  %v980_v29 = vadd.f32 1e-05, %v964_v23  ;;  %v981_v30 = vadd.f32 1e-05, %v965_v24 }
 0x290   : > { %v6805_v15 = vpop.eup %6804  ;;  %v944_v32 = vpop.xlane.xlu1 %943  ;;  %v1006_v34 = vmul.f32 %v6803_v26, %v8274_v35  ;;  %v1051_v48 = vadd.f32 %v8349_v27, %v1028_v37 }
 0x291   : > { %v946_v33 = vpop.xlane.xlu0 %945  ;;  %6814 = vrsqrt.f32 %v980_v29  ;;  %v966_v38 = vmul.f32 0.0078125, %v944_v32  ;;  %v1007_v39 = vmul.f32 %v6805_v15, %v8268_v28 }
 0x292   : > { %v967_v17 = vmul.f32 0.0078125, %v946_v33  ;;  %6816 = vrsqrt.f32 %v981_v30  ;;  %v1029_v40 = vmul.f32 %v8342_v25, %v1006_v34 }
 0x293   : > { %v6807_v18 = vpop.eup %6806  ;;  %v982_v41 = vadd.f32 1e-05, %v966_v38  ;;  %v1030_v35 = vmul.f32 %v8342_v25, %v1007_v39 }
 0x294   : > { %v983_v42 = vadd.f32 1e-05, %v967_v17  ;;  %v6809_v45 = vpop.eup %6808  ;;  %v948_v46 = vpop.xlane.xlu1 %947  ;;  %v1052_v50 = vadd.f32 %v8349_v27, %v1029_v40  ;;  %v1008_v53 = vmul.f32 %v6807_v18, %v8276_v36 }
 0x295   : > { %v950_v47 = vpop.xlane.xlu0 %949  ;;  %6818 = vrsqrt.f32 %v982_v41  ;;  %v968_v54 = vmul.f32 0.0078125, %v948_v46  ;;  %v1009_v57 = vmul.f32 %v6809_v45, %v8282_v43  ;;  %v1053_v63 = vadd.f32 %v8349_v27, %v1030_v35 }
 0x296   : > { %v969_v28 = vmul.f32 0.0078125, %v950_v47  ;;  %6820 = vrsqrt.f32 %v983_v42  ;;  %v1067_v55 = vpack.c.bf16 %v1052_v50, %v1051_v48  ;;  %v1031_v56 = vmul.f32 %v8342_v25, %v1008_v53 }
 0x297   : > { %v6811_v58 = vpop.eup %6810  ;;  %v984_v61 = vadd.f32 1e-05, %v968_v54  ;;  %v1032_v4 = vmul.f32 %v8342_v25, %v1009_v57 }
 0x298   : > { %v985_v62 = vadd.f32 1e-05, %v969_v28  ;;  %v6813_v0 = vpop.eup %6812  ;;  %v952_v1 = vpop.xlane.xlu1 %951  ;;  %1285 = vmatmul.mubr.bf16.vlgmr.msra.gmra.mrb[0].mxu0 %v1067_v55  ;;  %6181 = vmatprep.mubr.bf16.mxu1 %v1067_v55  ;;  %v1054_v36 = vadd.f32 %v8349_v27, %v1031_v56  ;;  %v1010_v3 = vmul.f32 %v6811_v58, %v8284_v44 }
 0x299   : > { %v954_v2 = vpop.xlane.xlu0 %953  ;;  %6822 = vrsqrt.f32 %v984_v61  ;;  %v970_v5 = vmul.f32 0.0078125, %v952_v1  ;;  %1294 = vmatprep.mubr.bf16.mxu0 %v7750_v49  ;;  %v1011_v43 = vmul.f32 %v6813_v0, %v8291_v51  ;;  %v1055_v22 = vadd.f32 %v8349_v27, %v1032_v4  ;;  %v6640_v4 = vld [vmem:[#allocation19 + $0x2c] ss:$20 sps:$4 sm:$0xff]  }
 0x29a   : > { %v971_v8 = vmul.f32 0.0078125, %v954_v2  ;;  %6824 = vrsqrt.f32 %v985_v62  ;;  %v1068_v9 = vpack.c.bf16 %v1054_v36, %v1053_v63  ;;  %v1033_v10 = vmul.f32 %v8342_v25, %v1010_v3  ;;  %v6635_v2 = vld [vmem:[#allocation19 + $0x8] ss:$20 sps:$4 sm:$0xff]   ;;  %v6637_v3 = vld [vmem:[#allocation19 + $0xc] ss:$20 sps:$4 sm:$0xff]  }
 0x29b   : > { %v6815_v11 = vpop.eup %6814  ;;  %v986_v12 = vadd.f32 1e-05, %v970_v5  ;;  %v1034_v13 = vmul.f32 %v8342_v25, %v1011_v43  ;;  %v11236_v36 = vlaneseq  ;;  %3016 = vmatprep.subr.bf16.mxu1 %v6637_v3  ;;  %v6638_v5 = vld [vmem:[#allocation19 + $0x28] ss:$20 sps:$4 sm:$0xff]   ;;  %v6677_v3 = vld [vmem:[#allocation19 + $0x120] ss:$20 sps:$4 sm:$0xff]  }
 0x29c   : > { %v987_v19 = vadd.f32 1e-05, %v971_v8  ;;  %v6817_v21 = vpop.eup %6816  ;;  %v956_v44 = vpop.xlane.xlu1 %955  ;;  %6182 = vmatmul.mubr.bf16.vlgmr.msra.gmra.mrb[0].mxu1 %v1068_v9  ;;  %v1056_v23 = vadd.f32 %v8349_v27, %v1033_v10  ;;  %v1012_v24 = vmul.f32 %v6815_v11, %v8294_v52  ;;  %v6641_v8 = vld [vmem:[#allocation19 + $0x30] ss:$20 sps:$4 sm:$0xff]   ;;  %v6643_v43 = vld [vmem:[#allocation19 + $0x34] ss:$20 sps:$4 sm:$0xff]  }
 0x29d   : > { %6826 = vrsqrt.f32 %v986_v12  ;;  %v972_v51 = vmul.f32 0.0078125, %v956_v44  ;;  %v1013_v26 = vmul.f32 %v6817_v21, %v8301_v59  ;;  %v1057_v33 = vadd.f32 %v8349_v27, %v1034_v13  ;;  %3017 = vmatpush1.bf16.msra.mxu1 %v6635_v2  ;;  %v6644_v11 = vld [vmem:[#allocation19 + $0x50] ss:$20 sps:$4 sm:$0xff]   ;;  %v6646_v12 = vld [vmem:[#allocation19 + $0x54] ss:$20 sps:$4 sm:$0xff]  }
 0x29e   : > { %6828 = vrsqrt.f32 %v987_v19  ;;  %v1069_v29 = vpack.c.bf16 %v1056_v23, %v1055_v22  ;;  %v1035_v30 = vmul.f32 %v8342_v25, %v1012_v24  ;;  %3018 = vmatprep.subr.bf16.mxu1 %v6643_v43  ;;  %v6647_v19 = vld [vmem:[#allocation19 + $0x58] ss:$20 sps:$4 sm:$0xff]   ;;  %v6649_v13 = vld [vmem:[#allocation19 + $0x5c] ss:$20 sps:$4 sm:$0xff]   ;;  %v6653_v24 = vld [vmem:[#allocation19 + $0x80] ss:$20 sps:$4 sm:$0xff]  }
 0x29f   : > { %v6819_v15 = vpop.eup %6818  ;;  %v988_v32 = vadd.f32 1e-05, %v972_v51  ;;  %v1036_v52 = vmul.f32 %v8342_v25, %v1013_v26  ;;  %v6650_v22 = vld [vmem:[#allocation19 + $0x78] ss:$20 sps:$4 sm:$0xff]   ;;  %v6652_v23 = vld [vmem:[#allocation19 + $0x7c] ss:$20 sps:$4 sm:$0xff]  }
 0x2a0   : > { %v6821_v34 = vpop.eup %6820  ;;  %1295 = vmatmul.mubr.bf16.gmra.mrb[4].mxu0 %v1068_v9  ;;  %6185 = vmatprep.mubr.bf16.mxu1 %v1069_v29  ;;  %v1058_v37 = vadd.f32 %v8349_v27, %v1035_v30  ;;  %v1014_v38 = vmul.f32 %v6819_v15, %v8304_v60  ;;  %v6655_v51 = vld [vmem:[#allocation19 + $0x84] ss:$20 sps:$4 sm:$0xff]  }
 0x2a1   : > { %6830 = vrsqrt.f32 %v988_v32  ;;  %1304 = vmatprep.mubr.bf16.mxu0 %v7750_v49  ;;  %v1015_v59 = vmul.f32 %v6821_v34, %v8311_v6  ;;  %v1059_v42 = vadd.f32 %v8349_v27, %v1036_v52  ;;  %3019 = vmatpush1.bf16.msra.mxu1 %v6641_v8  ;;  %v6658_v34 = vld [vmem:[#allocation19 + $0xa4] ss:$20 sps:$4 sm:$0xff]  }
 0x2a2   : > { %v1070_v17 = vpack.c.bf16 %v1058_v37, %v1057_v33  ;;  %v1037_v39 = vmul.f32 %v8342_v25, %v1014_v38  ;;  %3020 = vmatprep.subr.bf16.mxu1 %v6649_v13  ;;  %v6661_v37 = vld [vmem:[#allocation19 + $0xac] ss:$20 sps:$4 sm:$0xff]   ;;  %v6682_v43 = vld [vmem:[#allocation19 + $0x144] ss:$20 sps:$4 sm:$0xff]  }
 0x2a3   : > { %v6823_v40 = vpop.eup %6822  ;;  %v1038_v18 = vmul.f32 %v8342_v25, %v1015_v59  ;;  %v6656_v59 = vld [vmem:[#allocation19 + $0xa0] ss:$20 sps:$4 sm:$0xff]  }
 0x2a4   : > { %v6825_v41 = vpop.eup %6824  ;;  %6186 = vmatmul.mubr.bf16.gmra.mrb[4].mxu1 %v1070_v17  ;;  %v1060_v35 = vadd.f32 %v8349_v27, %v1037_v39  ;;  %v1016_v60 = vmul.f32 %v6823_v40, %v8314_v7  ;;  %v6680_v13 = vld [vmem:[#allocation19 + $0x140] ss:$20 sps:$4 sm:$0xff]  }
 0x2a5   : > { %v1017_v45 = vmul.f32 %v6825_v41, %v8321_v14  ;;  %v1061_v48 = vadd.f32 %v8349_v27, %v1038_v18  ;;  %3021 = vmatpush1.bf16.msra.mxu1 %v6647_v19 }
 0x2a6   : > { %v1071_v46 = vpack.c.bf16 %v1060_v35, %v1059_v42  ;;  %v1039_v47 = vmul.f32 %v8342_v25, %v1016_v60  ;;  %3022 = vmatprep.subr.bf16.mxu1 %v6655_v51  ;;  %v6664_v42 = vld [vmem:[#allocation19 + $0xcc] ss:$20 sps:$4 sm:$0xff]  }
 0x2a7   : > { %v6827_v6 = vpop.eup %6826  ;;  %v1040_v28 = vmul.f32 %v8342_v25, %v1017_v45  ;;  %v6662_v45 = vld [vmem:[#allocation19 + $0xc8] ss:$20 sps:$4 sm:$0xff]  }
 0x2a8   : > { %v6829_v50 = vpop.eup %6828  ;;  %1305 = vmatmul.mubr.bf16.gmra.mrb[8].mxu0 %v1069_v29  ;;  %6189 = vmatprep.mubr.bf16.mxu1 %v1071_v46  ;;  %v1062_v53 = vadd.f32 %v8349_v27, %v1039_v47  ;;  %v1018_v54 = vmul.f32 %v6827_v6, %v8324_v20  ;;  %v6665_v47 = vld [vmem:[#allocation19 + $0xd0] ss:$20 sps:$4 sm:$0xff]  }
 0x2a9   : > { %1314 = vmatprep.mubr.bf16.mxu0 %v7750_v49  ;;  %v1019_v7 = vmul.f32 %v6829_v50, %v8331_v16  ;;  %v1063_v57 = vadd.f32 %v8349_v27, %v1040_v28  ;;  %3023 = vmatpush1.bf16.msra.mxu1 %v6653_v24  ;;  %v6667_v50 = vld [vmem:[#allocation19 + $0xd4] ss:$20 sps:$4 sm:$0xff]   ;;  %v6673_v28 = vld [vmem:[#allocation19 + $0xfc] ss:$20 sps:$4 sm:$0xff]  }
 0x2aa   : > { %v1072_v14 = vpack.c.bf16 %v1062_v53, %v1061_v48  ;;  %v1041_v55 = vmul.f32 %v8342_v25, %v1018_v54  ;;  %3024 = vmatprep.subr.bf16.mxu1 %v6661_v37  ;;  %v6670_v54 = vld [vmem:[#allocation19 + $0xf4] ss:$20 sps:$4 sm:$0xff]  }
 0x2ab   : > { %v6831_v56 = vpop.eup %6830  ;;  %v1042_v62 = vmul.f32 %v8342_v25, %v1019_v7 }
 0x2ac   : > { %6190 = vmatmul.mubr.bf16.gmra.mrb[8].mxu1 %v1072_v14  ;;  %v1064_v58 = vadd.f32 %v8349_v27, %v1041_v55  ;;  %v1020_v61 = vmul.f32 %v6831_v56, %v8334_v31  ;;  %v6632_v31 = vld [vmem:[#allocation19] ss:$20 sps:$4 sm:$0xff]   ;;  %v6668_v56 = vld [vmem:[#allocation19 + $0xf0] ss:$20 sps:$4 sm:$0xff]  }
 0x2ad   : > { %v1065_v16 = vadd.f32 %v8349_v27, %v1042_v62 }
 0x2ae   : > { %v1073_v20 = vpack.c.bf16 %v1064_v58, %v1063_v57  ;;  %v1043_v63 = vmul.f32 %v8342_v25, %v1020_v61  ;;  %v6634_v25 = vld [vmem:[#allocation19 + $0x4] ss:$20 sps:$4 sm:$0xff]  }
 0x2af   : > { %2903 = vmatprep.subr.bf16.mxu0 %v6634_v25  ;;  %v6671_v61 = vld [vmem:[#allocation19 + $0xf8] ss:$20 sps:$4 sm:$0xff]   ;;  %v6710_v25 = vld [vmem:[#allocation19 + $0x208] ss:$20 sps:$4 sm:$0xff]  }
 0x2b0   : > { %1315 = vmatmul.mubr.bf16.gmra.mrb[12].mxu0 %v1070_v17  ;;  %6193 = vmatprep.mubr.bf16.mxu1 %v1073_v20  ;;  %v1066_v0 = vadd.f32 %v8349_v27, %v1043_v63  ;;  %v8404_v27 = vshrl.u32 %v11236_v36, 7  ;;  %v6659_v17 = vld [vmem:[#allocation19 + $0xa8] ss:$20 sps:$4 sm:$0xff]  }
 0x2b1   : > { %1324 = vmatprep.mubr.bf16.mxu0 %v7750_v49  ;;  %2904 = vmatpush1.bf16.msra.mxu0 %v6632_v31  ;;  %v6674_v31 = vld [vmem:[#allocation19 + $0x118] ss:$20 sps:$4 sm:$0xff]  }
 0x2b2   : > { %v1074_v1 = vpack.c.bf16 %v1066_v0, %v1065_v16  ;;  %11348 = vst [vmem:[#allocation41_spill] sm:$0xff] %v8404_v27  ;;  %v8407_v9 = vsub.s32 0, %v8404_v27  ;;  %2905 = vmatprep.subr.bf16.mxu0 %v6640_v4  ;;  %v8415_v10 = vsub.s32 1, %v8404_v27  ;;  %3025 = vmatpush1.bf16.msra.mxu1 %v6659_v17  ;;  %v6676_v16 = vld [vmem:[#allocation19 + $0x11c] ss:$20 sps:$4 sm:$0xff]   ;;  %v11235_v51 = vsub.s32 2, %v8404_v27 }
 0x2b3   : > { %3026 = vmatprep.subr.bf16.mxu1 %v6667_v50  ;;  %v6689_v17 = vld [vmem:[#allocation19 + $0x170] ss:$20 sps:$4 sm:$0xff]  }
 0x2b4   : > { %6194 = vmatmul.mubr.bf16.gmra.mrb[12].mxu1 %v1074_v1  ;;  %11349 = vst [vmem:[#allocation42_spill] sm:$0xff] %v8407_v9  ;;  %11351 = vst [vmem:[#allocation43_spill] sm:$0xff] %v8415_v10 }
 0x2b5   : > { %2906 = vmatpush1.bf16.msra.mxu0 %v6638_v5  ;;  %v6679_v5 = vld [vmem:[#allocation19 + $0x124] ss:$20 sps:$4 sm:$0xff]  }
 0x2b6   : > { %2907 = vmatprep.subr.bf16.mxu0 %v6646_v12  ;;  %3027 = vmatpush1.bf16.msra.mxu1 %v6665_v47 }
 0x2b7   : > { %3028 = vmatprep.subr.bf16.mxu1 %v6673_v28 }
 0x2b8   : > { %1325 = vmatmul.mubr.bf16.gmra.mrb[16].mxu0 %v1071_v46 }
 0x2b9   : > { %1334 = vmatprep.mubr.bf16.mxu0 %v7750_v49  ;;  %2908 = vmatpush1.bf16.msra.mxu0 %v6644_v11  ;;  %v6685_v11 = vld [vmem:[#allocation19 + $0x14c] ss:$20 sps:$4 sm:$0xff]  }
 0x2ba   : > { %2909 = vmatprep.subr.bf16.mxu0 %v6652_v23  ;;  %3029 = vmatpush1.bf16.msra.mxu1 %v6671_v61  ;;  %v6683_v23 = vld [vmem:[#allocation19 + $0x148] ss:$20 sps:$4 sm:$0xff]  }
 0x2bb   : > { %3030 = vmatprep.subr.bf16.mxu1 %v6679_v5 }
 0x2bd   : > { %2910 = vmatpush1.bf16.msra.mxu0 %v6650_v22 }
 0x2be   : > { %2911 = vmatprep.subr.bf16.mxu0 %v6658_v34  ;;  %3031 = vmatpush1.bf16.msra.mxu1 %v6677_v3 }
 0x2bf   : > { %3032 = vmatprep.subr.bf16.mxu1 %v6685_v11 }
 0x2c0   : > { %1335 = vmatmul.mubr.bf16.gmra.mrb[20].mxu0 %v1072_v14 }
 0x2c1   : > { %1344 = vmatprep.mubr.bf16.mxu0 %v7750_v49  ;;  %2912 = vmatpush1.bf16.msra.mxu0 %v6656_v59 }
 0x2c2   : > { %2913 = vmatprep.subr.bf16.mxu0 %v6664_v42  ;;  %3033 = vmatpush1.bf16.msra.mxu1 %v6683_v23 }
 0x2c5   : > { %2914 = vmatpush1.bf16.msra.mxu0 %v6662_v45  ;;  %v8527_v45 = vstv %s8493_s24 }
 0x2c6   : > { %2915 = vmatprep.subr.bf16.mxu0 %v6670_v54  ;;  %v6697_v54 = vld [vmem:[#allocation19 + $0x19c] ss:$20 sps:$4 sm:$0xff]  }
 0x2c8   : > { %1345 = vmatmul.mubr.bf16.gmra.mrb[24].mxu0 %v1073_v20 }
 0x2c9   : > { %1354 = vmatprep.mubr.bf16.mxu0 %v7750_v49  ;;  %v8412_v49 = vld [vmem:[%s11350_s8] sm:$0x7]  ;;  %2916 = vmatpush1.bf16.msra.mxu0 %v6668_v56 }
 0x2ca   : > { %v8419_v21 = vrot.slane %v8412_v49, %v8407_v9  ;;  %v8423_v44 = vrot.slane %v8412_v49, %v8415_v10  ;;  %2917 = vmatprep.subr.bf16.mxu0 %v6676_v16  ;;  %v8532_v47 = vrot.slane %v8412_v49, %v11235_v51  ;;  %v8549_v16 = vstv %s8504_s14  ;;  %v6715_v56 = vld [vmem:[#allocation19 + $0x214] ss:$20 sps:$4 sm:$0xff]  }
 0x2cc   : > { %11371 = vst [vmem:[#allocation63_spill] sm:$0xff] %v8532_v47 }
 0x2cd   : > { %2918 = vmatpush1.bf16.msra.mxu0 %v6674_v31  ;;  %v6692_v31 = vld [vmem:[#allocation19 + $0x190] ss:$20 sps:$4 sm:$0xff]  }
 0x2ce   : > { %2919 = vmatprep.subr.bf16.mxu0 %v6682_v43 }
 0x2d0   : > { %1355 = vmatmul.mubr.bf16.gmra.mrb[28].mxu0 %v1074_v1 }
 0x2d1   : > { %2920 = vmatpush1.bf16.msra.mxu0 %v6680_v13 }
 0x36b   : > { %v1286_v26 = vpop.f32.mrb[0].mxu0 }
 0x36c   : > { %v8426_v29 = vadd.f32 %v1286_v26, %v8419_v21  ;;  %v1288_v30 = vpop.f32.mrb[1].mxu0 }
 0x36d   : > { %v8429_v15 = vadd.f32 %v1288_v30, %v8423_v44  ;;  %v1290_v32 = vpop.f32.mrb[2].mxu0  ;;  %v6688_v30 = vld [vmem:[#allocation19 + $0x16c] ss:$20 sps:$4 sm:$0xff]  }
 0x36e   : > { %11352 = vst [vmem:[#allocation44_spill] sm:$0xff] %v8426_v29  ;;  %v1292_v33 = vpop.f32.mrb[3].mxu0  ;;  %1533 = vrot.lane.b32.xlu0 %v8426_v29, %s7751_s20  ;;  %v8441_v39 = vadd.f32 %v1290_v32, %v8419_v21  ;;  %2921 = vmatprep.subr.bf16.mxu0 %v6688_v30 }
 0x36f   : > { %11353 = vst [vmem:[#allocation45_spill] sm:$0xff] %v8429_v15  ;;  %v8434_v38 = vadd.f32 %v1292_v33, %v8423_v44  ;;  %1565 = vrot.lane.b32.xlu1 %v8429_v15, %s7751_s20  ;;  %v8438_v52 = vpop.f32.mrb[0].mxu1  ;;  %v6686_v33 = vld [vmem:[#allocation19 + $0x168] ss:$20 sps:$4 sm:$0xff]   ;;  %v1469_v27 = vmul.f32 %v8527_v45, %v8429_v15 }
 0x370   : > { %11354 = vst [vmem:[#allocation46_spill] sm:$0xff] %v8438_v52  ;;  %11355 = vst [vmem:[#allocation47_spill] sm:$0xff] %v8441_v39  ;;  %v8443_v40 = vpop.f32.mrb[1].mxu1  ;;  %2922 = vmatpush1.bf16.msra.mxu0 %v6686_v33 }
 0x371   : > { %11356 = vst [vmem:[#allocation48_spill] sm:$0xff] %v8443_v40  ;;  %v8445_v18 = vpop.f32.mrb[2].mxu1 }
 0x372   : > { %11357 = vst [vmem:[#allocation49_spill] sm:$0xff] %v8445_v18  ;;  %1730 = vrot.lane.b32.xlu0 %v8426_v29, %s7752_s27  ;;  %v8449_v41 = vpop.f32.mrb[3].mxu1 }
 0x373   : > { %11358 = vst [vmem:[#allocation50_spill] sm:$0xff] %v8449_v41  ;;  %1535 = vrot.lane.b32.xlu1 %v8441_v39, %s7751_s20  ;;  %v1296_v60 = vpop.f32.mrb[4].mxu0 }
 0x374   : > { %v1298_v46 = vpop.f32.mrb[5].mxu0  ;;  %v8475_v62 = vadd.f32 %v1296_v60, %v8419_v21 }
 0x375   : > { %v1300_v48 = vpop.f32.mrb[6].mxu0  ;;  %v8470_v57 = vadd.f32 %v1298_v46, %v8423_v44  ;;  %v6691_v46 = vld [vmem:[#allocation19 + $0x174] ss:$20 sps:$4 sm:$0xff]  }
 0x376   : > { %1927 = vrot.lane.b32.xlu0 %v8426_v29, %s7753_s15  ;;  %v1302_v53 = vpop.f32.mrb[7].mxu0  ;;  %v8460_v7 = vadd.f32 %v1300_v48, %v8419_v21  ;;  %11362 = vst [vmem:[#allocation54_spill] sm:$0xff] %v8475_v62  ;;  %3034 = vmatprep.subr.bf16.mxu1 %v6691_v46 }
 0x377   : > { %v8463_v14 = vadd.f32 %v1302_v53, %v8423_v44  ;;  %1732 = vrot.lane.b32.xlu1 %v8441_v39, %s7752_s27  ;;  %v8467_v55 = vpop.f32.mrb[4].mxu1  ;;  %11360 = vst [vmem:[#allocation52_spill] sm:$0xff] %v8470_v57  ;;  %v6694_v53 = vld [vmem:[#allocation19 + $0x194] ss:$20 sps:$4 sm:$0xff]   ;;  %3035 = vmatpush1.bf16.msra.mxu1 %v6689_v17 }
 0x378   : > { %11359 = vst [vmem:[#allocation51_spill] sm:$0xff] %v8467_v55  ;;  %v8472_v58 = vpop.f32.mrb[5].mxu1  ;;  %2923 = vmatprep.subr.bf16.mxu0 %v6694_v53  ;;  %3036 = vmatprep.subr.bf16.mxu1 %v6697_v54 }
 0x379   : > { %11361 = vst [vmem:[#allocation53_spill] sm:$0xff] %v8472_v58  ;;  %v8477_v20 = vpop.f32.mrb[6].mxu1  ;;  %2924 = vmatpush1.bf16.msra.mxu0 %v6692_v31 }
 0x37a   : > { %11363 = vst [vmem:[#allocation55_spill] sm:$0xff] %v8477_v20  ;;  %1762 = vrot.lane.b32.xlu0 %v8429_v15, %s7752_s27  ;;  %v8481_v63 = vpop.f32.mrb[7].mxu1 }
 0x37b   : > { %11364 = vst [vmem:[#allocation56_spill] sm:$0xff] %v8481_v63  ;;  %1929 = vrot.lane.b32.xlu1 %v8441_v39, %s7753_s15  ;;  %v8487_v1 = vpop.f32.mrb[8].mxu0 }
 0x37c   : > { %v1308_v2 = vpop.f32.mrb[9].mxu0 }
 0x37d   : > { %v8491_v4 = vpop.f32.mrb[10].mxu0  ;;  %v8518_v34 = vadd.f32 %v1308_v2, %v8423_v44 }
 0x37e   : > { %1959 = vrot.lane.b32.xlu0 %v8429_v15, %s7753_s15  ;;  %v1312_v8 = vpop.f32.mrb[11].mxu0 }
 0x37f   : > { %v8498_v12 = vadd.f32 %v1312_v8, %v8423_v44  ;;  %1567 = vrot.lane.b32.xlu1 %v8434_v38, %s7751_s20  ;;  %v8502_v19 = vpop.f32.mrb[8].mxu1  ;;  %v6695_v8 = vld [vmem:[#allocation19 + $0x198] ss:$20 sps:$4 sm:$0xff]  }
 0x380   : > { %11365 = vst [vmem:[#allocation57_spill] sm:$0xff] %v8502_v19  ;;  %v8506_v22 = vpop.f32.mrb[9].mxu1  ;;  %3037 = vmatpush1.bf16.msra.mxu1 %v6695_v8  ;;  %v6725_v19 = vld [vmem:[#allocation19 + $0x260] ss:$20 sps:$4 sm:$0xff]  }
 0x381   : > { %11366 = vst [vmem:[#allocation58_spill] sm:$0xff] %v8506_v22  ;;  %v8508_v24 = vpop.f32.mrb[10].mxu1 }
 0x382   : > { %11367 = vst [vmem:[#allocation59_spill] sm:$0xff] %v8508_v24  ;;  %1537 = vrot.lane.b32.xlu0 %v8475_v62, %s7751_s20  ;;  %v8513_v26 = vpop.f32.mrb[11].mxu1 }
 0x383   : > { %11368 = vst [vmem:[#allocation60_spill] sm:$0xff] %v8513_v26  ;;  %1764 = vrot.lane.b32.xlu1 %v8434_v38, %s7752_s27  ;;  %v1316_v32 = vpop.f32.mrb[12].mxu0 }
 0x384   : > { %v8521_v37 = vadd.f32 %v1316_v32, %v8419_v21  ;;  %v1318_v59 = vpop.f32.mrb[13].mxu0  ;;  %v6700_v32 = vld [vmem:[#allocation19 + $0x1bc] ss:$20 sps:$4 sm:$0xff]  }
 0x385   : > { %v8524_v42 = vadd.f32 %v1318_v59, %v8423_v44  ;;  %v1320_v60 = vpop.f32.mrb[14].mxu0  ;;  %v6698_v59 = vld [vmem:[#allocation19 + $0x1b8] ss:$20 sps:$4 sm:$0xff]   ;;  %2925 = vmatprep.subr.bf16.mxu0 %v6700_v32  ;;  %v6704_v32 = vld [vmem:[#allocation19 + $0x1e0] ss:$20 sps:$4 sm:$0xff]  }
 0x386   : > { %11369 = vst [vmem:[#allocation61_spill] sm:$0xff] %v8521_v37  ;;  %v8535_v48 = vadd.f32 %v1320_v60, %v8419_v21  ;;  %1734 = vrot.lane.b32.xlu0 %v8475_v62, %s7752_s27  ;;  %v1322_v50 = vpop.f32.mrb[15].mxu0  ;;  %v1480_v28 = vmul.f32 %v8527_v45, %v8521_v37  ;;  %2926 = vmatpush1.bf16.msra.mxu0 %v6698_v59 }
 0x387   : > { %11370 = vst [vmem:[#allocation62_spill] sm:$0xff] %v8524_v42  ;;  %v8544_v61 = vadd.f32 %v1322_v50, %v8423_v44  ;;  %1961 = vrot.lane.b32.xlu1 %v8434_v38, %s7753_s15  ;;  %v6195_v49 = vpop.f32.mrb[12].mxu1  ;;  %v1481_v2 = vmul.f32 %v8527_v45, %v8524_v42  ;;  %v6701_v50 = vld [vmem:[#allocation19 + $0x1c0] ss:$20 sps:$4 sm:$0xff]  }
 0x388   : > { %11372 = vst [vmem:[#allocation64_spill] sm:$0xff] %v8535_v48  ;;  %v8554_v3 = vadd.f32 %v6195_v49, %v8532_v47  ;;  %v8556_v5 = vpop.f32.mrb[13].mxu1  ;;  %v8559_v43 = vadd.f32 %v8549_v16, %v1480_v28  ;;  %v6703_v28 = vld [vmem:[#allocation19 + $0x1c4] ss:$20 sps:$4 sm:$0xff]   ;;  %v1482_v59 = vmul.f32 %v8527_v45, %v8535_v48 }
 0x389   : > { %11373 = vst [vmem:[#allocation65_spill] sm:$0xff] %v8544_v61  ;;  %11375 = vst [vmem:[#allocation67_spill] sm:$0xff] %v8556_v5  ;;  %v6196_v11 = vpop.f32.mrb[14].mxu1  ;;  %v8562_v13 = vadd.f32 %v8549_v16, %v1481_v2  ;;  %v1483_v17 = vmul.f32 %v8527_v45, %v8544_v61  ;;  %v6706_v2 = vld [vmem:[#allocation19 + $0x1e4] ss:$20 sps:$4 sm:$0xff]   ;;  %3038 = vmatprep.subr.bf16.mxu1 %v6703_v28 }
 0x38a   : > { %11374 = vst [vmem:[#allocation66_spill] sm:$0xff] %v8554_v3  ;;  %v8565_v23 = vadd.f32 %v6196_v11, %v8532_v47  ;;  %1931 = vrot.lane.b32.xlu0 %v8475_v62, %s7753_s15  ;;  %v8569_v30 = vpop.f32.mrb[15].mxu1  ;;  %v6709_v11 = vld [vmem:[#allocation19 + $0x1ec] ss:$20 sps:$4 sm:$0xff]   ;;  %3039 = vmatpush1.bf16.msra.mxu1 %v6701_v50  ;;  %v8605_v28 = vadd.f32 %v8549_v16, %v1482_v59  ;;  %v8822_v47 = vstv %s5801_s21 }
 0x38b   : > { %11377 = vst [vmem:[#allocation69_spill] sm:$0xff] %v8569_v30  ;;  %1539 = vrot.lane.b32.xlu1 %v8460_v7, %s7751_s20  ;;  %v1326_v33 = vpop.f32.mrb[16].mxu0  ;;  %2927 = vmatprep.subr.bf16.mxu0 %v6706_v2  ;;  %v8613_v50 = vadd.f32 %v8487_v1, %v8419_v21  ;;  %v6712_v2 = vld [vmem:[#allocation19 + $0x20c] ss:$20 sps:$4 sm:$0xff]  }
 0x38c   : > { %11376 = vst [vmem:[#allocation68_spill] sm:$0xff] %v8565_v23  ;;  %v8576_v60 = vadd.f32 %v1326_v33, %v8419_v21  ;;  %v1328_v46 = vpop.f32.mrb[17].mxu0  ;;  %v8587_v33 = vadd.f32 %v8549_v16, %v1483_v17  ;;  %3040 = vmatprep.subr.bf16.mxu1 %v6709_v11  ;;  %2928 = vmatpush1.bf16.msra.mxu0 %v6704_v32 }
 0x38d   : > { %v8579_v53 = vadd.f32 %v1328_v46, %v8423_v44  ;;  %v1330_v54 = vpop.f32.mrb[18].mxu0  ;;  %v8598_v46 = vadd.f32 %v8491_v4, %v8419_v21  ;;  %11382 = vst [vmem:[#allocation74_spill] sm:$0xff] %v8613_v50  ;;  %2929 = vmatprep.subr.bf16.mxu0 %v6712_v2 }
 0x38e   : > { %11378 = vst [vmem:[#allocation70_spill] sm:$0xff] %v8576_v60  ;;  %v8582_v49 = vadd.f32 %v1330_v54, %v8419_v21  ;;  %1569 = vrot.lane.b32.xlu0 %v8470_v57, %s7751_s20  ;;  %v1332_v31 = vpop.f32.mrb[19].mxu0  ;;  %v6707_v54 = vld [vmem:[#allocation19 + $0x1e8] ss:$20 sps:$4 sm:$0xff]   ;;  %v1484_v17 = vmul.f32 %v8527_v45, %v8576_v60 }
 0x38f   : > { %11379 = vst [vmem:[#allocation71_spill] sm:$0xff] %v8579_v53  ;;  %v8590_v8 = vadd.f32 %v1332_v31, %v8423_v44  ;;  %1736 = vrot.lane.b32.xlu1 %v8460_v7, %s7752_s27  ;;  %v1485_v31 = vmul.f32 %v8527_v45, %v8579_v53  ;;  %3041 = vmatpush1.bf16.msra.mxu1 %v6707_v54  ;;  %v6721_v54 = vld [vmem:[#allocation19 + $0x23c] ss:$20 sps:$4 sm:$0xff]  }
 0x390   : > { %11380 = vst [vmem:[#allocation72_spill] sm:$0xff] %v8582_v49  ;;  %v1486_v4 = vmul.f32 %v8527_v45, %v8582_v49  ;;  %v8618_v11 = vadd.f32 %v8549_v16, %v1484_v17  ;;  %v6713_v17 = vld [vmem:[#allocation19 + $0x210] ss:$20 sps:$4 sm:$0xff]   ;;  %3042 = vmatprep.subr.bf16.mxu1 %v6715_v56  ;;  %2930 = vmatpush1.bf16.msra.mxu0 %v6710_v25 }
 0x391   : > { %11381 = vst [vmem:[#allocation73_spill] sm:$0xff] %v8590_v8  ;;  %v1487_v51 = vmul.f32 %v8527_v45, %v8590_v8  ;;  %v8621_v32 = vadd.f32 %v8549_v16, %v1485_v31  ;;  %v6716_v25 = vld [vmem:[#allocation19 + $0x230] ss:$20 sps:$4 sm:$0xff]  }
 0x392   : > { %1766 = vrot.lane.b32.xlu0 %v8470_v57, %s7752_s27  ;;  %v8629_v1 = vadd.f32 %v8549_v16, %v1486_v4 }
 0x393   : > { %1933 = vrot.lane.b32.xlu1 %v8460_v7, %s7753_s15  ;;  %v1336_v59 = vpop.f32.mrb[20].mxu0  ;;  %v8626_v0 = vadd.f32 %v8549_v16, %v1487_v51  ;;  %3043 = vmatpush1.bf16.msra.mxu1 %v6713_v17  ;;  %v6724_v17 = vld [vmem:[#allocation19 + $0x25c] ss:$20 sps:$4 sm:$0xff]  }
 0x394   : > { %v8632_v6 = vadd.f32 %v1336_v59, %v8419_v21  ;;  %v1338_v35 = vpop.f32.mrb[21].mxu0  ;;  %v6718_v59 = vld [vmem:[#allocation19 + $0x234] ss:$20 sps:$4 sm:$0xff]   ;;  %3044 = vmatprep.subr.bf16.mxu1 %v6721_v54  ;;  %v6722_v54 = vld [vmem:[#allocation19 + $0x258] ss:$20 sps:$4 sm:$0xff]  }
 0x395   : > { %v8637_v36 = vadd.f32 %v1338_v35, %v8423_v44  ;;  %v1340_v23 = vpop.f32.mrb[22].mxu0  ;;  %2931 = vmatprep.subr.bf16.mxu0 %v6718_v59  ;;  %v6727_v59 = vld [vmem:[#allocation19 + $0x264] ss:$20 sps:$4 sm:$0xff]  }
 0x396   : > { %11383 = vst [vmem:[#allocation75_spill] sm:$0xff] %v8632_v6  ;;  %v8640_v51 = vadd.f32 %v1340_v23, %v8419_v21  ;;  %1963 = vrot.lane.b32.xlu0 %v8470_v57, %s7753_s15  ;;  %v1342_v4 = vpop.f32.mrb[23].mxu0  ;;  %v1488_v2 = vmul.f32 %v8527_v45, %v8632_v6  ;;  %v6719_v23 = vld [vmem:[#allocation19 + $0x238] ss:$20 sps:$4 sm:$0xff]   ;;  %2932 = vmatpush1.bf16.msra.mxu0 %v6716_v25 }
 0x397   : > { %11384 = vst [vmem:[#allocation76_spill] sm:$0xff] %v8637_v36  ;;  %v8649_v35 = vadd.f32 %v1342_v4, %v8423_v44  ;;  %1571 = vrot.lane.b32.xlu1 %v8463_v14, %s7751_s20  ;;  %v1489_v56 = vmul.f32 %v8527_v45, %v8637_v36  ;;  %3045 = vmatpush1.bf16.msra.mxu1 %v6719_v23 }
 0x398   : > { %11385 = vst [vmem:[#allocation77_spill] sm:$0xff] %v8640_v51  ;;  %v8656_v3 = vadd.f32 %v8549_v16, %v1488_v2  ;;  %v1490_v30 = vmul.f32 %v8527_v45, %v8640_v51  ;;  %2933 = vmatprep.subr.bf16.mxu0 %v6724_v17  ;;  %3046 = vmatprep.subr.bf16.mxu1 %v6727_v59 }
 0x399   : > { %11386 = vst [vmem:[#allocation78_spill] sm:$0xff] %v8649_v35  ;;  %v8661_v4 = vadd.f32 %v8549_v16, %v1489_v56  ;;  %v1491_v31 = vmul.f32 %v8527_v45, %v8649_v35 }
 0x39a   : > { %1541 = vrot.lane.b32.xlu0 %v8613_v50, %s7751_s20  ;;  %v8668_v5 = vadd.f32 %v8549_v16, %v1490_v30  ;;  %2934 = vmatpush1.bf16.msra.mxu0 %v6722_v54 }
 0x39b   : > { %1768 = vrot.lane.b32.xlu1 %v8463_v14, %s7752_s27  ;;  %v1346_v2 = vpop.f32.mrb[24].mxu0  ;;  %v8673_v25 = vadd.f32 %v8549_v16, %v1491_v31  ;;  %3047 = vmatpush1.bf16.msra.mxu1 %v6725_v19 }
 0x39c   : > { %v8676_v56 = vadd.f32 %v1346_v2, %v8419_v21  ;;  %v1348_v24 = vpop.f32.mrb[25].mxu0 }
 0x39d   : > { %v8679_v26 = vadd.f32 %v1348_v24, %v8423_v44  ;;  %v1350_v30 = vpop.f32.mrb[26].mxu0 }
 0x39e   : > { %11387 = vst [vmem:[#allocation79_spill] sm:$0xff] %v8676_v56  ;;  %v8682_v22 = vadd.f32 %v1350_v30, %v8419_v21  ;;  %1738 = vrot.lane.b32.xlu0 %v8613_v50, %s7752_s27  ;;  %v1352_v31 = vpop.f32.mrb[27].mxu0  ;;  %v1492_v2 = vmul.f32 %v8527_v45, %v8676_v56 }
 0x39f   : > { %11388 = vst [vmem:[#allocation80_spill] sm:$0xff] %v8679_v26  ;;  %v8689_v23 = vadd.f32 %v1352_v31, %v8423_v44  ;;  %1965 = vrot.lane.b32.xlu1 %v8463_v14, %s7753_s15  ;;  %v1493_v24 = vmul.f32 %v8527_v45, %v8679_v26 }
 0x3a0   : > { %11389 = vst [vmem:[#allocation81_spill] sm:$0xff] %v8682_v22  ;;  %v8696_v17 = vadd.f32 %v8549_v16, %v1492_v2  ;;  %v1494_v59 = vmul.f32 %v8527_v45, %v8682_v22 }
 0x3a1   : > { %11390 = vst [vmem:[#allocation82_spill] sm:$0xff] %v8689_v23  ;;  %v8701_v54 = vadd.f32 %v8549_v16, %v1493_v24  ;;  %v1495_v30 = vmul.f32 %v8527_v45, %v8689_v23 }
 0x3a2   : > { %1935 = vrot.lane.b32.xlu0 %v8613_v50, %s7753_s15  ;;  %v8708_v31 = vadd.f32 %v8549_v16, %v1494_v59 }
 0x3a3   : > { %1543 = vrot.lane.b32.xlu1 %v8598_v46, %s7751_s20  ;;  %v1356_v19 = vpop.f32.mrb[28].mxu0  ;;  %v8713_v2 = vadd.f32 %v8549_v16, %v1495_v30 }
 0x3a4   : > { %v8716_v20 = vadd.f32 %v1356_v19, %v8419_v21  ;;  %v1358_v24 = vpop.f32.mrb[29].mxu0 }
 0x3a5   : > { %v8719_v55 = vadd.f32 %v1358_v24, %v8423_v44  ;;  %v1360_v58 = vpop.f32.mrb[30].mxu0 }
 0x3a6   : > { %11391 = vst [vmem:[#allocation83_spill] sm:$0xff] %v8716_v20  ;;  %v8722_v63 = vadd.f32 %v1360_v58, %v8419_v21  ;;  %1573 = vrot.lane.b32.xlu0 %v8518_v34, %s7751_s20  ;;  %v1362_v59 = vpop.f32.mrb[31].mxu0  ;;  %v1496_v52 = vmul.f32 %v8527_v45, %v8716_v20 }
 0x3a7   : > { %v8729_v30 = vadd.f32 %v1362_v59, %v8423_v44  ;;  %1740 = vrot.lane.b32.xlu1 %v8598_v46, %s7752_s27  ;;  %v1497_v19 = vmul.f32 %v8527_v45, %v8719_v55  ;;  %v11394_v59 = vlaneseq }
 0x3a8   : > { %v8736_v24 = vadd.f32 %v8549_v16, %v1496_v52  ;;  %v1498_v21 = vmul.f32 %v8527_v45, %v8722_v63 }
 0x3a9   : > { %v8741_v58 = vadd.f32 %v8549_v16, %v1497_v19  ;;  %v1499_v18 = vmul.f32 %v8527_v45, %v8729_v30  ;;  %v8808_v19 = vand.u32 127, %v11394_v59 }
 0x3aa   : > { %1770 = vrot.lane.b32.xlu0 %v8518_v34, %s7752_s27  ;;  %v8748_v44 = vadd.f32 %v8549_v16, %v1498_v21 }
 0x3ab   : > { %1937 = vrot.lane.b32.xlu1 %v8598_v46, %s7753_s15  ;;  %v8753_v52 = vadd.f32 %v8549_v16, %v1499_v18  ;;  %vm1597_vm0 = vcmp.lt.s32.totalorder %v8808_v19, 1  ;;  %vm1630_vm1 = vcmp.ge.s32.totalorder %v8808_v19, 1  ;;  %vm1794_vm2 = vcmp.lt.s32.totalorder %v8808_v19, 2 }
 0x3ac   : > { %11392 = vst [vmem:[#allocation84_spill] sm:$0xff] %v8748_v44  ;;  %vm1827_vm3 = vcmp.ge.s32.totalorder %v8808_v19, 2  ;;  %vm1991_vm4 = vcmp.lt.s32.totalorder %v8808_v19, 3  ;;  %vm2024_vm5 = vcmp.ge.s32.totalorder %v8808_v19, 3 }
 0x3ad   : > { %11393 = vst [vmem:[#allocation85_spill] sm:$0xff] %v8753_v52 }
 0x3ae   : > { %1967 = vrot.lane.b32.xlu0 %v8518_v34, %s7753_s15 }
 0x3af   : > { %1575 = vrot.lane.b32.xlu1 %v8498_v12, %s7751_s20 }
 0x3b2   : > { %1545 = vrot.lane.b32.xlu0 %v8521_v37, %s7751_s20 }
 0x3b3   : > { %1772 = vrot.lane.b32.xlu1 %v8498_v12, %s7752_s27 }
 0x3b6   : > { %1742 = vrot.lane.b32.xlu0 %v8521_v37, %s7752_s27 }
 0x3b7   : > { %1969 = vrot.lane.b32.xlu1 %v8498_v12, %s7753_s15 }
 0x3ba   : > { %1939 = vrot.lane.b32.xlu0 %v8521_v37, %s7753_s15 }
 0x3bb   : > { %1547 = vrot.lane.b32.xlu1 %v8535_v48, %s7751_s20 }
 0x3be   : > { %1577 = vrot.lane.b32.xlu0 %v8524_v42, %s7751_s20 }
 0x3bf   : > { %1744 = vrot.lane.b32.xlu1 %v8535_v48, %s7752_s27 }
 0x3c2   : > { %1774 = vrot.lane.b32.xlu0 %v8524_v42, %s7752_s27 }
 0x3c3   : > { %1941 = vrot.lane.b32.xlu1 %v8535_v48, %s7753_s15 }
 0x3c6   : > { %1971 = vrot.lane.b32.xlu0 %v8524_v42, %s7753_s15 }
 0x3c7   : > { %1579 = vrot.lane.b32.xlu1 %v8544_v61, %s7751_s20 }
 0x3ca   : > { %1549 = vrot.lane.b32.xlu0 %v8576_v60, %s7751_s20 }
 0x3cb   : > { %1776 = vrot.lane.b32.xlu1 %v8544_v61, %s7752_s27 }
 0x3ce   : > { %1746 = vrot.lane.b32.xlu0 %v8576_v60, %s7752_s27 }
 0x3cf   : > { %1973 = vrot.lane.b32.xlu1 %v8544_v61, %s7753_s15 }
 0x3d2   : > { %1943 = vrot.lane.b32.xlu0 %v8576_v60, %s7753_s15  ;;  %v1468_v60 = vmul.f32 %v8527_v45, %v8426_v29 }
 0x3d3   : > { %1551 = vrot.lane.b32.xlu1 %v8582_v49, %s7751_s20 }
 0x3d6   : > { %1581 = vrot.lane.b32.xlu0 %v8579_v53, %s7751_s20 }
 0x3d7   : > { %1748 = vrot.lane.b32.xlu1 %v8582_v49, %s7752_s27 }
 0x3da   : > { %1778 = vrot.lane.b32.xlu0 %v8579_v53, %s7752_s27 }
 0x3db   : > { %1945 = vrot.lane.b32.xlu1 %v8582_v49, %s7753_s15 }
 0x3de   : > { %1975 = vrot.lane.b32.xlu0 %v8579_v53, %s7753_s15 }
 0x3df   : > { %1583 = vrot.lane.b32.xlu1 %v8590_v8, %s7751_s20 }
 0x3e0   : > { %v1534_v18 = vpop.permute.xlu0 %1533 }
 0x3e1   : > { %v1566_v21 = vpop.permute.xlu1 %1565 }
 0x3e2   : > { %1553 = vrot.lane.b32.xlu0 %v8632_v6, %s7751_s20  ;;  %v1614_v59 = vsel %vm1597_vm0, %v1566_v21, %v1534_v18  ;;  %v1598_v10 = vsel %vm1597_vm0, %v1534_v18, %v1566_v21  ;;  %v8839_v18 = vstv %s5802_s26  ;;  %s11599_s26 = sld [smem:[#allocation132_spill]] }
 0x3e3   : > { %1780 = vrot.lane.b32.xlu1 %v8590_v8, %s7752_s27  ;;  %v1632_v37 = vsel %vm1630_vm1, %v1614_v59, 0.0  ;;  %v1667_v48 = vmul.f32 %v8822_v47, %v1598_v10  ;;  %v1501_v10 = vadd.f32 %v8549_v16, %v1468_v60 }
 0x3e4   : > { %v1731_v40 = vpop.permute.xlu0 %1730  ;;  %v1666_v53 = vmul.f32 %v8822_v47, %v1632_v37 }
 0x3e5   : > { %v1536_v41 = vpop.permute.xlu1 %1535 }
 0x3e6   : > { %1750 = vrot.lane.b32.xlu0 %v8632_v6, %s7752_s27  ;;  %v1698_v60 = vadd.f32 %v1666_v53, %v1501_v10 }
 0x3e7   : > { %1977 = vrot.lane.b32.xlu1 %v8590_v8, %s7753_s15  ;;  %v1502_v8 = vadd.f32 %v8549_v16, %v1469_v27 }
 0x3e8   : > { %v1928_v9 = vpop.permute.xlu0 %1927 }
 0x3e9   : > { %v1733_v49 = vpop.permute.xlu1 %1732  ;;  %v1699_v27 = vadd.f32 %v1667_v48, %v1502_v8 }
 0x3ea   : > { %1947 = vrot.lane.b32.xlu0 %v8632_v6, %s7753_s15 }
 0x3eb   : > { %1555 = vrot.lane.b32.xlu1 %v8640_v51, %s7751_s20 }
 0x3ec   : > { %v1763_v21 = vpop.permute.xlu0 %1762 }
 0x3ed   : > { %v1795_v59 = vsel %vm1794_vm2, %v1731_v40, %v1763_v21  ;;  %v1811_v6 = vsel %vm1794_vm2, %v1763_v21, %v1731_v40  ;;  %v1930_v61 = vpop.permute.xlu1 %1929  ;;  %v8858_v40 = vstv %s2058_s18  ;;  %s7754_s18 = smov [#allocation26]  }
 0x3ee   : > { %v1829_v42 = vsel %vm1827_vm3, %v1811_v6, 0.0  ;;  %v1864_v29 = vmul.f32 %v8839_v18, %v1795_v59  ;;  %1585 = vrot.lane.b32.xlu0 %v8637_v36, %s7751_s20  ;;  %s5482_s25 = sshll.u32 %s7754_s18, 4  ;;  %s5483_s25 = int_to_ptr.vmem [resolvable:$true] %s5482_s25 }
 0x3ef   : > { %v1863_v37 = vmul.f32 %v8839_v18, %v1829_v42  ;;  %1752 = vrot.lane.b32.xlu1 %v8640_v51, %s7752_s27  ;;  %s7532_s0 = scalar_lea.vmem %s5483_s25, 128  ;;  %p7539_p11 = scmp.lt.s32.totalorder %s5483_s25, %s5483_s25 }
 0x3f0   : > { %v1960_v21 = vpop.permute.xlu0 %1959  ;;  %v1896_v15 = vadd.f32 %v1864_v29, %v1699_v27  ;;  %p7533_p0 = scmp.ne.s32.totalorder %s5483_s25, %s7532_s0  ;;  %p7540_p7 = scmp.lt.s32.totalorder %s7532_s0, %s7532_s0 }
 0x3f1   : > { %v1992_v6 = vsel %vm1991_vm4, %v1928_v9, %v1960_v21  ;;  %v2008_v59 = vsel %vm1991_vm4, %v1960_v21, %v1928_v9  ;;  %v1568_v44 = vpop.permute.xlu1 %1567  ;;  %v1895_v29 = vadd.f32 %v1863_v37, %v1698_v60  ;;  %v1471_v9 = vmul.f32 %v8527_v45, %v8434_v38 }
 0x3f2   : > { %v2026_v42 = vsel %vm2024_vm5, %v2008_v59, 0.0  ;;  %v2061_v48 = vmul.f32 %v8858_v40, %v1992_v6  ;;  %v1599_v8 = vsel %vm1597_vm0, %v1536_v41, %v1568_v44  ;;  %v1615_v52 = vsel %vm1597_vm0, %v1568_v44, %v1536_v41  ;;  %1782 = vrot.lane.b32.xlu0 %v8637_v36, %s7752_s27  ;;  %p7534_p13 = pnand %p7533_p0, %p11626_p2  ;;  %p7541_p3 = por %p7540_p7, %p7539_p11 }
 0x3f3   : > { %v2060_v53 = vmul.f32 %v8858_v40, %v2026_v42  ;;  %v1634_v10 = vsel %vm1630_vm1, %v1615_v52, 0.0  ;;  %1949 = vrot.lane.b32.xlu1 %v8640_v51, %s7753_s15  ;;  %v1470_v41 = vmul.f32 %v8527_v45, %v8441_v39  ;;  %v1669_v37 = vmul.f32 %v8822_v47, %v1599_v8 }
 0x3f4   : > { %v8880_v27 = vadd.f32 %v2061_v48, %v1896_v15  ;;  %v1538_v44 = vpop.permute.xlu0 %1537  ;;  %v1668_v59 = vmul.f32 %v8822_v47, %v1634_v10  ;;  %v1504_v48 = vadd.f32 %v8549_v16, %v1471_v9  ;;  %p7535_p9 = pneg %p7534_p13 }
 0x3f5   : > { %v8884_v21 = vadd.f32 %v2060_v53, %v1895_v29  ;;  %v1765_v60 = vpop.permute.xlu1 %1764  ;;  %v1503_v53 = vadd.f32 %v8549_v16, %v1470_v41 }
 0x3f6   : > { %v5804_v6 = vmul.f32 -1.442695, %v8880_v27  ;;  %v1796_v52 = vsel %vm1794_vm2, %v1733_v49, %v1765_v60  ;;  %v1812_v15 = vsel %vm1794_vm2, %v1765_v60, %v1733_v49  ;;  %1979 = vrot.lane.b32.xlu0 %v8637_v36, %s7753_s15  ;;  %v1701_v60 = vadd.f32 %v1669_v37, %v1504_v48  ;;  %p7542_p1 = pnand %p7541_p3, %p7535_p9 }
 0x3f7   : > { %v5803_v42 = vmul.f32 -1.442695, %v8884_v21  ;;  %v1831_v8 = vsel %vm1827_vm3, %v1812_v15, 0.0  ;;  %v1866_v29 = vmul.f32 %v8839_v18, %v1796_v52  ;;  %1587 = vrot.lane.b32.xlu1 %v8649_v35, %s7751_s20  ;;  %v1700_v36 = vadd.f32 %v1668_v59, %v1503_v53 }
 0x3f8   : > { %v1865_v10 = vmul.f32 %v8839_v18, %v1831_v8  ;;  %v1735_v49 = vpop.permute.xlu0 %1734  ;;  %6832 = vpow2.f32 %v5804_v6 }
 0x3f9   : > { %v1962_v51 = vpop.permute.xlu1 %1961  ;;  %6834 = vpow2.f32 %v5803_v42  ;;  %v1898_v52 = vadd.f32 %v1866_v29, %v1701_v60 }
 0x3fa   : > { %v1993_v9 = vsel %vm1991_vm4, %v1930_v61, %v1962_v51  ;;  %v2009_v15 = vsel %vm1991_vm4, %v1962_v51, %v1930_v61  ;;  %1557 = vrot.lane.b32.xlu0 %v8676_v56, %s7751_s20  ;;  %v1897_v37 = vadd.f32 %v1865_v10, %v1700_v36  ;;  %v1473_v36 = vmul.f32 %v8527_v45, %v8470_v57 }
 0x3fb   : > { %v2028_v41 = vsel %vm2024_vm5, %v2009_v15, 0.0  ;;  %v2063_v8 = vmul.f32 %v8858_v40, %v1993_v9  ;;  %1784 = vrot.lane.b32.xlu1 %v8649_v35, %s7752_s27 }
 0x3fc   : > { %v2062_v6 = vmul.f32 %v8858_v40, %v2028_v41  ;;  %v1932_v59 = vpop.permute.xlu0 %1931 }
 0x3fd   : > { %v8916_v48 = vadd.f32 %v2063_v8, %v1898_v52  ;;  %v1540_v61 = vpop.permute.xlu1 %1539  ;;  %v1472_v52 = vmul.f32 %v8527_v45, %v8475_v62 }
 0x3fe   : > { %v8918_v51 = vadd.f32 %v2062_v6, %v1897_v37  ;;  %1754 = vrot.lane.b32.xlu0 %v8676_v56, %s7752_s27 }
 0x3ff   : > { %v5806_v42 = vmul.f32 -1.442695, %v8916_v48  ;;  %1981 = vrot.lane.b32.xlu1 %v8649_v35, %s7753_s15 }
 0x400   : > { %v5805_v29 = vmul.f32 -1.442695, %v8918_v51  ;;  %v1570_v53 = vpop.permute.xlu0 %1569 }
 0x401   : > { %6836 = vpow2.f32 %v5806_v42  ;;  %v1600_v10 = vsel %vm1597_vm0, %v1538_v44, %v1570_v53  ;;  %v1616_v60 = vsel %vm1597_vm0, %v1570_v53, %v1538_v44  ;;  %v1737_v9 = vpop.permute.xlu1 %1736  ;;  %v1506_v44 = vadd.f32 %v8549_v16, %v1473_v36 }
 0x402   : > { %6838 = vpow2.f32 %v5805_v29  ;;  %v1636_v15 = vsel %vm1630_vm1, %v1616_v60, 0.0  ;;  %1951 = vrot.lane.b32.xlu0 %v8676_v56, %s7753_s15  ;;  %v1671_v41 = vmul.f32 %v8822_v47, %v1600_v10  ;;  %v6833_v8 = vpop.eup %6832  ;;  %v1505_v36 = vadd.f32 %v8549_v16, %v1472_v52 }
 0x403   : > { %1559 = vrot.lane.b32.xlu1 %v8682_v22, %s7751_s20  ;;  %v6835_v6 = vpop.eup %6834  ;;  %v1670_v42 = vmul.f32 %v8822_v47, %v1636_v15  ;;  %v2221_v35 = vadd.f32 1.0, %v6833_v8 }
 0x404   : > { %v1767_v37 = vpop.permute.xlu0 %1766  ;;  %v1703_v62 = vadd.f32 %v1671_v41, %v1506_v44  ;;  %v2220_v57 = vadd.f32 1.0, %v6835_v6 }
 0x405   : > { %v1797_v29 = vsel %vm1794_vm2, %v1735_v49, %v1767_v37  ;;  %v1813_v53 = vsel %vm1794_vm2, %v1767_v37, %v1735_v49  ;;  %v1934_v60 = vpop.permute.xlu1 %1933  ;;  %v1475_v37 = vmul.f32 %v8527_v45, %v8463_v14  ;;  %6840 = vrcp.f32 %v2221_v35 }
 0x406   : > { %v1833_v10 = vsel %vm1827_vm3, %v1813_v53, 0.0  ;;  %v1868_v56 = vmul.f32 %v8839_v18, %v1797_v29  ;;  %1589 = vrot.lane.b32.xlu0 %v8679_v26, %s7751_s20  ;;  %v1702_v53 = vadd.f32 %v1670_v42, %v1505_v36  ;;  %6842 = vrcp.f32 %v2220_v57 }
 0x407   : > { %v1867_v15 = vmul.f32 %v8839_v18, %v1833_v10  ;;  %1756 = vrot.lane.b32.xlu1 %v8682_v22, %s7752_s27  ;;  %v1508_v57 = vadd.f32 %v8549_v16, %v1475_v37 }
 0x408   : > { %v1964_v49 = vpop.permute.xlu0 %1963  ;;  %v1900_v39 = vadd.f32 %v1868_v56, %v1703_v62 }
 0x409   : > { %v1994_v29 = vsel %vm1991_vm4, %v1932_v59, %v1964_v49  ;;  %v2010_v8 = vsel %vm1991_vm4, %v1964_v49, %v1932_v59  ;;  %v1572_v52 = vpop.permute.xlu1 %1571  ;;  %v1899_v56 = vadd.f32 %v1867_v15, %v1702_v53 }
 0x40a   : > { %v2030_v41 = vsel %vm2024_vm5, %v2010_v8, 0.0  ;;  %v2065_v44 = vmul.f32 %v8858_v40, %v1994_v29  ;;  %v1601_v6 = vsel %vm1597_vm0, %v1540_v61, %v1572_v52  ;;  %v1617_v10 = vsel %vm1597_vm0, %v1572_v52, %v1540_v61  ;;  %1786 = vrot.lane.b32.xlu0 %v8679_v26, %s7752_s27 }
 0x40b   : > { %v6837_v62 = vpop.eup %6836  ;;  %v2064_v59 = vmul.f32 %v8858_v40, %v2030_v41  ;;  %v1638_v42 = vsel %vm1630_vm1, %v1617_v10, 0.0  ;;  %1953 = vrot.lane.b32.xlu1 %v8682_v22, %s7753_s15  ;;  %v1474_v61 = vmul.f32 %v8527_v45, %v8460_v7  ;;  %v1673_v15 = vmul.f32 %v8822_v47, %v1601_v6 }
 0x40c   : > { %v6839_v36 = vpop.eup %6838  ;;  %v2223_v49 = vadd.f32 1.0, %v6837_v62  ;;  %v8976_v29 = vadd.f32 %v2065_v44, %v1900_v39  ;;  %v1542_v8 = vpop.permute.xlu0 %1541  ;;  %v1672_v10 = vmul.f32 %v8822_v47, %v1638_v42 }
 0x40d   : > { %v2222_v52 = vadd.f32 1.0, %v6839_v36  ;;  %v8980_v35 = vadd.f32 %v2064_v59, %v1899_v56  ;;  %v1769_v53 = vpop.permute.xlu1 %1768  ;;  %v1507_v56 = vadd.f32 %v8549_v16, %v1474_v61  ;;  %v1705_v36 = vadd.f32 %v1673_v15, %v1508_v57  ;;  %v6732_v15 = vld [vmem:[#allocation21 + $0x4] ss:$8 sps:$4 sm:$0xff]  }
 0x40e   : > { %6844 = vrcp.f32 %v2223_v49  ;;  %v5808_v41 = vmul.f32 -1.442695, %v8976_v29  ;;  %v1798_v39 = vsel %vm1794_vm2, %v1737_v9, %v1769_v53  ;;  %1983 = vrot.lane.b32.xlu0 %v8679_v26, %s7753_s15  ;;  %v1814_v44 = vsel %vm1794_vm2, %v1769_v53, %v1737_v9  ;;  %3526 = vmatprep.subr.bf16.mxu1 %v6732_v15 }
 0x40f   : > { %6846 = vrcp.f32 %v2222_v52  ;;  %v1870_v6 = vmul.f32 %v8839_v18, %v1798_v39  ;;  %1591 = vrot.lane.b32.xlu1 %v8689_v23, %s7751_s20  ;;  %v5807_v62 = vmul.f32 -1.442695, %v8980_v35  ;;  %v1835_v59 = vsel %vm1827_vm3, %v1814_v44, 0.0 }
 0x410   : > { %v1739_v42 = vpop.permute.xlu0 %1738  ;;  %6848 = vpow2.f32 %v5808_v41  ;;  %v1869_v37 = vmul.f32 %v8839_v18, %v1835_v59  ;;  %v1704_v52 = vadd.f32 %v1672_v10, %v1507_v56 }
 0x411   : > { %v1966_v49 = vpop.permute.xlu1 %1965  ;;  %v1902_v61 = vadd.f32 %v1870_v6, %v1705_v36  ;;  %6850 = vpow2.f32 %v5807_v62 }
 0x412   : > { %v1995_v9 = vsel %vm1991_vm4, %v1934_v60, %v1966_v49  ;;  %v2011_v53 = vsel %vm1991_vm4, %v1966_v49, %v1934_v60  ;;  %1561 = vrot.lane.b32.xlu0 %v8716_v20, %s7751_s20  ;;  %v1901_v10 = vadd.f32 %v1869_v37, %v1704_v52  ;;  %v6841_v60 = vpop.eup %6840  ;;  %v1476_v52 = vmul.f32 %v8527_v45, %v8613_v50 }
 0x413   : > { %v2032_v39 = vsel %vm2024_vm5, %v2011_v53, 0.0  ;;  %v2067_v41 = vmul.f32 %v8858_v40, %v1995_v9  ;;  %1788 = vrot.lane.b32.xlu1 %v8689_v23, %s7752_s27  ;;  %v6843_v36 = vpop.eup %6842  ;;  %v1477_v9 = vmul.f32 %v8527_v45, %v8518_v34 }
 0x414   : > { %v2066_v57 = vmul.f32 %v8858_v40, %v2032_v39  ;;  %v9012_v44 = vpop.permute.xlu0 %1935  ;;  %v2316_v22 = vmul.f32 %v6843_v36, %v8884_v21  ;;  %v6730_v36 = vld [vmem:[#allocation21] ss:$8 sps:$4 sm:$0xff]  }
 0x415   : > { %v9014_v56 = vadd.f32 %v2067_v41, %v1902_v61  ;;  %v9016_v59 = vpop.permute.xlu1 %1543  ;;  %v2317_v61 = vmul.f32 %v6841_v60, %v8880_v27 }
 0x416   : > { %v9018_v6 = vadd.f32 %v2066_v57, %v1901_v10  ;;  %1758 = vrot.lane.b32.xlu0 %v8716_v20, %s7752_s27 }
 0x417   : > { %v5810_v49 = vmul.f32 -1.442695, %v9014_v56  ;;  %1985 = vrot.lane.b32.xlu1 %v8689_v23, %s7753_s15 }
 0x418   : > { %v6845_v62 = vpop.eup %6844  ;;  %v5809_v37 = vmul.f32 -1.442695, %v9018_v6  ;;  %v1574_v53 = vpop.permute.xlu0 %1573 }
 0x419   : > { %v6847_v39 = vpop.eup %6846  ;;  %6852 = vpow2.f32 %v5810_v49  ;;  %v1602_v41 = vsel %vm1597_vm0, %v1542_v8, %v1574_v53  ;;  %v1618_v15 = vsel %vm1597_vm0, %v1574_v53, %v1542_v8  ;;  %v9035_v10 = vpop.permute.xlu1 %1740  ;;  %v2319_v57 = vmul.f32 %v6845_v62, %v8916_v48 }
 0x41a   : > { %v2318_v23 = vmul.f32 %v6847_v39, %v8918_v51  ;;  %6854 = vpow2.f32 %v5809_v37  ;;  %v1640_v27 = vsel %vm1630_vm1, %v1618_v15, 0.0  ;;  %1955 = vrot.lane.b32.xlu0 %v8716_v20, %s7753_s15  ;;  %v6849_v60 = vpop.eup %6848  ;;  %v1675_v49 = vmul.f32 %v8822_v47, %v1602_v41  ;;  %v6733_v20 = vld [vmem:[#allocation21 + $0x10] ss:$8 sps:$4 sm:$0xff]  }
 0x41b   : > { %1563 = vrot.lane.b32.xlu1 %v8722_v63, %s7751_s20  ;;  %v9047_v8 = vpack.c.bf16 %v2319_v57, %v2317_v61  ;;  %v1674_v21 = vmul.f32 %v8822_v47, %v1640_v27  ;;  %v1510_v62 = vadd.f32 %v8549_v16, %v1477_v9  ;;  %v2225_v61 = vadd.f32 1.0, %v6849_v60  ;;  %v6728_v27 = vld [vmem:[#allocation19 + $0x150] ss:$20 sps:$4 sm:$0xff]   ;;  %v6736_v60 = vld [vmem:[#allocation19 + $0x178] ss:$20 sps:$4 sm:$0xff]  }
 0x41c   : > { %v9049_v48 = vpack.c.bf16 %v2318_v23, %v2316_v22  ;;  %v1771_v51 = vpop.permute.xlu0 %1770  ;;  %v6735_v22 = vld [vmem:[#allocation21 + $0x14] ss:$8 sps:$4 sm:$0xff]   ;;  %v6851_v23 = vpop.eup %6850  ;;  %v1509_v41 = vadd.f32 %v8549_v16, %v1476_v52  ;;  %v6729_v52 = vld [vmem:[#allocation19 + $0x10] ss:$20 sps:$4 sm:$0xff]   ;;  %6021 = vmatprep.subr.bf16.mxu0 %v6728_v27 }
 0x41d   : > { %v1799_v37 = vsel %vm1794_vm2, %v1739_v42, %v1771_v51  ;;  %v1815_v53 = vsel %vm1794_vm2, %v1771_v51, %v1739_v42  ;;  %v9057_v39 = vpop.permute.xlu1 %1937  ;;  %2935 = vmatprep.mubr.bf16.mxu0 %v9047_v8  ;;  %3048 = vmatprep.mubr.bf16.mxu1 %v9047_v8  ;;  %v1707_v42 = vadd.f32 %v1675_v49, %v1510_v62  ;;  %v2224_v26 = vadd.f32 1.0, %v6851_v23 }
 0x41e   : > { %v1837_v9 = vsel %vm1827_vm3, %v1815_v53, 0.0  ;;  %v1872_v15 = vmul.f32 %v8839_v18, %v1799_v37  ;;  %1593 = vrot.lane.b32.xlu0 %v8719_v55, %s7751_s20  ;;  %2936 = vmatmul.mubr.bf16.vlgmr.msra.gmra.mrb[32].mxu0 %v9049_v48  ;;  %v1706_v51 = vadd.f32 %v1674_v21, %v1509_v41  ;;  %v1479_v37 = vmul.f32 %v8527_v45, %v8498_v12  ;;  %v6740_v21 = vld [vmem:[#allocation21 + $0x24] ss:$8 sps:$4 sm:$0xff]  }
 0x41f   : > { %v1871_v57 = vmul.f32 %v8839_v18, %v1837_v9  ;;  %3049 = vmatmul.mubr.bf16.vlgmr.msra.gmra.mrb[16].mxu1 %v9049_v48  ;;  %1760 = vrot.lane.b32.xlu1 %v8722_v63, %s7752_s27  ;;  %6856 = vrcp.f32 %v2225_v61  ;;  %v6738_v61 = vld [vmem:[#allocation21 + $0x20] ss:$8 sps:$4 sm:$0xff]  }
 0x420   : > { %v1968_v53 = vpop.permute.xlu0 %1967  ;;  %3527 = vmatpush1.bf16.msra.mxu1 %v6730_v36  ;;  %v1904_v50 = vadd.f32 %v1872_v15, %v1707_v42  ;;  %6022 = vmatpush3.bf16.msra.mxu0 %v6729_v52  ;;  %v1478_v52 = vmul.f32 %v8527_v45, %v8598_v46  ;;  %6858 = vrcp.f32 %v2224_v26 }
 0x421   : > { %v1996_v49 = vsel %vm1991_vm4, %v9012_v44, %v1968_v53  ;;  %v2012_v62 = vsel %vm1991_vm4, %v1968_v53, %v9012_v44  ;;  %v1576_v9 = vpop.permute.xlu1 %1575  ;;  %3528 = vmatprep.subr.bf16.mxu1 %v6735_v22  ;;  %v6737_v44 = vld [vmem:[#allocation19 + $0x38] ss:$20 sps:$4 sm:$0xff]   ;;  %v1903_v42 = vadd.f32 %v1871_v57, %v1706_v51  ;;  %6023 = vmatprep.subr.bf16.mxu0 %v6736_v60  ;;  %v6743_v60 = vld [vmem:[#allocation21 + $0x34] ss:$8 sps:$4 sm:$0xff]  }
 0x422   : > { %v2034_v41 = vsel %vm2024_vm5, %v2012_v62, 0.0  ;;  %v2069_v36 = vmul.f32 %v8858_v40, %v1996_v49  ;;  %v1603_v23 = vsel %vm1597_vm0, %v9016_v59, %v1576_v9  ;;  %v1619_v15 = vsel %vm1597_vm0, %v1576_v9, %v9016_v59  ;;  %1790 = vrot.lane.b32.xlu0 %v8719_v55, %s7752_s27 }
 0x423   : > { %v6853_v22 = vpop.eup %6852  ;;  %v2068_v27 = vmul.f32 %v8858_v40, %v2034_v41  ;;  %v1642_v53 = vsel %vm1630_vm1, %v1619_v15, 0.0  ;;  %1957 = vrot.lane.b32.xlu1 %v8722_v63, %s7753_s15  ;;  %v1677_v41 = vmul.f32 %v8822_v47, %v1603_v23 }
 0x424   : > { %v6855_v49 = vpop.eup %6854  ;;  %v2227_v62 = vadd.f32 1.0, %v6853_v22  ;;  %v9096_v59 = vadd.f32 %v2069_v36, %v1904_v50  ;;  %v9100_v9 = vpop.permute.xlu0 %1545  ;;  %3529 = vmatpush1.bf16.msra.mxu1 %v6733_v20  ;;  %v1676_v36 = vmul.f32 %v8822_v47, %v1642_v53  ;;  %6024 = vmatpush3.bf16.msra.mxu0 %v6737_v44  ;;  %v1512_v20 = vadd.f32 %v8549_v16, %v1479_v37  ;;  %v6741_v37 = vld [vmem:[#allocation21 + $0x30] ss:$8 sps:$4 sm:$0xff]  }
 0x425   : > { %v2226_v57 = vadd.f32 1.0, %v6855_v49  ;;  %v9102_v51 = vadd.f32 %v2068_v27, %v1903_v42  ;;  %v1773_v15 = vpop.permute.xlu1 %1772  ;;  %3530 = vmatprep.subr.bf16.mxu1 %v6740_v21  ;;  %v1511_v22 = vadd.f32 %v8549_v16, %v1478_v52  ;;  %v6748_v49 = vld [vmem:[#allocation21 + $0x44] ss:$8 sps:$4 sm:$0xff]  }
 0x426   : > { %6860 = vrcp.f32 %v2227_v62  ;;  %v5812_v50 = vmul.f32 -1.442695, %v9096_v59  ;;  %v1800_v45 = vsel %vm1794_vm2, %v9035_v10, %v1773_v15  ;;  %1987 = vrot.lane.b32.xlu0 %v8719_v55, %s7753_s15  ;;  %v1816_v26 = vsel %vm1794_vm2, %v1773_v15, %v9035_v10 }
 0x427   : > { %6862 = vrcp.f32 %v2226_v57  ;;  %v1874_v21 = vmul.f32 %v8839_v18, %v1800_v45  ;;  %1595 = vrot.lane.b32.xlu1 %v8729_v30, %s7751_s20  ;;  %v5811_v23 = vmul.f32 -1.442695, %v9102_v51  ;;  %v1839_v42 = vsel %vm1827_vm3, %v1816_v26, 0.0  ;;  %v6751_v26 = vld [vmem:[#allocation21 + $0x54] ss:$8 sps:$4 sm:$0xff]  }
 0x428   : > { %v9123_v44 = vpop.permute.xlu0 %1742  ;;  %3531 = vmatpush1.bf16.msra.mxu1 %v6738_v61  ;;  %6864 = vpow2.f32 %v5812_v50  ;;  %v1709_v27 = vadd.f32 %v1677_v41, %v1512_v20  ;;  %v1873_v10 = vmul.f32 %v8839_v18, %v1839_v42  ;;  %v1708_v62 = vadd.f32 %v1676_v36, %v1511_v22  ;;  %v6746_v36 = vld [vmem:[#allocation21 + $0x40] ss:$8 sps:$4 sm:$0xff]  }
 0x429   : > { %v1970_v53 = vpop.permute.xlu1 %1969  ;;  %3532 = vmatprep.subr.bf16.mxu1 %v6743_v60  ;;  %6866 = vpow2.f32 %v5811_v23  ;;  %v6857_v45 = vpop.eup %6856  ;;  %v6744_v22 = vld [vmem:[#allocation19 + $0x1a0] ss:$20 sps:$4 sm:$0xff]  }
 0x42a   : > { %v1997_v57 = vsel %vm1991_vm4, %v9057_v39, %v1970_v53  ;;  %v2013_v16 = vsel %vm1991_vm4, %v1970_v53, %v9057_v39  ;;  %v1906_v52 = vadd.f32 %v1874_v21, %v1709_v27  ;;  %v1905_v15 = vadd.f32 %v1873_v10, %v1708_v62  ;;  %v6745_v42 = vld [vmem:[#allocation19 + $0x60] ss:$20 sps:$4 sm:$0xff]   ;;  %v6859_v27 = vpop.eup %6858  ;;  %6025 = vmatprep.subr.bf16.mxu0 %v6744_v22 }
 0x42b   : > { %v2036_v61 = vsel %vm2024_vm5, %v2013_v16, 0.0  ;;  %v2071_v41 = vmul.f32 %v8858_v40, %v1997_v57  ;;  %1792 = vrot.lane.b32.xlu1 %v8729_v30, %s7752_s27  ;;  %v2321_v62 = vmul.f32 %v6857_v45, %v8976_v29  ;;  %6026 = vmatpush3.bf16.msra.mxu0 %v6745_v42 }
 0x42c   : > { %v2070_v60 = vmul.f32 %v8858_v40, %v2036_v61  ;;  %v9138_v50 = vpop.permute.xlu0 %1939  ;;  %3533 = vmatpush1.bf16.msra.mxu1 %v6741_v37 }
 0x42d   : > { %v9140_v20 = vadd.f32 %v2071_v41, %v1906_v52  ;;  %v9142_v39 = vpop.permute.xlu1 %1547  ;;  %3534 = vmatprep.subr.bf16.mxu1 %v6748_v49  ;;  %v6749_v49 = vld [vmem:[#allocation21 + $0x50] ss:$8 sps:$4 sm:$0xff]  }
 0x42e   : > { %v9144_v21 = vadd.f32 %v2070_v60, %v1905_v15  ;;  %v2320_v15 = vmul.f32 %v6859_v27, %v8980_v35  ;;  %v6759_v27 = vld [vmem:[#allocation21 + $0x74] ss:$8 sps:$4 sm:$0xff]  }
 0x42f   : > { %v5814_v23 = vmul.f32 -1.442695, %v9140_v20  ;;  %1989 = vrot.lane.b32.xlu1 %v8729_v30, %s7753_s15 }
 0x430   : > { %v6861_v10 = vpop.eup %6860  ;;  %v5813_v37 = vmul.f32 -1.442695, %v9144_v21  ;;  %v1578_v53 = vpop.permute.xlu0 %1577  ;;  %3535 = vmatpush1.bf16.msra.mxu1 %v6746_v36 }
 0x431   : > { %v6863_v57 = vpop.eup %6862  ;;  %6868 = vpow2.f32 %v5814_v23  ;;  %v1604_v16 = vsel %vm1597_vm0, %v9100_v9, %v1578_v53  ;;  %v1620_v52 = vsel %vm1597_vm0, %v1578_v53, %v9100_v9  ;;  %v9157_v61 = vpop.permute.xlu1 %1744  ;;  %v2323_v41 = vmul.f32 %v6861_v10, %v9014_v56  ;;  %3536 = vmatprep.subr.bf16.mxu1 %v6751_v26  ;;  %v6756_v9 = vld [vmem:[#allocation21 + $0x64] ss:$8 sps:$4 sm:$0xff]   ;;  %v6754_v26 = vld [vmem:[#allocation21 + $0x60] ss:$8 sps:$4 sm:$0xff]  }
 0x432   : > { %6870 = vpow2.f32 %v5813_v37  ;;  %v1644_v29 = vsel %vm1630_vm1, %v1620_v52, 0.0  ;;  %v2322_v60 = vmul.f32 %v6863_v57, %v9018_v6  ;;  %v6865_v36 = vpop.eup %6864  ;;  %v1679_v45 = vmul.f32 %v8822_v47, %v1604_v16  ;;  %v6752_v16 = vld [vmem:[#allocation19 + $0x1c8] ss:$20 sps:$4 sm:$0xff]  }
 0x433   : > { %v9165_v22 = vpack.c.bf16 %v2323_v41, %v2321_v62  ;;  %v1678_v23 = vmul.f32 %v8822_v47, %v1644_v29  ;;  %v6867_v10 = vpop.eup %6866  ;;  %v2229_v37 = vadd.f32 1.0, %v6865_v36  ;;  %v6753_v52 = vld [vmem:[#allocation19 + $0x88] ss:$20 sps:$4 sm:$0xff]   ;;  %v6760_v41 = vld [vmem:[#allocation19 + $0x1f0] ss:$20 sps:$4 sm:$0xff]   ;;  %6027 = vmatprep.subr.bf16.mxu0 %v6752_v16 }
 0x434   : > { %v1775_v53 = vpop.permute.xlu0 %1774  ;;  %v9168_v56 = vpack.c.bf16 %v2322_v60, %v2320_v15  ;;  %3537 = vmatpush1.bf16.msra.mxu1 %v6749_v49  ;;  %v6757_v60 = vld [vmem:[#allocation21 + $0x70] ss:$8 sps:$4 sm:$0xff]   ;;  %v2228_v36 = vadd.f32 1.0, %v6867_v10  ;;  %6028 = vmatpush3.bf16.msra.mxu0 %v6753_v52 }
 0x435   : > { %v1801_v42 = vsel %vm1794_vm2, %v9123_v44, %v1775_v53  ;;  %v1817_v35 = vsel %vm1794_vm2, %v1775_v53, %v9123_v44  ;;  %v9176_v6 = vpop.permute.xlu1 %1941  ;;  %2945 = vmatprep.mubr.bf16.mxu0 %v9165_v22  ;;  %3058 = vmatprep.mubr.bf16.mxu1 %v9165_v22  ;;  %v1711_v44 = vadd.f32 %v1679_v45, %v8562_v13  ;;  %v6761_v10 = vld [vmem:[#allocation19 + $0xb0] ss:$20 sps:$4 sm:$0xff]   ;;  %6872 = vrcp.f32 %v2229_v37 }
 0x436   : > { %v1841_v62 = vsel %vm1827_vm3, %v1817_v35, 0.0  ;;  %v1876_v49 = vmul.f32 %v8839_v18, %v1801_v42  ;;  %2946 = vmatmul.mubr.bf16.gmra.mrb[36].mxu0 %v9168_v56  ;;  %3059 = vmatmul.mubr.bf16.gmra.mrb[20].mxu1 %v9168_v56  ;;  %v1710_v29 = vadd.f32 %v1678_v23, %v8559_v43  ;;  %6874 = vrcp.f32 %v2228_v36 }
 0x437   : > { %v1875_v57 = vmul.f32 %v8839_v18, %v1841_v62  ;;  %3538 = vmatprep.subr.bf16.mxu1 %v6756_v9  ;;  %v6764_v9 = vld [vmem:[#allocation21 + $0x84] ss:$8 sps:$4 sm:$0xff]   ;;  %6029 = vmatprep.subr.bf16.mxu0 %v6760_v41 }
 0x438   : > { %v1972_v15 = vpop.permute.xlu0 %1971  ;;  %3539 = vmatpush1.bf16.msra.mxu1 %v6754_v26  ;;  %v1908_v53 = vadd.f32 %v1876_v49, %v1711_v44  ;;  %v6768_v44 = vld [vmem:[#allocation19 + $0x218] ss:$20 sps:$4 sm:$0xff]   ;;  %6030 = vmatpush3.bf16.msra.mxu0 %v6761_v10 }
 0x439   : > { %v1998_v42 = vsel %vm1991_vm4, %v9138_v50, %v1972_v15  ;;  %v2014_v13 = vsel %vm1991_vm4, %v1972_v15, %v9138_v50  ;;  %v1580_v45 = vpop.permute.xlu1 %1579  ;;  %3540 = vmatprep.subr.bf16.mxu1 %v6759_v27  ;;  %v1907_v62 = vadd.f32 %v1875_v57, %v1710_v29  ;;  %v6767_v29 = vld [vmem:[#allocation21 + $0x94] ss:$8 sps:$4 sm:$0xff]   ;;  %6031 = vmatprep.subr.bf16.mxu0 %v6768_v44 }
 0x43a   : > { %v2038_v43 = vsel %vm2024_vm5, %v2014_v13, 0.0  ;;  %v2073_v23 = vmul.f32 %v8858_v40, %v1998_v42  ;;  %v1605_v26 = vsel %vm1597_vm0, %v9142_v39, %v1580_v45  ;;  %v1621_v35 = vsel %vm1597_vm0, %v1580_v45, %v9142_v39  ;;  %v6762_v39 = vld [vmem:[#allocation21 + $0x80] ss:$8 sps:$4 sm:$0xff]  }
 0x43b   : > { %v6869_v50 = vpop.eup %6868  ;;  %v2072_v27 = vmul.f32 %v8858_v40, %v2038_v43  ;;  %v1646_v49 = vsel %vm1630_vm1, %v1621_v35, 0.0  ;;  %v1681_v37 = vmul.f32 %v8822_v47, %v1605_v26  ;;  %v6776_v26 = vld [vmem:[#allocation19 + $0x240] ss:$20 sps:$4 sm:$0xff]  }
 0x43c   : > { %v6871_v16 = vpop.eup %6870  ;;  %v2231_v15 = vadd.f32 1.0, %v6869_v50  ;;  %v9206_v42 = vadd.f32 %v2073_v23, %v1908_v53  ;;  %v9208_v13 = vpop.permute.xlu0 %1549  ;;  %3541 = vmatpush1.bf16.msra.mxu1 %v6757_v60  ;;  %v1680_v43 = vmul.f32 %v8822_v47, %v1646_v49  ;;  %v6769_v60 = vld [vmem:[#allocation19 + $0xd8] ss:$20 sps:$4 sm:$0xff]  }
 0x43d   : > { %v2230_v52 = vadd.f32 1.0, %v6871_v16  ;;  %v9210_v45 = vadd.f32 %v2072_v27, %v1907_v62  ;;  %v1777_v57 = vpop.permute.xlu1 %1776  ;;  %3542 = vmatprep.subr.bf16.mxu1 %v6764_v9  ;;  %v6765_v62 = vld [vmem:[#allocation21 + $0x90] ss:$8 sps:$4 sm:$0xff]   ;;  %v1713_v10 = vadd.f32 %v1681_v37, %v8587_v33  ;;  %v6772_v16 = vld [vmem:[#allocation21 + $0xa4] ss:$8 sps:$4 sm:$0xff]   ;;  %6032 = vmatpush3.bf16.msra.mxu0 %v6769_v60 }
 0x43e   : > { %6876 = vrcp.f32 %v2231_v15  ;;  %v5816_v41 = vmul.f32 -1.442695, %v9206_v42  ;;  %v1802_v53 = vsel %vm1794_vm2, %v9157_v61, %v1777_v57  ;;  %v1818_v23 = vsel %vm1794_vm2, %v1777_v57, %v9157_v61  ;;  %6033 = vmatprep.subr.bf16.mxu0 %v6776_v26  ;;  %v6775_v60 = vld [vmem:[#allocation21 + $0xb4] ss:$8 sps:$4 sm:$0xff]  }
 0x43f   : > { %6878 = vrcp.f32 %v2230_v52  ;;  %v5815_v36 = vmul.f32 -1.442695, %v9210_v45  ;;  %v1878_v9 = vmul.f32 %v8839_v18, %v1802_v53  ;;  %v1843_v35 = vsel %vm1827_vm3, %v1818_v23, 0.0 }
 0x440   : > { %v9225_v50 = vpop.permute.xlu0 %1746  ;;  %3543 = vmatpush1.bf16.msra.mxu1 %v6762_v39  ;;  %v1877_v27 = vmul.f32 %v8839_v18, %v1843_v35  ;;  %6880 = vpow2.f32 %v5816_v41  ;;  %v1712_v61 = vadd.f32 %v1680_v43, %v8605_v28  ;;  %v6777_v39 = vld [vmem:[#allocation19 + $0x100] ss:$20 sps:$4 sm:$0xff]   ;;  %v6873_v43 = vpop.eup %6872 }
 0x441   : > { %v1974_v49 = vpop.permute.xlu1 %1973  ;;  %3544 = vmatprep.subr.bf16.mxu1 %v6767_v29  ;;  %6882 = vpow2.f32 %v5815_v36  ;;  %v1910_v33 = vadd.f32 %v1878_v9, %v1713_v10  ;;  %v6770_v41 = vld [vmem:[#allocation21 + $0xa0] ss:$8 sps:$4 sm:$0xff]   ;;  %6034 = vmatpush3.bf16.msra.mxu0 %v6777_v39  ;;  %v6875_v26 = vpop.eup %6874 }
 0x442   : > { %v1999_v44 = vsel %vm1991_vm4, %v9176_v6, %v1974_v49  ;;  %v2015_v15 = vsel %vm1991_vm4, %v1974_v49, %v9176_v6  ;;  %v1909_v57 = vadd.f32 %v1877_v27, %v1712_v61  ;;  %v6784_v36 = vld [vmem:[#allocation19 + $0x268] ss:$20 sps:$4 sm:$0xff]   ;;  %v2325_v49 = vmul.f32 %v6873_v43, %v9096_v59  ;;  %v6773_v61 = vld [vmem:[#allocation21 + $0xb0] ss:$8 sps:$4 sm:$0xff]  }
 0x443   : > { %v2040_v52 = vsel %vm2024_vm5, %v2015_v15, 0.0  ;;  %v2075_v37 = vmul.f32 %v8858_v40, %v1999_v44  ;;  %v6785_v9 = vld [vmem:[#allocation19 + $0x128] ss:$20 sps:$4 sm:$0xff]   ;;  %6035 = vmatprep.subr.bf16.mxu0 %v6784_v36 }
 0x444   : > { %v2074_v28 = vmul.f32 %v8858_v40, %v2040_v52  ;;  %v9240_v29 = vpop.permute.xlu0 %1943  ;;  %3545 = vmatpush1.bf16.msra.mxu1 %v6765_v62  ;;  %v2324_v52 = vmul.f32 %v6875_v26, %v9102_v51  ;;  %v6783_v26 = vld [vmem:[#allocation21 + $0xd4] ss:$8 sps:$4 sm:$0xff]  }
 0x445   : > { %v9242_v53 = vadd.f32 %v2075_v37, %v1910_v33  ;;  %v9244_v6 = vpop.permute.xlu1 %1551  ;;  %3546 = vmatprep.subr.bf16.mxu1 %v6772_v16  ;;  %6036 = vmatpush3.bf16.msra.mxu0 %v6785_v9 }
 0x446   : > { %v9246_v23 = vadd.f32 %v2074_v28, %v1909_v57 }
 0x447   : > { %v5818_v35 = vmul.f32 -1.442695, %v9242_v53 }
 0x448   : > { %v6877_v10 = vpop.eup %6876  ;;  %v5817_v62 = vmul.f32 -1.442695, %v9246_v23  ;;  %v1582_v27 = vpop.permute.xlu0 %1581  ;;  %3547 = vmatpush1.bf16.msra.mxu1 %v6770_v41  ;;  %v6780_v41 = vld [vmem:[#allocation21 + $0xc4] ss:$8 sps:$4 sm:$0xff]  }
 0x449   : > { %v6879_v44 = vpop.eup %6878  ;;  %6884 = vpow2.f32 %v5818_v35  ;;  %v1606_v16 = vsel %vm1597_vm0, %v9208_v13, %v1582_v27  ;;  %v1622_v15 = vsel %vm1597_vm0, %v1582_v27, %v9208_v13  ;;  %v9257_v39 = vpop.permute.xlu1 %1748  ;;  %v2327_v33 = vmul.f32 %v6877_v10, %v9140_v20  ;;  %3548 = vmatprep.subr.bf16.mxu1 %v6775_v60  ;;  %v6778_v20 = vld [vmem:[#allocation21 + $0xc0] ss:$8 sps:$4 sm:$0xff]  }
 0x44a   : > { %6886 = vpow2.f32 %v5817_v62  ;;  %v1648_v59 = vsel %vm1630_vm1, %v1622_v15, 0.0  ;;  %v2326_v37 = vmul.f32 %v6879_v44, %v9144_v21  ;;  %v1683_v57 = vmul.f32 %v8822_v47, %v1606_v16  ;;  %v6881_v13 = vpop.eup %6880  ;;  %v6781_v16 = vld [vmem:[#allocation21 + $0xd0] ss:$8 sps:$4 sm:$0xff]  }
 0x44b   : > { %v9265_v28 = vpack.c.bf16 %v2327_v33, %v2325_v49  ;;  %v6883_v60 = vpop.eup %6882  ;;  %v1682_v35 = vmul.f32 %v8822_v47, %v1648_v59  ;;  %v2233_v27 = vadd.f32 1.0, %v6881_v13 }
 0x44c   : > { %v1779_v43 = vpop.permute.xlu0 %1778  ;;  %v9267_v36 = vpack.c.bf16 %v2326_v37, %v2324_v52  ;;  %3549 = vmatpush1.bf16.msra.mxu1 %v6773_v61  ;;  %v1715_v49 = vadd.f32 %v1683_v57, %v8621_v32  ;;  %v2232_v61 = vadd.f32 1.0, %v6883_v60  ;;  %v6788_v32 = vld [vmem:[#allocation21 + $0xe4] ss:$8 sps:$4 sm:$0xff]  }
 0x44d   : > { %v1803_v51 = vsel %vm1794_vm2, %v9225_v50, %v1779_v43  ;;  %v1819_v21 = vsel %vm1794_vm2, %v1779_v43, %v9225_v50  ;;  %v9276_v9 = vpop.permute.xlu1 %1945  ;;  %2955 = vmatprep.mubr.bf16.mxu0 %v9265_v28  ;;  %3068 = vmatprep.mubr.bf16.mxu1 %v9265_v28  ;;  %v1714_v15 = vadd.f32 %v1682_v35, %v8618_v11  ;;  %6888 = vrcp.f32 %v2233_v27 }
 0x44e   : > { %v1845_v10 = vsel %vm1827_vm3, %v1819_v21, 0.0  ;;  %v1880_v62 = vmul.f32 %v8839_v18, %v1803_v51  ;;  %2956 = vmatmul.mubr.bf16.gmra.mrb[40].mxu0 %v9267_v36  ;;  %3069 = vmatmul.mubr.bf16.gmra.mrb[24].mxu1 %v9267_v36  ;;  %6890 = vrcp.f32 %v2232_v61 }
 0x44f   : > { %v1879_v50 = vmul.f32 %v8839_v18, %v1845_v10  ;;  %3550 = vmatprep.subr.bf16.mxu1 %v6780_v41  ;;  %v6786_v10 = vld [vmem:[#allocation21 + $0xe0] ss:$8 sps:$4 sm:$0xff]  }
 0x450   : > { %v1976_v44 = vpop.permute.xlu0 %1975  ;;  %3551 = vmatpush1.bf16.msra.mxu1 %v6778_v20  ;;  %v1912_v33 = vadd.f32 %v1880_v62, %v1715_v49 }
 0x451   : > { %v2000_v59 = vsel %vm1991_vm4, %v9240_v29, %v1976_v44  ;;  %v2016_v52 = vsel %vm1991_vm4, %v1976_v44, %v9240_v29  ;;  %v1584_v37 = vpop.permute.xlu1 %1583  ;;  %3552 = vmatprep.subr.bf16.mxu1 %v6783_v26  ;;  %v1911_v20 = vadd.f32 %v1879_v50, %v1714_v15  ;;  %v6791_v50 = vld [vmem:[#allocation21 + $0xf4] ss:$8 sps:$4 sm:$0xff]  }
 0x452   : > { %v2042_v57 = vsel %vm2024_vm5, %v2016_v52, 0.0  ;;  %v2077_v41 = vmul.f32 %v8858_v40, %v2000_v59  ;;  %v1607_v11 = vsel %vm1597_vm0, %v9244_v6, %v1584_v37  ;;  %v1623_v13 = vsel %vm1597_vm0, %v1584_v37, %v9244_v6 }
 0x453   : > { %v6885_v43 = vpop.eup %6884  ;;  %v2076_v29 = vmul.f32 %v8858_v40, %v2042_v57  ;;  %v1650_v60 = vsel %vm1630_vm1, %v1623_v13, 0.0  ;;  %v1685_v6 = vmul.f32 %v8822_v47, %v1607_v11 }
 0x454   : > { %v6887_v35 = vpop.eup %6886  ;;  %v2235_v51 = vadd.f32 1.0, %v6885_v43  ;;  %v9306_v21 = vadd.f32 %v2077_v41, %v1912_v33  ;;  %v1554_v26 = vpop.permute.xlu0 %1553  ;;  %3553 = vmatpush1.bf16.msra.mxu1 %v6781_v16  ;;  %v1684_v15 = vmul.f32 %v8822_v47, %v1650_v60 }
 0x455   : > { %v2234_v62 = vadd.f32 1.0, %v6887_v35  ;;  %v9308_v49 = vadd.f32 %v2076_v29, %v1911_v20  ;;  %v1781_v27 = vpop.permute.xlu1 %1780  ;;  %3554 = vmatprep.subr.bf16.mxu1 %v6788_v32  ;;  %v6789_v32 = vld [vmem:[#allocation21 + $0xf0] ss:$8 sps:$4 sm:$0xff]   ;;  %v1717_v57 = vadd.f32 %v1685_v6, %v8626_v0 }
 0x456   : > { %6892 = vrcp.f32 %v2235_v51  ;;  %v5820_v44 = vmul.f32 -1.442695, %v9306_v21  ;;  %v1804_v33 = vsel %vm1794_vm2, %v9257_v39, %v1781_v27  ;;  %v1820_v16 = vsel %vm1794_vm2, %v1781_v27, %v9257_v39 }
 0x457   : > { %6894 = vrcp.f32 %v2234_v62  ;;  %v5819_v61 = vmul.f32 -1.442695, %v9308_v49  ;;  %v1882_v59 = vmul.f32 %v8839_v18, %v1804_v33  ;;  %v1847_v52 = vsel %vm1827_vm3, %v1820_v16, 0.0 }
 0x458   : > { %v1751_v37 = vpop.permute.xlu0 %1750  ;;  %3555 = vmatpush1.bf16.msra.mxu1 %v6786_v10  ;;  %v1881_v41 = vmul.f32 %v8839_v18, %v1847_v52  ;;  %6896 = vpow2.f32 %v5820_v44  ;;  %v1716_v13 = vadd.f32 %v1684_v15, %v8629_v1  ;;  %v6889_v1 = vpop.eup %6888 }
 0x459   : > { %v1978_v11 = vpop.permute.xlu1 %1977  ;;  %3556 = vmatprep.subr.bf16.mxu1 %v6791_v50  ;;  %6898 = vpow2.f32 %v5819_v61  ;;  %v1914_v20 = vadd.f32 %v1882_v59, %v1717_v57  ;;  %v6891_v27 = vpop.eup %6890  ;;  %v2329_v33 = vmul.f32 %v6889_v1, %v9206_v42 }
 0x45a   : > { %v2001_v39 = vsel %vm1991_vm4, %v9276_v9, %v1978_v11  ;;  %v2017_v43 = vsel %vm1991_vm4, %v1978_v11, %v9276_v9  ;;  %v1913_v60 = vadd.f32 %v1881_v41, %v1716_v13  ;;  %v2328_v41 = vmul.f32 %v6891_v27, %v9210_v45 }
 0x45b   : > { %v2044_v0 = vsel %vm2024_vm5, %v2017_v43, 0.0  ;;  %v2079_v29 = vmul.f32 %v8858_v40, %v2001_v39 }
 0x45c   : > { %v2078_v35 = vmul.f32 %v8858_v40, %v2044_v0  ;;  %v1948_v51 = vpop.permute.xlu0 %1947  ;;  %3557 = vmatpush1.bf16.msra.mxu1 %v6789_v32 }
 0x45d   : > { %v9336_v10 = vadd.f32 %v2079_v29, %v1914_v20  ;;  %v1556_v62 = vpop.permute.xlu1 %1555 }
 0x45e   : > { %v9338_v6 = vadd.f32 %v2078_v35, %v1913_v60 }
 0x45f   : > { %v5822_v9 = vmul.f32 -1.442695, %v9336_v10 }
 0x460   : > { %v6893_v50 = vpop.eup %6892  ;;  %v5821_v44 = vmul.f32 -1.442695, %v9338_v6  ;;  %v1586_v15 = vpop.permute.xlu0 %1585 }
 0x461   : > { %v6895_v61 = vpop.eup %6894  ;;  %6900 = vpow2.f32 %v5822_v9  ;;  %v1608_v16 = vsel %vm1597_vm0, %v1554_v26, %v1586_v15  ;;  %v1624_v59 = vsel %vm1597_vm0, %v1586_v15, %v1554_v26  ;;  %v1753_v52 = vpop.permute.xlu1 %1752  ;;  %v2331_v32 = vmul.f32 %v6893_v50, %v9242_v53 }
 0x462   : > { %6902 = vpow2.f32 %v5821_v44  ;;  %v1652_v57 = vsel %vm1630_vm1, %v1624_v59, 0.0  ;;  %v2330_v11 = vmul.f32 %v6895_v61, %v9246_v23  ;;  %v1687_v42 = vmul.f32 %v8822_v47, %v1608_v16  ;;  %v6897_v39 = vpop.eup %6896 }
 0x463   : > { %v9353_v13 = vpack.c.bf16 %v2331_v32, %v2329_v33  ;;  %v6899_v26 = vpop.eup %6898  ;;  %v1686_v0 = vmul.f32 %v8822_v47, %v1652_v57  ;;  %v2237_v35 = vadd.f32 1.0, %v6897_v39 }
 0x464   : > { %v1783_v43 = vpop.permute.xlu0 %1782  ;;  %v9355_v20 = vpack.c.bf16 %v2330_v11, %v2328_v41  ;;  %v1719_v1 = vadd.f32 %v1687_v42, %v8661_v4 }
 0x465   : > { %v1805_v53 = vsel %vm1794_vm2, %v1751_v37, %v1783_v43  ;;  %v1821_v29 = vsel %vm1794_vm2, %v1783_v43, %v1751_v37  ;;  %v1950_v45 = vpop.permute.xlu1 %1949  ;;  %2965 = vmatprep.mubr.bf16.mxu0 %v9353_v13  ;;  %3078 = vmatprep.mubr.bf16.mxu1 %v9353_v13  ;;  %v2236_v37 = vadd.f32 1.0, %v6899_v26  ;;  %v1718_v50 = vadd.f32 %v1686_v0, %v8656_v3 }
 0x466   : > { %v1849_v23 = vsel %vm1827_vm3, %v1821_v29, 0.0  ;;  %v1884_v60 = vmul.f32 %v8839_v18, %v1805_v53  ;;  %2966 = vmatmul.mubr.bf16.gmra.mrb[44].mxu0 %v9355_v20  ;;  %3079 = vmatmul.mubr.bf16.gmra.mrb[28].mxu1 %v9355_v20  ;;  %6904 = vrcp.f32 %v2237_v35 }
 0x467   : > { %v1883_v27 = vmul.f32 %v8839_v18, %v1849_v23  ;;  %6906 = vrcp.f32 %v2236_v37 }
 0x468   : > { %v1980_v9 = vpop.permute.xlu0 %1979  ;;  %v1916_v44 = vadd.f32 %v1884_v60, %v1719_v1 }
 0x469   : > { %v2002_v15 = vsel %vm1991_vm4, %v1948_v51, %v1980_v9  ;;  %v2018_v33 = vsel %vm1991_vm4, %v1980_v9, %v1948_v51  ;;  %v1588_v61 = vpop.permute.xlu1 %1587  ;;  %v1915_v57 = vadd.f32 %v1883_v27, %v1718_v50 }
 0x46a   : > { %v2046_v16 = vsel %vm2024_vm5, %v2018_v33, 0.0  ;;  %v2081_v59 = vmul.f32 %v8858_v40, %v2002_v15  ;;  %v1609_v4 = vsel %vm1597_vm0, %v1556_v62, %v1588_v61  ;;  %v1625_v32 = vsel %vm1597_vm0, %v1588_v61, %v1556_v62 }
 0x46b   : > { %v6901_v3 = vpop.eup %6900  ;;  %v2080_v41 = vmul.f32 %v8858_v40, %v2046_v16  ;;  %v1654_v51 = vsel %vm1630_vm1, %v1625_v32, 0.0  ;;  %v1689_v53 = vmul.f32 %v8822_v47, %v1609_v4 }
 0x46c   : > { %v6903_v11 = vpop.eup %6902  ;;  %v2239_v42 = vadd.f32 1.0, %v6901_v3  ;;  %v9386_v39 = vadd.f32 %v2081_v59, %v1916_v44  ;;  %v1558_v43 = vpop.permute.xlu0 %1557  ;;  %v1688_v23 = vmul.f32 %v8822_v47, %v1654_v51 }
 0x46d   : > { %v2238_v26 = vadd.f32 1.0, %v6903_v11  ;;  %v9388_v0 = vadd.f32 %v2080_v41, %v1915_v57  ;;  %v1785_v62 = vpop.permute.xlu1 %1784  ;;  %v1721_v50 = vadd.f32 %v1689_v53, %v8673_v25 }
 0x46e   : > { %6908 = vrcp.f32 %v2239_v42  ;;  %v5824_v29 = vmul.f32 -1.442695, %v9386_v39  ;;  %v1806_v60 = vsel %vm1794_vm2, %v1753_v52, %v1785_v62  ;;  %v1822_v1 = vsel %vm1794_vm2, %v1785_v62, %v1753_v52 }
 0x46f   : > { %6910 = vrcp.f32 %v2238_v26  ;;  %v5823_v35 = vmul.f32 -1.442695, %v9388_v0  ;;  %v1886_v27 = vmul.f32 %v8839_v18, %v1806_v60  ;;  %v1851_v37 = vsel %vm1827_vm3, %v1822_v1, 0.0 }
 0x470   : > { %v1755_v9 = vpop.permute.xlu0 %1754  ;;  %v1885_v44 = vmul.f32 %v8839_v18, %v1851_v37  ;;  %6912 = vpow2.f32 %v5824_v29  ;;  %v1720_v33 = vadd.f32 %v1688_v23, %v8668_v5  ;;  %v6905_v57 = vpop.eup %6904 }
 0x471   : > { %v1982_v15 = vpop.permute.xlu1 %1981  ;;  %6914 = vpow2.f32 %v5823_v35  ;;  %v1918_v16 = vadd.f32 %v1886_v27, %v1721_v50  ;;  %v6907_v11 = vpop.eup %6906  ;;  %v2333_v62 = vmul.f32 %v6905_v57, %v9306_v21 }
 0x472   : > { %v2003_v61 = vsel %vm1991_vm4, %v1950_v45, %v1982_v15  ;;  %v2019_v52 = vsel %vm1991_vm4, %v1982_v15, %v1950_v45  ;;  %v1917_v25 = vadd.f32 %v1885_v44, %v1720_v33  ;;  %v2332_v37 = vmul.f32 %v6907_v11, %v9308_v49 }
 0x473   : > { %v2048_v59 = vsel %vm2024_vm5, %v2019_v52, 0.0  ;;  %v2083_v4 = vmul.f32 %v8858_v40, %v2003_v61 }
 0x474   : > { %v2082_v32 = vmul.f32 %v8858_v40, %v2048_v59  ;;  %v1952_v3 = vpop.permute.xlu0 %1951 }
 0x475   : > { %v9412_v41 = vadd.f32 %v2083_v4, %v1918_v16  ;;  %v1560_v5 = vpop.permute.xlu1 %1559 }
 0x476   : > { %v9414_v51 = vadd.f32 %v2082_v32, %v1917_v25 }
 0x477   : > { %v5826_v45 = vmul.f32 -1.442695, %v9412_v41 }
 0x478   : > { %v6909_v42 = vpop.eup %6908  ;;  %v5825_v26 = vmul.f32 -1.442695, %v9414_v51  ;;  %v1590_v53 = vpop.permute.xlu0 %1589 }
 0x479   : > { %v6911_v29 = vpop.eup %6910  ;;  %6916 = vpow2.f32 %v5826_v45  ;;  %v1610_v23 = vsel %vm1597_vm0, %v1558_v43, %v1590_v53  ;;  %v1626_v60 = vsel %vm1597_vm0, %v1590_v53, %v1558_v43  ;;  %v1757_v35 = vpop.permute.xlu1 %1756  ;;  %v2335_v1 = vmul.f32 %v6909_v42, %v9336_v10 }
 0x47a   : > { %6918 = vpow2.f32 %v5825_v26  ;;  %v1656_v27 = vsel %vm1630_vm1, %v1626_v60, 0.0  ;;  %v2334_v50 = vmul.f32 %v6911_v29, %v9338_v6  ;;  %v1691_v21 = vmul.f32 %v8822_v47, %v1610_v23  ;;  %v6913_v15 = vpop.eup %6912 }
 0x47b   : > { %v9429_v44 = vpack.c.bf16 %v2335_v1, %v2333_v62  ;;  %v6915_v43 = vpop.eup %6914  ;;  %v1690_v52 = vmul.f32 %v8822_v47, %v1656_v27  ;;  %v2241_v4 = vadd.f32 1.0, %v6913_v15 }
 0x47c   : > { %v1787_v33 = vpop.permute.xlu0 %1786  ;;  %v9431_v61 = vpack.c.bf16 %v2334_v50, %v2332_v37  ;;  %v1723_v25 = vadd.f32 %v1691_v21, %v8701_v54 }
 0x47d   : > { %v1807_v10 = vsel %vm1794_vm2, %v1755_v9, %v1787_v33  ;;  %v1823_v16 = vsel %vm1794_vm2, %v1787_v33, %v1755_v9  ;;  %v1954_v49 = vpop.permute.xlu1 %1953  ;;  %2975 = vmatprep.mubr.bf16.mxu0 %v9429_v44  ;;  %3088 = vmatprep.mubr.bf16.mxu1 %v9429_v44  ;;  %v2240_v9 = vadd.f32 1.0, %v6915_v43  ;;  %v1722_v11 = vadd.f32 %v1690_v52, %v8696_v17 }
 0x47e   : > { %v1853_v6 = vsel %vm1827_vm3, %v1823_v16, 0.0  ;;  %v1888_v59 = vmul.f32 %v8839_v18, %v1807_v10  ;;  %2976 = vmatmul.mubr.bf16.gmra.mrb[48].mxu0 %v9431_v61  ;;  %3089 = vmatmul.mubr.bf16.gmra.mrb[32].mxu1 %v9431_v61  ;;  %6920 = vrcp.f32 %v2241_v4 }
 0x47f   : > { %v1887_v32 = vmul.f32 %v8839_v18, %v1853_v6  ;;  %6922 = vrcp.f32 %v2240_v9 }
 0x480   : > { %v1984_v57 = vpop.permute.xlu0 %1983  ;;  %v1920_v45 = vadd.f32 %v1888_v59, %v1723_v25 }
 0x481   : > { %v2004_v42 = vsel %vm1991_vm4, %v1952_v3, %v1984_v57  ;;  %v2020_v26 = vsel %vm1991_vm4, %v1984_v57, %v1952_v3  ;;  %v1592_v53 = vpop.permute.xlu1 %1591  ;;  %v1919_v60 = vadd.f32 %v1887_v32, %v1722_v11 }
 0x482   : > { %v2050_v62 = vsel %vm2024_vm5, %v2020_v26, 0.0  ;;  %v2085_v29 = vmul.f32 %v8858_v40, %v2004_v42  ;;  %v1611_v54 = vsel %vm1597_vm0, %v1560_v5, %v1592_v53  ;;  %v1627_v23 = vsel %vm1597_vm0, %v1592_v53, %v1560_v5 }
 0x483   : > { %v6917_v17 = vpop.eup %6916  ;;  %v2084_v1 = vmul.f32 %v8858_v40, %v2050_v62  ;;  %v1658_v3 = vsel %vm1630_vm1, %v1627_v23, 0.0  ;;  %v1693_v43 = vmul.f32 %v8822_v47, %v1611_v54 }
 0x484   : > { %v6919_v27 = vpop.eup %6918  ;;  %v2243_v37 = vadd.f32 1.0, %v6917_v17  ;;  %v9462_v50 = vadd.f32 %v2085_v29, %v1920_v45  ;;  %v1562_v21 = vpop.permute.xlu0 %1561  ;;  %v1692_v10 = vmul.f32 %v8822_v47, %v1658_v3 }
 0x485   : > { %v2242_v15 = vadd.f32 1.0, %v6919_v27  ;;  %v9464_v33 = vadd.f32 %v2084_v1, %v1919_v60  ;;  %v1789_v5 = vpop.permute.xlu1 %1788  ;;  %v1725_v9 = vadd.f32 %v1693_v43, %v8713_v2 }
 0x486   : > { %6924 = vrcp.f32 %v2243_v37  ;;  %v5828_v52 = vmul.f32 -1.442695, %v9462_v50  ;;  %v1808_v16 = vsel %vm1794_vm2, %v1757_v35, %v1789_v5  ;;  %v1824_v59 = vsel %vm1794_vm2, %v1789_v5, %v1757_v35 }
 0x487   : > { %6926 = vrcp.f32 %v2242_v15  ;;  %v5827_v6 = vmul.f32 -1.442695, %v9464_v33  ;;  %v1890_v4 = vmul.f32 %v8839_v18, %v1808_v16  ;;  %v1855_v25 = vsel %vm1827_vm3, %v1824_v59, 0.0 }
 0x488   : > { %v1759_v32 = vpop.permute.xlu0 %1758  ;;  %v1889_v57 = vmul.f32 %v8839_v18, %v1855_v25  ;;  %6928 = vpow2.f32 %v5828_v52  ;;  %v1724_v45 = vadd.f32 %v1692_v10, %v8708_v31  ;;  %v6921_v23 = vpop.eup %6920 }
 0x489   : > { %v1986_v11 = vpop.permute.xlu1 %1985  ;;  %6930 = vpow2.f32 %v5827_v6  ;;  %v1922_v26 = vadd.f32 %v1890_v4, %v1725_v9  ;;  %v6923_v1 = vpop.eup %6922  ;;  %v2337_v15 = vmul.f32 %v6921_v23, %v9386_v39 }
 0x48a   : > { %v2005_v42 = vsel %vm1991_vm4, %v1954_v49, %v1986_v11  ;;  %v2021_v35 = vsel %vm1991_vm4, %v1986_v11, %v1954_v49  ;;  %v1921_v2 = vadd.f32 %v1889_v57, %v1724_v45  ;;  %v2336_v59 = vmul.f32 %v6923_v1, %v9388_v0 }
 0x48b   : > { %v2052_v53 = vsel %vm2024_vm5, %v2021_v35, 0.0  ;;  %v2087_v62 = vmul.f32 %v8858_v40, %v2005_v42 }
 0x48c   : > { %v2086_v29 = vmul.f32 %v8858_v40, %v2052_v53  ;;  %v1956_v54 = vpop.permute.xlu0 %1955 }
 0x48d   : > { %v9488_v17 = vadd.f32 %v2087_v62, %v1922_v26  ;;  %v1564_v31 = vpop.permute.xlu1 %1563 }
 0x48e   : > { %v9490_v60 = vadd.f32 %v2086_v29, %v1921_v2 }
 0x48f   : > { %v5830_v49 = vmul.f32 -1.442695, %v9488_v17 }
 0x490   : > { %v6925_v3 = vpop.eup %6924  ;;  %v5829_v27 = vmul.f32 -1.442695, %v9490_v60  ;;  %v1594_v37 = vpop.permute.xlu0 %1593 }
 0x491   : > { %v6927_v43 = vpop.eup %6926  ;;  %6932 = vpow2.f32 %v5830_v49  ;;  %v1612_v5 = vsel %vm1597_vm0, %v1562_v21, %v1594_v37  ;;  %v1628_v52 = vsel %vm1597_vm0, %v1594_v37, %v1562_v21  ;;  %v1761_v10 = vpop.permute.xlu1 %1760  ;;  %v2339_v16 = vmul.f32 %v6925_v3, %v9412_v41 }
 0x492   : > { %6934 = vpow2.f32 %v5829_v27  ;;  %v1660_v6 = vsel %vm1630_vm1, %v1628_v52, 0.0  ;;  %v2338_v4 = vmul.f32 %v6927_v43, %v9414_v51  ;;  %v1695_v39 = vmul.f32 %v8822_v47, %v1612_v5  ;;  %v6929_v9 = vpop.eup %6928 }
 0x493   : > { %v9505_v25 = vpack.c.bf16 %v2339_v16, %v2337_v15  ;;  %v6931_v21 = vpop.eup %6930  ;;  %v1694_v45 = vmul.f32 %v8822_v47, %v1660_v6 }
 0x494   : > { %v1791_v57 = vpop.permute.xlu0 %1790  ;;  %v9507_v11 = vpack.c.bf16 %v2338_v4, %v2336_v59  ;;  %v1727_v26 = vadd.f32 %v1695_v39, %v8741_v58  ;;  %v2244_v62 = vadd.f32 1.0, %v6931_v21 }
 0x495   : > { %v1809_v41 = vsel %vm1794_vm2, %v1759_v32, %v1791_v57  ;;  %v1825_v42 = vsel %vm1794_vm2, %v1791_v57, %v1759_v32  ;;  %v1958_v0 = vpop.permute.xlu1 %1957  ;;  %2985 = vmatprep.mubr.bf16.mxu0 %v9505_v25  ;;  %3098 = vmatprep.mubr.bf16.mxu1 %v9505_v25  ;;  %v2245_v32 = vadd.f32 1.0, %v6929_v9  ;;  %v1726_v29 = vadd.f32 %v1694_v45, %v8736_v24 }
 0x496   : > { %v1857_v51 = vsel %vm1827_vm3, %v1825_v42, 0.0  ;;  %v1892_v35 = vmul.f32 %v8839_v18, %v1809_v41  ;;  %2986 = vmatmul.mubr.bf16.gmra.mrb[52].mxu0 %v9507_v11  ;;  %3099 = vmatmul.mubr.bf16.gmra.mrb[36].mxu1 %v9507_v11 }
 0x497   : > { %v1891_v53 = vmul.f32 %v8839_v18, %v1857_v51  ;;  %6936 = vrcp.f32 %v2245_v32 }
 0x498   : > { %v1988_v2 = vpop.permute.xlu0 %1987  ;;  %v1924_v23 = vadd.f32 %v1892_v35, %v1727_v26  ;;  %6938 = vrcp.f32 %v2244_v62  ;;  %v11395_v35 = vld [vmem:[#allocation85_spill] sm:$0xff]  ;;  %v11396_v62 = vld [vmem:[#allocation84_spill] sm:$0xff] }
 0x499   : > { %v2006_v1 = vsel %vm1991_vm4, %v1956_v54, %v1988_v2  ;;  %v2022_v49 = vsel %vm1991_vm4, %v1988_v2, %v1956_v54  ;;  %v1596_v3 = vpop.permute.xlu1 %1595  ;;  %v1923_v43 = vadd.f32 %v1891_v53, %v1726_v29 }
 0x49a   : > { %v2054_v27 = vsel %vm2024_vm5, %v2022_v49, 0.0  ;;  %v2089_v58 = vmul.f32 %v8858_v40, %v2006_v1  ;;  %v1613_v37 = vsel %vm1597_vm0, %v1564_v31, %v1596_v3  ;;  %v1629_v15 = vsel %vm1597_vm0, %v1596_v3, %v1564_v31 }
 0x49b   : > { %v6933_v24 = vpop.eup %6932  ;;  %v2088_v5 = vmul.f32 %v8858_v40, %v2054_v27  ;;  %v1662_v52 = vsel %vm1630_vm1, %v1629_v15, 0.0  ;;  %v1697_v39 = vmul.f32 %v8822_v47, %v1613_v37 }
 0x49c   : > { %v6935_v54 = vpop.eup %6934  ;;  %v2247_v16 = vadd.f32 1.0, %v6933_v24  ;;  %v9538_v6 = vadd.f32 %v2089_v58, %v1924_v23  ;;  %v1696_v31 = vmul.f32 %v8822_v47, %v1662_v52 }
 0x49d   : > { %v2246_v59 = vadd.f32 1.0, %v6935_v54  ;;  %v9540_v4 = vadd.f32 %v2088_v5, %v1923_v43  ;;  %v1793_v9 = vpop.permute.xlu1 %1792  ;;  %v1729_v26 = vadd.f32 %v1697_v39, %v11395_v35 }
 0x49e   : > { %6940 = vrcp.f32 %v2247_v16  ;;  %v1810_v57 = vsel %vm1794_vm2, %v1761_v10, %v1793_v9  ;;  %v5832_v21 = vmul.f32 -1.442695, %v9538_v6  ;;  %v1826_v45 = vsel %vm1794_vm2, %v1793_v9, %v1761_v10 }
 0x49f   : > { %6942 = vrcp.f32 %v2246_v59  ;;  %v1894_v41 = vmul.f32 %v8839_v18, %v1810_v57  ;;  %v5831_v42 = vmul.f32 -1.442695, %v9540_v4  ;;  %v1859_v51 = vsel %vm1827_vm3, %v1826_v45, 0.0 }
 0x4a0   : > { %v1893_v47 = vmul.f32 %v8839_v18, %v1859_v51  ;;  %v1728_v32 = vadd.f32 %v1696_v31, %v11396_v62  ;;  %6944 = vpow2.f32 %v5832_v21  ;;  %v11397_v62 = vld [vmem:[#allocation45_spill] sm:$0xff] }
 0x4a1   : > { %v1990_v53 = vpop.permute.xlu1 %1989  ;;  %v1926_v29 = vadd.f32 %v1894_v41, %v1729_v26  ;;  %6946 = vpow2.f32 %v5831_v42  ;;  %v6937_v27 = vpop.eup %6936 }
 0x4a2   : > { %v2007_v2 = vsel %vm1991_vm4, %v1958_v0, %v1990_v53  ;;  %v2023_v10 = vsel %vm1991_vm4, %v1990_v53, %v1958_v0  ;;  %v1925_v49 = vadd.f32 %v1893_v47, %v1728_v32  ;;  %v6939_v37 = vpop.eup %6938  ;;  %v2341_v0 = vmul.f32 %v6937_v27, %v9462_v50 }
 0x4a3   : > { %v2056_v23 = vsel %vm2024_vm5, %v2023_v10, 0.0  ;;  %v2091_v1 = vmul.f32 %v8858_v40, %v2007_v2  ;;  %v2340_v52 = vmul.f32 %v6939_v37, %v9464_v33  ;;  %v11398_v32 = vpack.c.bf16 %v8434_v38, %v11397_v62  ;;  %v11399_v2 = vld [vmem:[#allocation47_spill] sm:$0xff] }
 0x4a4   : > { %v2090_v18 = vmul.f32 %v8858_v40, %v2056_v23  ;;  %v11406_v38 = vpack.c.bf16 %v8498_v12, %v8518_v34  ;;  %v11414_v12 = vld [vmem:[#allocation61_spill] sm:$0xff] }
 0x4a5   : > { %v2123_v3 = vadd.f32 %v2091_v1, %v1926_v29  ;;  %v11408_v1 = vld [vmem:[#allocation65_spill] sm:$0xff] }
 0x4a6   : > { %v2122_v58 = vadd.f32 %v2090_v18, %v1925_v49 }
 0x4a7   : > { %v5834_v15 = vmul.f32 -1.442695, %v2123_v3 }
 0x4a8   : > { %v6941_v24 = vpop.eup %6940  ;;  %v5833_v43 = vmul.f32 -1.442695, %v2122_v58 }
 0x4a9   : > { %v6943_v5 = vpop.eup %6942  ;;  %6948 = vpow2.f32 %v5834_v15  ;;  %v2343_v19 = vmul.f32 %v6941_v24, %v9488_v17 }
 0x4aa   : > { %6950 = vpow2.f32 %v5833_v43  ;;  %v2342_v54 = vmul.f32 %v6943_v5, %v9490_v60  ;;  %v6945_v59 = vpop.eup %6944 }
 0x4ab   : > { %v9568_v16 = vpack.c.bf16 %v2343_v19, %v2341_v0  ;;  %v6947_v39 = vpop.eup %6946  ;;  %v2249_v50 = vadd.f32 1.0, %v6945_v59  ;;  %v11422_v0 = vld [vmem:[#allocation75_spill] sm:$0xff] }
 0x4ac   : > { %v9570_v40 = vpack.c.bf16 %v2342_v54, %v2340_v52  ;;  %v2248_v17 = vadd.f32 1.0, %v6947_v39  ;;  %v11425_v54 = vld [vmem:[#allocation82_spill] sm:$0xff]  ;;  %v11426_v39 = vld [vmem:[#allocation79_spill] sm:$0xff] }
 0x4ad   : > { %2995 = vmatprep.mubr.bf16.mxu0 %v9568_v16  ;;  %3108 = vmatprep.mubr.bf16.mxu1 %v9568_v16  ;;  %6952 = vrcp.f32 %v2249_v50  ;;  %v11427_v50 = vld [vmem:[#allocation81_spill] sm:$0xff] }
 0x4ae   : > { %2996 = vmatmul.mubr.bf16.gmra.mrb[56].mxu0 %v9570_v40  ;;  %3109 = vmatmul.mubr.bf16.gmra.mrb[40].mxu1 %v9570_v40  ;;  %6954 = vrcp.f32 %v2248_v17  ;;  %v3318_v17 = vpack.c.bf16 %v11427_v50, %v11426_v39  ;;  %v11446_v50 = vld [vmem:[#allocation41_spill] sm:$0xff] }
 0x4b3   : > { %v6949_v9 = vpop.eup %6948 }
 0x4b4   : > { %v6951_v33 = vpop.eup %6950  ;;  %v2251_v60 = vadd.f32 1.0, %v6949_v9  ;;  %v3321_v9 = vpack.c.bf16 %v8729_v30, %v8719_v55 }
 0x4b5   : > { %v2250_v31 = vadd.f32 1.0, %v6951_v33  ;;  %v11428_v33 = vld [vmem:[#allocation83_spill] sm:$0xff] }
 0x4b6   : > { %6956 = vrcp.f32 %v2251_v60  ;;  %v3320_v60 = vpack.c.bf16 %v8722_v63, %v11428_v33 }
 0x4b7   : > { %6958 = vrcp.f32 %v2250_v31  ;;  %v6953_v57 = vpop.eup %6952 }
 0x4b8   : > { %v6955_v21 = vpop.eup %6954  ;;  %v2345_v42 = vmul.f32 %v6953_v57, %v9538_v6  ;;  %v11400_v6 = vld [vmem:[#allocation44_spill] sm:$0xff] }
 0x4b9   : > { %v2344_v35 = vmul.f32 %v6955_v21, %v9540_v4  ;;  %v11401_v10 = vpack.c.bf16 %v11399_v2, %v11400_v6  ;;  %v11402_v4 = vld [vmem:[#allocation52_spill] sm:$0xff] }
 0x4ba   : > { %v11403_v29 = vpack.c.bf16 %v8463_v14, %v11402_v4  ;;  %v11409_v14 = vld [vmem:[#allocation74_spill] sm:$0xff] }
 0x4c0   : > { %v6957_v45 = vpop.eup %6956 }
 0x4c1   : > { %v6959_v41 = vpop.eup %6958  ;;  %v2347_v51 = vmul.f32 %v6957_v45, %v2123_v3  ;;  %v11417_v3 = vld [vmem:[#allocation72_spill] sm:$0xff] }
 0x4c2   : > { %v2346_v26 = vmul.f32 %v6959_v41, %v2122_v58  ;;  %v11419_v58 = vld [vmem:[#allocation78_spill] sm:$0xff] }
 0x4c3   : > { %v2363_v47 = vpack.c.bf16 %v2347_v51, %v2345_v42 }
 0x4c4   : > { %v2362_v53 = vpack.c.bf16 %v2346_v26, %v2344_v35 }
 0x4c5   : > { %3005 = vmatprep.mubr.bf16.mxu0 %v2363_v47  ;;  %3118 = vmatprep.mubr.bf16.mxu1 %v2363_v47 }
 0x4c6   : > { %3006 = vmatmul.mubr.bf16.gmra.mrb[60].mxu0 %v2362_v53  ;;  %3119 = vmatmul.mubr.bf16.gmra.mrb[44].mxu1 %v2362_v53 }
 0x4c7   : > { %3161 = vmatprep.mubr.bf16.mxu0 %v9047_v8  ;;  %3558 = vmatprep.mubr.bf16.mxu1 %v11398_v32  ;;  %v11404_v8 = vld [vmem:[#allocation54_spill] sm:$0xff] }
 0x4c8   : > { %v11405_v23 = vpack.c.bf16 %v8460_v7, %v11404_v8  ;;  %v11411_v7 = vld [vmem:[#allocation71_spill] sm:$0xff] }
 0x4ce   : > { %3162 = vmatmul.mubr.bf16.vlgmr.msra.gmra.mrb[64].mxu0 %v9049_v48  ;;  %3559 = vmatmul.mubr.bf16.vlgmr.msra.gmra.mrb[48].mxu1 %v11401_v10  ;;  %v11407_v48 = vld [vmem:[#allocation62_spill] sm:$0xff] }
 0x4cf   : > { %3169 = vmatprep.mubr.bf16.mxu0 %v9165_v22  ;;  %3568 = vmatprep.mubr.bf16.mxu1 %v11403_v29  ;;  %v3313_v49 = vpack.c.bf16 %v11408_v1, %v11407_v48  ;;  %v11410_v22 = vpack.c.bf16 %v8598_v46, %v11409_v14  ;;  %v11418_v46 = vld [vmem:[#allocation76_spill] sm:$0xff] }
 0x4d0   : > { %v3317_v37 = vpack.c.bf16 %v11419_v58, %v11418_v46 }
 0x4d6   : > { %3170 = vmatmul.mubr.bf16.gmra.mrb[68].mxu0 %v9168_v56  ;;  %3569 = vmatmul.mubr.bf16.gmra.mrb[52].mxu1 %v11405_v23  ;;  %v11412_v56 = vld [vmem:[#allocation73_spill] sm:$0xff] }
 0x4d7   : > { %3177 = vmatprep.mubr.bf16.mxu0 %v9265_v28  ;;  %3578 = vmatprep.mubr.bf16.mxu1 %v11406_v38  ;;  %v3315_v18 = vpack.c.bf16 %v11412_v56, %v11411_v7  ;;  %v11413_v28 = vld [vmem:[#allocation64_spill] sm:$0xff] }
 0x4d8   : > { %v11415_v34 = vpack.c.bf16 %v11413_v28, %v11414_v12 }
 0x4de   : > { %3178 = vmatmul.mubr.bf16.gmra.mrb[72].mxu0 %v9267_v36  ;;  %3579 = vmatmul.mubr.bf16.gmra.mrb[56].mxu1 %v11410_v22  ;;  %v11416_v36 = vld [vmem:[#allocation70_spill] sm:$0xff] }
 0x4df   : > { %3185 = vmatprep.mubr.bf16.mxu0 %v9353_v13  ;;  %3588 = vmatprep.mubr.bf16.mxu1 %v3313_v49  ;;  %v3314_v27 = vpack.c.bf16 %v11417_v3, %v11416_v36 }
 0x4e6   : > { %3186 = vmatmul.mubr.bf16.gmra.mrb[76].mxu0 %v9355_v20  ;;  %3589 = vmatmul.mubr.bf16.gmra.mrb[60].mxu1 %v11415_v34 }
 0x4e7   : > { %3193 = vmatprep.mubr.bf16.mxu0 %v9429_v44  ;;  %3598 = vmatprep.mubr.bf16.mxu1 %v3315_v18 }
 0x4ee   : > { %3194 = vmatmul.mubr.bf16.gmra.mrb[80].mxu0 %v9431_v61  ;;  %3599 = vmatmul.mubr.bf16.gmra.mrb[64].mxu1 %v3314_v27  ;;  %v11423_v61 = vld [vmem:[#allocation77_spill] sm:$0xff] }
 0x4ef   : > { %3201 = vmatprep.mubr.bf16.mxu0 %v9505_v25  ;;  %3608 = vmatprep.mubr.bf16.mxu1 %v3317_v37  ;;  %v3316_v19 = vpack.c.bf16 %v11423_v61, %v11422_v0  ;;  %v11424_v25 = vld [vmem:[#allocation80_spill] sm:$0xff] }
 0x4f0   : > { %v3319_v59 = vpack.c.bf16 %v11425_v54, %v11424_v25  ;;  %v2460_v54 = vld [vmem:[%s11200_s10] sm:$0x1f] }
 0x4f1   : > { %v9618_v13 = vpop.f32.mrb[32].mxu0 }
 0x4f2   : > { %11420 = vst [vmem:[#allocation85_spill] sm:$0xff] %v9618_v13  ;;  %v9620_v20 = vpop.f32.mrb[16].mxu1  ;;  %v9622_v15 = vpop.f32.mrb[33].mxu0 }
 0x4f3   : > { %v9624_v44 = vpop.f32.mrb[17].mxu1  ;;  %v9626_v24 = vpop.f32.mrb[34].mxu0 }
 0x4f4   : > { %11421 = vst [vmem:[#allocation84_spill] sm:$0xff] %v9626_v24  ;;  %v9628_v43 = vpop.f32.mrb[18].mxu1  ;;  %v9630_v5 = vpop.f32.mrb[35].mxu0 }
 0x4f5   : > { %v9634_v52 = vpop.f32.mrb[19].mxu1 }
 0x4f6   : > { %3202 = vmatmul.mubr.bf16.gmra.mrb[84].mxu0 %v9507_v11  ;;  %3609 = vmatmul.mubr.bf16.gmra.mrb[68].mxu1 %v3316_v19 }
 0x4f7   : > { %3209 = vmatprep.mubr.bf16.mxu0 %v9568_v16  ;;  %3618 = vmatprep.mubr.bf16.mxu1 %v3319_v59 }
 0x4fe   : > { %3210 = vmatmul.mubr.bf16.gmra.mrb[88].mxu0 %v9570_v40  ;;  %3619 = vmatmul.mubr.bf16.gmra.mrb[72].mxu1 %v3318_v17  ;;  %v11447_v17 = vsub.s32 2, %v11446_v50 }
 0x4ff   : > { %3217 = vmatprep.mubr.bf16.mxu0 %v2363_v47  ;;  %3628 = vmatprep.mubr.bf16.mxu1 %v3321_v9 }
 0x500   : > { %v9752_v9 = vrot.slane %v2460_v54, %v11447_v17  ;;  %v2480_v17 = vsub.s32 4, %v11446_v50 }
 0x506   : > { %3218 = vmatmul.mubr.bf16.gmra.mrb[92].mxu0 %v2362_v53  ;;  %3629 = vmatmul.mubr.bf16.gmra.mrb[76].mxu1 %v3320_v60 }
 0x509   : > { %v9647_v11 = vpop.f32.mrb[36].mxu0  ;;  %v9649_v16 = vpop.f32.mrb[20].mxu1 }
 0x50a   : > { %11429 = vst [vmem:[#allocation45_spill] sm:$0xff] %v9647_v11  ;;  %v9651_v31 = vpop.f32.mrb[37].mxu0  ;;  %v9653_v57 = vpop.f32.mrb[21].mxu1  ;;  %v9781_v11 = vrot.slane %v2460_v54, %v2480_v17 }
 0x50b   : > { %v9655_v21 = vpop.f32.mrb[38].mxu0  ;;  %v9657_v55 = vpop.f32.mrb[22].mxu1 }
 0x50c   : > { %11430 = vst [vmem:[#allocation47_spill] sm:$0xff] %v9655_v21  ;;  %v9659_v30 = vpop.f32.mrb[39].mxu0  ;;  %v9661_v40 = vpop.f32.mrb[23].mxu1 }
 0x521   : > { %v9663_v45 = vpop.f32.mrb[40].mxu0  ;;  %v9665_v63 = vpop.f32.mrb[24].mxu1 }
 0x522   : > { %11431 = vst [vmem:[#allocation44_spill] sm:$0xff] %v9663_v45  ;;  %v9667_v41 = vpop.f32.mrb[41].mxu0  ;;  %v9669_v42 = vpop.f32.mrb[25].mxu1 }
 0x523   : > { %v9671_v51 = vpop.f32.mrb[42].mxu0  ;;  %v9673_v35 = vpop.f32.mrb[26].mxu1 }
 0x524   : > { %11432 = vst [vmem:[#allocation52_spill] sm:$0xff] %v9671_v51  ;;  %v9675_v26 = vpop.f32.mrb[43].mxu0  ;;  %v9677_v47 = vpop.f32.mrb[27].mxu1 }
 0x539   : > { %v9679_v53 = vpop.f32.mrb[44].mxu0  ;;  %v9681_v62 = vpop.f32.mrb[28].mxu1 }
 0x53a   : > { %11433 = vst [vmem:[#allocation54_spill] sm:$0xff] %v9679_v53  ;;  %v9683_v32 = vpop.f32.mrb[45].mxu0  ;;  %v9685_v2 = vpop.f32.mrb[29].mxu1 }
 0x53b   : > { %v9687_v6 = vpop.f32.mrb[46].mxu0  ;;  %v9689_v10 = vpop.f32.mrb[30].mxu1 }
 0x53c   : > { %11434 = vst [vmem:[#allocation62_spill] sm:$0xff] %v9687_v6  ;;  %v9691_v4 = vpop.f32.mrb[47].mxu0  ;;  %v9693_v29 = vpop.f32.mrb[31].mxu1  ;;  %v3055_v6 = vadd.f32 %v9628_v43, %v9752_v9 }
 0x53e   : > { %v9793_v43 = vmul.f32 0.17677669, %v3055_v6 }
 0x540   : > { %11455 = vst [vmem:[#allocation83_spill] sm:$0xff] %v9793_v43 }
 0x551   : > { %v9695_v8 = vpop.f32.mrb[48].mxu0  ;;  %v9697_v23 = vpop.f32.mrb[32].mxu1 }
 0x552   : > { %11435 = vst [vmem:[#allocation65_spill] sm:$0xff] %v9695_v8  ;;  %v9699_v38 = vpop.f32.mrb[49].mxu0  ;;  %v9701_v48 = vpop.f32.mrb[33].mxu1  ;;  %v3051_v8 = vadd.f32 %v9620_v20, %v9752_v9 }
 0x553   : > { %v9703_v1 = vpop.f32.mrb[50].mxu0  ;;  %v9705_v49 = vpop.f32.mrb[34].mxu1 }
 0x554   : > { %11436 = vst [vmem:[#allocation74_spill] sm:$0xff] %v9703_v1  ;;  %v9707_v14 = vpop.f32.mrb[51].mxu0  ;;  %v9709_v22 = vpop.f32.mrb[35].mxu1  ;;  %v11452_v1 = vld [vmem:[#allocation42_spill] sm:$0xff]  ;;  %v9783_v21 = vmul.f32 0.17677669, %v3051_v8 }
 0x555   : > { %v3780_v8 = vld [vmem:[#allocation7] sm:$0xff] }
 0x569   : > { %v9711_v7 = vpop.f32.mrb[52].mxu0  ;;  %v9713_v56 = vpop.f32.mrb[36].mxu1 }
 0x56a   : > { %11437 = vst [vmem:[#allocation71_spill] sm:$0xff] %v9711_v7  ;;  %v9715_v18 = vpop.f32.mrb[53].mxu0  ;;  %v9717_v28 = vpop.f32.mrb[37].mxu1  ;;  %v9765_v7 = vld [vmem:[%s11202_s12] sm:$0x3] }
 0x56b   : > { %11438 = vst [vmem:[#allocation73_spill] sm:$0xff] %v9715_v18  ;;  %v9719_v12 = vpop.f32.mrb[54].mxu0  ;;  %v9721_v34 = vpop.f32.mrb[38].mxu1  ;;  %v9776_v53 = vrot.slane %v9765_v7, %v11452_v1 }
 0x56c   : > { %11439 = vst [vmem:[#allocation64_spill] sm:$0xff] %v9719_v12  ;;  %v9723_v36 = vpop.f32.mrb[55].mxu0  ;;  %v9725_v3 = vpop.f32.mrb[39].mxu1 }
 0x56d   : > { %11440 = vst [vmem:[#allocation61_spill] sm:$0xff] %v9723_v36 }
 0x581   : > { %v9727_v27 = vpop.f32.mrb[56].mxu0  ;;  %v9729_v46 = vpop.f32.mrb[40].mxu1 }
 0x582   : > { %11441 = vst [vmem:[#allocation70_spill] sm:$0xff] %v9727_v27  ;;  %v9731_v58 = vpop.f32.mrb[57].mxu0  ;;  %v9733_v37 = vpop.f32.mrb[41].mxu1 }
 0x583   : > { %11442 = vst [vmem:[#allocation72_spill] sm:$0xff] %v9731_v58  ;;  %v9735_v0 = vpop.f32.mrb[58].mxu0  ;;  %v9737_v61 = vpop.f32.mrb[42].mxu1 }
 0x584   : > { %11443 = vst [vmem:[#allocation76_spill] sm:$0xff] %v9735_v0  ;;  %v9739_v19 = vpop.f32.mrb[59].mxu0  ;;  %v9741_v25 = vpop.f32.mrb[43].mxu1 }
 0x585   : > { %11444 = vst [vmem:[#allocation78_spill] sm:$0xff] %v9739_v19 }
 0x599   : > { %v9746_v59 = vpop.f32.mrb[60].mxu0  ;;  %v9748_v39 = vpop.f32.mrb[44].mxu1 }
 0x59a   : > { %11445 = vst [vmem:[#allocation75_spill] sm:$0xff] %v9746_v59  ;;  %v9754_v33 = vpop.f32.mrb[61].mxu0  ;;  %v9756_v60 = vpop.f32.mrb[45].mxu1 }
 0x59b   : > { %11448 = vst [vmem:[#allocation77_spill] sm:$0xff] %v9754_v33  ;;  %v9758_v27 = vpop.f32.mrb[62].mxu0  ;;  %v9760_v0 = vpop.f32.mrb[46].mxu1 }
 0x59c   : > { %11449 = vst [vmem:[#allocation80_spill] sm:$0xff] %v9758_v27  ;;  %v9767_v59 = vpop.f32.mrb[63].mxu0  ;;  %v9769_v12 = vpop.f32.mrb[47].mxu1  ;;  %v2476_v27 = vsub.s32 3, %v11446_v50  ;;  %v11453_v50 = vld [vmem:[#allocation43_spill] sm:$0xff] }
 0x59d   : > { %11450 = vst [vmem:[#allocation82_spill] sm:$0xff] %v9767_v59  ;;  %11451 = vst [vmem:[#allocation79_spill] sm:$0xff] %v9769_v12  ;;  %v9791_v58 = vrot.slane %v2460_v54, %v11453_v50 }
 0x59e   : > { %v9788_v20 = vrot.slane %v2460_v54, %v2476_v27  ;;  %v3061_v27 = vadd.f32 %v9649_v16, %v9752_v9  ;;  %v3065_v54 = vadd.f32 %v9657_v55, %v9752_v9 }
 0x59f   : > { %11454 = vst [vmem:[#allocation81_spill] sm:$0xff] %v9791_v58  ;;  %v9815_v16 = vadd.f32 %v9630_v5, %v9791_v58  ;;  %v9823_v55 = vadd.f32 %v9651_v31, %v9791_v58 }
 0x5a0   : > { %v9840_v31 = vadd.f32 %v9661_v40, %v9788_v20 }
 0x5a1   : > { %v6037_v45 = vpop.f32.mrb[64].mxu0  ;;  %v3560_v51 = vpop.f32.mrb[48].mxu1  ;;  %11459 = vst [vmem:[#allocation87_spill] sm:$0xff] %v9815_v16  ;;  %11460 = vst [vmem:[#allocation88_spill] sm:$0xff] %v9823_v55 }
 0x5a2   : > { %v3561_v13 = vadd.f32 %v3560_v51, %v9776_v53  ;;  %v6038_v24 = vpop.f32.mrb[65].mxu0  ;;  %v9786_v59 = vpop.f32.mrb[49].mxu1 }
 0x5a3   : > { %v6039_v1 = vadd.f32 %v6038_v24, %v6037_v45  ;;  %v6040_v33 = vpop.f32.mrb[66].mxu0  ;;  %v3564_v19 = vpop.f32.mrb[50].mxu1 }
 0x5a4   : > { %v9796_v17 = vmul.f32 %v9783_v21, %v3561_v13  ;;  %v3565_v36 = vadd.f32 %v3564_v19, %v9776_v53  ;;  %v6041_v51 = vpop.f32.mrb[67].mxu0  ;;  %v3566_v18 = vpop.f32.mrb[51].mxu1  ;;  %v3053_v13 = vadd.f32 %v9624_v44, %v9788_v20  ;;  %v9811_v19 = vadd.f32 %v9622_v15, %v9791_v58 }
 0x5a5   : > { %v3164_v24 = vadd.f32 %v6039_v1, %v9781_v11  ;;  %v6042_v45 = vadd.f32 %v6041_v51, %v6040_v33  ;;  %v9819_v1 = vadd.f32 %v9634_v52, %v9788_v20  ;;  %v9829_v44 = vadd.f32 %v9653_v57, %v9788_v20 }
 0x5a6   : > { %11456 = vst [vmem:[#allocation41_spill] sm:$0xff] %v9796_v17  ;;  %v9805_v6 = vmul.f32 %v9793_v43, %v3565_v36  ;;  %11458 = vst [vmem:[#allocation86_spill] sm:$0xff] %v9811_v19  ;;  %v9825_v36 = vmul.f32 0.17677669, %v3061_v27  ;;  %v9832_v51 = vmul.f32 0.17677669, %v3065_v54  ;;  %v9836_v52 = vadd.f32 %v9659_v30, %v9791_v58 }
 0x5a7   : > { %v3781_v17 = vadd.f32 %v3780_v8, %v3164_v24  ;;  %v3167_v33 = vadd.f32 %v6042_v45, %v9781_v11  ;;  %v3071_v30 = vadd.f32 %v9665_v63, %v9752_v9 }
 0x5a8   : > { %11457 = vst [vmem:[#allocation43_spill] sm:$0xff] %v9805_v6  ;;  %11461 = vst [vmem:[#allocation89_spill] sm:$0xff] %v9825_v36 }
 0x5a9   : > { %v3782_v15 = vmax.f32 %v3781_v17, %v3053_v13  ;;  %v6043_v8 = vpop.f32.mrb[68].mxu0  ;;  %v3570_v5 = vpop.f32.mrb[52].mxu1  ;;  %11462 = vst [vmem:[#allocation90_spill] sm:$0xff] %v9832_v51  ;;  %11463 = vst [vmem:[#allocation91_spill] sm:$0xff] %v9836_v52  ;;  %v9851_v52 = vadd.f32 %v9667_v41, %v9791_v58 }
 0x5aa   : > { %v3571_v27 = vadd.f32 %v3570_v5, %v9776_v53  ;;  %v6044_v24 = vpop.f32.mrb[69].mxu0  ;;  %v9843_v57 = vpop.f32.mrb[53].mxu1 }
 0x5ab   : > { %v3783_v6 = vsub.f32 %v3053_v13, %v3782_v15  ;;  %v3786_v55 = vsub.f32 %v3781_v17, %v3782_v15  ;;  %v9845_v45 = vadd.f32 %v3782_v15, %v3167_v33  ;;  %v6045_v16 = vadd.f32 %v6044_v24, %v6043_v8  ;;  %v6046_v54 = vpop.f32.mrb[70].mxu0  ;;  %v3574_v12 = vpop.f32.mrb[54].mxu1  ;;  %11464 = vst [vmem:[#allocation92_spill] sm:$0xff] %v9851_v52 }
 0x5ac   : > { %v9854_v40 = vmul.f32 %v9825_v36, %v3571_v27  ;;  %v3575_v5 = vadd.f32 %v3574_v12, %v9776_v53  ;;  %v6047_v43 = vpop.f32.mrb[71].mxu0  ;;  %v9857_v13 = vpop.f32.mrb[55].mxu1  ;;  %v3075_v17 = vadd.f32 %v9673_v35, %v9752_v9  ;;  %v9868_v8 = vrot.slane %v9765_v7, %v11453_v50 }
 0x5ad   : > { %v3784_v15 = vmul.f32 1.442695, %v3783_v6  ;;  %v9863_v33 = vmax.f32 %v9845_v45, %v9819_v1  ;;  %v3172_v63 = vadd.f32 %v6045_v16, %v9781_v11  ;;  %v3787_v41 = vmul.f32 1.442695, %v3786_v55 }
 0x5ae   : > { %11465 = vst [vmem:[#allocation93_spill] sm:$0xff] %v9854_v40  ;;  %v9871_v12 = vmul.f32 %v9832_v51, %v3575_v5  ;;  %v6048_v27 = vadd.f32 %v6047_v43, %v6046_v54  ;;  %v9880_v16 = vmul.f32 0.17677669, %v3071_v30  ;;  %v9884_v7 = vadd.f32 %v9669_v42, %v9788_v20 }
 0x5af   : > { %6960 = vpow2.f32 %v3784_v15  ;;  %v3840_v6 = vsub.f32 %v9845_v45, %v9863_v33  ;;  %v9878_v24 = vadd.f32 %v9863_v33, %v3172_v63  ;;  %v9888_v50 = vadd.f32 %v9675_v26, %v9791_v58 }
 0x5b0   : > { %11466 = vst [vmem:[#allocation94_spill] sm:$0xff] %v9871_v12  ;;  %11467 = vst [vmem:[#allocation95_spill] sm:$0xff] %v9880_v16  ;;  %v9892_v43 = vadd.f32 %v9677_v47, %v9788_v20  ;;  %v9894_v55 = vmul.f32 0.17677669, %v3075_v17  ;;  %v3081_v45 = vadd.f32 %v9681_v62, %v9752_v9  ;;  %v3175_v42 = vadd.f32 %v6048_v27, %v9781_v11 }
 0x5b1   : > { %11468 = vst [vmem:[#allocation96_spill] sm:$0xff] %v9888_v50  ;;  %v9900_v54 = vmax.f32 %v9878_v24, %v9829_v44  ;;  %v6049_v30 = vpop.f32.mrb[72].mxu0  ;;  %v3580_v5 = vpop.f32.mrb[56].mxu1  ;;  %v9905_v26 = vadd.f32 %v9683_v32, %v9791_v58  ;;  %v3563_v47 = vadd.f32 %v9786_v59, %v9868_v8  ;;  %v3567_v17 = vadd.f32 %v3566_v18, %v9868_v8 }
 0x5b2   : > { %11469 = vst [vmem:[#allocation97_spill] sm:$0xff] %v9894_v55  ;;  %v3581_v15 = vadd.f32 %v3580_v5, %v9776_v53  ;;  %v6050_v62 = vpop.f32.mrb[73].mxu0  ;;  %v9911_v63 = vpop.f32.mrb[57].mxu1  ;;  %6962 = vpow2.f32 %v3787_v41  ;;  %v9922_v18 = vadd.f32 %v9685_v2, %v9788_v20  ;;  %v3085_v59 = vadd.f32 %v9689_v10, %v9752_v9 }
 0x5b3   : > { %11470 = vst [vmem:[#allocation98_spill] sm:$0xff] %v9905_v26  ;;  %v9918_v32 = vadd.f32 %v9900_v54, %v3175_v42  ;;  %v6052_v26 = vpop.f32.mrb[74].mxu0  ;;  %v3584_v50 = vpop.f32.mrb[58].mxu1  ;;  %v6051_v5 = vadd.f32 %v6050_v62, %v6049_v30  ;;  %v9931_v35 = vmul.f32 0.17677669, %v3081_v45  ;;  %v9935_v42 = vadd.f32 %v9691_v4, %v9791_v58 }
 0x5b4   : > { %v9927_v41 = vmul.f32 %v9880_v16, %v3581_v15  ;;  %v6053_v27 = vpop.f32.mrb[75].mxu0  ;;  %v9929_v12 = vpop.f32.mrb[59].mxu1  ;;  %v3091_v2 = vadd.f32 %v9697_v23, %v9752_v9  ;;  %v9945_v10 = vadd.f32 %v9693_v29, %v9788_v20  ;;  %v5947_v30 = vmul.f32 -1.442695, %v3563_v47 }
 0x5b5   : > { %11472 = vst [vmem:[#allocation100_spill] sm:$0xff] %v9931_v35  ;;  %11473 = vst [vmem:[#allocation101_spill] sm:$0xff] %v9935_v42  ;;  %v9941_v40 = vmax.f32 %v9918_v32, %v9840_v31  ;;  %v3180_v15 = vadd.f32 %v6051_v5, %v9781_v11  ;;  %v3585_v45 = vadd.f32 %v3584_v50, %v9776_v53  ;;  %v5948_v62 = vmul.f32 -1.442695, %v3567_v17 }
 0x5b6   : > { %11471 = vst [vmem:[#allocation99_spill] sm:$0xff] %v9927_v41  ;;  %v6054_v42 = vadd.f32 %v6053_v27, %v6052_v26  ;;  %v9953_v41 = vmul.f32 0.17677669, %v3085_v59  ;;  %v3841_v52 = vmul.f32 1.442695, %v3840_v6  ;;  %v9967_v17 = vadd.f32 %v9699_v38, %v9791_v58 }
 0x5b7   : > { %v9956_v16 = vadd.f32 %v9941_v40, %v3180_v15  ;;  %v9959_v29 = vmul.f32 %v9894_v55, %v3585_v45  ;;  %v9963_v50 = vmul.f32 0.17677669, %v3091_v2  ;;  %v9971_v26 = vadd.f32 %v9701_v48, %v9788_v20 }
 0x5b8   : > { %11474 = vst [vmem:[#allocation102_spill] sm:$0xff] %v9953_v41  ;;  %11478 = vst [vmem:[#allocation106_spill] sm:$0xff] %v9967_v17  ;;  %v3095_v6 = vadd.f32 %v9705_v49, %v9752_v9  ;;  %6964 = vpow2.f32 %v5947_v30  ;;  %v3101_v48 = vadd.f32 %v9713_v56, %v9752_v9  ;;  %v3183_v49 = vadd.f32 %v6054_v42, %v9781_v11 }
 0x5b9   : > { %11475 = vst [vmem:[#allocation103_spill] sm:$0xff] %v9959_v29  ;;  %v9961_v47 = vpop.eup %6960  ;;  %11477 = vst [vmem:[#allocation105_spill] sm:$0xff] %v9963_v50  ;;  %v6055_v27 = vpop.f32.mrb[76].mxu0  ;;  %v9977_v5 = vmax.f32 %v9956_v16, %v9884_v7  ;;  %6966 = vpow2.f32 %v5948_v62  ;;  %v3573_v17 = vadd.f32 %v9843_v57, %v9868_v8  ;;  %v9999_v42 = vadd.f32 %v9707_v14, %v9791_v58 }
 0x5ba   : > { %11476 = vst [vmem:[#allocation104_spill] sm:$0xff] %v9961_v47  ;;  %v3590_v59 = vpop.f32.mrb[60].mxu1  ;;  %v6056_v15 = vpop.f32.mrb[77].mxu0  ;;  %v3796_v38 = vmul.f32 %v9961_v47, %v9783_v21  ;;  %6968 = vpow2.f32 %v3841_v52  ;;  %v3577_v52 = vadd.f32 %v9857_v13, %v9868_v8  ;;  %v10013_v29 = vadd.f32 %v9709_v22, %v9788_v20 }
 0x5bb   : > { %v3591_v2 = vadd.f32 %v3590_v59, %v9776_v53  ;;  %v9980_v45 = vpop.f32.mrb[61].mxu1  ;;  %v6057_v23 = vadd.f32 %v6056_v15, %v6055_v27  ;;  %v6058_v30 = vpop.f32.mrb[78].mxu0  ;;  %11480 = vst [vmem:[#allocation108_spill] sm:$0xff] %v9999_v42  ;;  %v10004_v57 = vadd.f32 %v9977_v5, %v3183_v49  ;;  %v3794_v27 = vld [vmem:[#allocation6] sm:$0xff]  ;;  %v10009_v15 = vmul.f32 0.17677669, %v3095_v6 }
 0x5bc   : > { %v3594_v4 = vpop.f32.mrb[62].mxu1  ;;  %v6059_v21 = vpop.f32.mrb[79].mxu0  ;;  %v3105_v14 = vadd.f32 %v9721_v34, %v9752_v9  ;;  %v10018_v42 = vmul.f32 0.17677669, %v3101_v48  ;;  %v10022_v13 = vadd.f32 %v9717_v28, %v9788_v20  ;;  %v3111_v22 = vadd.f32 %v9729_v46, %v9752_v9 }
 0x5bd   : > { %v9993_v47 = vpop.f32.mrb[63].mxu1  ;;  %v9995_v56 = vpop.eup %6962  ;;  %v10007_v62 = vmul.f32 %v9931_v35, %v3591_v2  ;;  %v3188_v59 = vadd.f32 %v6057_v23, %v9781_v11  ;;  %v10026_v2 = vmax.f32 %v10004_v57, %v9892_v43  ;;  %v3595_v6 = vadd.f32 %v3594_v4, %v9776_v53 }
 0x5be   : > { %11479 = vst [vmem:[#allocation107_spill] sm:$0xff] %v9995_v56  ;;  %v5949_v49 = vmul.f32 -1.442695, %v3573_v17  ;;  %v3795_v34 = vmul.f32 %v9995_v56, %v3794_v27  ;;  %v5950_v23 = vmul.f32 -1.442695, %v3577_v52  ;;  %v10043_v46 = vadd.f32 %v9725_v3, %v9788_v20 }
 0x5bf   : > { %11481 = vst [vmem:[#allocation109_spill] sm:$0xff] %v10007_v62  ;;  %v6060_v62 = vadd.f32 %v6059_v21, %v6058_v30  ;;  %v10037_v58 = vadd.f32 %v10026_v2, %v3188_v59  ;;  %v10039_v4 = vmul.f32 0.17677669, %v3105_v14  ;;  %v10047_v17 = vadd.f32 %v9733_v37, %v9788_v20 }
 0x5c0   : > { %v10050_v30 = vmul.f32 %v9953_v41, %v3595_v6  ;;  %v3115_v59 = vadd.f32 %v9737_v61, %v9752_v9  ;;  %v11483_v27 = vsub.f32 %v9819_v1, %v9863_v33  ;;  %6970 = vpow2.f32 %v5949_v49 }
 0x5c1   : > { %v6061_v35 = vpop.f32.mrb[80].mxu0  ;;  %v3600_v55 = vpop.f32.mrb[64].mxu1  ;;  %v10061_v3 = vmax.f32 %v10037_v58, %v9922_v18  ;;  %v3797_v41 = vadd.f32 %v3796_v38, %v3795_v34  ;;  %v10067_v1 = vmul.f32 0.17677669, %v3111_v22  ;;  %6972 = vpow2.f32 %v5950_v23 }
 0x5c2   : > { %11482 = vst [vmem:[#allocation110_spill] sm:$0xff] %v10050_v30  ;;  %v6062_v21 = vpop.f32.mrb[81].mxu0  ;;  %v10052_v52 = vpop.f32.mrb[65].mxu1  ;;  %v3838_v14 = vmul.f32 1.442695, %v11483_v27  ;;  %v3601_v37 = vadd.f32 %v3600_v55, %v9776_v53  ;;  %v3191_v30 = vadd.f32 %v6060_v62, %v9781_v11  ;;  %v10077_v62 = vadd.f32 %v9741_v25, %v9788_v20 }
 0x5c3   : > { %v6064_v28 = vpop.f32.mrb[82].mxu0  ;;  %v3604_v48 = vpop.f32.mrb[66].mxu1  ;;  %v6063_v56 = vadd.f32 %v6062_v21, %v6061_v35  ;;  %v10086_v49 = vmul.f32 0.17677669, %v3115_v59  ;;  %v3121_v34 = vadd.f32 %v9748_v39, %v9752_v9  ;;  %v3583_v21 = vadd.f32 %v9911_v63, %v9868_v8 }
 0x5c4   : > { %v6965_v6 = vpop.eup %6964  ;;  %v6065_v51 = vpop.f32.mrb[83].mxu0  ;;  %v10080_v35 = vadd.f32 %v10061_v3, %v3191_v30  ;;  %v10083_v38 = vmul.f32 %v9963_v50, %v3601_v37  ;;  %6974 = vpow2.f32 %v3838_v14  ;;  %v3798_v30 = vmul.f32 %v3797_v41, %v9811_v19 }
 0x5c5   : > { %v10065_v61 = vpop.f32.mrb[67].mxu1  ;;  %v6967_v36 = vpop.eup %6966  ;;  %v3196_v22 = vadd.f32 %v6063_v56, %v9781_v11  ;;  %v3703_v23 = vadd.f32 1.0, %v6965_v6  ;;  %v3605_v37 = vadd.f32 %v3604_v48, %v9776_v53  ;;  %v10100_v56 = vadd.f32 %v9756_v60, %v9788_v20 }
 0x5c6   : > { %v10073_v27 = vpop.eup %6968  ;;  %11485 = vst [vmem:[#allocation112_spill] sm:$0xff] %v10083_v38  ;;  %v10094_v25 = vmax.f32 %v10080_v35, %v9945_v10  ;;  %v3704_v59 = vadd.f32 1.0, %v6967_v36  ;;  %v6066_v55 = vadd.f32 %v6065_v51, %v6064_v28  ;;  %v11486_v63 = vsub.f32 %v9829_v44, %v9900_v54 }
 0x5c7   : > { %11484 = vst [vmem:[#allocation111_spill] sm:$0xff] %v10073_v27  ;;  %v10103_v14 = vmul.f32 %v10073_v27, %v3797_v41  ;;  %6976 = vrcp.f32 %v3703_v23  ;;  %v11488_v41 = vsub.f32 %v9878_v24, %v9900_v54  ;;  %v3799_v27 = vmul.f32 %v3798_v30, %v3798_v30 }
 0x5c8   : > { %v3893_v33 = vmul.f32 1.442695, %v11486_v63  ;;  %v10113_v60 = vadd.f32 %v10094_v25, %v3196_v22  ;;  %v10121_v44 = vmul.f32 %v10009_v15, %v3605_v37  ;;  %v5951_v19 = vmul.f32 -1.442695, %v3583_v21 }
 0x5c9   : > { %v6067_v39 = vpop.f32.mrb[84].mxu0  ;;  %v3610_v6 = vpop.f32.mrb[68].mxu1  ;;  %v3896_v28 = vmul.f32 1.442695, %v11488_v41  ;;  %v3587_v48 = vadd.f32 %v9929_v12, %v9868_v8  ;;  %v3199_v23 = vadd.f32 %v6066_v55, %v9781_v11  ;;  %6978 = vrcp.f32 %v3704_v59  ;;  %3800 = vadd.xlane.f32.xlu0 %v3799_v27 }
 0x5ca   : > { %v6068_v36 = vpop.f32.mrb[85].mxu0  ;;  %v10115_v51 = vpop.f32.mrb[69].mxu1  ;;  %v10127_v22 = vmax.f32 %v10113_v60, %v9971_v26  ;;  %v11490_v24 = vsub.f32 %v9840_v31, %v9941_v40  ;;  %v3611_v21 = vadd.f32 %v3610_v6, %v9776_v53  ;;  %6980 = vpow2.f32 %v3893_v33 }
 0x5cb   : > { %11487 = vst [vmem:[#allocation113_spill] sm:$0xff] %v10115_v51  ;;  %v6070_v63 = vpop.f32.mrb[86].mxu0  ;;  %v3614_v38 = vpop.f32.mrb[70].mxu1  ;;  %v6069_v30 = vadd.f32 %v6068_v36, %v6067_v39  ;;  %6982 = vpow2.f32 %v3896_v28  ;;  %v11491_v31 = vsub.f32 %v9918_v32, %v9941_v40  ;;  %v10150_v39 = vmul.f32 0.17677669, %v3121_v34 }
 0x5cc   : > { %v6071_v51 = vpop.f32.mrb[87].mxu0  ;;  %v10130_v50 = vpop.f32.mrb[71].mxu1  ;;  %v3948_v54 = vmul.f32 1.442695, %v11490_v24  ;;  %v10141_v41 = vadd.f32 %v10127_v22, %v3199_v23  ;;  %v10147_v6 = vmul.f32 %v10018_v42, %v3611_v21  ;;  %6984 = vpow2.f32 %v5951_v19 }
 0x5cd   : > { %11489 = vst [vmem:[#allocation114_spill] sm:$0xff] %v10130_v50  ;;  %v6971_v37 = vpop.eup %6970  ;;  %v3951_v27 = vmul.f32 1.442695, %v11491_v31  ;;  %v3204_v33 = vadd.f32 %v6069_v30, %v9781_v11  ;;  %v5952_v36 = vmul.f32 -1.442695, %v3587_v48  ;;  %v3615_v40 = vadd.f32 %v3614_v38, %v9776_v53 }
 0x5ce   : > { %v6973_v59 = vpop.eup %6972  ;;  %11492 = vst [vmem:[#allocation115_spill] sm:$0xff] %v10147_v6  ;;  %v10154_v24 = vmax.f32 %v10141_v41, %v10013_v29  ;;  %v3705_v28 = vadd.f32 1.0, %v6971_v37  ;;  %6986 = vpow2.f32 %v3948_v54  ;;  %v6072_v32 = vadd.f32 %v6071_v51, %v6070_v63 }
 0x5cf   : > { %v10156_v23 = vpop.eup %6974  ;;  %v3706_v55 = vadd.f32 1.0, %v6973_v59  ;;  %6988 = vpow2.f32 %v3951_v27  ;;  %v11494_v38 = vsub.f32 %v9884_v7, %v9977_v5  ;;  %v3593_v63 = vadd.f32 %v9980_v45, %v9868_v8 }
 0x5d0   : > { %v10164_v48 = vadd.f32 %v10154_v24, %v3204_v33  ;;  %v10174_v54 = vmul.f32 %v10039_v4, %v3615_v40  ;;  %v3125_v33 = vadd.f32 %v9760_v0, %v9752_v9  ;;  %6990 = vpow2.f32 %v5952_v36 }
 0x5d1   : > { %v6073_v31 = vpop.f32.mrb[88].mxu0  ;;  %v3620_v21 = vpop.f32.mrb[72].mxu1  ;;  %v4003_v51 = vmul.f32 1.442695, %v11494_v38  ;;  %v3207_v27 = vadd.f32 %v6072_v32, %v9781_v11  ;;  %6992 = vrcp.f32 %v3705_v28  ;;  %v11498_v45 = vsub.f32 %v9956_v16, %v9977_v5  ;;  %v11501_v16 = vld [vmem:[#allocation79_spill] sm:$0xff] }
 0x5d2   : > { %v6074_v30 = vpop.f32.mrb[89].mxu0  ;;  %v10166_v12 = vpop.f32.mrb[73].mxu1  ;;  %11495 = vst [vmem:[#allocation117_spill] sm:$0xff] %v10174_v54  ;;  %v10180_v19 = vmax.f32 %v10164_v48, %v10022_v13  ;;  %v3621_v9 = vadd.f32 %v3620_v21, %v9776_v53  ;;  %6994 = vrcp.f32 %v3706_v55  ;;  %v10204_v5 = vadd.f32 %v11501_v16, %v9788_v20 }
 0x5d3   : > { %11493 = vst [vmem:[#allocation116_spill] sm:$0xff] %v10166_v12  ;;  %v6076_v37 = vpop.f32.mrb[90].mxu0  ;;  %v3624_v59 = vpop.f32.mrb[74].mxu1  ;;  %v4006_v40 = vmul.f32 1.442695, %v11498_v45  ;;  %v11499_v12 = vld [vmem:[#allocation83_spill] sm:$0xff]  ;;  %6996 = vpow2.f32 %v4003_v51  ;;  %v6075_v16 = vadd.f32 %v6074_v30, %v6073_v31  ;;  %v11508_v31 = vsub.f32 %v9945_v10, %v10094_v25 }
 0x5d4   : > { %v6077_v7 = vpop.f32.mrb[91].mxu0  ;;  %v10183_v38 = vpop.f32.mrb[75].mxu1  ;;  %v3850_v0 = vmul.f32 %v10156_v23, %v11499_v12  ;;  %v4332_v36 = vsub.f32 %v10022_v13, %v10180_v19  ;;  %v5953_v12 = vmul.f32 -1.442695, %v3593_v63  ;;  %v11502_v13 = vsub.f32 %v9892_v43, %v10026_v2 }
 0x5d5   : > { %11496 = vst [vmem:[#allocation118_spill] sm:$0xff] %v10183_v38  ;;  %v10185_v34 = vpop.eup %6976  ;;  %v10198_v38 = vadd.f32 %v10180_v19, %v3207_v27  ;;  %v3597_v27 = vadd.f32 %v9993_v47, %v9868_v8  ;;  %v10219_v20 = vmul.f32 %v10067_v1, %v3621_v9  ;;  %6998 = vpow2.f32 %v4006_v40 }
 0x5d6   : > { %11497 = vst [vmem:[#allocation119_spill] sm:$0xff] %v10185_v34  ;;  %v10200_v28 = vpop.eup %6978  ;;  %v3851_v21 = vadd.f32 %v3850_v0, %v10103_v14  ;;  %v4058_v45 = vmul.f32 1.442695, %v11502_v13  ;;  %v11504_v14 = vsub.f32 %v10004_v57, %v10026_v2  ;;  %v11505_v0 = vld [vmem:[#allocation87_spill] sm:$0xff]  ;;  %7000 = vpow2.f32 %v5953_v12 }
 0x5d7   : > { %11500 = vst [vmem:[#allocation83_spill] sm:$0xff] %v10200_v28  ;;  %v10207_v55 = vpop.eup %6980  ;;  %v10216_v32 = vmax.f32 %v10198_v38, %v10043_v46  ;;  %11503 = vst [vmem:[#allocation79_spill] sm:$0xff] %v10219_v20  ;;  %v11506_v28 = vsub.f32 %v9922_v18, %v10061_v3  ;;  %v3625_v20 = vadd.f32 %v3624_v59, %v9776_v53  ;;  %v4168_v30 = vmul.f32 1.442695, %v11508_v31 }
 0x5d8   : > { %v10221_v51 = vpop.eup %6982  ;;  %v4061_v63 = vmul.f32 1.442695, %v11504_v14  ;;  %v3852_v43 = vmul.f32 %v3851_v21, %v11505_v0  ;;  %v10243_v34 = vmul.f32 0.17677669, %v3125_v33  ;;  %7002 = vpow2.f32 %v4058_v45 }
 0x5d9   : > { %v6079_v13 = vpop.f32.mrb[92].mxu0  ;;  %v3630_v50 = vpop.f32.mrb[76].mxu1  ;;  %v4113_v54 = vmul.f32 1.442695, %v11506_v28  ;;  %v4387_v9 = vsub.f32 %v10043_v46, %v10216_v32  ;;  %v3212_v28 = vadd.f32 %v6075_v16, %v9781_v11  ;;  %v11509_v59 = vsub.f32 %v9971_v26, %v10127_v22 }
 0x5da   : > { %v6985_v47 = vpop.eup %6984  ;;  %v6080_v57 = vpop.f32.mrb[93].mxu0  ;;  %v3853_v18 = vmul.f32 %v3852_v43, %v3852_v43  ;;  %7004 = vpow2.f32 %v4061_v63  ;;  %v5954_v43 = vmul.f32 -1.442695, %v3597_v27  ;;  %v6078_v33 = vadd.f32 %v6077_v7, %v6076_v37 }
 0x5db   : > { %v10235_v2 = vpop.f32.mrb[77].mxu1  ;;  %v10237_v14 = vpop.eup %6986  ;;  %v4223_v40 = vmul.f32 1.442695, %v11509_v59  ;;  %v10256_v16 = vadd.f32 %v10216_v32, %v3212_v28  ;;  %7006 = vpow2.f32 %v4113_v54  ;;  %v11511_v26 = vsub.f32 %v10013_v29, %v10154_v24 }
 0x5dc   : > { %11507 = vst [vmem:[#allocation120_spill] sm:$0xff] %v10235_v2  ;;  %v6082_v0 = vpop.f32.mrb[94].mxu0  ;;  %v3634_v46 = vpop.f32.mrb[78].mxu1  ;;  %v10249_v2 = vmul.f32 %v10086_v49, %v3625_v20  ;;  %3854 = vadd.xlane.f32.xlu1 %v3853_v18  ;;  %v3631_v31 = vadd.f32 %v3630_v50, %v9776_v53  ;;  %v6081_v59 = vadd.f32 %v6080_v57, %v6079_v13  ;;  %7008 = vpow2.f32 %v4168_v30 }
 0x5dd   : > { %v6083_v12 = vpop.f32.mrb[95].mxu0  ;;  %v10251_v6 = vpop.f32.mrb[79].mxu1  ;;  %v4278_v20 = vmul.f32 1.442695, %v11511_v26  ;;  %v4333_v63 = vmul.f32 1.442695, %v4332_v36  ;;  %v10268_v27 = vmax.f32 %v10256_v16, %v10047_v17  ;;  %v3215_v37 = vadd.f32 %v6078_v33, %v9781_v11 }
 0x5de   : > { %11510 = vst [vmem:[#allocation121_spill] sm:$0xff] %v10251_v6  ;;  %v10253_v10 = vpop.eup %6988  ;;  %7010 = vpow2.f32 %v4223_v40  ;;  %v3603_v29 = vadd.f32 %v10052_v52, %v9868_v8  ;;  %v4388_v54 = vmul.f32 1.442695, %v4387_v9  ;;  %v10276_v50 = vmul.f32 %v10150_v39, %v3631_v31  ;;  %v11512_v9 = vld [vmem:[#allocation89_spill] sm:$0xff] }
 0x5df   : > { %v10258_v45 = vpop.eup %6990  ;;  %v4442_v36 = vsub.f32 %v10047_v17, %v10268_v27  ;;  %v10285_v30 = vadd.f32 %v10268_v27, %v3215_v37  ;;  %v3220_v40 = vadd.f32 %v6081_v59, %v9781_v11  ;;  %v3707_v18 = vadd.f32 1.0, %v6985_v47 }
 0x5e0   : > { %v10264_v6 = vpop.eup %6992  ;;  %7012 = vpow2.f32 %v4278_v20  ;;  %v3904_v52 = vmul.f32 %v10221_v51, %v3851_v21  ;;  %v3905_v28 = vmul.f32 %v10207_v55, %v11512_v9  ;;  %v11513_v17 = vsub.f32 %v10037_v58, %v10061_v3 }
 0x5e1   : > { %v10271_v7 = vpop.eup %6994  ;;  %7014 = vpow2.f32 %v4333_v63  ;;  %v4443_v31 = vmul.f32 1.442695, %v4442_v36  ;;  %v10298_v37 = vmax.f32 %v10285_v30, %v10077_v62  ;;  %v3635_v20 = vadd.f32 %v3634_v46, %v9776_v53  ;;  %v11515_v53 = vld [vmem:[#allocation88_spill] sm:$0xff] }
 0x5e2   : > { %v10278_v13 = vpop.eup %6996  ;;  %v4116_v26 = vmul.f32 1.442695, %v11513_v17  ;;  %7016 = vpow2.f32 %v4388_v54  ;;  %v3906_v47 = vadd.f32 %v3905_v28, %v3904_v52  ;;  %v6084_v21 = vadd.f32 %v6083_v12, %v6082_v0 }
 0x5e3   : > { %v10291_v33 = vpop.eup %6998  ;;  %7018 = vpow2.f32 %v4443_v31  ;;  %v4497_v9 = vsub.f32 %v10077_v62, %v10298_v37  ;;  %v10308_v3 = vadd.f32 %v10298_v37, %v3220_v40  ;;  %v11514_v54 = vsub.f32 %v10080_v35, %v10094_v25 }
 0x5e4   : > { %v10301_v59 = vpop.eup %7000  ;;  %7020 = vpow2.f32 %v5954_v43  ;;  %v3907_v0 = vmul.f32 %v3906_v47, %v11515_v53  ;;  %v10317_v46 = vmul.f32 %v10243_v34, %v3635_v20  ;;  %v3223_v52 = vadd.f32 %v6084_v21, %v9781_v11 }
 0x5e5   : > { %v10310_v63 = vpop.eup %7002  ;;  %v4171_v36 = vmul.f32 1.442695, %v11514_v54  ;;  %7022 = vrcp.f32 %v3707_v18  ;;  %v4498_v62 = vmul.f32 1.442695, %v4497_v9  ;;  %v10323_v40 = vmax.f32 %v10308_v3, %v10100_v56  ;;  %v11520_v9 = vld [vmem:[#allocation95_spill] sm:$0xff] }
 0x5e6   : > { %v10319_v12 = vpop.eup %7004  ;;  %v5955_v35 = vmul.f32 -1.442695, %v3603_v29  ;;  %v3607_v25 = vadd.f32 %v10065_v61, %v9868_v8  ;;  %v3908_v43 = vmul.f32 %v3907_v0, %v3907_v0  ;;  %v3959_v17 = vmul.f32 %v10253_v10, %v3906_v47  ;;  %v11519_v47 = vld [vmem:[#allocation90_spill] sm:$0xff] }
 0x5e7   : > { %11516 = vst [vmem:[#allocation89_spill] sm:$0xff] %v10319_v12  ;;  %v10326_v28 = vpop.eup %7006  ;;  %7024 = vpow2.f32 %v4116_v26  ;;  %v4552_v18 = vsub.f32 %v10100_v56, %v10323_v40  ;;  %v10338_v11 = vadd.f32 %v10323_v40, %v3223_v52  ;;  %v11518_v61 = vsub.f32 %v10113_v60, %v10127_v22 }
 0x5e8   : > { %v10331_v31 = vpop.eup %7008  ;;  %7026 = vpow2.f32 %v4171_v36  ;;  %3909 = vadd.xlane.f32.xlu0 %v3908_v43  ;;  %v3960_v26 = vmul.f32 %v10237_v14, %v11519_v47  ;;  %v4015_v56 = vmul.f32 %v10278_v13, %v11520_v9  ;;  %v11521_v54 = vsub.f32 %v10141_v41, %v10154_v24  ;;  %v11525_v9 = vld [vmem:[#allocation100_spill] sm:$0xff] }
 0x5e9   : > { %11517 = vst [vmem:[#allocation88_spill] sm:$0xff] %v10338_v11  ;;  %v10340_v21 = vpop.eup %7010  ;;  %v4226_v29 = vmul.f32 1.442695, %v11518_v61  ;;  %7028 = vpow2.f32 %v4498_v62  ;;  %v4553_v52 = vmul.f32 1.442695, %v4552_v18  ;;  %v10354_v36 = vmax.f32 %v10338_v11, %v10204_v5  ;;  %v11524_v61 = vld [vmem:[#allocation97_spill] sm:$0xff] }
 0x5ea   : > { %v4281_v0 = vmul.f32 1.442695, %v11521_v54  ;;  %v10356_v20 = vpop.eup %7012  ;;  %v11523_v60 = vsub.f32 %v10164_v48, %v10180_v19  ;;  %v3961_v43 = vadd.f32 %v3960_v26, %v3959_v17  ;;  %v4070_v47 = vmul.f32 %v10310_v63, %v11524_v61  ;;  %v11526_v19 = vld [vmem:[#allocation102_spill] sm:$0xff]  ;;  %v11527_v26 = vld [vmem:[#allocation81_spill] sm:$0xff] }
 0x5eb   : > { %11522 = vst [vmem:[#allocation90_spill] sm:$0xff] %v10354_v36  ;;  %v4125_v41 = vmul.f32 %v10326_v28, %v11525_v9  ;;  %v10365_v24 = vpop.eup %7014  ;;  %7030 = vpow2.f32 %v4553_v52  ;;  %v4607_v62 = vsub.f32 %v10204_v5, %v10354_v36  ;;  %4645 = vst [vmem:[#allocation7] sm:$0xff] %v10354_v36  ;;  %v10374_v48 = vmul.f32 %v10331_v31, %v11526_v19  ;;  %v11528_v54 = vld [vmem:[#allocation73_spill] sm:$0xff]  ;;  %v11530_v52 = vld [vmem:[#allocation91_spill] sm:$0xff] }
 0x5ec   : > { %v4336_v22 = vmul.f32 1.442695, %v11523_v60  ;;  %v10376_v17 = vpop.eup %7016  ;;  %v10380_v60 = vadd.f32 %v11528_v54, %v11527_v26  ;;  %7032 = vpow2.f32 %v5955_v35  ;;  %v3962_v61 = vmul.f32 %v3961_v43, %v11530_v52  ;;  %v11531_v54 = vld [vmem:[#allocation105_spill] sm:$0xff]  ;;  %v3789_v26 = vld [vmem:[#allocation5] sm:$0xff] }
 0x5ed   : > { %v4014_v5 = vmul.f32 %v10291_v33, %v3961_v43  ;;  %v7019_v9 = vpop.eup %7018  ;;  %v10385_v18 = vadd.f32 1.0, %v10258_v45  ;;  %7034 = vpow2.f32 %v4226_v29  ;;  %v10387_v58 = vmul.f32 -1.442695, %v3607_v25 }
 0x5ee   : > { %11529 = vst [vmem:[#allocation95_spill] sm:$0xff] %v10380_v60  ;;  %v4608_v19 = vmul.f32 1.442695, %v4607_v62  ;;  %v10389_v57 = vpop.eup %7020  ;;  %7036 = vpow2.f32 %v4281_v0  ;;  %v3963_v36 = vmul.f32 %v3962_v61, %v3962_v61  ;;  %v10393_v35 = vmul.f32 %v10340_v21, %v11531_v54  ;;  %v11538_v61 = vld [vmem:[#allocation107_spill] sm:$0xff]  ;;  %v11539_v54 = vld [vmem:[#allocation41_spill] sm:$0xff] }
 0x5ef   : > { %v4016_v11 = vadd.f32 %v4015_v56, %v4014_v5  ;;  %v10395_v60 = vpop.eup %7022  ;;  %7038 = vpow2.f32 %v4336_v22  ;;  %v10399_v45 = vmul.f32 %v10356_v20, %v10009_v15  ;;  %v10403_v25 = vmul.f32 %v10365_v24, %v10018_v42  ;;  %v11535_v56 = vld [vmem:[#allocation92_spill] sm:$0xff] }
 0x5f0   : > { %11532 = vst [vmem:[#allocation97_spill] sm:$0xff] %v10395_v60  ;;  %v10407_v29 = vmul.f32 %v10376_v17, %v10039_v4  ;;  %7040 = vpow2.f32 %v4608_v19  ;;  %3964 = vadd.xlane.f32.xlu0 %v3963_v36  ;;  %v10412_v22 = vmul.f32 %v7019_v9, %v10067_v1  ;;  %v11537_v15 = vsub.f32 %v10198_v38, %v10216_v32  ;;  %v11540_v4 = vld [vmem:[#allocation104_spill] sm:$0xff]  ;;  %v11541_v19 = vld [vmem:[#allocation43_spill] sm:$0xff]  ;;  %v11542_v1 = vld [vmem:[#allocation93_spill] sm:$0xff] }
 0x5f1   : > { %11533 = vst [vmem:[#allocation100_spill] sm:$0xff] %v10403_v25  ;;  %v4017_v0 = vmul.f32 %v4016_v11, %v11535_v56  ;;  %v4069_v43 = vmul.f32 %v10319_v12, %v4016_v11  ;;  %v10414_v62 = vpop.eup %7024  ;;  %v3790_v5 = vmul.f32 %v11538_v61, %v3789_v26  ;;  %v3846_v36 = vmul.f32 %v10156_v23, %v11541_v19  ;;  %v11543_v12 = vld [vmem:[#allocation94_spill] sm:$0xff]  ;;  %v11550_v19 = vld [vmem:[#allocation111_spill] sm:$0xff] }
 0x5f2   : > { %11534 = vst [vmem:[#allocation102_spill] sm:$0xff] %v10407_v29  ;;  %11536 = vst [vmem:[#allocation73_spill] sm:$0xff] %v10412_v22  ;;  %v4391_v42 = vmul.f32 1.442695, %v11537_v15  ;;  %v3792_v29 = vmul.f32 %v11540_v4, %v11539_v54  ;;  %v10424_v60 = vpop.eup %7026  ;;  %v3901_v22 = vmul.f32 %v10207_v55, %v11542_v1  ;;  %v10430_v56 = vmul.f32 %v10237_v14, %v11543_v12  ;;  %v5452_v38 = vld [vmem:[#allocation7] sm:$0xff]  ;;  %v11544_v15 = vld [vmem:[#allocation99_spill] sm:$0xff] }
 0x5f3   : > { %v4018_v11 = vmul.f32 %v4017_v0, %v4017_v0  ;;  %v4071_v25 = vadd.f32 %v4070_v47, %v4069_v43  ;;  %v7029_v32 = vpop.eup %7028  ;;  %v10434_v61 = vmul.f32 %v10278_v13, %v11544_v15  ;;  %v11545_v54 = vld [vmem:[#allocation103_spill] sm:$0xff]  ;;  %v11546_v0 = vld [vmem:[#allocation109_spill] sm:$0xff]  ;;  %5453 = vst [vmem:[#allocation31] sm:$0xff] %v5452_v38  ;;  %v11547_v55 = vld [vmem:[#allocation96_spill] sm:$0xff] }
 0x5f4   : > { %v3793_v26 = vadd.f32 %v3792_v29, %v3790_v5  ;;  %v10438_v23 = vmul.f32 %v10310_v63, %v11545_v54  ;;  %v10442_v47 = vmul.f32 %v10326_v28, %v11546_v0  ;;  %v10447_v29 = vmul.f32 %v7029_v32, %v10086_v49  ;;  %v11548_v43 = vld [vmem:[#allocation110_spill] sm:$0xff]  ;;  %v11551_v28 = vld [vmem:[#allocation112_spill] sm:$0xff]  ;;  %v11553_v54 = vld [vmem:[#allocation115_spill] sm:$0xff] }
 0x5f5   : > { %4019 = vadd.xlane.f32.xlu0 %v4018_v11  ;;  %v4072_v14 = vmul.f32 %v4071_v25, %v11547_v55  ;;  %v4124_v12 = vmul.f32 %v10414_v62, %v4071_v25  ;;  %v10451_v13 = vmul.f32 %v10331_v31, %v11548_v43  ;;  %v7031_v5 = vpop.eup %7030  ;;  %v11549_v63 = vld [vmem:[#allocation86_spill] sm:$0xff]  ;;  %v10457_v38 = vmul.f32 %v10340_v21, %v11551_v28  ;;  %v4662_v43 = vld [vmem:[#allocation22] sm:$0xff] }
 0x5f6   : > { %v3814_v4 = vmul.f32 %v3793_v26, %v11549_v63  ;;  %v3844_v1 = vmul.f32 %v11550_v19, %v3793_v26  ;;  %v10461_v11 = vmul.f32 %v10356_v20, %v10121_v44  ;;  %v10463_v25 = vpop.eup %7032  ;;  %v10466_v31 = vmul.f32 %v7031_v5, %v10150_v39  ;;  %v4663_v21 = vld [vmem:[#allocation22 + $0x8] sm:$0xff]  ;;  %v11555_v63 = vld [vmem:[#allocation119_spill] sm:$0xff]  ;;  %v11556_v20 = vld [vmem:[#allocation117_spill] sm:$0xff] }
 0x5f7   : > { %v4073_v49 = vmul.f32 %v4072_v14, %v4072_v14  ;;  %v4126_v15 = vadd.f32 %v4125_v41, %v4124_v12  ;;  %v10470_v0 = vmul.f32 %v10365_v24, %v11553_v54  ;;  %v10472_v26 = vpop.eup %7034  ;;  %v10479_v28 = vmul.f32 %v10376_v17, %v11556_v20  ;;  %v11557_v41 = vld [vmem:[#allocation79_spill] sm:$0xff]  ;;  %v11558_v24 = vld [vmem:[#allocation113_spill] sm:$0xff]  ;;  %v11559_v54 = vld [vmem:[#allocation98_spill] sm:$0xff] }
 0x5f8   : > { %11552 = vst [vmem:[#allocation91_spill] sm:$0xff] %v10461_v11  ;;  %v10475_v19 = vmul.f32 %v11555_v63, %v3814_v4  ;;  %v3847_v44 = vadd.f32 %v3846_v36, %v3844_v1  ;;  %v10482_v14 = vmul.f32 %v7019_v9, %v11557_v41  ;;  %v10484_v39 = vpop.eup %7036  ;;  %v3613_v12 = vadd.f32 %v11558_v24, %v9868_v8  ;;  %v11560_v36 = vld [vmem:[#allocation87_spill] sm:$0xff] }
 0x5f9   : > { %11554 = vst [vmem:[#allocation105_spill] sm:$0xff] %v10470_v0  ;;  %4074 = vadd.xlane.f32.xlu1 %v4073_v49  ;;  %v4127_v0 = vmul.f32 %v4126_v15, %v11559_v54  ;;  %v4179_v11 = vmul.f32 %v10424_v60, %v4126_v15  ;;  %v6341_v4 = vpack.c.bf16 %v4663_v21, %v4662_v43  ;;  %v10490_v63 = vpop.eup %7038  ;;  %7042 = vpow2.f32 %v4391_v42  ;;  %v4664_v21 = vld [vmem:[#allocation22 + $0x10] sm:$0xff] }
 0x5fa   : > { %v3868_v1 = vmul.f32 %v3847_v44, %v11560_v36  ;;  %v3899_v17 = vmul.f32 %v10221_v51, %v3847_v44  ;;  %v10495_v9 = vmul.f32 %v7029_v32, %v10249_v2  ;;  %v10498_v20 = vmul.f32 %v7031_v5, %v10276_v50  ;;  %v7041_v41 = vpop.eup %7040  ;;  %v4665_v51 = vld [vmem:[#allocation22 + $0x18] sm:$0xff]  ;;  %v11562_v32 = vld [vmem:[#allocation83_spill] sm:$0xff] }
 0x5fb   : > { %v11561_v49 = vsub.f32 %v10256_v16, %v10268_v27  ;;  %v4128_v15 = vmul.f32 %v4127_v0, %v4127_v0  ;;  %v4181_v43 = vadd.f32 %v10374_v48, %v4179_v11  ;;  %6342 = vmatprep.subr.bf16.mxu0 %v6341_v4  ;;  %6374 = vmatprep.subr.bf16.mxu1 %v6341_v4  ;;  %v3709_v16 = vadd.f32 1.0, %v10301_v59  ;;  %v11563_v27 = vld [vmem:[#allocation101_spill] sm:$0xff] }
 0x5fc   : > { %6344 = vmatpush3.bf16.msra.mxu0 %v6341_v4  ;;  %v10505_v2 = vmul.f32 %v7041_v41, %v10243_v34  ;;  %v10508_v50 = vmul.f32 %v11562_v32, %v3868_v1  ;;  %v3902_v5 = vadd.f32 %v3901_v22, %v3899_v17  ;;  %v10511_v42 = vmul.f32 %v7041_v41, %v10317_v46  ;;  %v11564_v46 = vld [vmem:[#allocation114_spill] sm:$0xff] }
 0x5fd   : > { %v4446_v24 = vmul.f32 1.442695, %v11561_v49  ;;  %4129 = vadd.xlane.f32.xlu0 %v4128_v15  ;;  %v4182_v48 = vmul.f32 %v4181_v43, %v11563_v27  ;;  %v4234_v11 = vmul.f32 %v10472_v26, %v4181_v43  ;;  %v6345_v0 = vpack.c.bf16 %v4665_v51, %v4664_v21  ;;  %6376 = vmatpush3.bf16.msra.mxu1 %v6341_v4  ;;  %v11566_v17 = vld [vmem:[#allocation106_spill] sm:$0xff] }
 0x5fe   : > { %7044 = vrcp.f32 %v10385_v18  ;;  %v5957_v34 = vmul.f32 -1.442695, %v3613_v12  ;;  %v3923_v44 = vmul.f32 %v3902_v5, %v11515_v53  ;;  %v3954_v36 = vmul.f32 %v10253_v10, %v3902_v5  ;;  %v4666_v12 = vld [vmem:[#allocation22 + $0x20] sm:$0xff]  ;;  %v4667_v53 = vld [vmem:[#allocation22 + $0x28] sm:$0xff]  ;;  %v4668_v5 = vld [vmem:[#allocation22 + $0x30] sm:$0xff] }
 0x5ff   : > { %7046 = vpow2.f32 %v10387_v58  ;;  %v3617_v22 = vadd.f32 %v11564_v46, %v9868_v8  ;;  %v4183_v59 = vmul.f32 %v4182_v48, %v4182_v48  ;;  %v4236_v1 = vadd.f32 %v10393_v35, %v4234_v11  ;;  %6346 = vmatprep.subr.bf16.mxu0 %v6345_v0  ;;  %6378 = vmatprep.subr.bf16.mxu1 %v6345_v0  ;;  %v11571_v46 = vld [vmem:[#allocation92_spill] sm:$0xff] }
 0x600   : > { %7048 = vpow2.f32 %v4446_v24  ;;  %v11565_v4 = vsub.f32 %v10285_v30, %v10298_v37  ;;  %6348 = vmatpush3.bf16.msra.mxu0 %v6345_v0  ;;  %v10527_v10 = vmul.f32 %v10264_v6, %v3923_v44  ;;  %v3957_v58 = vadd.f32 %v10430_v56, %v3954_v36  ;;  %v11567_v30 = vld [vmem:[#allocation116_spill] sm:$0xff]  ;;  %v4670_v36 = vld [vmem:[#allocation22 + $0x40] sm:$0xff] }
 0x601   : > { %7050 = vrcp.f32 %v3709_v16  ;;  %4184 = vadd.xlane.f32.xlu1 %v4183_v59  ;;  %v4237_v41 = vmul.f32 %v4236_v1, %v11566_v17  ;;  %v4289_v35 = vmul.f32 %v10484_v39, %v4236_v1  ;;  %v6349_v49 = vpack.c.bf16 %v4667_v53, %v4666_v12  ;;  %6380 = vmatpush3.bf16.msra.mxu1 %v6345_v0  ;;  %v4669_v16 = vld [vmem:[#allocation22 + $0x38] sm:$0xff] }
 0x602   : > { %v4501_v18 = vmul.f32 1.442695, %v11565_v4  ;;  %7052 = vpow2.f32 %v5957_v34  ;;  %v3623_v37 = vadd.f32 %v11567_v30, %v9868_v8  ;;  %v3978_v24 = vmul.f32 %v3957_v58, %v11530_v52  ;;  %v11574_v53 = vld [vmem:[#allocation88_spill] sm:$0xff] }
 0x603   : > { %v4009_v15 = vmul.f32 %v10291_v33, %v3957_v58  ;;  %v3710_v6 = vadd.f32 1.0, %v10389_v57  ;;  %v5958_v43 = vmul.f32 -1.442695, %v3617_v22  ;;  %v4238_v56 = vmul.f32 %v4237_v41, %v4237_v41  ;;  %6350 = vmatprep.subr.bf16.mxu0 %v6349_v49  ;;  %6382 = vmatprep.subr.bf16.mxu1 %v6349_v49  ;;  %v10545_v57 = vpop.eup %7042  ;;  %v11575_v58 = vld [vmem:[#allocation90_spill] sm:$0xff] }
 0x604   : > { %v4291_v21 = vadd.f32 %v10399_v45, %v4289_v35  ;;  %7054 = vpow2.f32 %v4501_v18  ;;  %v11568_v51 = vsub.f32 %v10308_v3, %v10323_v40  ;;  %6352 = vmatpush3.bf16.msra.mxu0 %v6349_v49  ;;  %v10542_v52 = vmul.f32 %v10271_v7, %v3978_v24  ;;  %v11569_v45 = vld [vmem:[#allocation108_spill] sm:$0xff]  ;;  %v11570_v40 = vld [vmem:[#allocation118_spill] sm:$0xff] }
 0x605   : > { %v4012_v33 = vadd.f32 %v10434_v61, %v4009_v15  ;;  %v3711_v48 = vadd.f32 1.0, %v10463_v25  ;;  %4239 = vadd.xlane.f32.xlu0 %v4238_v56  ;;  %v6353_v34 = vpack.c.bf16 %v4669_v16, %v4668_v5  ;;  %6384 = vmatpush3.bf16.msra.mxu1 %v6349_v49  ;;  %v5959_v3 = vmul.f32 -1.442695, %v3623_v37  ;;  %v4671_v7 = vld [vmem:[#allocation22 + $0x48] sm:$0xff]  ;;  %v11572_v61 = vld [vmem:[#allocation89_spill] sm:$0xff]  ;;  %v11573_v25 = vld [vmem:[#allocation100_spill] sm:$0xff] }
 0x606   : > { %v4556_v32 = vmul.f32 1.442695, %v11568_v51  ;;  %v4292_v11 = vmul.f32 %v4291_v21, %v11569_v45  ;;  %v4344_v0 = vmul.f32 %v10490_v63, %v4291_v21  ;;  %v3627_v44 = vadd.f32 %v11570_v40, %v9868_v8  ;;  %v11577_v49 = vld [vmem:[#allocation97_spill] sm:$0xff]  ;;  %v11578_v15 = vld [vmem:[#allocation95_spill] sm:$0xff]  ;;  %v11579_v51 = vld [vmem:[#allocation120_spill] sm:$0xff] }
 0x607   : > { %v4033_v22 = vmul.f32 %v4012_v33, %v11571_v46  ;;  %v4064_v59 = vmul.f32 %v11572_v61, %v4012_v33  ;;  %7056 = vpow2.f32 %v5958_v43  ;;  %6354 = vmatprep.subr.bf16.mxu0 %v6353_v34  ;;  %v6357_v18 = vpack.c.bf16 %v4671_v7, %v4670_v36  ;;  %6386 = vmatprep.subr.bf16.mxu1 %v6353_v34  ;;  %v11580_v33 = vld [vmem:[#allocation81_spill] sm:$0xff]  ;;  %v11582_v40 = vld [vmem:[#allocation102_spill] sm:$0xff]  ;;  %v4672_v46 = vld [vmem:[#allocation22 + $0x50] sm:$0xff] }
 0x608   : > { %v4293_v1 = vmul.f32 %v4292_v11, %v4292_v11  ;;  %v4346_v4 = vadd.f32 %v11573_v25, %v4344_v0  ;;  %v7045_v12 = vpop.eup %7044  ;;  %7058 = vpow2.f32 %v4556_v32  ;;  %v11576_v41 = vsub.f32 %v11574_v53, %v11575_v58  ;;  %6356 = vmatpush3.bf16.msra.mxu0 %v6353_v34  ;;  %v4675_v25 = vld [vmem:[#allocation22 + $0x68] sm:$0xff]  ;;  %v4676_v58 = vld [vmem:[#allocation22 + $0x70] sm:$0xff] }
 0x609   : > { %v10559_v30 = vmul.f32 %v11577_v49, %v4033_v22  ;;  %v4067_v37 = vadd.f32 %v10438_v23, %v4064_v59  ;;  %v7047_v24 = vpop.eup %7046  ;;  %7060 = vrcp.f32 %v3710_v6  ;;  %6358 = vmatprep.subr.bf16.mxu0 %v6357_v18  ;;  %v3633_v32 = vadd.f32 %v11579_v51, %v9868_v8  ;;  %6388 = vmatpush3.bf16.msra.mxu1 %v6353_v34  ;;  %v11581_v6 = vld [vmem:[#allocation61_spill] sm:$0xff]  ;;  %v4673_v22 = vld [vmem:[#allocation22 + $0x58] sm:$0xff] }
 0x60a   : > { %v4611_v35 = vmul.f32 1.442695, %v11576_v41  ;;  %4294 = vadd.xlane.f32.xlu1 %v4293_v1  ;;  %v4347_v43 = vmul.f32 %v4346_v4, %v11578_v15  ;;  %v4399_v56 = vmul.f32 %v10545_v57, %v4346_v4  ;;  %v10564_v21 = vpop.eup %7048  ;;  %7062 = vpow2.f32 %v5959_v3  ;;  %6390 = vmatprep.subr.bf16.mxu1 %v6357_v18  ;;  %v4677_v41 = vld [vmem:[#allocation22 + $0x78] sm:$0xff]  ;;  %v11585_v51 = vld [vmem:[#allocation121_spill] sm:$0xff] }
 0x60b   : > { %v4088_v5 = vmul.f32 %v4067_v37, %v11547_v55  ;;  %v4119_v16 = vmul.f32 %v10414_v62, %v4067_v37  ;;  %v7051_v23 = vpop.eup %7050  ;;  %v10572_v11 = vadd.f32 %v11581_v6, %v11580_v33  ;;  %7064 = vrcp.f32 %v3711_v48  ;;  %v4674_v55 = vld [vmem:[#allocation22 + $0x60] sm:$0xff] }
 0x60c   : > { %v4348_v0 = vmul.f32 %v4347_v43, %v4347_v43  ;;  %v4401_v36 = vadd.f32 %v11582_v40, %v4399_v56  ;;  %v7053_v7 = vpop.eup %7052  ;;  %v5960_v3 = vmul.f32 -1.442695, %v3627_v44  ;;  %7066 = vpow2.f32 %v4611_v35  ;;  %6360 = vmatpush3.bf16.msra.mxu0 %v6357_v18  ;;  %v11584_v43 = vld [vmem:[#allocation73_spill] sm:$0xff] }
 0x60d   : > { %v10575_v61 = vmul.f32 %v7045_v12, %v4088_v5  ;;  %v4122_v62 = vadd.f32 %v10442_v47, %v4119_v16  ;;  %v3712_v34 = vadd.f32 1.0, %v7047_v24  ;;  %v6361_v1 = vpack.c.bf16 %v4673_v22, %v4672_v46  ;;  %6392 = vmatpush3.bf16.msra.mxu1 %v6357_v18  ;;  %v11583_v47 = vld [vmem:[#allocation72_spill] sm:$0xff] }
 0x60e   : > { %4349 = vadd.xlane.f32.xlu0 %v4348_v0  ;;  %v4402_v59 = vmul.f32 %v4401_v36, %v10572_v11  ;;  %v4454_v48 = vmul.f32 %v10564_v21, %v4401_v36  ;;  %v10580_v4 = vpop.eup %7054  ;;  %v5961_v44 = vmul.f32 -1.442695, %v3633_v32  ;;  %v6365_v53 = vpack.c.bf16 %v4675_v25, %v4674_v55  ;;  %v11587_v25 = vld [vmem:[#allocation77_spill] sm:$0xff] }
 0x60f   : > { %v4143_v35 = vmul.f32 %v4122_v62, %v11559_v54  ;;  %v4174_v12 = vmul.f32 %v10424_v60, %v4122_v62  ;;  %v10586_v49 = vadd.f32 %v11583_v47, %v11580_v33  ;;  %v3713_v37 = vadd.f32 1.0, %v7053_v7  ;;  %6362 = vmatprep.subr.bf16.mxu0 %v6361_v1  ;;  %6394 = vmatprep.subr.bf16.mxu1 %v6361_v1 }
 0x610   : > { %v4403_v24 = vmul.f32 %v4402_v59, %v4402_v59  ;;  %v4456_v56 = vadd.f32 %v11584_v43, %v4454_v48  ;;  %7068 = vpow2.f32 %v5960_v3  ;;  %v3637_v32 = vadd.f32 %v11585_v51, %v9868_v8  ;;  %6364 = vmatpush3.bf16.msra.mxu0 %v6361_v1 }
 0x611   : > { %v10591_v5 = vmul.f32 %v7051_v23, %v4143_v35  ;;  %v4177_v60 = vadd.f32 %v10451_v13, %v4174_v12  ;;  %v7057_v54 = vpop.eup %7056  ;;  %7070 = vrcp.f32 %v3712_v34  ;;  %6366 = vmatprep.subr.bf16.mxu0 %v6365_v53  ;;  %v6369_v6 = vpack.c.bf16 %v4677_v41, %v4676_v58  ;;  %6396 = vmatpush3.bf16.msra.mxu1 %v6361_v1  ;;  %v11586_v13 = vld [vmem:[#allocation78_spill] sm:$0xff]  ;;  %v11588_v12 = vld [vmem:[#allocation91_spill] sm:$0xff] }
 0x612   : > { %4404 = vadd.xlane.f32.xlu1 %v4403_v24  ;;  %v4457_v18 = vmul.f32 %v4456_v56, %v10586_v49  ;;  %v4509_v16 = vmul.f32 %v10580_v4, %v4456_v56  ;;  %v10596_v0 = vpop.eup %7058  ;;  %7072 = vpow2.f32 %v5961_v44  ;;  %v10602_v36 = vadd.f32 %v11586_v13, %v11580_v33  ;;  %6398 = vmatprep.subr.bf16.mxu1 %v6365_v53 }
 0x613   : > { %v4198_v40 = vmul.f32 %v4177_v60, %v11563_v27  ;;  %v4229_v8 = vmul.f32 %v10472_v26, %v4177_v60  ;;  %v7061_v23 = vpop.eup %7060  ;;  %7074 = vrcp.f32 %v3713_v37  ;;  %v5962_v22 = vmul.f32 -1.442695, %v3637_v32 }
 0x614   : > { %v4458_v7 = vmul.f32 %v4457_v18, %v4457_v18  ;;  %v4511_v3 = vadd.f32 %v10447_v29, %v4509_v16  ;;  %v7063_v46 = vpop.eup %7062  ;;  %6368 = vmatpush3.bf16.msra.mxu0 %v6365_v53  ;;  %v3714_v26 = vadd.f32 1.0, %v7057_v54  ;;  %v3010_v44 = vadd.f32 %v11587_v25, %v11580_v33  ;;  %v11590_v18 = vld [vmem:[#allocation105_spill] sm:$0xff] }
 0x615   : > { %v10605_v55 = vmul.f32 %v7061_v23, %v4198_v40  ;;  %v4232_v27 = vadd.f32 %v10457_v38, %v4229_v8  ;;  %v7065_v62 = vpop.eup %7064  ;;  %6370 = vmatprep.subr.bf16.mxu0 %v6369_v6  ;;  %6400 = vmatpush3.bf16.msra.mxu1 %v6365_v53  ;;  %v3715_v58 = vadd.f32 1.0, %v7063_v46  ;;  %7076 = vpow2.f32 %v5962_v22 }
 0x616   : > { %4459 = vadd.xlane.f32.xlu0 %v4458_v7  ;;  %v4512_v34 = vmul.f32 %v4511_v3, %v10602_v36  ;;  %v4564_v59 = vmul.f32 %v10596_v0, %v4511_v3  ;;  %v10610_v48 = vpop.eup %7066  ;;  %6402 = vmatprep.subr.bf16.mxu1 %v6369_v6  ;;  %7078 = vrcp.f32 %v3714_v26 }
 0x617   : > { %v4253_v29 = vmul.f32 %v4232_v27, %v11566_v17  ;;  %v4284_v1 = vmul.f32 %v10484_v39, %v4232_v27  ;;  %7080 = vrcp.f32 %v3715_v58 }
 0x618   : > { %v4513_v38 = vmul.f32 %v4512_v34, %v4512_v34  ;;  %v4566_v41 = vadd.f32 %v10466_v31, %v4564_v59  ;;  %6372 = vmatpush3.bf16.msra.mxu0 %v6369_v6  ;;  %v11589_v31 = vld [vmem:[#allocation82_spill] sm:$0xff] }
 0x619   : > { %v10617_v35 = vmul.f32 %v7065_v62, %v4253_v29  ;;  %v4287_v47 = vadd.f32 %v11588_v12, %v4284_v1  ;;  %6404 = vmatpush3.bf16.msra.mxu1 %v6369_v6  ;;  %v3014_v56 = vadd.f32 %v11589_v31, %v11580_v33 }
 0x61a   : > { %4514 = vadd.xlane.f32.xlu1 %v4513_v38  ;;  %v4567_v17 = vmul.f32 %v4566_v41, %v3010_v44  ;;  %v4619_v39 = vmul.f32 %v10610_v48, %v4566_v41  ;;  %v7069_v53 = vpop.eup %7068 }
 0x61b   : > { %v4308_v37 = vmul.f32 %v4287_v47, %v11569_v45  ;;  %v4339_v24 = vmul.f32 %v10490_v63, %v4287_v47  ;;  %v7071_v43 = vpop.eup %7070  ;;  %v3716_v8 = vadd.f32 1.0, %v7069_v53 }
 0x61c   : > { %v4568_v51 = vmul.f32 %v4567_v17, %v4567_v17  ;;  %v4621_v32 = vadd.f32 %v10505_v2, %v4619_v39  ;;  %v7073_v60 = vpop.eup %7072 }
 0x61d   : > { %v10626_v54 = vmul.f32 %v7071_v43, %v4308_v37  ;;  %v4342_v16 = vadd.f32 %v11590_v18, %v4339_v24  ;;  %v7075_v40 = vpop.eup %7074  ;;  %v3717_v23 = vadd.f32 1.0, %v7073_v60  ;;  %7082 = vrcp.f32 %v3716_v8 }
 0x61e   : > { %4569 = vadd.xlane.f32.xlu0 %v4568_v51  ;;  %v4622_v45 = vmul.f32 %v4621_v32, %v3014_v56  ;;  %4644 = vst [vmem:[#allocation6] sm:$0xff] %v4621_v32 }
 0x61f   : > { %v4363_v63 = vmul.f32 %v4342_v16, %v11578_v15  ;;  %v4394_v6 = vmul.f32 %v10545_v57, %v4342_v16  ;;  %v7077_v7 = vpop.eup %7076  ;;  %7084 = vrcp.f32 %v3717_v23 }
 0x620   : > { %v4623_v33 = vmul.f32 %v4622_v45, %v4622_v45  ;;  %v7079_v22 = vpop.eup %7078  ;;  %v3718_v26 = vadd.f32 1.0, %v7077_v7 }
 0x621   : > { %v10631_v13 = vmul.f32 %v7075_v40, %v4363_v63  ;;  %v4397_v2 = vadd.f32 %v10479_v28, %v4394_v6  ;;  %v7081_v62 = vpop.eup %7080 }
 0x622   : > { %4624 = vadd.xlane.f32.xlu1 %v4623_v33  ;;  %7086 = vrcp.f32 %v3718_v26 }
 0x623   : > { %v4418_v3 = vmul.f32 %v4397_v2, %v10572_v11  ;;  %v4449_v46 = vmul.f32 %v10564_v21, %v4397_v2 }
 0x625   : > { %v10636_v27 = vmul.f32 %v7079_v22, %v4418_v3  ;;  %v4452_v15 = vadd.f32 %v10482_v14, %v4449_v46  ;;  %v5450_v57 = vld [vmem:[#allocation6] sm:$0xff] }
 0x626   : > { %5451 = vst [vmem:[#allocation29] sm:$0xff] %v5450_v57 }
 0x627   : > { %v4473_v34 = vmul.f32 %v4452_v15, %v10586_v49  ;;  %v4504_v28 = vmul.f32 %v10580_v4, %v4452_v15  ;;  %v7083_v1 = vpop.eup %7082 }
 0x629   : > { %v10641_v59 = vmul.f32 %v7081_v62, %v4473_v34  ;;  %v4507_v11 = vadd.f32 %v10495_v9, %v4504_v28  ;;  %v7085_v58 = vpop.eup %7084 }
 0x62b   : > { %v4528_v21 = vmul.f32 %v4507_v11, %v10602_v36  ;;  %v4559_v29 = vmul.f32 %v10596_v0, %v4507_v11 }
 0x62c   : > { %v7087_v9 = vpop.eup %7086 }
 0x62d   : > { %v10646_v25 = vmul.f32 %v7083_v1, %v4528_v21  ;;  %v4562_v14 = vadd.f32 %v10498_v20, %v4559_v29 }
 0x62f   : > { %v4583_v38 = vmul.f32 %v4562_v14, %v3010_v44  ;;  %v4614_v49 = vmul.f32 %v10610_v48, %v4562_v14 }
 0x631   : > { %v10650_v41 = vmul.f32 %v7085_v58, %v4583_v38  ;;  %v4617_v4 = vadd.f32 %v10511_v42, %v4614_v49 }
 0x633   : > { %v4638_v12 = vmul.f32 %v4617_v4, %v3014_v56  ;;  %4643 = vst [vmem:[#allocation5] sm:$0xff] %v4617_v4  ;;  %5449 = vst [vmem:[#allocation28] sm:$0xff] %v4617_v4 }
 0x635   : > { %v10653_v36 = vmul.f32 %v7087_v9, %v4638_v12 }
 0x656   : > { %v3801_v0 = vpop.xlane.xlu0 %3800 }
 0x657   : > { %7088 = vrsqrt.f32 %v3801_v0  ;;  %vm3804_vm6 = vcmp.eq.f32.partialorder %v3801_v0, inf  ;;  %v3807_v20 = vand.u32 2147483648, %v3801_v0  ;;  %vm3806_vm7 = vcmp.eq.f32.partialorder %v3801_v0, 0.0 }
 0x661   : > { %v7089_v47 = vpop.eup %7088 }
 0x662   : > { %v3803_v17 = vmul.f32 %v7089_v47, %v3801_v0 }
 0x664   : > { %v3805_v39 = vsel %vm3804_vm6, %v3801_v0, %v3803_v17 }
 0x665   : > { %v3808_v44 = vsel %vm3806_vm7, %v3807_v20, %v3805_v39 }
 0x666   : > { %v3809_v53 = vadd.f32 1e-06, %v3808_v44 }
 0x669   : > { %v3855_v48 = vpop.xlane.xlu1 %3854 }
 0x66a   : > { %7090 = vrsqrt.f32 %v3855_v48  ;;  %vm3858_vm8 = vcmp.eq.f32.partialorder %v3855_v48, inf  ;;  %v3861_v43 = vand.u32 2147483648, %v3855_v48  ;;  %vm3860_vm9 = vcmp.eq.f32.partialorder %v3855_v48, 0.0 }
 0x66b   : > { %7092 = vrcp.f32 %v3809_v53 }
 0x674   : > { %v7091_v42 = vpop.eup %7090 }
 0x675   : > { %v7093_v37 = vpop.eup %7092  ;;  %v3857_v24 = vmul.f32 %v7091_v42, %v3855_v48  ;;  %v3910_v31 = vpop.xlane.xlu0 %3909 }
 0x676   : > { %v3811_v56 = vmul.f32 %v7093_v37, %v3809_v53  ;;  %7094 = vrsqrt.f32 %v3910_v31  ;;  %vm3913_vm10 = vcmp.eq.f32.partialorder %v3910_v31, inf  ;;  %v3916_v23 = vand.u32 2147483648, %v3910_v31 }
 0x677   : > { %v3859_v51 = vsel %vm3858_vm8, %v3855_v48, %v3857_v24  ;;  %vm3915_vm11 = vcmp.eq.f32.partialorder %v3910_v31, 0.0 }
 0x678   : > { %v3862_v32 = vsel %vm3860_vm9, %v3861_v43, %v3859_v51  ;;  %v3812_v60 = vsub.f32 2.0, %v3811_v56 }
 0x679   : > { %v3863_v18 = vadd.f32 1e-06, %v3862_v32 }
 0x67a   : > { %v3813_v16 = vmul.f32 %v7093_v37, %v3812_v60 }
 0x67b   : > { %7096 = vrcp.f32 %v3863_v18 }
 0x67c   : > { %v10656_v40 = vmul.f32 %v10475_v19, %v3813_v16 }
 0x67d   : > { %v3965_v8 = vpop.xlane.xlu0 %3964 }
 0x67e   : > { %6229 = vmatprep.mubr.f32.mxu0 %v10656_v40  ;;  %7098 = vrsqrt.f32 %v3965_v8  ;;  %vm3968_vm12 = vcmp.eq.f32.partialorder %v3965_v8, inf  ;;  %v3971_v34 = vand.u32 2147483648, %v3965_v8  ;;  %vm3970_vm13 = vcmp.eq.f32.partialorder %v3965_v8, 0.0 }
 0x680   : > { %v7095_v45 = vpop.eup %7094 }
 0x681   : > { %v3912_v63 = vmul.f32 %v7095_v45, %v3910_v31 }
 0x682   : > { %v4020_v6 = vpop.xlane.xlu0 %4019 }
 0x683   : > { %7100 = vrsqrt.f32 %v4020_v6  ;;  %v3914_v33 = vsel %vm3913_vm10, %v3910_v31, %v3912_v63  ;;  %vm4023_vm14 = vcmp.eq.f32.partialorder %v4020_v6, inf  ;;  %v4026_v38 = vand.u32 2147483648, %v4020_v6 }
 0x684   : > { %v3917_v7 = vsel %vm3915_vm11, %v3916_v23, %v3914_v33  ;;  %vm4025_vm15 = vcmp.eq.f32.partialorder %v4020_v6, 0.0 }
 0x685   : > { %v7097_v2 = vpop.eup %7096  ;;  %v3918_v22 = vadd.f32 1e-06, %v3917_v7 }
 0x686   : > { %v3865_v3 = vmul.f32 %v7097_v2, %v3863_v18  ;;  %v4075_v46 = vpop.xlane.xlu1 %4074 }
 0x687   : > { %7102 = vrsqrt.f32 %v4075_v46  ;;  %vm4078_vm0 = vcmp.eq.f32.partialorder %v4075_v46, inf  ;;  %v4081_v17 = vand.u32 2147483648, %v4075_v46  ;;  %vm4080_vm1 = vcmp.eq.f32.partialorder %v4075_v46, 0.0 }
 0x688   : > { %v3866_v19 = vsub.f32 2.0, %v3865_v3  ;;  %7104 = vrcp.f32 %v3918_v22  ;;  %v7099_v15 = vpop.eup %7098 }
 0x689   : > { %v3967_v57 = vmul.f32 %v7099_v15, %v3965_v8 }
 0x68a   : > { %v3867_v62 = vmul.f32 %v7097_v2, %v3866_v19  ;;  %v4130_v26 = vpop.xlane.xlu0 %4129 }
 0x68b   : > { %7106 = vrsqrt.f32 %v4130_v26  ;;  %v3969_v28 = vsel %vm3968_vm12, %v3965_v8, %v3967_v57  ;;  %vm4133_vm2 = vcmp.eq.f32.partialorder %v4130_v26, inf  ;;  %v4136_v31 = vand.u32 2147483648, %v4130_v26 }
 0x68c   : > { %v10660_v11 = vmul.f32 %v10508_v50, %v3867_v62  ;;  %v3972_v29 = vsel %vm3970_vm13, %v3971_v34, %v3969_v28  ;;  %vm4135_vm3 = vcmp.eq.f32.partialorder %v4130_v26, 0.0 }
 0x68d   : > { %v7101_v21 = vpop.eup %7100  ;;  %v3973_v14 = vadd.f32 1e-06, %v3972_v29 }
 0x68e   : > { %v4022_v1 = vmul.f32 %v7101_v21, %v4020_v6  ;;  %6230 = vmatmul.mubr.f32.vlgmr.msra.gmra.mrb[96].mxu0 %v10660_v11  ;;  %v4185_v58 = vpop.xlane.xlu1 %4184 }
 0x68f   : > { %7108 = vrsqrt.f32 %v4185_v58  ;;  %vm4188_vm4 = vcmp.eq.f32.partialorder %v4185_v58, inf  ;;  %vm4190_vm5 = vcmp.eq.f32.partialorder %v4185_v58, 0.0 }
 0x690   : > { %v4024_v49 = vsel %vm4023_vm14, %v4020_v6, %v4022_v1  ;;  %7110 = vrcp.f32 %v3973_v14  ;;  %v4191_v6 = vand.u32 2147483648, %v4185_v58 }
 0x691   : > { %v7103_v4 = vpop.eup %7102  ;;  %v4027_v12 = vsel %vm4025_vm15, %v4026_v38, %v4024_v49 }
 0x692   : > { %v7105_v9 = vpop.eup %7104  ;;  %v4077_v0 = vmul.f32 %v7103_v4, %v4075_v46  ;;  %v4028_v47 = vadd.f32 1e-06, %v4027_v12  ;;  %v4240_v50 = vpop.xlane.xlu0 %4239 }
 0x693   : > { %v3920_v20 = vmul.f32 %v7105_v9, %v3918_v22  ;;  %7112 = vrsqrt.f32 %v4240_v50  ;;  %vm4243_vm6 = vcmp.eq.f32.partialorder %v4240_v50, inf  ;;  %v4246_v57 = vand.u32 2147483648, %v4240_v50 }
 0x694   : > { %v4079_v39 = vsel %vm4078_vm0, %v4075_v46, %v4077_v0  ;;  %7114 = vrcp.f32 %v4028_v47  ;;  %vm4245_vm7 = vcmp.eq.f32.partialorder %v4240_v50, 0.0 }
 0x695   : > { %v7107_v44 = vpop.eup %7106  ;;  %v3921_v48 = vsub.f32 2.0, %v3920_v20  ;;  %v4082_v53 = vsel %vm4080_vm1, %v4081_v17, %v4079_v39 }
 0x696   : > { %v4132_v42 = vmul.f32 %v7107_v44, %v4130_v26  ;;  %v4083_v37 = vadd.f32 1e-06, %v4082_v53 }
 0x697   : > { %v4295_v24 = vpop.xlane.xlu1 %4294  ;;  %v3922_v43 = vmul.f32 %v7105_v9, %v3921_v48 }
 0x698   : > { %7116 = vrsqrt.f32 %v4295_v24  ;;  %v4134_v56 = vsel %vm4133_vm2, %v4130_v26, %v4132_v42  ;;  %vm4298_vm8 = vcmp.eq.f32.partialorder %v4295_v24, inf  ;;  %v4301_v4 = vand.u32 2147483648, %v4295_v24 }
 0x699   : > { %7118 = vrcp.f32 %v4083_v37  ;;  %v7109_v51 = vpop.eup %7108  ;;  %v10664_v32 = vmul.f32 %v10527_v10, %v3922_v43  ;;  %v4137_v60 = vsel %vm4135_vm3, %v4136_v31, %v4134_v56  ;;  %vm4300_vm9 = vcmp.eq.f32.partialorder %v4295_v24, 0.0 }
 0x69a   : > { %v7111_v18 = vpop.eup %7110  ;;  %v4187_v16 = vmul.f32 %v7109_v51, %v4185_v58  ;;  %v4138_v8 = vadd.f32 1e-06, %v4137_v60 }
 0x69b   : > { %v10666_v45 = vpop.xlane.xlu0 %4349  ;;  %6232 = vmatprep.mubr.f32.mxu0 %v10664_v32  ;;  %v3975_v63 = vmul.f32 %v7111_v18, %v3973_v14 }
 0x69c   : > { %7120 = vrsqrt.f32 %v10666_v45  ;;  %v4189_v23 = vsel %vm4188_vm4, %v4185_v58, %v4187_v16  ;;  %vm4353_vm10 = vcmp.eq.f32.partialorder %v10666_v45, inf  ;;  %v4356_v53 = vand.u32 2147483648, %v10666_v45 }
 0x69d   : > { %7122 = vrcp.f32 %v4138_v8  ;;  %v7113_v33 = vpop.eup %7112  ;;  %v3976_v2 = vsub.f32 2.0, %v3975_v63  ;;  %v4192_v10 = vsel %vm4190_vm5, %v4191_v6, %v4189_v23  ;;  %vm4355_vm11 = vcmp.eq.f32.partialorder %v10666_v45, 0.0 }
 0x69e   : > { %v7115_v7 = vpop.eup %7114  ;;  %v4242_v3 = vmul.f32 %v7113_v33, %v4240_v50  ;;  %v4193_v46 = vadd.f32 1e-06, %v4192_v10 }
 0x69f   : > { %v10670_v22 = vpop.xlane.xlu1 %4404  ;;  %v3977_v19 = vmul.f32 %v7111_v18, %v3976_v2  ;;  %v4030_v15 = vmul.f32 %v7115_v7, %v4028_v47 }
 0x6a0   : > { %7124 = vrsqrt.f32 %v10670_v22  ;;  %v4244_v62 = vsel %vm4243_vm6, %v4240_v50, %v4242_v3  ;;  %vm4408_vm12 = vcmp.eq.f32.partialorder %v10670_v22, inf  ;;  %vm4410_vm13 = vcmp.eq.f32.partialorder %v10670_v22, 0.0 }
 0x6a1   : > { %7126 = vrcp.f32 %v4193_v46  ;;  %v10674_v34 = vmul.f32 %v10542_v52, %v3977_v19  ;;  %v4031_v28 = vsub.f32 2.0, %v4030_v15  ;;  %v4247_v21 = vsel %vm4245_vm7, %v4246_v57, %v4244_v62 }
 0x6a2   : > { %v7117_v26 = vpop.eup %7116  ;;  %v4248_v14 = vadd.f32 1e-06, %v4247_v21 }
 0x6a3   : > { %v7119_v29 = vpop.eup %7118  ;;  %v4297_v1 = vmul.f32 %v7117_v26, %v4295_v24  ;;  %v10676_v58 = vpop.xlane.xlu0 %4459  ;;  %6233 = vmatmul.mubr.f32.gmra.mrb[98].mxu0 %v10674_v34  ;;  %v4032_v38 = vmul.f32 %v7115_v7, %v4031_v28 }
 0x6a4   : > { %v4085_v49 = vmul.f32 %v7119_v29, %v4083_v37  ;;  %7128 = vrsqrt.f32 %v10676_v58  ;;  %vm4463_vm14 = vcmp.eq.f32.partialorder %v10676_v58, inf  ;;  %vm4465_vm15 = vcmp.eq.f32.partialorder %v10676_v58, 0.0 }
 0x6a5   : > { %v4299_v12 = vsel %vm4298_vm8, %v4295_v24, %v4297_v1  ;;  %7130 = vrcp.f32 %v4248_v14  ;;  %v10681_v9 = vmul.f32 %v10559_v30, %v4032_v38 }
 0x6a6   : > { %v7121_v52 = vpop.eup %7120  ;;  %v4086_v0 = vsub.f32 2.0, %v4085_v49  ;;  %v4302_v47 = vsel %vm4300_vm9, %v4301_v4, %v4299_v12 }
 0x6a7   : > { %v7123_v50 = vpop.eup %7122  ;;  %v4352_v17 = vmul.f32 %v7121_v52, %v10666_v45  ;;  %v4303_v20 = vadd.f32 1e-06, %v4302_v47  ;;  %v10685_v39 = vpop.xlane.xlu1 %4514  ;;  %6235 = vmatprep.mubr.f32.mxu0 %v10681_v9 }
 0x6a8   : > { %v4087_v44 = vmul.f32 %v7119_v29, %v4086_v0  ;;  %v4140_v48 = vmul.f32 %v7123_v50, %v4138_v8  ;;  %7132 = vrsqrt.f32 %v10685_v39  ;;  %v4411_v8 = vand.u32 2147483648, %v10670_v22 }
 0x6a9   : > { %v4354_v30 = vsel %vm4353_vm10, %v10666_v45, %v4352_v17  ;;  %7134 = vrcp.f32 %v4303_v20  ;;  %vm4518_vm0 = vcmp.eq.f32.partialorder %v10685_v39, inf  ;;  %vm4520_vm1 = vcmp.eq.f32.partialorder %v10685_v39, 0.0 }
 0x6aa   : > { %v7125_v42 = vpop.eup %7124  ;;  %v10693_v37 = vmul.f32 %v10575_v61, %v4087_v44  ;;  %v4141_v24 = vsub.f32 2.0, %v4140_v48  ;;  %v4357_v43 = vsel %vm4355_vm11, %v4356_v53, %v4354_v30 }
 0x6ab   : > { %v7127_v31 = vpop.eup %7126  ;;  %v4407_v56 = vmul.f32 %v7125_v42, %v10670_v22  ;;  %v4358_v51 = vadd.f32 1e-06, %v4357_v43  ;;  %v4570_v60 = vpop.xlane.xlu0 %4569 }
 0x6ac   : > { %6236 = vmatmul.mubr.f32.gmra.mrb[100].mxu0 %v10693_v37  ;;  %v4142_v18 = vmul.f32 %v7123_v50, %v4141_v24  ;;  %v4195_v16 = vmul.f32 %v7127_v31, %v4193_v46  ;;  %7136 = vrsqrt.f32 %v4570_v60  ;;  %vm4573_vm2 = vcmp.eq.f32.partialorder %v4570_v60, inf }
 0x6ad   : > { %v4409_v45 = vsel %vm4408_vm12, %v10670_v22, %v4407_v56  ;;  %7138 = vrcp.f32 %v4358_v51  ;;  %v4466_v22 = vand.u32 2147483648, %v10676_v58  ;;  %v4576_v17 = vand.u32 2147483648, %v4570_v60 }
 0x6ae   : > { %v7129_v61 = vpop.eup %7128  ;;  %v10702_v63 = vmul.f32 %v10591_v5, %v4142_v18  ;;  %v4196_v6 = vsub.f32 2.0, %v4195_v16  ;;  %v4412_v23 = vsel %vm4410_vm13, %v4411_v8, %v4409_v45  ;;  %vm4575_vm3 = vcmp.eq.f32.partialorder %v4570_v60, 0.0 }
 0x6af   : > { %v7131_v33 = vpop.eup %7130  ;;  %v4462_v2 = vmul.f32 %v7129_v61, %v10676_v58  ;;  %v4413_v10 = vadd.f32 1e-06, %v4412_v23  ;;  %v4625_v7 = vpop.xlane.xlu1 %4624 }
 0x6b0   : > { %6238 = vmatprep.mubr.f32.mxu0 %v10702_v63  ;;  %v4197_v3 = vmul.f32 %v7127_v31, %v4196_v6  ;;  %v4250_v46 = vmul.f32 %v7131_v33, %v4248_v14  ;;  %7140 = vrsqrt.f32 %v4625_v7  ;;  %v4521_v14 = vand.u32 2147483648, %v10685_v39 }
 0x6b1   : > { %v4464_v19 = vsel %vm4463_vm14, %v10676_v58, %v4462_v2  ;;  %7142 = vrcp.f32 %v4413_v10  ;;  %vm4628_vm4 = vcmp.eq.f32.partialorder %v4625_v7, inf  ;;  %v4631_v31 = vand.u32 2147483648, %v4625_v7 }
 0x6b2   : > { %v7133_v5 = vpop.eup %7132  ;;  %v10711_v15 = vmul.f32 %v10605_v55, %v4197_v3  ;;  %v4251_v57 = vsub.f32 2.0, %v4250_v46  ;;  %v4467_v62 = vsel %vm4465_vm15, %v4466_v22, %v4464_v19  ;;  %vm4630_vm5 = vcmp.eq.f32.partialorder %v4625_v7, 0.0 }
 0x6b3   : > { %v7135_v26 = vpop.eup %7134  ;;  %v4517_v28 = vmul.f32 %v7133_v5, %v10685_v39  ;;  %v4468_v21 = vadd.f32 1e-06, %v4467_v62 }
 0x6b4   : > { %6239 = vmatmul.mubr.f32.gmra.mrb[102].mxu0 %v10711_v15  ;;  %v4252_v29 = vmul.f32 %v7131_v33, %v4251_v57  ;;  %v4305_v1 = vmul.f32 %v7135_v26, %v4303_v20 }
 0x6b5   : > { %v4519_v58 = vsel %vm4518_vm0, %v10685_v39, %v4517_v28  ;;  %7144 = vrcp.f32 %v4468_v21 }
 0x6b6   : > { %v7137_v55 = vpop.eup %7136  ;;  %v10720_v38 = vmul.f32 %v10617_v35, %v4252_v29  ;;  %v4306_v49 = vsub.f32 2.0, %v4305_v1  ;;  %v4522_v4 = vsel %vm4520_vm1, %v4521_v14, %v4519_v58 }
 0x6b7   : > { %v7139_v12 = vpop.eup %7138  ;;  %v4572_v52 = vmul.f32 %v7137_v55, %v4570_v60  ;;  %v4523_v0 = vadd.f32 1e-06, %v4522_v4 }
 0x6b8   : > { %6241 = vmatprep.mubr.f32.mxu0 %v10720_v38  ;;  %v4307_v47 = vmul.f32 %v7135_v26, %v4306_v49  ;;  %v4360_v50 = vmul.f32 %v7139_v12, %v4358_v51 }
 0x6b9   : > { %v4574_v20 = vsel %vm4573_vm2, %v4570_v60, %v4572_v52  ;;  %7146 = vrcp.f32 %v4523_v0 }
 0x6ba   : > { %v7141_v39 = vpop.eup %7140  ;;  %v10724_v44 = vmul.f32 %v10626_v54, %v4307_v47  ;;  %v4361_v35 = vsub.f32 2.0, %v4360_v50  ;;  %v4577_v48 = vsel %vm4575_vm3, %v4576_v17, %v4574_v20 }
 0x6bb   : > { %v7143_v53 = vpop.eup %7142  ;;  %v4627_v30 = vmul.f32 %v7141_v39, %v4625_v7  ;;  %v4578_v42 = vadd.f32 1e-06, %v4577_v48 }
 0x6bc   : > { %6242 = vmatmul.mubr.f32.gmra.mrb[104].mxu0 %v10724_v44  ;;  %v4362_v24 = vmul.f32 %v7139_v12, %v4361_v35  ;;  %v4415_v43 = vmul.f32 %v7143_v53, %v4413_v10 }
 0x6bd   : > { %v4629_v56 = vsel %vm4628_vm4, %v4625_v7, %v4627_v30  ;;  %7148 = vrcp.f32 %v4578_v42 }
 0x6be   : > { %v10728_v51 = vmul.f32 %v10631_v13, %v4362_v24  ;;  %v4416_v60 = vsub.f32 2.0, %v4415_v43  ;;  %v4632_v54 = vsel %vm4630_vm5, %v4631_v31, %v4629_v56 }
 0x6bf   : > { %v7145_v18 = vpop.eup %7144  ;;  %v4633_v16 = vadd.f32 1e-06, %v4632_v54 }
 0x6c0   : > { %6244 = vmatprep.mubr.f32.mxu0 %v10728_v51  ;;  %v4417_v8 = vmul.f32 %v7143_v53, %v4416_v60  ;;  %v4470_v45 = vmul.f32 %v7145_v18, %v4468_v21 }
 0x6c1   : > { %7150 = vrcp.f32 %v4633_v16 }
 0x6c2   : > { %v10732_v61 = vmul.f32 %v10636_v27, %v4417_v8  ;;  %v4471_v6 = vsub.f32 2.0, %v4470_v45 }
 0x6c3   : > { %v7147_v23 = vpop.eup %7146 }
 0x6c4   : > { %6245 = vmatmul.mubr.f32.gmra.mrb[106].mxu0 %v10732_v61  ;;  %v4472_v33 = vmul.f32 %v7145_v18, %v4471_v6  ;;  %v4525_v2 = vmul.f32 %v7147_v23, %v4523_v0 }
 0x6c6   : > { %v10736_v13 = vmul.f32 %v10641_v59, %v4472_v33  ;;  %v4526_v10 = vsub.f32 2.0, %v4525_v2  ;;  %v6792_v33 = vld [vmem:[#allocation24] sm:$0xff]   ;;  %v6793_v2 = vld [vmem:[#allocation24 + $0x8] sm:$0xff]  }
 0x6c7   : > { %v7149_v7 = vpop.eup %7148  ;;  %6309 = vmatprep.subr.bf16.mxu0 %v6792_v33  ;;  %6405 = vmatprep.subr.bf16.mxu1 %v6792_v33 }
 0x6c8   : > { %6247 = vmatprep.mubr.f32.mxu0 %v10736_v13  ;;  %v4527_v3 = vmul.f32 %v7147_v23, %v4526_v10  ;;  %v4580_v46 = vmul.f32 %v7149_v7, %v4578_v42  ;;  %6310 = vmatpush3.bf16.msra.mxu0 %v6792_v33  ;;  %v6795_v10 = vld [vmem:[#allocation24 + $0x18] sm:$0xff]  }
 0x6c9   : > { %6311 = vmatprep.subr.bf16.mxu0 %v6793_v2 }
 0x6ca   : > { %v4530_v22 = vmul.f32 %v10646_v25, %v4527_v3  ;;  %v4581_v19 = vsub.f32 2.0, %v4580_v46  ;;  %v6797_v3 = vld [vmem:[#allocation24 + $0x28] sm:$0xff]   ;;  %v6798_v46 = vld [vmem:[#allocation24 + $0x30] sm:$0xff]  }
 0x6cb   : > { %v7151_v27 = vpop.eup %7150 }
 0x6cc   : > { %6248 = vmatmul.mubr.f32.gmra.mrb[108].mxu0 %v4530_v22  ;;  %v4582_v5 = vmul.f32 %v7149_v7, %v4581_v19  ;;  %v4635_v57 = vmul.f32 %v7151_v27, %v4633_v16  ;;  %v6796_v7 = vld [vmem:[#allocation24 + $0x20] sm:$0xff]   ;;  %v11591_v19 = vld [vmem:[#allocation63_spill] sm:$0xff] }
 0x6cd   : > { %6312 = vmatpush3.bf16.msra.mxu0 %v6793_v2 }
 0x6ce   : > { %v10741_v62 = vmul.f32 %v10650_v41, %v4582_v5  ;;  %v4636_v26 = vsub.f32 2.0, %v4635_v57  ;;  %v11593_v57 = vld [vmem:[#allocation48_spill] sm:$0xff] }
 0x6d0   : > { %6250 = vmatprep.mubr.f32.mxu0 %v10741_v62  ;;  %v4637_v59 = vmul.f32 %v7151_v27, %v4636_v26  ;;  %v11592_v27 = vld [vmem:[#allocation50_spill] sm:$0xff] }
 0x6d1   : > { %v1403_v5 = vadd.f32 %v11592_v27, %v11591_v19 }
 0x6d2   : > { %v4640_v28 = vmul.f32 %v10653_v36, %v4637_v59 }
 0x6d3   : > { %v5966_v26 = vmul.f32 -1.442695, %v1403_v5 }
 0x6d4   : > { %6251 = vmatmul.mubr.f32.gmra.mrb[110].mxu0 %v4640_v28  ;;  %5447 = vst [vmem:[#allocation26] sm:$0xff] %v4640_v28 }
 0x6d5   : > { %7152 = vpow2.f32 %v5966_v26 }
 0x761   : > { %v6231_v21 = vpop.f32.mrb[96].mxu0 }
 0x762   : > { %v10746_v29 = vsub.f32 %v10660_v11, %v6231_v21  ;;  %v4744_v25 = vpop.f32.mrb[97].mxu0 }
 0x763   : > { %v10749_v1 = vsub.f32 %v10656_v40, %v4744_v25 }
 0x764   : > { %v4840_v14 = vmul.f32 %v10746_v29, %v10746_v29 }
 0x765   : > { %v4839_v41 = vmul.f32 %v10749_v1, %v10749_v1 }
 0x767   : > { %6285 = vmatprep.mubr.f32.mxu1 %v4839_v41 }
 0x768   : > { %6286 = vmatmul.mubr.f32.vlgmr.msra.gmra.mrb[80].mxu1 %v4840_v14 }
 0x769   : > { %6413 = vmatpush3.bf16.msra.mxu1 %v6792_v33 }
 0x76a   : > { %6406 = vmatprep.subr.bf16.mxu1 %v6793_v2 }
 0x76d   : > { %6414 = vmatpush3.bf16.msra.mxu1 %v6793_v2  ;;  %v11601_v2 = vld [vmem:[#allocation84_spill] sm:$0xff] }
 0x776   : > { %v6234_v58 = vpop.f32.mrb[98].mxu0 }
 0x777   : > { %v10756_v36 = vsub.f32 %v10674_v34, %v6234_v58  ;;  %v4754_v55 = vpop.f32.mrb[99].mxu0 }
 0x778   : > { %v10759_v11 = vsub.f32 %v10664_v32, %v4754_v55  ;;  %v11594_v55 = vld [vmem:[#allocation49_spill] sm:$0xff] }
 0x779   : > { %v4842_v49 = vmul.f32 %v10756_v36, %v10756_v36 }
 0x77a   : > { %v4841_v40 = vmul.f32 %v10759_v11, %v10759_v11 }
 0x77c   : > { %6288 = vmatprep.mubr.f32.mxu1 %v4841_v40  ;;  %v10829_v40 = vadd.f32 %v11594_v55, %v11591_v19 }
 0x77d   : > { %6289 = vmatmul.mubr.f32.gmra.mrb[82].mxu1 %v4842_v49 }
 0x77f   : > { %v6237_v4 = vpop.f32.mrb[100].mxu0 }
 0x780   : > { %v10766_v12 = vsub.f32 %v10693_v37, %v6237_v4  ;;  %v4764_v52 = vpop.f32.mrb[101].mxu0  ;;  %v11595_v4 = vld [vmem:[#allocation46_spill] sm:$0xff] }
 0x781   : > { %v10769_v34 = vsub.f32 %v10681_v9, %v4764_v52  ;;  %v10833_v52 = vadd.f32 %v11595_v4, %v11591_v19 }
 0x782   : > { %v4844_v0 = vmul.f32 %v10766_v12, %v10766_v12 }
 0x783   : > { %v4843_v32 = vmul.f32 %v10769_v34, %v10769_v34 }
 0x785   : > { %6291 = vmatprep.mubr.f32.mxu1 %v4843_v32 }
 0x786   : > { %6292 = vmatmul.mubr.f32.gmra.mrb[84].mxu1 %v4844_v0  ;;  %v5968_v0 = vmul.f32 -1.442695, %v10829_v40 }
 0x787   : > { %v6240_v47 = vpop.f32.mrb[102].mxu0 }
 0x788   : > { %v10776_v50 = vsub.f32 %v10711_v15, %v6240_v47  ;;  %v4774_v17 = vpop.f32.mrb[103].mxu0  ;;  %v5967_v47 = vmul.f32 -1.442695, %v10833_v52 }
 0x789   : > { %v10779_v37 = vsub.f32 %v10702_v63, %v4774_v17  ;;  %v11596_v17 = vld [vmem:[#allocation56_spill] sm:$0xff] }
 0x78a   : > { %v4846_v20 = vmul.f32 %v10776_v50, %v10776_v50 }
 0x78b   : > { %v4845_v9 = vmul.f32 %v10779_v37, %v10779_v37 }
 0x78d   : > { %6294 = vmatprep.mubr.f32.mxu1 %v4845_v9  ;;  %v10839_v9 = vadd.f32 %v11596_v17, %v11591_v19 }
 0x78e   : > { %6295 = vmatmul.mubr.f32.gmra.mrb[86].mxu1 %v4846_v20  ;;  %v11597_v20 = vld [vmem:[#allocation53_spill] sm:$0xff] }
 0x78f   : > { %v6243_v39 = vpop.f32.mrb[104].mxu0 }
 0x790   : > { %v10786_v35 = vsub.f32 %v10724_v44, %v6243_v39  ;;  %v4784_v48 = vpop.f32.mrb[105].mxu0  ;;  %v10843_v39 = vadd.f32 %v11597_v20, %v11591_v19  ;;  %v11605_v20 = vld [vmem:[#allocation60_spill] sm:$0xff] }
 0x791   : > { %v10789_v15 = vsub.f32 %v10720_v38, %v4784_v48 }
 0x792   : > { %v4848_v53 = vmul.f32 %v10786_v35, %v10786_v35 }
 0x793   : > { %v4847_v63 = vmul.f32 %v10789_v15, %v10789_v15 }
 0x795   : > { %6297 = vmatprep.mubr.f32.mxu1 %v4847_v63  ;;  %v10848_v63 = vld [vmem:[%s11203_s13] ss:$0 sm:$0xff] }
 0x796   : > { %6298 = vmatmul.mubr.f32.gmra.mrb[88].mxu1 %v4848_v53 }
 0x797   : > { %v6246_v30 = vpop.f32.mrb[106].mxu0 }
 0x798   : > { %v10796_v42 = vsub.f32 %v10732_v61, %v6246_v30  ;;  %v4794_v24 = vpop.f32.mrb[107].mxu0 }
 0x799   : > { %v10799_v44 = vsub.f32 %v10728_v51, %v4794_v24  ;;  %v5970_v24 = vmul.f32 -1.442695, %v10839_v9 }
 0x79a   : > { %v4850_v43 = vmul.f32 %v10796_v42, %v10796_v42 }
 0x79b   : > { %v4849_v38 = vmul.f32 %v10799_v44, %v10799_v44 }
 0x79d   : > { %6300 = vmatprep.mubr.f32.mxu1 %v4849_v38  ;;  %v7248_v38 = vld [vmem:[%s11200_s10] sm:$0x1f] }
 0x79e   : > { %6301 = vmatmul.mubr.f32.gmra.mrb[90].mxu1 %v4850_v43  ;;  %v11598_v43 = vld [vmem:[#allocation42_spill] sm:$0xff] }
 0x79f   : > { %v6249_v31 = vpop.f32.mrb[108].mxu0 }
 0x7a0   : > { %v10805_v56 = vsub.f32 %v4530_v22, %v6249_v31  ;;  %v4804_v60 = vpop.f32.mrb[109].mxu0  ;;  %v6799_v22 = vld [vmem:[#allocation24 + $0x38] sm:$0xff]   ;;  %v10856_v31 = vrot.slane %v7248_v38, %v11598_v43 }
 0x7a1   : > { %v10808_v54 = vsub.f32 %v10736_v13, %v4804_v60  ;;  %v6794_v13 = vld [vmem:[#allocation24 + $0x10] sm:$0xff]  }
 0x7a2   : > { %v4852_v51 = vmul.f32 %v10805_v56, %v10805_v56  ;;  %6313 = vmatprep.subr.bf16.mxu0 %v6794_v13  ;;  %6407 = vmatprep.subr.bf16.mxu1 %v6794_v13 }
 0x7a3   : > { %v4851_v18 = vmul.f32 %v10808_v54, %v10808_v54  ;;  %6314 = vmatpush3.bf16.msra.mxu0 %v6794_v13  ;;  %6415 = vmatpush3.bf16.msra.mxu1 %v6794_v13 }
 0x7a4   : > { %6315 = vmatprep.subr.bf16.mxu0 %v6795_v10  ;;  %6408 = vmatprep.subr.bf16.mxu1 %v6795_v10 }
 0x7a5   : > { %6303 = vmatprep.mubr.f32.mxu1 %v4851_v18  ;;  %v10862_v18 = vld [vmem:[%s11599_s26] ss:$0 sm:$0xff] }
 0x7a6   : > { %6304 = vmatmul.mubr.f32.gmra.mrb[92].mxu1 %v4852_v51  ;;  %v5969_v51 = vmul.f32 -1.442695, %v10843_v39 }
 0x7a7   : > { %v6252_v16 = vpop.f32.mrb[110].mxu0  ;;  %6316 = vmatpush3.bf16.msra.mxu0 %v6795_v10  ;;  %6416 = vmatpush3.bf16.msra.mxu1 %v6795_v10  ;;  %v11602_v10 = vld [vmem:[#allocation55_spill] sm:$0xff] }
 0x7a8   : > { %v10814_v8 = vsub.f32 %v4640_v28, %v6252_v16  ;;  %v4814_v45 = vpop.f32.mrb[111].mxu0  ;;  %6317 = vmatprep.subr.bf16.mxu0 %v6796_v7  ;;  %6409 = vmatprep.subr.bf16.mxu1 %v6796_v7  ;;  %v7153_v28 = vpop.eup %7152 }
 0x7a9   : > { %v10817_v61 = vsub.f32 %v10741_v62, %v4814_v45  ;;  %v1400_v62 = vadd.f32 %v11593_v57, %v11591_v19  ;;  %v5159_v49 = vadd.f32 1.0, %v7153_v28 }
 0x7aa   : > { %v4854_v23 = vmul.f32 %v10814_v8, %v10814_v8 }
 0x7ab   : > { %v4853_v6 = vmul.f32 %v10817_v61, %v10817_v61  ;;  %6318 = vmatpush3.bf16.msra.mxu0 %v6796_v7  ;;  %6417 = vmatpush3.bf16.msra.mxu1 %v6796_v7  ;;  %v5965_v59 = vmul.f32 -1.442695, %v1400_v62  ;;  %v10876_v7 = vadd.f32 %v11602_v10, %v11591_v19 }
 0x7ac   : > { %6319 = vmatprep.subr.bf16.mxu0 %v6797_v3  ;;  %6410 = vmatprep.subr.bf16.mxu1 %v6797_v3 }
 0x7ad   : > { %6306 = vmatprep.mubr.f32.mxu1 %v4853_v6  ;;  %7154 = vpow2.f32 %v5965_v59 }
 0x7ae   : > { %6307 = vmatmul.mubr.f32.gmra.mrb[94].mxu1 %v4854_v23  ;;  %v11600_v23 = vld [vmem:[#allocation51_spill] sm:$0xff] }
 0x7af   : > { %6320 = vmatpush3.bf16.msra.mxu0 %v6797_v3  ;;  %6418 = vmatpush3.bf16.msra.mxu1 %v6797_v3  ;;  %v10869_v33 = vadd.f32 %v11600_v23, %v11591_v19  ;;  %v11603_v3 = vld [vmem:[#allocation85_spill] sm:$0xff] }
 0x7b0   : > { %6321 = vmatprep.subr.bf16.mxu0 %v6798_v46  ;;  %6411 = vmatprep.subr.bf16.mxu1 %v6798_v46  ;;  %v11606_v23 = vld [vmem:[#allocation57_spill] sm:$0xff] }
 0x7b3   : > { %6322 = vmatpush3.bf16.msra.mxu0 %v6798_v46  ;;  %6419 = vmatpush3.bf16.msra.mxu1 %v6798_v46  ;;  %v2938_v46 = vadd.f32 %v11603_v3, %v10856_v31 }
 0x7b4   : > { %6323 = vmatprep.subr.bf16.mxu0 %v6799_v22  ;;  %6412 = vmatprep.subr.bf16.mxu1 %v6799_v22 }
 0x7b7   : > { %6324 = vmatpush3.bf16.msra.mxu0 %v6799_v22  ;;  %6420 = vmatpush3.bf16.msra.mxu1 %v6799_v22  ;;  %v7155_v25 = vpop.eup %7154 }
 0x7b8   : > { %v5158_v32 = vadd.f32 1.0, %v7155_v25 }
 0x83b   : > { %v6287_v21 = vpop.f32.mrb[80].mxu1 }
 0x83c   : > { %v4927_v41 = vadd.f32 1e-05, %v6287_v21  ;;  %v4921_v14 = vpop.f32.mrb[81].mxu1 }
 0x83d   : > { %v4922_v58 = vadd.f32 1e-05, %v4921_v14 }
 0x83e   : > { %7156 = vrsqrt.f32 %v4927_v41  ;;  %v5971_v41 = vmul.f32 -1.442695, %v10869_v33 }
 0x83f   : > { %7158 = vrsqrt.f32 %v4922_v58 }
 0x840   : > { %7160 = vrcp.f32 %v5159_v49  ;;  %v5972_v49 = vmul.f32 -1.442695, %v10876_v7 }
 0x841   : > { %7162 = vrcp.f32 %v5158_v32 }
 0x842   : > { %7164 = vpow2.f32 %v5968_v0 }
 0x843   : > { %7166 = vpow2.f32 %v5967_v47 }
 0x844   : > { %7168 = vpow2.f32 %v5970_v24 }
 0x845   : > { %7170 = vpow2.f32 %v5969_v51 }
 0x848   : > { %v7157_v48 = vpop.eup %7156 }
 0x849   : > { %v7159_v53 = vpop.eup %7158  ;;  %v5017_v30 = vmul.f32 %v7157_v48, %v10746_v29  ;;  %v10889_v48 = vadd.f32 %v11605_v20, %v11591_v19 }
 0x84a   : > { %v5016_v60 = vmul.f32 %v7159_v53, %v10749_v1  ;;  %v7161_v16 = vpop.eup %7160  ;;  %v2942_v1 = vadd.f32 %v11601_v2, %v10856_v31  ;;  %v10895_v2 = vadd.f32 %v11606_v23, %v11591_v19 }
 0x84b   : > { %v5040_v29 = vmul.f32 %v10848_v63, %v5017_v30  ;;  %v7163_v6 = vpop.eup %7162  ;;  %v5207_v27 = vmul.f32 %v7161_v16, %v1403_v5  ;;  %v5974_v51 = vmul.f32 -1.442695, %v10889_v48 }
 0x84c   : > { %v5039_v45 = vmul.f32 %v10848_v63, %v5016_v60  ;;  %v7165_v26 = vpop.eup %7164  ;;  %v5206_v59 = vmul.f32 %v7163_v6, %v1400_v62  ;;  %v11604_v62 = vld [vmem:[#allocation58_spill] sm:$0xff] }
 0x84d   : > { %v5063_v13 = vadd.f32 %v10862_v18, %v5040_v29  ;;  %v7167_v25 = vpop.eup %7166  ;;  %v5161_v0 = vadd.f32 1.0, %v7165_v26  ;;  %v10885_v17 = vadd.f32 %v11604_v62, %v11591_v19 }
 0x84e   : > { %v5062_v22 = vadd.f32 %v10862_v18, %v5039_v45  ;;  %v5160_v47 = vadd.f32 1.0, %v7167_v25  ;;  %v7169_v53 = vpop.eup %7168 }
 0x84f   : > { %v5095_v57 = vadd.f32 %v5063_v13, %v2942_v1  ;;  %v7171_v24 = vpop.eup %7170  ;;  %v5973_v38 = vmul.f32 -1.442695, %v10885_v17  ;;  %v5163_v16 = vadd.f32 1.0, %v7169_v53  ;;  %v11607_v13 = vld [vmem:[#allocation59_spill] sm:$0xff] }
 0x850   : > { %v6290_v28 = vpop.f32.mrb[82].mxu1  ;;  %v5094_v21 = vadd.f32 %v5062_v22, %v2938_v46  ;;  %v5162_v45 = vadd.f32 1.0, %v7171_v24  ;;  %v10899_v10 = vadd.f32 %v11607_v13, %v11591_v19  ;;  %v11610_v24 = vld [vmem:[#allocation67_spill] sm:$0xff] }
 0x851   : > { %v4937_v14 = vadd.f32 1e-05, %v6290_v28  ;;  %v4931_v58 = vpop.f32.mrb[83].mxu1  ;;  %v5223_v55 = vmul.f32 %v5207_v27, %v5095_v57  ;;  %v5975_v28 = vmul.f32 -1.442695, %v10895_v2 }
 0x852   : > { %v4932_v4 = vadd.f32 1e-05, %v4931_v58  ;;  %v5222_v32 = vmul.f32 %v5206_v59, %v5094_v21  ;;  %v5976_v58 = vmul.f32 -1.442695, %v10899_v10 }
 0x853   : > { %7172 = vrsqrt.f32 %v4937_v14 }
 0x854   : > { %7174 = vrsqrt.f32 %v4932_v4  ;;  %v5238_v5 = vpack.c.bf16 %v5223_v55, %v5222_v32  ;;  %v11609_v32 = vld [vmem:[#allocation45_spill] sm:$0xff] }
 0x855   : > { %7176 = vpow2.f32 %v5971_v41 }
 0x856   : > { %7178 = vpow2.f32 %v5972_v49  ;;  %6325 = vmatprep.mubr.bf16.mxu0 %v5238_v5 }
 0x857   : > { %7180 = vrcp.f32 %v5161_v0  ;;  %v2948_v0 = vadd.f32 %v11609_v32, %v10856_v31 }
 0x858   : > { %7182 = vrcp.f32 %v5160_v47 }
 0x859   : > { %v6293_v30 = vpop.f32.mrb[84].mxu1 }
 0x85a   : > { %v4947_v43 = vadd.f32 1e-05, %v6293_v30  ;;  %v4941_v60 = vpop.f32.mrb[85].mxu1 }
 0x85b   : > { %v4942_v29 = vadd.f32 1e-05, %v4941_v60 }
 0x85c   : > { %7184 = vrsqrt.f32 %v4947_v43 }
 0x85d   : > { %7186 = vrsqrt.f32 %v4942_v29  ;;  %v7173_v6 = vpop.eup %7172 }
 0x85e   : > { %7188 = vpow2.f32 %v5973_v38  ;;  %v7175_v1 = vpop.eup %7174  ;;  %v5019_v3 = vmul.f32 %v7173_v6, %v10756_v36  ;;  %v11608_v36 = vld [vmem:[#allocation47_spill] sm:$0xff]  ;;  %v10917_v38 = vadd.f32 %v11610_v24, %v11591_v19 }
 0x85f   : > { %7190 = vpow2.f32 %v5974_v51  ;;  %v7177_v46 = vpop.eup %7176  ;;  %v5018_v22 = vmul.f32 %v7175_v1, %v10759_v11  ;;  %v2952_v55 = vadd.f32 %v11608_v36, %v10856_v31  ;;  %v11611_v51 = vld [vmem:[#allocation69_spill] sm:$0xff] }
 0x860   : > { %7192 = vrcp.f32 %v5163_v16  ;;  %v7179_v27 = vpop.eup %7178  ;;  %v5042_v57 = vmul.f32 %v10848_v63, %v5019_v3  ;;  %v5164_v62 = vadd.f32 1.0, %v7177_v46  ;;  %v10921_v29 = vadd.f32 %v11611_v51, %v11591_v19 }
 0x861   : > { %7194 = vrcp.f32 %v5162_v45  ;;  %v6296_v26 = vpop.f32.mrb[86].mxu1  ;;  %v7181_v59 = vpop.eup %7180  ;;  %v5041_v21 = vmul.f32 %v10848_v63, %v5018_v22  ;;  %v5165_v4 = vadd.f32 1.0, %v7179_v27  ;;  %v5977_v46 = vmul.f32 -1.442695, %v10917_v38 }
 0x862   : > { %v4957_v25 = vadd.f32 1e-05, %v6296_v26  ;;  %v4951_v41 = vpop.f32.mrb[87].mxu1  ;;  %v7183_v14 = vpop.eup %7182  ;;  %v5065_v11 = vadd.f32 %v10862_v18, %v5042_v57  ;;  %v5209_v5 = vmul.f32 %v7181_v59, %v10829_v40  ;;  %v5978_v26 = vmul.f32 -1.442695, %v10921_v29  ;;  %v11612_v59 = vld [vmem:[#allocation52_spill] sm:$0xff] }
 0x863   : > { %v4952_v49 = vadd.f32 1e-05, %v4951_v41  ;;  %v5064_v47 = vadd.f32 %v10862_v18, %v5041_v21  ;;  %v5208_v30 = vmul.f32 %v7183_v14, %v10833_v52  ;;  %v11613_v41 = vld [vmem:[#allocation44_spill] sm:$0xff] }
 0x864   : > { %7196 = vrsqrt.f32 %v4957_v25  ;;  %v5097_v20 = vadd.f32 %v5065_v11, %v2952_v55  ;;  %v2958_v14 = vadd.f32 %v11613_v41, %v10856_v31 }
 0x865   : > { %7198 = vrsqrt.f32 %v4952_v49  ;;  %v5096_v43 = vadd.f32 %v5064_v47, %v2948_v0 }
 0x866   : > { %v7185_v53 = vpop.eup %7184  ;;  %7200 = vpow2.f32 %v5975_v28  ;;  %v5225_v16 = vmul.f32 %v5209_v5, %v5097_v20 }
 0x867   : > { %v7187_v60 = vpop.eup %7186  ;;  %7202 = vpow2.f32 %v5976_v58  ;;  %v5021_v40 = vmul.f32 %v7185_v53, %v10766_v12  ;;  %v5224_v52 = vmul.f32 %v5208_v30, %v5096_v43 }
 0x868   : > { %v7189_v45 = vpop.eup %7188  ;;  %7204 = vrcp.f32 %v5165_v4  ;;  %v5020_v6 = vmul.f32 %v7187_v60, %v10769_v34  ;;  %v2962_v34 = vadd.f32 %v11612_v59, %v10856_v31  ;;  %v11614_v60 = vld [vmem:[#allocation66_spill] sm:$0xff] }
 0x869   : > { %v7191_v23 = vpop.eup %7190  ;;  %7206 = vrcp.f32 %v5164_v62  ;;  %v5044_v1 = vmul.f32 %v10848_v63, %v5021_v40  ;;  %v6299_v13 = vpop.f32.mrb[88].mxu1  ;;  %v5239_v22 = vpack.c.bf16 %v5225_v16, %v5224_v52  ;;  %v5166_v55 = vadd.f32 1.0, %v7189_v45 }
 0x86a   : > { %v7193_v3 = vpop.eup %7192  ;;  %v5043_v19 = vmul.f32 %v10848_v63, %v5020_v6  ;;  %v4967_v27 = vadd.f32 1e-05, %v6299_v13  ;;  %v4961_v57 = vpop.f32.mrb[89].mxu1  ;;  %v5167_v25 = vadd.f32 1.0, %v7191_v23  ;;  %v11615_v6 = vld [vmem:[#allocation68_spill] sm:$0xff]  ;;  %v11616_v23 = vld [vmem:[#allocation62_spill] sm:$0xff] }
 0x86b   : > { %v7195_v12 = vpop.eup %7194  ;;  %v5067_v28 = vadd.f32 %v10862_v18, %v5044_v1  ;;  %v4962_v21 = vadd.f32 1e-05, %v4961_v57  ;;  %6326 = vmatmul.mubr.bf16.vlgmr.msra.gmra.mrb[112].mxu0 %v5239_v22  ;;  %v5211_v36 = vmul.f32 %v7193_v3, %v10839_v9  ;;  %v5980_v52 = vmul.f32 -1.442695, %v11615_v6 }
 0x86c   : > { %v5066_v58 = vadd.f32 %v10862_v18, %v5043_v19  ;;  %7208 = vrsqrt.f32 %v4967_v27  ;;  %v5210_v4 = vmul.f32 %v7195_v12, %v10843_v39  ;;  %v5979_v39 = vmul.f32 -1.442695, %v11614_v60 }
 0x86d   : > { %v5099_v11 = vadd.f32 %v5067_v28, %v2962_v34  ;;  %7210 = vrsqrt.f32 %v4962_v21 }
 0x86e   : > { %v7197_v49 = vpop.eup %7196  ;;  %7212 = vpow2.f32 %v5977_v46  ;;  %v5098_v32 = vadd.f32 %v5066_v58, %v2958_v14  ;;  %v11617_v46 = vld [vmem:[#allocation54_spill] sm:$0xff] }
 0x86f   : > { %v7199_v0 = vpop.eup %7198  ;;  %7214 = vpow2.f32 %v5978_v26  ;;  %v5023_v47 = vmul.f32 %v7197_v49, %v10776_v50  ;;  %v5227_v5 = vmul.f32 %v5211_v36, %v5099_v11  ;;  %v2968_v22 = vadd.f32 %v11617_v46, %v10856_v31 }
 0x870   : > { %v7201_v62 = vpop.eup %7200  ;;  %7216 = vrcp.f32 %v5167_v25  ;;  %v5022_v20 = vmul.f32 %v7199_v0, %v10779_v37  ;;  %v5226_v53 = vmul.f32 %v5210_v4, %v5098_v32  ;;  %v2972_v37 = vadd.f32 %v11616_v23, %v10856_v31 }
 0x871   : > { %v7203_v30 = vpop.eup %7202  ;;  %7218 = vrcp.f32 %v5166_v55  ;;  %v5046_v9 = vmul.f32 %v10848_v63, %v5023_v47  ;;  %v6302_v24 = vpop.f32.mrb[90].mxu1  ;;  %v5168_v57 = vadd.f32 1.0, %v7201_v62 }
 0x872   : > { %v7205_v43 = vpop.eup %7204  ;;  %v5240_v51 = vpack.c.bf16 %v5227_v5, %v5226_v53  ;;  %v5045_v40 = vmul.f32 %v10848_v63, %v5022_v20  ;;  %v4977_v16 = vadd.f32 1e-05, %v6302_v24  ;;  %v4971_v45 = vpop.f32.mrb[91].mxu1  ;;  %v5169_v3 = vadd.f32 1.0, %v7203_v30  ;;  %v11619_v20 = vld [vmem:[#allocation65_spill] sm:$0xff] }
 0x873   : > { %v7207_v50 = vpop.eup %7206  ;;  %v5069_v1 = vadd.f32 %v10862_v18, %v5046_v9  ;;  %v4972_v13 = vadd.f32 1e-05, %v4971_v45  ;;  %v5213_v27 = vmul.f32 %v7205_v43, %v10876_v7  ;;  %v2978_v53 = vadd.f32 %v11619_v20, %v10856_v31 }
 0x874   : > { %6329 = vmatprep.mubr.bf16.mxu0 %v5240_v51  ;;  %v5068_v19 = vadd.f32 %v10862_v18, %v5045_v40  ;;  %7220 = vrsqrt.f32 %v4977_v16  ;;  %v5212_v59 = vmul.f32 %v7207_v50, %v10869_v33 }
 0x875   : > { %v5101_v12 = vadd.f32 %v5069_v1, %v2972_v37  ;;  %7222 = vrsqrt.f32 %v4972_v13 }
 0x876   : > { %v7209_v26 = vpop.eup %7208  ;;  %7224 = vpow2.f32 %v5979_v39  ;;  %v5100_v34 = vadd.f32 %v5068_v19, %v2968_v22 }
 0x877   : > { %v7211_v28 = vpop.eup %7210  ;;  %7226 = vpow2.f32 %v5980_v52  ;;  %v5025_v21 = vmul.f32 %v7209_v26, %v10786_v35  ;;  %v5229_v25 = vmul.f32 %v5213_v27, %v5101_v12  ;;  %v11618_v35 = vld [vmem:[#allocation74_spill] sm:$0xff] }
 0x878   : > { %v7213_v41 = vpop.eup %7212  ;;  %7228 = vrcp.f32 %v5169_v3  ;;  %v5024_v14 = vmul.f32 %v7211_v28, %v10789_v15  ;;  %v5228_v58 = vmul.f32 %v5212_v59, %v5100_v34  ;;  %v2982_v47 = vadd.f32 %v11618_v35, %v10856_v31  ;;  %v11621_v59 = vld [vmem:[#allocation71_spill] sm:$0xff] }
 0x879   : > { %v7215_v36 = vpop.eup %7214  ;;  %7230 = vrcp.f32 %v5168_v57  ;;  %v5048_v7 = vmul.f32 %v10848_v63, %v5025_v21  ;;  %v6305_v55 = vpop.f32.mrb[92].mxu1  ;;  %v5170_v24 = vadd.f32 1.0, %v7213_v41  ;;  %v2988_v34 = vadd.f32 %v11621_v59, %v10856_v31 }
 0x87a   : > { %v7217_v11 = vpop.eup %7216  ;;  %v5241_v49 = vpack.c.bf16 %v5229_v25, %v5228_v58  ;;  %v5047_v33 = vmul.f32 %v10848_v63, %v5024_v14  ;;  %v4987_v4 = vadd.f32 1e-05, %v6305_v55  ;;  %v4981_v32 = vpop.f32.mrb[93].mxu1  ;;  %v5171_v15 = vadd.f32 1.0, %v7215_v36 }
 0x87b   : > { %v7219_v0 = vpop.eup %7218  ;;  %v5071_v5 = vadd.f32 %v10862_v18, %v5048_v7  ;;  %v4982_v62 = vadd.f32 1e-05, %v4981_v32  ;;  %v5215_v9 = vmul.f32 %v7217_v11, %v10889_v48 }
 0x87c   : > { %6330 = vmatmul.mubr.bf16.gmra.mrb[116].mxu0 %v5241_v49  ;;  %v5070_v30 = vadd.f32 %v10862_v18, %v5047_v33  ;;  %7232 = vrsqrt.f32 %v4987_v4  ;;  %v5214_v51 = vmul.f32 %v7219_v0, %v10885_v17 }
 0x87d   : > { %v5103_v43 = vadd.f32 %v5071_v5, %v2982_v47  ;;  %7234 = vrsqrt.f32 %v4982_v62  ;;  %v11622_v47 = vld [vmem:[#allocation76_spill] sm:$0xff] }
 0x87e   : > { %v7221_v39 = vpop.eup %7220  ;;  %v5102_v40 = vadd.f32 %v5070_v30, %v2978_v53  ;;  %7236 = vrcp.f32 %v5171_v15 }
 0x87f   : > { %v7223_v16 = vpop.eup %7222  ;;  %v5027_v45 = vmul.f32 %v7221_v39, %v10796_v42  ;;  %v5231_v50 = vmul.f32 %v5215_v9, %v5103_v43  ;;  %7238 = vrcp.f32 %v5170_v24  ;;  %v11620_v42 = vld [vmem:[#allocation64_spill] sm:$0xff] }
 0x880   : > { %v7225_v52 = vpop.eup %7224  ;;  %v5026_v23 = vmul.f32 %v7223_v16, %v10799_v44  ;;  %v5230_v37 = vmul.f32 %v5214_v51, %v5102_v40  ;;  %v2992_v57 = vadd.f32 %v11620_v42, %v10856_v31 }
 0x881   : > { %v7227_v1 = vpop.eup %7226  ;;  %v5050_v48 = vmul.f32 %v10848_v63, %v5027_v45  ;;  %v6308_v13 = vpop.f32.mrb[94].mxu1  ;;  %v5172_v25 = vadd.f32 1.0, %v7225_v52 }
 0x882   : > { %v7229_v3 = vpop.eup %7228  ;;  %v5049_v46 = vmul.f32 %v10848_v63, %v5026_v23  ;;  %v5242_v22 = vpack.c.bf16 %v5231_v50, %v5230_v37  ;;  %v4997_v17 = vadd.f32 1e-05, %v6308_v13  ;;  %v4991_v19 = vpop.f32.mrb[95].mxu1  ;;  %v5173_v44 = vadd.f32 1.0, %v7227_v1  ;;  %v11625_v1 = vld [vmem:[#allocation75_spill] sm:$0xff] }
 0x883   : > { %v7231_v27 = vpop.eup %7230  ;;  %v5073_v12 = vadd.f32 %v10862_v18, %v5050_v48  ;;  %v4992_v26 = vadd.f32 1e-05, %v4991_v19  ;;  %v5217_v21 = vmul.f32 %v7229_v3, %v10899_v10  ;;  %v3008_v48 = vadd.f32 %v11625_v1, %v10856_v31 }
 0x884   : > { %v5072_v28 = vadd.f32 %v10862_v18, %v5049_v46  ;;  %6333 = vmatprep.mubr.bf16.mxu1 %v5242_v22  ;;  %7240 = vrsqrt.f32 %v4997_v17  ;;  %v5216_v58 = vmul.f32 %v7231_v27, %v10895_v2  ;;  %v3002_v2 = vadd.f32 %v11622_v47, %v10856_v31 }
 0x885   : > { %v5105_v41 = vadd.f32 %v5073_v12, %v2992_v57  ;;  %7242 = vrsqrt.f32 %v4992_v26 }
 0x886   : > { %v7233_v14 = vpop.eup %7232  ;;  %v5104_v36 = vadd.f32 %v5072_v28, %v2988_v34  ;;  %7244 = vrcp.f32 %v5173_v44 }
 0x887   : > { %v7235_v7 = vpop.eup %7234  ;;  %v5029_v55 = vmul.f32 %v7233_v14, %v10805_v56  ;;  %v5233_v11 = vmul.f32 %v5217_v21, %v5105_v41  ;;  %7246 = vrcp.f32 %v5172_v25  ;;  %v11623_v56 = vld [vmem:[#allocation70_spill] sm:$0xff] }
 0x888   : > { %v5028_v49 = vmul.f32 %v7235_v7, %v10808_v54  ;;  %v5232_v33 = vmul.f32 %v5216_v58, %v5104_v36  ;;  %v7237_v32 = vpop.eup %7236  ;;  %v2998_v62 = vadd.f32 %v11623_v56, %v10856_v31 }
 0x889   : > { %v5052_v4 = vmul.f32 %v10848_v63, %v5029_v55  ;;  %v7239_v35 = vpop.eup %7238  ;;  %v5219_v15 = vmul.f32 %v7237_v32, %v10921_v29  ;;  %v11624_v29 = vld [vmem:[#allocation80_spill] sm:$0xff] }
 0x88a   : > { %v5243_v10 = vpack.c.bf16 %v5233_v11, %v5232_v33  ;;  %v5051_v0 = vmul.f32 %v10848_v63, %v5028_v49  ;;  %v5218_v30 = vmul.f32 %v7239_v35, %v10917_v38  ;;  %v3012_v37 = vadd.f32 %v11624_v29, %v10856_v31 }
 0x88b   : > { %v5075_v5 = vadd.f32 %v10862_v18, %v5052_v4 }
 0x88c   : > { %6334 = vmatmul.mubr.bf16.vlgmr.msra.gmra.mrb[96].mxu1 %v5243_v10  ;;  %v5074_v54 = vadd.f32 %v10862_v18, %v5051_v0 }
 0x88d   : > { %v5107_v20 = vadd.f32 %v5075_v5, %v3002_v2 }
 0x88e   : > { %v7241_v53 = vpop.eup %7240  ;;  %v5106_v9 = vadd.f32 %v5074_v54, %v2998_v62 }
 0x88f   : > { %v7243_v24 = vpop.eup %7242  ;;  %v5031_v43 = vmul.f32 %v7241_v53, %v10814_v8  ;;  %v5235_v39 = vmul.f32 %v5219_v15, %v5107_v20 }
 0x890   : > { %v5030_v51 = vmul.f32 %v7243_v24, %v10817_v61  ;;  %v5234_v40 = vmul.f32 %v5218_v30, %v5106_v9  ;;  %v7245_v45 = vpop.eup %7244 }
 0x891   : > { %v5054_v16 = vmul.f32 %v10848_v63, %v5031_v43  ;;  %v7247_v23 = vpop.eup %7246  ;;  %v5221_v61 = vmul.f32 %v7245_v45, %v11615_v6 }
 0x892   : > { %v5244_v50 = vpack.c.bf16 %v5235_v39, %v5234_v40  ;;  %v5053_v52 = vmul.f32 %v10848_v63, %v5030_v51  ;;  %v5220_v3 = vmul.f32 %v7247_v23, %v11614_v60 }
 0x893   : > { %v5077_v38 = vadd.f32 %v10862_v18, %v5054_v16 }
 0x894   : > { %6337 = vmatprep.mubr.bf16.mxu1 %v5244_v50  ;;  %v5076_v8 = vadd.f32 %v10862_v18, %v5053_v52 }
 0x895   : > { %v5109_v13 = vadd.f32 %v5077_v38, %v3012_v37 }
 0x896   : > { %v5108_v46 = vadd.f32 %v5076_v8, %v3008_v48 }
 0x897   : > { %v5237_v63 = vmul.f32 %v5221_v61, %v5109_v13 }
 0x898   : > { %v5236_v22 = vmul.f32 %v5220_v3, %v5108_v46 }
 0x89a   : > { %v5245_v17 = vpack.c.bf16 %v5237_v63, %v5236_v22 }
 0x89c   : > { %6338 = vmatmul.mubr.bf16.gmra.mrb[100].mxu1 %v5245_v17 }
 0x89d   : > { %7545 = shalt.err (!%p7542_p1)
}
 0x89e   : > { %s11627_s15 = sld [smem:[#allocation136_spill]]  ;;  %p11628_p10 = pmov %p11626_p2 }
 0x8a4   : > { %s7546_s24 = scalar_lea.hbm %s11627_s15, 128 }
 0x8a5   : > { %p7547_p8 = scmp.ne.s32.totalorder %s11627_s15, %s7546_s24  ;;  %p7552_p5 = scmp.lt.u32.totalorder %s7546_s24, %s11627_s15 }
 0x8a7   : > { %p7548_p4 = pnand %p7547_p8, %p11628_p10 }
 0x8a9   : > { %p7549_p6 = pneg %p7548_p4 }
 0x8ab   : > { %p7554_p12 = pnand %p7552_p5, %p7549_p6 }
 0x8ad   : > { %7557 = shalt.err (!%p7554_p12)
}
 0x8ae   : > { %p11629_p0 = pmov %p11626_p2  ;;  %s7558_s20 = scalar_lea.vmem %s10999_s9, 128 }
 0x8af   : > { %p7559_p2 = scmp.ne.s32.totalorder %s10999_s9, %s7558_s20  ;;  %p7565_p7 = scmp.lt.s32.totalorder %s10999_s9, %s10999_s9 }
 0x8b0   : > { %6461 = dma.vmem_to_hbm [thread:$0]  (%p11629_p0), %s5483_s25, 128, %s11627_s15, [#allocation27]  }
 0x8b1   : > { %p11630_p13 = pmov %p11629_p0  ;;  %p7566_p3 = scmp.lt.s32.totalorder %s7558_s20, %s7558_s20 }
 0x8b3   : > { %p7560_p9 = pnand %p7559_p2, %p11630_p13  ;;  %p7567_p1 = por %p7566_p3, %p7565_p7 }
 0x8b5   : > { %p7561_p11 = pneg %p7560_p9 }
 0x8b7   : > { %p7568_p8 = pnand %p7567_p1, %p7561_p11 }
 0x8b9   : > { %7571 = shalt.err (!%p7568_p8)
}
 0x8ba   : > { %s11631_s14 = sld [smem:[#allocation138_spill]]  ;;  %p11632_p4 = pmov %p11629_p0 }
 0x8c0   : > { %s7572_s21 = scalar_lea.hbm %s11631_s14, 128 }
 0x8c1   : > { %p7573_p10 = scmp.ne.s32.totalorder %s11631_s14, %s7572_s21  ;;  %p7578_p12 = scmp.lt.u32.totalorder %s7572_s21, %s11631_s14 }
 0x8c3   : > { %p7574_p6 = pnand %p7573_p10, %p11632_p4 }
 0x8c5   : > { %p7575_p5 = pneg %p7574_p6 }
 0x8c7   : > { %p7580_p0 = pnand %p7578_p12, %p7575_p5 }
 0x8c9   : > { %7583 = shalt.err (!%p7580_p0)
}
 0x8ca   : > { %p11633_p2 = pmov %p11632_p4  ;;  %s7756_s27 = smov [#allocation28]  }
 0x8cb   : > { %s5493_s24 = sshll.u32 %s7756_s27, 4  ;;  %s7757_s26 = smov [#allocation31]   ;;  %s5494_s24 = int_to_ptr.vmem [resolvable:$true] %s5493_s24 }
 0x8cc   : > { %6465 = dma.vmem_to_hbm [thread:$0]  (%p11633_p2), %s10999_s9, 128, %s11631_s14, [#allocation30]  }
 0x8cd   : > { %s5515_s18 = sshll.u32 %s7757_s26, 4  ;;  %s7584_s5 = scalar_lea.vmem %s5494_s24, 128  ;;  %s5516_s18 = int_to_ptr.vmem [resolvable:$true] %s5515_s18 }
 0x8ce   : > { %p7585_p13 = scmp.ne.s32.totalorder %s5494_s24, %s7584_s5  ;;  %p11634_p9 = pmov %p11633_p2 }
 0x8cf   : > { %p7591_p3 = scmp.lt.s32.totalorder %s5494_s24, %s5494_s24  ;;  %p7592_p1 = scmp.lt.s32.totalorder %s7584_s5, %s7584_s5 }
 0x8d0   : > { %p7586_p11 = pnand %p7585_p13, %p11634_p9 }
 0x8d1   : > { %p7593_p8 = por %p7592_p1, %p7591_p3 }
 0x8d2   : > { %p7587_p7 = pneg %p7586_p11 }
 0x8d4   : > { %p7594_p10 = pnand %p7593_p8, %p7587_p7 }
 0x8d6   : > { %7597 = shalt.err (!%p7594_p10)
}
 0x8d7   : > { %s11635_s19 = sld [smem:[#allocation137_spill]]  ;;  %p11636_p6 = pmov %p11633_p2 }
 0x8dd   : > { %s7598_s9 = scalar_lea.hbm %s11635_s19, 128 }
 0x8de   : > { %p7599_p4 = scmp.ne.s32.totalorder %s11635_s19, %s7598_s9  ;;  %p7604_p0 = scmp.lt.u32.totalorder %s7598_s9, %s11635_s19 }
 0x8e0   : > { %p7600_p5 = pnand %p7599_p4, %p11636_p6 }
 0x8e2   : > { %p7601_p12 = pneg %p7600_p5 }
 0x8e4   : > { %p7606_p2 = pnand %p7604_p0, %p7601_p12 }
 0x8e6   : > { %7609 = shalt.err (!%p7606_p2)
}
 0x8e7   : > { %p11637_p13 = pmov %p11636_p6  ;;  %s7610_s21 = scalar_lea.vmem %s5516_s18, 128 }
 0x8e8   : > { %p7611_p9 = scmp.ne.s32.totalorder %s5516_s18, %s7610_s21  ;;  %p11638_p11 = pmov %p11636_p6 }
 0x8e9   : > { %6463 = dma.vmem_to_hbm [thread:$0]  (%p11637_p13), %s5494_s24, 128, %s11635_s19, [#allocation27]  }
 0x8ea   : > { %p7612_p7 = pnand %p7611_p9, %p11638_p11  ;;  %p7617_p1 = scmp.lt.s32.totalorder %s5516_s18, %s5516_s18 }
 0x8eb   : > { %p7618_p8 = scmp.lt.s32.totalorder %s7610_s21, %s7610_s21 }
 0x8ec   : > { %p7613_p3 = pneg %p7612_p7 }
 0x8ed   : > { %p7619_p10 = por %p7618_p8, %p7617_p1 }
 0x8ef   : > { %p7620_p4 = pnand %p7619_p10, %p7613_p3 }
 0x8f1   : > { %7623 = shalt.err (!%p7620_p4)
}
 0x8f2   : > { %s11639_s0 = sld [smem:[#allocation139_spill]]  ;;  %p11640_p5 = pmov %p11638_p11 }
 0x8f8   : > { %s7624_s20 = scalar_lea.hbm %s11639_s0, 128 }
 0x8f9   : > { %p7625_p6 = scmp.ne.s32.totalorder %s11639_s0, %s7624_s20  ;;  %p7630_p2 = scmp.lt.u32.totalorder %s7624_s20, %s11639_s0 }
 0x8fb   : > { %p7626_p12 = pnand %p7625_p6, %p11640_p5 }
 0x8fd   : > { %p7627_p0 = pneg %p7626_p12 }
 0x8ff   : > { %p7632_p13 = pnand %p7630_p2, %p7627_p0 }
 0x901   : > { %7635 = shalt.err (!%p7632_p13)
}
 0x902   : > { %p11641_p9 = pmov %p11640_p5  ;;  %s11642_s27 = sld [smem:[#allocation134_spill]]  ;;  %v7249_v42 = vld [vmem:[%s8191_s6 + $0x10] sm:$0xff]  ;;  %v7250_v44 = vld [vmem:[%s8191_s6] sm:$0xff]  ;;  %v7251_v28 = vld [vmem:[%s8191_s6 + $0x18] sm:$0xff] }
 0x903   : > { %v7252_v25 = vld [vmem:[%s8191_s6 + $0x8] sm:$0xff]  ;;  %v7253_v11 = vld [vmem:[%s8191_s6 + $0x30] sm:$0xff]  ;;  %v7254_v32 = vld [vmem:[%s8191_s6 + $0x20] sm:$0xff]  ;;  %s5468_s20 = sshll.u32 %s8213_s1, 4  ;;  %s11643_s26 = sld [smem:[#allocation135_spill]]  ;;  %s11134_s20 = int_to_ptr.vmem [resolvable:$true] %s5468_s20 }
 0x904   : > { %6467 = dma.vmem_to_hbm [thread:$0]  (%p11641_p9), %s5516_s18, 128, %s11639_s0, [#allocation30]   ;;  %v7255_v35 = vld [vmem:[%s8191_s6 + $0x38] sm:$0xff]  ;;  %v7256_v2 = vld [vmem:[%s8191_s6 + $0x28] sm:$0xff]  ;;  %v7257_v53 = vld [vmem:[%s8191_s6 + $0x50] sm:$0xff] }
 0x905   : > { %v7258_v43 = vld [vmem:[%s8191_s6 + $0x40] sm:$0xff]  ;;  %v7259_v40 = vld [vmem:[%s8191_s6 + $0x58] sm:$0xff]  ;;  %v7260_v45 = vld [vmem:[%s8191_s6 + $0x48] sm:$0xff]  ;;  %s6004_s18 = sshll.u32 %s7897_s23, 11  ;;  %s5455_s21 = scalar_lea.sflag [#allocation10], %s8187_s7 }
 0x906   : > { %v7261_v1 = vld [vmem:[%s8191_s6 + $0x70] sm:$0xff]  ;;  %v7262_v13 = vld [vmem:[%s8191_s6 + $0x60] sm:$0xff]  ;;  %v7263_v63 = vld [vmem:[%s8191_s6 + $0x78] sm:$0xff]  ;;  %s7636_s25 = scalar_lea.vmem %s11134_s20, 2048  ;;  %p11644_p7 = scmp.ne.s32.totalorder %s11330_s2, 0 }
 0x907   : > { %v7264_v17 = vld [vmem:[%s8191_s6 + $0x68] sm:$0xff]  ;;  %p7637_p11 = scmp.ne.s32.totalorder %s11134_s20, %s7636_s25  ;;  %s7758_s9 = smov [#allocation25]  }
 0x908   : > { %v11081_v31 = vld [vmem:[%s11642_s27] ss:$0 sm:$0xff]  ;;  %s7640_s27 = sshll.u32 %s7758_s9, 4  ;;  %s7641_s27 = int_to_ptr.vmem [resolvable:$false] %s7640_s27 }
 0x909   : > { %s11132_s5 = scalar_lea.hbm %s11643_s26, %s6004_s18  ;;  %p7638_p3 = pnand %p7637_p11, %p11644_p7 }
 0x90a   : > { %s7642_s18 = scalar_lea.vmem %s7641_s27, 4096  ;;  %p7643_p8 = scmp.lt.s32.totalorder %s11134_s20, %s7641_s27 }
 0x90b   : > { %p7639_p1 = pneg %p7638_p3  ;;  %p7644_p10 = scmp.lt.s32.totalorder %s7642_s18, %s7636_s25 }
 0x90d   : > { %p7645_p4 = por %p7644_p10, %p7643_p8 }
 0x90f   : > { %p7646_p6 = pnand %p7645_p4, %p7639_p1 }
 0x93e   : > { %v6327_v18 = vpop.f32.mrb[112].mxu0 }
 0x93f   : > { %v5360_v60 = vadd.f32 %v6327_v18, %v11081_v31  ;;  %v5351_v6 = vpop.f32.mrb[113].mxu0 }
 0x940   : > { %v5352_v19 = vadd.f32 %v11081_v31, %v5351_v6  ;;  %v6328_v27 = vpop.f32.mrb[114].mxu0 }
 0x941   : > { %v5416_v57 = vadd.f32 %v7249_v42, %v5360_v60  ;;  %v5363_v12 = vadd.f32 %v6328_v27, %v11081_v31  ;;  %v5354_v26 = vpop.f32.mrb[115].mxu0 }
 0x942   : > { %v5414_v59 = vadd.f32 %v7250_v44, %v5352_v19  ;;  %v5355_v34 = vadd.f32 %v11081_v31, %v5354_v26 }
 0x943   : > { %5432 = vst [vmem:[%s8213_s1 + $0x10] sm:$0xff] %v5416_v57  ;;  %v5417_v21 = vadd.f32 %v7251_v28, %v5363_v12 }
 0x944   : > { %5430 = vst [vmem:[%s8213_s1] sm:$0xff] %v5414_v59  ;;  %v5415_v41 = vadd.f32 %v7252_v25, %v5355_v34 }
 0x945   : > { %5433 = vst [vmem:[%s8213_s1 + $0x18] sm:$0xff] %v5417_v21 }
 0x946   : > { %5431 = vst [vmem:[%s8213_s1 + $0x8] sm:$0xff] %v5415_v41 }
 0x94f   : > { %v6331_v14 = vpop.f32.mrb[116].mxu0 }
 0x950   : > { %v5376_v58 = vadd.f32 %v6331_v14, %v11081_v31  ;;  %v5367_v36 = vpop.f32.mrb[117].mxu0 }
 0x951   : > { %v5368_v7 = vadd.f32 %v11081_v31, %v5367_v36  ;;  %v6332_v55 = vpop.f32.mrb[118].mxu0 }
 0x952   : > { %v5420_v49 = vadd.f32 %v7253_v11, %v5376_v58  ;;  %v5379_v33 = vadd.f32 %v6332_v55, %v11081_v31  ;;  %v5370_v4 = vpop.f32.mrb[119].mxu0 }
 0x953   : > { %v5418_v10 = vadd.f32 %v7254_v32, %v5368_v7  ;;  %v5371_v0 = vadd.f32 %v11081_v31, %v5370_v4 }
 0x954   : > { %5436 = vst [vmem:[%s8213_s1 + $0x30] sm:$0xff] %v5420_v49  ;;  %v5421_v47 = vadd.f32 %v7255_v35, %v5379_v33 }
 0x955   : > { %5434 = vst [vmem:[%s8213_s1 + $0x20] sm:$0xff] %v5418_v10  ;;  %v5419_v5 = vadd.f32 %v7256_v2, %v5371_v0 }
 0x956   : > { %5437 = vst [vmem:[%s8213_s1 + $0x38] sm:$0xff] %v5421_v47 }
 0x957   : > { %5435 = vst [vmem:[%s8213_s1 + $0x28] sm:$0xff] %v5419_v5 }
 0x95f   : > { %v6335_v56 = vpop.f32.mrb[96].mxu1 }
 0x960   : > { %v5392_v62 = vadd.f32 %v6335_v56, %v11081_v31  ;;  %v5383_v54 = vpop.f32.mrb[97].mxu1 }
 0x961   : > { %v5384_v15 = vadd.f32 %v11081_v31, %v5383_v54  ;;  %v6336_v20 = vpop.f32.mrb[98].mxu1 }
 0x962   : > { %v5424_v30 = vadd.f32 %v7257_v53, %v5392_v62  ;;  %v5395_v9 = vadd.f32 %v6336_v20, %v11081_v31  ;;  %v5386_v24 = vpop.f32.mrb[99].mxu1 }
 0x963   : > { %v5422_v39 = vadd.f32 %v7258_v43, %v5384_v15  ;;  %v5387_v51 = vadd.f32 %v11081_v31, %v5386_v24 }
 0x964   : > { %5440 = vst [vmem:[%s8213_s1 + $0x50] sm:$0xff] %v5424_v30  ;;  %v5425_v16 = vadd.f32 %v7259_v40, %v5395_v9 }
 0x965   : > { %5438 = vst [vmem:[%s8213_s1 + $0x40] sm:$0xff] %v5422_v39  ;;  %v5423_v50 = vadd.f32 %v7260_v45, %v5387_v51 }
 0x966   : > { %5441 = vst [vmem:[%s8213_s1 + $0x58] sm:$0xff] %v5425_v16 }
 0x967   : > { %5439 = vst [vmem:[%s8213_s1 + $0x48] sm:$0xff] %v5423_v50 }
 0x96f   : > { %v6339_v52 = vpop.f32.mrb[100].mxu1 }
 0x970   : > { %v5408_v23 = vadd.f32 %v6339_v52, %v11081_v31  ;;  %v5399_v29 = vpop.f32.mrb[101].mxu1 }
 0x971   : > { %v5400_v37 = vadd.f32 %v11081_v31, %v5399_v29  ;;  %v6340_v38 = vpop.f32.mrb[102].mxu1 }
 0x972   : > { %v5428_v48 = vadd.f32 %v7261_v1, %v5408_v23  ;;  %v5411_v8 = vadd.f32 %v6340_v38, %v11081_v31  ;;  %v5402_v61 = vpop.f32.mrb[103].mxu1 }
 0x973   : > { %v5426_v3 = vadd.f32 %v7262_v13, %v5400_v37  ;;  %v5403_v46 = vadd.f32 %v11081_v31, %v5402_v61 }
 0x974   : > { %5444 = vst [vmem:[%s8213_s1 + $0x70] sm:$0xff] %v5428_v48  ;;  %v5429_v22 = vadd.f32 %v7263_v63, %v5411_v8 }
 0x975   : > { %5442 = vst [vmem:[%s8213_s1 + $0x60] sm:$0xff] %v5426_v3  ;;  %v5427_v18 = vadd.f32 %v7264_v17, %v5403_v46 }
 0x976   : > { %5445 = vst [vmem:[%s8213_s1 + $0x78] sm:$0xff] %v5429_v22 }
 0x977   : > { %5443 = vst [vmem:[%s8213_s1 + $0x68] sm:$0xff] %v5427_v18 }
 0x978   : > { %7649 = shalt.err (!%p7646_p6)
}
 0x979   : > { %s7650_s6 = scalar_lea.hbm %s11132_s5, 2048  ;;  %s7654_s24 = scalar_lea.hbm %s11643_s26, 4096 }
 0x97a   : > { %p7651_p5 = scmp.ne.s32.totalorder %s11132_s5, %s7650_s6  ;;  %p7655_p2 = scmp.lt.u32.totalorder %s11132_s5, %s11643_s26 }
 0x97b   : > { %p7656_p13 = scmp.lt.u32.totalorder %s7654_s24, %s7650_s6  ;;  %p7658_p11 = scmp.lt.u32.totalorder %s7650_s6, %s11132_s5 }
 0x97c   : > { %p7652_p12 = pnand %p7651_p5, %p11644_p7 }
 0x97d   : > { %p7657_p9 = por %p7656_p13, %p7655_p2 }
 0x97e   : > { %p7653_p0 = pneg %p7652_p12 }
 0x97f   : > { %p7659_p3 = por %p7658_p11, %p7657_p9 }
 0x981   : > { %p7660_p1 = pnand %p7659_p3, %p7653_p0 }
 0x983   : > { %7663 = shalt.err (!%p7660_p1)
}
 0x984   : > { %s7759_s25 = smov 128   ;;  %s7760_s18 = smov 8  }
 0x985   : > { %6459 = dma.vmem_to_hbm [thread:$0]  (%p11644_p7), %s11134_s20, 2048, %s11132_s5, %s5455_s21, %s7759_s25, %s7759_s25, %s7760_s18  }
 0x986   : > { %p11645_p8 = scmp.eq.s32.totalorder %s7897_s23, 1 }
 0x988   : > { %7705 = dma.done.wait (%p11645_p8), [#allocation27], 256   ;;  %p11646_p10 = pmov %p11645_p8 }
 0x989   : > { %p11647_p4 = pmov %p11645_p8 }
 0x98a   : > { %7707 = vsyncadd (%p11646_p10), [#allocation27], 4294967040 }
 0x98b   : > { %7709 = dma.done.wait (%p11647_p4), [#allocation30], 256   ;;  %p11648_p6 = pmov %p11647_p4 }
 0x98d   : > { %7711 = vsyncadd (%p11648_p6), [#allocation30], 4294967040 }
 0x98e PF: > { %s5543_s6 = sand.u32 1, %s7718_s3   ;;  %p11649_p5 = scmp.ne.s32.totalorder %s11331_s17, 0 }
 0x98f   : > { %p11650_p12 = scmp.ge.s32.totalorder %s7730_s30, 2  ;;  %s5544_s2 = scalar_lea.sflag [#allocation10], %s5543_s6 }
 0x991   : > { %p6510_p0 = pnand %p11650_p12, %p11649_p5 }
 0x993   : > { %7713 = dma.done.wait (!%p6510_p0), %s5544_s2, 2048  }
 0x994   : > { %7715 = vsyncadd (!%p6510_p0), %s5544_s2, 4294965248  ;;  %p43_p7 = scmp.ge.s32.totalorder %s8105_s22, 4   ;;  %s11651_s3 = smov %s7722_s28 }
 0x995   : > { %s11652_s28 = smov %s7726_s29  ;;  %s11653_s29 = smov %s8117_s4 }
 0x996   : > { %s11654_s30 = smov %s8105_s22  ;;  %45 = sbr.rel (!%p43_p7) target bundleno = 31 (0x1f), region = 257 }
 0x99d   :  { %5549 = vsyncpa [#allocation9], 1 }
 0x99e   :  { %5551 = vsyncpa [#allocation9 + $0x1], 1 }
 0x99f   :  { %5552 = vsyncpa [#allocation14], 1 }
 0x9a0   :  { %5553 = vsyncpa [#allocation17], 1 }
 0x9a1   :  { %5554 = vsyncpa [#allocation20], 1 }
 0x9a2   :  { %5555 = vsyncpa [#allocation23], 1 }
 0x9a3   :  { %5556 = vsyncpa [#allocation10], 1 }
 0x9a4   :  { %5558 = vsyncpa [#allocation10 + $0x1], 1 }
 0x9a5   :  { %5559 = vsyncpa [#allocation27], 1 }
 0x9a6   :  { %5560 = vsyncpa [#allocation30], 1 }
 0x9a7   :  { %5561 = vsyncpa [#allocation11], 1 }
 0x9a8   :  { %5563 = vsyncpa [#allocation11 + $0x1], 1 }

</bundles_post_ra>
